<compile_context>
chip_gen: v7x
topology: tpu7x:2x2x1
jax: 0.10.0
libtpu: 0.0.40
codegen_flags: <defaults>
</compile_context>

<pallas_src>
import functools

import jax
import jax.numpy as jnp
from jax.experimental import pallas as pl
from jax.experimental.pallas import tpu as pltpu


# ----------------------------------------------------------------------------
# helpers
# ----------------------------------------------------------------------------
def _round_up(a: int, m: int) -> int:
    return (a + m - 1) // m * m


def _mosaic_kwargs(dimension_semantics):
    """Version-tolerant compiler_params (CompilerParams vs TPUCompilerParams)."""
    cls = getattr(pltpu, "CompilerParams", None) or getattr(pltpu, "TPUCompilerParams", None)
    if cls is None:
        return {}
    try:
        return {"compiler_params": cls(dimension_semantics=dimension_semantics)}
    except Exception:
        return {}


# ----------------------------------------------------------------------------
# 3x3 conv (padding=1) + bias + ReLU, NHWC, no materialized im2col
# ----------------------------------------------------------------------------
def _conv3x3_bias_relu_kernel(a_ref, w_ref, b_ref, m_ref, o_ref, *, H, W):
    """One ROI per program.

    a_ref: (1, (H+4)*W, C)   H padded by 2 zero rows top/bottom, rows flattened (h, w)
    w_ref: (3, 3, C, F)      tap (kh, kw) -> (C, F)
    b_ref: (1, F)
    m_ref: (3, H*W, 1)       row-validity mask for dw = kw-1 in {-1, 0, +1}
    o_ref: (1, H*W, F)       lane-dense output (channels last)
    """
    HW = H * W
    F = o_ref.shape[-1]
    acc = jnp.zeros((HW, F), dtype=jnp.float32)
    # Nine shifted 2-D matmuls out of the VMEM-resident block (static unroll).
    for kh in range(3):
        for kw in range(3):
            dw = kw - 1
            start = (kh + 1) * W + dw          # static sublane offset of the tap's rows
            patch = a_ref[0, pl.ds(start, HW), :]
            if dw != 0:
                # zero rows whose horizontal tap falls outside [0, W)
                patch = patch * m_ref[kw]
            acc = acc + jnp.dot(patch, w_ref[kh, kw],
                                preferred_element_type=jnp.float32)
    out = jnp.maximum(acc + b_ref[...].astype(jnp.float32), 0.0)
    o_ref[0] = out.astype(o_ref.dtype)


def conv3x3_bias_relu(x_nhwc, weight_oihw, bias, out_dtype=None):
    """x_nhwc: (N, H, W, C); weight_oihw: (F, C, 3, 3) (PyTorch layout); bias: (F,).
    Returns (N, H*W, F) with rows in (h, w) order and channels last."""
    N, H, W, C = x_nhwc.shape
    F = weight_oihw.shape[0]
    assert weight_oihw.shape == (F, C, 3, 3)
    HW = H * W
    R = (H + 4) * W

    # Pad H by 2 zero rows each side (covers kh in {0,1,2} and the +-1 dw shifts),
    # then flatten (h, w) -> rows. Both ops are cheap layout plumbing.
    xp = jnp.pad(x_nhwc, ((0, 0), (2, 2), (0, 0), (0, 0)))
    a = xp.reshape(N, R, C)                                   # contiguous, free
    wt = jnp.transpose(weight_oihw, (2, 3, 1, 0))             # (3, 3, C, F)
    b2 = bias.reshape(1, F).astype(jnp.float32)

    # Horizontal validity masks: for dw = kw-1, output column w is valid iff 0 <= w+dw < W.
    col = jnp.arange(HW, dtype=jnp.int32) % W
    masks = jnp.stack(
        [((col + dw >= 0) & (col + dw <= W - 1)).astype(x_nhwc.dtype) for dw in (-1, 0, 1)],
        axis=0)[:, :, None]                                   # (3, HW, 1)

    kernel = functools.partial(_conv3x3_bias_relu_kernel, H=H, W=W)
    out = pl.pallas_call(
        kernel,
        out_shape=jax.ShapeDtypeStruct((N, HW, F), out_dtype or x_nhwc.dtype),
        grid_spec=pltpu.PrefetchScalarGridSpec(
            num_scalar_prefetch=0,
            grid=(N,),
            in_specs=[
                pl.BlockSpec((1, R, C), lambda n: (n, 0, 0)),          # one ROI's rows
                pl.BlockSpec((3, 3, C, F), lambda n: (0, 0, 0, 0)),    # full weight
                pl.BlockSpec((1, F), lambda n: (0, 0)),                # bias
                pl.BlockSpec((3, HW, 1), lambda n: (0, 0, 0)),         # dw masks
            ],
            out_specs=pl.BlockSpec((1, HW, F), lambda n: (n, 0, 0)),
        ),
        **_mosaic_kwargs(("parallel",)),
    )(a, wt, b2, masks)
    return out


# ----------------------------------------------------------------------------
# fused matmul + bias + ReLU (used for the FC layers)
# ----------------------------------------------------------------------------
def _mm_bias_relu_kernel(x_ref, w_ref, b_ref, o_ref, acc_ref):
    k = pl.program_id(2)

    @pl.when(k == 0)
    def _init():
        acc_ref[...] = jnp.zeros_like(acc_ref)

    acc_ref[...] += jnp.dot(x_ref[...], w_ref[...],
                            preferred_element_type=jnp.float32)

    @pl.when(k == pl.num_programs(2) - 1)
    def _epilogue():  # bias + ReLU + downcast only once, after the full K reduction
        o_ref[...] = jnp.maximum(acc_ref[...] + b_ref[...].astype(jnp.float32),
                                 0.0).astype(o_ref.dtype)


def fc_bias_relu(x, w_oi, b, *, tm_max=256, tn_max=256, tk_max=512, out_dtype=None):
    """relu(x @ w_oi.T + b). x: (M, K); w_oi: (N, K) (PyTorch Linear layout); b: (N,)."""
    M, K = x.shape
    Nf = w_oi.shape[0]
    wt = jnp.transpose(w_oi)                 # (K, N); one-time weight transform
    # TODO(synk): fold this transpose into the weight BlockSpec index_map / dot_general.

    tm = min(tm_max, _round_up(M, 8))
    tn = min(tn_max, _round_up(Nf, 128))
    tk = min(tk_max, _round_up(K, 128))
    Mp, Kp, Np = _round_up(M, tm), _round_up(K, tk), _round_up(Nf, tn)

    xp = jnp.pad(x, ((0, Mp - M), (0, Kp - K)))
    wp = jnp.pad(wt, ((0, Kp - K), (0, Np - Nf)))
    bp = jnp.pad(b, (0, Np - Nf)).reshape(1, Np).astype(jnp.float32)

    grid = (Mp // tm, Np // tn, Kp // tk)    # K (reduction) axis last
    out = pl.pallas_call(
        _mm_bias_relu_kernel,
        out_shape=jax.ShapeDtypeStruct((Mp, Np), out_dtype or x.dtype),
        grid_spec=pltpu.PrefetchScalarGridSpec(
            num_scalar_prefetch=0,
            grid=grid,
            in_specs=[
                pl.BlockSpec((tm, tk), lambda i, j, k: (i, k)),
                pl.BlockSpec((tk, tn), lambda i, j, k: (k, j)),   # weight streamed over K
                pl.BlockSpec((1, tn), lambda i, j, k: (0, j)),
            ],
            out_specs=pl.BlockSpec((tm, tn), lambda i, j, k: (i, j)),
            scratch_shapes=[pltpu.VMEM((tm, tn), jnp.float32)],
        ),
        **_mosaic_kwargs(("parallel", "parallel", "arbitrary")),
    )(xp, wp, bp)
    return out[:M, :Nf]


# ----------------------------------------------------------------------------
# full head forward (matches FastRCNNConvFCHead.forward semantics)
# ----------------------------------------------------------------------------
def fastrcnn_conv_fc_head(x_nchw, conv_params, fc_params):
    """x_nchw: (N, C, H, W). conv_params: [(w(F,C,3,3), b(F,)), ...].
    fc_params: [(w(out, in), b(out,)), ...] with fc1's `in` indexing the NCHW flatten."""
    x = jnp.transpose(x_nchw, (0, 2, 3, 1))        # one-time NCHW -> NHWC
    N, H, W, _ = x.shape

    for cw, cb in conv_params:
        y = conv3x3_bias_relu(x, cw, cb)           # (N, H*W, F), channels last
        x = y.reshape(N, H, W, cw.shape[0])        # contiguous, free

    if fc_params:
        permute_first = False
        Cc = None
        if x.ndim > 2:
            Cc = x.shape[-1]
            x = x.reshape(N, H * W * Cc)           # (h, w, c) flatten; contiguous, free
            permute_first = True
        for idx, (fw, fb) in enumerate(fc_params):
            if idx == 0 and permute_first:
                # Reorder fc1 weight columns from PyTorch's (c, h, w) flatten order to
                # our (h, w, c) order, so activations never round-trip through HBM.
                fw = fw.reshape(fw.shape[0], Cc, H, W).transpose(0, 2, 3, 1)
                fw = fw.reshape(fw.shape[0], -1)
            x = fc_bias_relu(x, fw, fb)
    return x


# ----------------------------------------------------------------------------
# pure-JAX reference (PyTorch semantics) for validation
# ----------------------------------------------------------------------------
def reference_forward(x_nchw, conv_params, fc_params):
    x = x_nchw
    for cw, cb in conv_params:
        x = jax.lax.conv_general_dilated(
            x, cw, window_strides=(1, 1), padding=((1, 1), (1, 1)),
            dimension_numbers=("NCHW", "OIHW", "NCHW"),
            precision=jax.lax.Precision.HIGHEST)
        x = jax.nn.relu(x + cb[None, :, None, None])
    if fc_params:
        if x.ndim > 2:
            x = x.reshape(x.shape[0], -1)
        for fw, fb in fc_params:
            x = jax.nn.relu(jnp.dot(x, fw.T, precision=jax.lax.Precision.HIGHEST) + fb)
    return x


# ----------------------------------------------------------------------------
if __name__ == "__main__":
    jax.config.update("jax_default_matmul_precision", "highest")

    # Small, ROI-head-like shapes: 4 ROIs, 8 input channels, 7x7 pooled features,
    # 2 convs (conv_dim=16), 2 FCs (fc_dim=32).
    N, C_in, H, W = 4, 8, 7, 7
    conv_dim, num_conv = 16, 2
    fc_dim, num_fc = 32, 2

    keys = iter(jax.random.split(jax.random.PRNGKey(0), 1 + 2 * (num_conv + num_fc)))
    x = jax.random.normal(next(keys), (N, C_in, H, W), jnp.float32)

    conv_params = []
    c_prev = C_in
    for _ in range(num_conv):
        cw = 0.1 * jax.random.normal(next(keys), (conv_dim, c_prev, 3, 3), jnp.float32)
        cb = 0.1 * jax.random.normal(next(keys), (conv_dim,), jnp.float32)
        conv_params.append((cw, cb))
        c_prev = conv_dim

    fc_params = []
    in_dim = (conv_dim if num_conv > 0 else C_in) * H * W
    for _ in range(num_fc):
        fw = 0.1 * jax.random.normal(next(keys), (fc_dim, in_dim), jnp.float32)
        fb = 0.1 * jax.random.normal(next(keys), (fc_dim,), jnp.float32)
        fc_params.append((fw, fb))
        in_dim = fc_dim

    head = jax.jit(fastrcnn_conv_fc_head)
    out = jax.block_until_ready(head(x, conv_params, fc_params))

    ref = reference_forward(x, conv_params, fc_params)
    err = float(jnp.max(jnp.abs(out - ref)))
    assert out.shape == (N, fc_dim), f"bad output shape {out.shape}"
    assert err < 1e-2, f"max abs error vs reference too large: {err}"
    print("KERNEL_OK")
</pallas_src>

<mosaic_0001>
module attributes {stable_mosaic.version = 11 : i64} {
  func.func @_conv3x3_bias_relu_kernel(%arg0: i32, %arg1: memref<1x77x8xf32, #tpu.memory_space<vmem>>, %arg2: memref<3x3x8x16xf32, #tpu.memory_space<vmem>>, %arg3: memref<1x16xf32, #tpu.memory_space<vmem>>, %arg4: memref<3x49x1xf32, #tpu.memory_space<vmem>>, %arg5: memref<1x49x16xf32, #tpu.memory_space<vmem>>) attributes {dimension_semantics = [#tpu.dimension_semantics<parallel>], iteration_bounds = array<i64: 4>, scalar_prefetch = 0 : i64, scratch_operands = 0 : i64, tpu.core_type = #tpu.core_type<tc>, window_params = [{transform_indices = @transform_0, window_bounds = array<i64: 1, 77, 8>}, {pipeline_mode = #tpu.pipeline_mode<synchronous>, transform_indices = @transform_1, window_bounds = array<i64: 3, 3, 8, 16>}, {pipeline_mode = #tpu.pipeline_mode<synchronous>, transform_indices = @transform_2, window_bounds = array<i64: 1, 16>}, {pipeline_mode = #tpu.pipeline_mode<synchronous>, transform_indices = @transform_3, window_bounds = array<i64: 3, 49, 1>}, {transform_indices = @transform_4, window_bounds = array<i64: 1, 49, 16>}]} {
    %cst = arith.constant 0.000000e+00 : f32
    %0 = vector.broadcast %cst : f32 to vector<49x16xf32>
    %c0 = arith.constant 0 : index
    %c6 = arith.constant 6 : index
    %c0_0 = arith.constant 0 : index
    %1 = vector.load %arg1[%c0, %c6, %c0_0] : memref<1x77x8xf32, #tpu.memory_space<vmem>>, vector<1x49x8xf32>
    %2 = vector.shape_cast %1 : vector<1x49x8xf32> to vector<49x8xf32>
    %c0_1 = arith.constant 0 : index
    %c0_2 = arith.constant 0 : index
    %c0_3 = arith.constant 0 : index
    %3 = vector.load %arg4[%c0_1, %c0_2, %c0_3] : memref<3x49x1xf32, #tpu.memory_space<vmem>>, vector<1x49x1xf32>
    %4 = vector.shape_cast %3 : vector<1x49x1xf32> to vector<49x1xf32>
    %5 = vector.broadcast %4 : vector<49x1xf32> to vector<49x8xf32>
    %6 = arith.mulf %2, %5 : vector<49x8xf32>
    %c0_4 = arith.constant 0 : index
    %c0_5 = arith.constant 0 : index
    %c0_6 = arith.constant 0 : index
    %c0_7 = arith.constant 0 : index
    %7 = vector.load %arg2[%c0_4, %c0_5, %c0_6, %c0_7] : memref<3x3x8x16xf32, #tpu.memory_space<vmem>>, vector<1x1x8x16xf32>
    %8 = vector.shape_cast %7 : vector<1x1x8x16xf32> to vector<8x16xf32>
    %cst_8 = arith.constant dense<0.000000e+00> : vector<49x16xf32>
    %9 = tpu.matmul %6, %8, %cst_8 {dimension_numbers = #tpu.dot_dimension_numbers<[1], [0], [0], [1], [0, 0, 1, 1], [], []>, precision = #tpu.contract_precision<fp32>} : vector<49x8xf32>, vector<8x16xf32>, vector<49x16xf32> -> vector<49x16xf32>
    %10 = arith.addf %0, %9 : vector<49x16xf32>
    %c0_9 = arith.constant 0 : index
    %c7 = arith.constant 7 : index
    %c0_10 = arith.constant 0 : index
    %11 = vector.load %arg1[%c0_9, %c7, %c0_10] : memref<1x77x8xf32, #tpu.memory_space<vmem>>, vector<1x49x8xf32>
    %12 = vector.shape_cast %11 : vector<1x49x8xf32> to vector<49x8xf32>
    %c0_11 = arith.constant 0 : index
    %c1 = arith.constant 1 : index
    %c0_12 = arith.constant 0 : index
    %c0_13 = arith.constant 0 : index
    %13 = vector.load %arg2[%c0_11, %c1, %c0_12, %c0_13] : memref<3x3x8x16xf32, #tpu.memory_space<vmem>>, vector<1x1x8x16xf32>
    %14 = vector.shape_cast %13 : vector<1x1x8x16xf32> to vector<8x16xf32>
    %cst_14 = arith.constant dense<0.000000e+00> : vector<49x16xf32>
    %15 = tpu.matmul %12, %14, %cst_14 {dimension_numbers = #tpu.dot_dimension_numbers<[1], [0], [0], [1], [0, 0, 1, 1], [], []>, precision = #tpu.contract_precision<fp32>} : vector<49x8xf32>, vector<8x16xf32>, vector<49x16xf32> -> vector<49x16xf32>
    %16 = arith.addf %10, %15 : vector<49x16xf32>
    %c0_15 = arith.constant 0 : index
    %c8 = arith.constant 8 : index
    %c0_16 = arith.constant 0 : index
    %17 = vector.load %arg1[%c0_15, %c8, %c0_16] : memref<1x77x8xf32, #tpu.memory_space<vmem>>, vector<1x49x8xf32>
    %18 = vector.shape_cast %17 : vector<1x49x8xf32> to vector<49x8xf32>
    %c2 = arith.constant 2 : index
    %c0_17 = arith.constant 0 : index
    %c0_18 = arith.constant 0 : index
    %19 = vector.load %arg4[%c2, %c0_17, %c0_18] : memref<3x49x1xf32, #tpu.memory_space<vmem>>, vector<1x49x1xf32>
    %20 = vector.shape_cast %19 : vector<1x49x1xf32> to vector<49x1xf32>
    %21 = vector.broadcast %20 : vector<49x1xf32> to vector<49x8xf32>
    %22 = arith.mulf %18, %21 : vector<49x8xf32>
    %c0_19 = arith.constant 0 : index
    %c2_20 = arith.constant 2 : index
    %c0_21 = arith.constant 0 : index
    %c0_22 = arith.constant 0 : index
    %23 = vector.load %arg2[%c0_19, %c2_20, %c0_21, %c0_22] : memref<3x3x8x16xf32, #tpu.memory_space<vmem>>, vector<1x1x8x16xf32>
    %24 = vector.shape_cast %23 : vector<1x1x8x16xf32> to vector<8x16xf32>
    %cst_23 = arith.constant dense<0.000000e+00> : vector<49x16xf32>
    %25 = tpu.matmul %22, %24, %cst_23 {dimension_numbers = #tpu.dot_dimension_numbers<[1], [0], [0], [1], [0, 0, 1, 1], [], []>, precision = #tpu.contract_precision<fp32>} : vector<49x8xf32>, vector<8x16xf32>, vector<49x16xf32> -> vector<49x16xf32>
    %26 = arith.addf %16, %25 : vector<49x16xf32>
    %c0_24 = arith.constant 0 : index
    %c13 = arith.constant 13 : index
    %c0_25 = arith.constant 0 : index
    %27 = vector.load %arg1[%c0_24, %c13, %c0_25] : memref<1x77x8xf32, #tpu.memory_space<vmem>>, vector<1x49x8xf32>
    %28 = vector.shape_cast %27 : vector<1x49x8xf32> to vector<49x8xf32>
    %c0_26 = arith.constant 0 : index
    %c0_27 = arith.constant 0 : index
    %c0_28 = arith.constant 0 : index
    %29 = vector.load %arg4[%c0_26, %c0_27, %c0_28] : memref<3x49x1xf32, #tpu.memory_space<vmem>>, vector<1x49x1xf32>
    %30 = vector.shape_cast %29 : vector<1x49x1xf32> to vector<49x1xf32>
    %31 = vector.broadcast %30 : vector<49x1xf32> to vector<49x8xf32>
    %32 = arith.mulf %28, %31 : vector<49x8xf32>
    %c1_29 = arith.constant 1 : index
    %c0_30 = arith.constant 0 : index
    %c0_31 = arith.constant 0 : index
    %c0_32 = arith.constant 0 : index
    %33 = vector.load %arg2[%c1_29, %c0_30, %c0_31, %c0_32] : memref<3x3x8x16xf32, #tpu.memory_space<vmem>>, vector<1x1x8x16xf32>
    %34 = vector.shape_cast %33 : vector<1x1x8x16xf32> to vector<8x16xf32>
    %cst_33 = arith.constant dense<0.000000e+00> : vector<49x16xf32>
    %35 = tpu.matmul %32, %34, %cst_33 {dimension_numbers = #tpu.dot_dimension_numbers<[1], [0], [0], [1], [0, 0, 1, 1], [], []>, precision = #tpu.contract_precision<fp32>} : vector<49x8xf32>, vector<8x16xf32>, vector<49x16xf32> -> vector<49x16xf32>
    %36 = arith.addf %26, %35 : vector<49x16xf32>
    %c0_34 = arith.constant 0 : index
    %c14 = arith.constant 14 : index
    %c0_35 = arith.constant 0 : index
    %37 = vector.load %arg1[%c0_34, %c14, %c0_35] : memref<1x77x8xf32, #tpu.memory_space<vmem>>, vector<1x49x8xf32>
    %38 = vector.shape_cast %37 : vector<1x49x8xf32> to vector<49x8xf32>
    %c1_36 = arith.constant 1 : index
    %c1_37 = arith.constant 1 : index
    %c0_38 = arith.constant 0 : index
    %c0_39 = arith.constant 0 : index
    %39 = vector.load %arg2[%c1_36, %c1_37, %c0_38, %c0_39] : memref<3x3x8x16xf32, #tpu.memory_space<vmem>>, vector<1x1x8x16xf32>
    %40 = vector.shape_cast %39 : vector<1x1x8x16xf32> to vector<8x16xf32>
    %cst_40 = arith.constant dense<0.000000e+00> : vector<49x16xf32>
    %41 = tpu.matmul %38, %40, %cst_40 {dimension_numbers = #tpu.dot_dimension_numbers<[1], [0], [0], [1], [0, 0, 1, 1], [], []>, precision = #tpu.contract_precision<fp32>} : vector<49x8xf32>, vector<8x16xf32>, vector<49x16xf32> -> vector<49x16xf32>
    %42 = arith.addf %36, %41 : vector<49x16xf32>
    %c0_41 = arith.constant 0 : index
    %c15 = arith.constant 15 : index
    %c0_42 = arith.constant 0 : index
    %43 = vector.load %arg1[%c0_41, %c15, %c0_42] : memref<1x77x8xf32, #tpu.memory_space<vmem>>, vector<1x49x8xf32>
    %44 = vector.shape_cast %43 : vector<1x49x8xf32> to vector<49x8xf32>
    %c2_43 = arith.constant 2 : index
    %c0_44 = arith.constant 0 : index
    %c0_45 = arith.constant 0 : index
    %45 = vector.load %arg4[%c2_43, %c0_44, %c0_45] : memref<3x49x1xf32, #tpu.memory_space<vmem>>, vector<1x49x1xf32>
    %46 = vector.shape_cast %45 : vector<1x49x1xf32> to vector<49x1xf32>
    %47 = vector.broadcast %46 : vector<49x1xf32> to vector<49x8xf32>
    %48 = arith.mulf %44, %47 : vector<49x8xf32>
    %c1_46 = arith.constant 1 : index
    %c2_47 = arith.constant 2 : index
    %c0_48 = arith.constant 0 : index
    %c0_49 = arith.constant 0 : index
    %49 = vector.load %arg2[%c1_46, %c2_47, %c0_48, %c0_49] : memref<3x3x8x16xf32, #tpu.memory_space<vmem>>, vector<1x1x8x16xf32>
    %50 = vector.shape_cast %49 : vector<1x1x8x16xf32> to vector<8x16xf32>
    %cst_50 = arith.constant dense<0.000000e+00> : vector<49x16xf32>
    %51 = tpu.matmul %48, %50, %cst_50 {dimension_numbers = #tpu.dot_dimension_numbers<[1], [0], [0], [1], [0, 0, 1, 1], [], []>, precision = #tpu.contract_precision<fp32>} : vector<49x8xf32>, vector<8x16xf32>, vector<49x16xf32> -> vector<49x16xf32>
    %52 = arith.addf %42, %51 : vector<49x16xf32>
    %c0_51 = arith.constant 0 : index
    %c20 = arith.constant 20 : index
    %c0_52 = arith.constant 0 : index
    %53 = vector.load %arg1[%c0_51, %c20, %c0_52] : memref<1x77x8xf32, #tpu.memory_space<vmem>>, vector<1x49x8xf32>
    %54 = vector.shape_cast %53 : vector<1x49x8xf32> to vector<49x8xf32>
    %c0_53 = arith.constant 0 : index
    %c0_54 = arith.constant 0 : index
    %c0_55 = arith.constant 0 : index
    %55 = vector.load %arg4[%c0_53, %c0_54, %c0_55] : memref<3x49x1xf32, #tpu.memory_space<vmem>>, vector<1x49x1xf32>
    %56 = vector.shape_cast %55 : vector<1x49x1xf32> to vector<49x1xf32>
    %57 = vector.broadcast %56 : vector<49x1xf32> to vector<49x8xf32>
    %58 = arith.mulf %54, %57 : vector<49x8xf32>
    %c2_56 = arith.constant 2 : index
    %c0_57 = arith.constant 0 : index
    %c0_58 = arith.constant 0 : index
    %c0_59 = arith.constant 0 : index
    %59 = vector.load %arg2[%c2_56, %c0_57, %c0_58, %c0_59] : memref<3x3x8x16xf32, #tpu.memory_space<vmem>>, vector<1x1x8x16xf32>
    %60 = vector.shape_cast %59 : vector<1x1x8x16xf32> to vector<8x16xf32>
    %cst_60 = arith.constant dense<0.000000e+00> : vector<49x16xf32>
    %61 = tpu.matmul %58, %60, %cst_60 {dimension_numbers = #tpu.dot_dimension_numbers<[1], [0], [0], [1], [0, 0, 1, 1], [], []>, precision = #tpu.contract_precision<fp32>} : vector<49x8xf32>, vector<8x16xf32>, vector<49x16xf32> -> vector<49x16xf32>
    %62 = arith.addf %52, %61 : vector<49x16xf32>
    %c0_61 = arith.constant 0 : index
    %c21 = arith.constant 21 : index
    %c0_62 = arith.constant 0 : index
    %63 = vector.load %arg1[%c0_61, %c21, %c0_62] : memref<1x77x8xf32, #tpu.memory_space<vmem>>, vector<1x49x8xf32>
    %64 = vector.shape_cast %63 : vector<1x49x8xf32> to vector<49x8xf32>
    %c2_63 = arith.constant 2 : index
    %c1_64 = arith.constant 1 : index
    %c0_65 = arith.constant 0 : index
    %c0_66 = arith.constant 0 : index
    %65 = vector.load %arg2[%c2_63, %c1_64, %c0_65, %c0_66] : memref<3x3x8x16xf32, #tpu.memory_space<vmem>>, vector<1x1x8x16xf32>
    %66 = vector.shape_cast %65 : vector<1x1x8x16xf32> to vector<8x16xf32>
    %cst_67 = arith.constant dense<0.000000e+00> : vector<49x16xf32>
    %67 = tpu.matmul %64, %66, %cst_67 {dimension_numbers = #tpu.dot_dimension_numbers<[1], [0], [0], [1], [0, 0, 1, 1], [], []>, precision = #tpu.contract_precision<fp32>} : vector<49x8xf32>, vector<8x16xf32>, vector<49x16xf32> -> vector<49x16xf32>
    %68 = arith.addf %62, %67 : vector<49x16xf32>
    %c0_68 = arith.constant 0 : index
    %c22 = arith.constant 22 : index
    %c0_69 = arith.constant 0 : index
    %69 = vector.load %arg1[%c0_68, %c22, %c0_69] : memref<1x77x8xf32, #tpu.memory_space<vmem>>, vector<1x49x8xf32>
    %70 = vector.shape_cast %69 : vector<1x49x8xf32> to vector<49x8xf32>
    %c2_70 = arith.constant 2 : index
    %c0_71 = arith.constant 0 : index
    %c0_72 = arith.constant 0 : index
    %71 = vector.load %arg4[%c2_70, %c0_71, %c0_72] : memref<3x49x1xf32, #tpu.memory_space<vmem>>, vector<1x49x1xf32>
    %72 = vector.shape_cast %71 : vector<1x49x1xf32> to vector<49x1xf32>
    %73 = vector.broadcast %72 : vector<49x1xf32> to vector<49x8xf32>
    %74 = arith.mulf %70, %73 : vector<49x8xf32>
    %c2_73 = arith.constant 2 : index
    %c2_74 = arith.constant 2 : index
    %c0_75 = arith.constant 0 : index
    %c0_76 = arith.constant 0 : index
    %75 = vector.load %arg2[%c2_73, %c2_74, %c0_75, %c0_76] : memref<3x3x8x16xf32, #tpu.memory_space<vmem>>, vector<1x1x8x16xf32>
    %76 = vector.shape_cast %75 : vector<1x1x8x16xf32> to vector<8x16xf32>
    %cst_77 = arith.constant dense<0.000000e+00> : vector<49x16xf32>
    %77 = tpu.matmul %74, %76, %cst_77 {dimension_numbers = #tpu.dot_dimension_numbers<[1], [0], [0], [1], [0, 0, 1, 1], [], []>, precision = #tpu.contract_precision<fp32>} : vector<49x8xf32>, vector<8x16xf32>, vector<49x16xf32> -> vector<49x16xf32>
    %78 = arith.addf %68, %77 : vector<49x16xf32>
    %c0_78 = arith.constant 0 : index
    %c0_79 = arith.constant 0 : index
    %79 = vector.load %arg3[%c0_78, %c0_79] : memref<1x16xf32, #tpu.memory_space<vmem>>, vector<1x16xf32>
    %80 = vector.broadcast %79 : vector<1x16xf32> to vector<49x16xf32>
    %81 = arith.addf %78, %80 : vector<49x16xf32>
    %cst_80 = arith.constant 0.000000e+00 : f32
    %82 = vector.broadcast %cst_80 : f32 to vector<49x16xf32>
    %83 = arith.maximumf %81, %82 : vector<49x16xf32>
    %c0_81 = arith.constant 0 : index
    %c0_82 = arith.constant 0 : index
    %c0_83 = arith.constant 0 : index
    %84 = vector.load %arg5[%c0_81, %c0_82, %c0_83] : memref<1x49x16xf32, #tpu.memory_space<vmem>>, vector<1x49x16xf32>
    %85 = vector.shape_cast %84 : vector<1x49x16xf32> to vector<49x16xf32>
    %86 = vector.shape_cast %83 : vector<49x16xf32> to vector<1x49x16xf32>
    tpu.vector_store %arg5[%c0_81, %c0_82, %c0_83], %86 {strides = array<i32>} : memref<1x49x16xf32, #tpu.memory_space<vmem>>, vector<1x49x16xf32>,
    return
  }
  func.func @transform_0(%arg0: i32) -> (i32, i32, i32) {
    %c0_i32 = arith.constant 0 : i32
    %c0_i32_0 = arith.constant 0 : i32
    %c0_i32_1 = arith.constant 0 : i32
    return %arg0, %c0_i32, %c0_i32_0 : i32, i32, i32
  }
  func.func @transform_1(%arg0: i32) -> (i32, i32, i32, i32) {
    %c0_i32 = arith.constant 0 : i32
    %c0_i32_0 = arith.constant 0 : i32
    %c0_i32_1 = arith.constant 0 : i32
    %c0_i32_2 = arith.constant 0 : i32
    %c0_i32_3 = arith.constant 0 : i32
    return %c0_i32, %c0_i32_0, %c0_i32_1, %c0_i32_2 : i32, i32, i32, i32
  }
  func.func @transform_2(%arg0: i32) -> (i32, i32) {
    %c0_i32 = arith.constant 0 : i32
    %c0_i32_0 = arith.constant 0 : i32
    %c0_i32_1 = arith.constant 0 : i32
    return %c0_i32, %c0_i32_0 : i32, i32
  }
  func.func @transform_3(%arg0: i32) -> (i32, i32, i32) {
    %c0_i32 = arith.constant 0 : i32
    %c0_i32_0 = arith.constant 0 : i32
    %c0_i32_1 = arith.constant 0 : i32
    %c0_i32_2 = arith.constant 0 : i32
    return %c0_i32, %c0_i32_0, %c0_i32_1 : i32, i32, i32
  }
  func.func @transform_4(%arg0: i32) -> (i32, i32, i32) {
    %c0_i32 = arith.constant 0 : i32
    %c0_i32_0 = arith.constant 0 : i32
    %c0_i32_1 = arith.constant 0 : i32
    return %arg0, %c0_i32, %c0_i32_0 : i32, i32, i32
  }
}

module attributes {stable_mosaic.version = 11 : i64} {
  func.func @_conv3x3_bias_relu_kernel(%arg0: i32, %arg1: memref<1x77x16xf32, #tpu.memory_space<vmem>>, %arg2: memref<3x3x16x16xf32, #tpu.memory_space<vmem>>, %arg3: memref<1x16xf32, #tpu.memory_space<vmem>>, %arg4: memref<3x49x1xf32, #tpu.memory_space<vmem>>, %arg5: memref<1x49x16xf32, #tpu.memory_space<vmem>>) attributes {dimension_semantics = [#tpu.dimension_semantics<parallel>], iteration_bounds = array<i64: 4>, scalar_prefetch = 0 : i64, scratch_operands = 0 : i64, tpu.core_type = #tpu.core_type<tc>, window_params = [{transform_indices = @transform_0, window_bounds = array<i64: 1, 77, 16>}, {pipeline_mode = #tpu.pipeline_mode<synchronous>, transform_indices = @transform_1, window_bounds = array<i64: 3, 3, 16, 16>}, {pipeline_mode = #tpu.pipeline_mode<synchronous>, transform_indices = @transform_2, window_bounds = array<i64: 1, 16>}, {pipeline_mode = #tpu.pipeline_mode<synchronous>, transform_indices = @transform_3, window_bounds = array<i64: 3, 49, 1>}, {transform_indices = @transform_4, window_bounds = array<i64: 1, 49, 16>}]} {
    %cst = arith.constant 0.000000e+00 : f32
    %0 = vector.broadcast %cst : f32 to vector<49x16xf32>
    %c0 = arith.constant 0 : index
    %c6 = arith.constant 6 : index
    %c0_0 = arith.constant 0 : index
    %1 = vector.load %arg1[%c0, %c6, %c0_0] : memref<1x77x16xf32, #tpu.memory_space<vmem>>, vector<1x49x16xf32>
    %2 = vector.shape_cast %1 : vector<1x49x16xf32> to vector<49x16xf32>
    %c0_1 = arith.constant 0 : index
    %c0_2 = arith.constant 0 : index
    %c0_3 = arith.constant 0 : index
    %3 = vector.load %arg4[%c0_1, %c0_2, %c0_3] : memref<3x49x1xf32, #tpu.memory_space<vmem>>, vector<1x49x1xf32>
    %4 = vector.shape_cast %3 : vector<1x49x1xf32> to vector<49x1xf32>
    %5 = vector.broadcast %4 : vector<49x1xf32> to vector<49x16xf32>
    %6 = arith.mulf %2, %5 : vector<49x16xf32>
    %c0_4 = arith.constant 0 : index
    %c0_5 = arith.constant 0 : index
    %c0_6 = arith.constant 0 : index
    %c0_7 = arith.constant 0 : index
    %7 = vector.load %arg2[%c0_4, %c0_5, %c0_6, %c0_7] : memref<3x3x16x16xf32, #tpu.memory_space<vmem>>, vector<1x1x16x16xf32>
    %8 = vector.shape_cast %7 : vector<1x1x16x16xf32> to vector<16x16xf32>
    %cst_8 = arith.constant dense<0.000000e+00> : vector<49x16xf32>
    %9 = tpu.matmul %6, %8, %cst_8 {dimension_numbers = #tpu.dot_dimension_numbers<[1], [0], [0], [1], [0, 0, 1, 1], [], []>, precision = #tpu.contract_precision<fp32>} : vector<49x16xf32>, vector<16x16xf32>, vector<49x16xf32> -> vector<49x16xf32>
    %10 = arith.addf %0, %9 : vector<49x16xf32>
    %c0_9 = arith.constant 0 : index
    %c7 = arith.constant 7 : index
    %c0_10 = arith.constant 0 : index
    %11 = vector.load %arg1[%c0_9, %c7, %c0_10] : memref<1x77x16xf32, #tpu.memory_space<vmem>>, vector<1x49x16xf32>
    %12 = vector.shape_cast %11 : vector<1x49x16xf32> to vector<49x16xf32>
    %c0_11 = arith.constant 0 : index
    %c1 = arith.constant 1 : index
    %c0_12 = arith.constant 0 : index
    %c0_13 = arith.constant 0 : index
    %13 = vector.load %arg2[%c0_11, %c1, %c0_12, %c0_13] : memref<3x3x16x16xf32, #tpu.memory_space<vmem>>, vector<1x1x16x16xf32>
    %14 = vector.shape_cast %13 : vector<1x1x16x16xf32> to vector<16x16xf32>
    %cst_14 = arith.constant dense<0.000000e+00> : vector<49x16xf32>
    %15 = tpu.matmul %12, %14, %cst_14 {dimension_numbers = #tpu.dot_dimension_numbers<[1], [0], [0], [1], [0, 0, 1, 1], [], []>, precision = #tpu.contract_precision<fp32>} : vector<49x16xf32>, vector<16x16xf32>, vector<49x16xf32> -> vector<49x16xf32>
    %16 = arith.addf %10, %15 : vector<49x16xf32>
    %c0_15 = arith.constant 0 : index
    %c8 = arith.constant 8 : index
    %c0_16 = arith.constant 0 : index
    %17 = vector.load %arg1[%c0_15, %c8, %c0_16] : memref<1x77x16xf32, #tpu.memory_space<vmem>>, vector<1x49x16xf32>
    %18 = vector.shape_cast %17 : vector<1x49x16xf32> to vector<49x16xf32>
    %c2 = arith.constant 2 : index
    %c0_17 = arith.constant 0 : index
    %c0_18 = arith.constant 0 : index
    %19 = vector.load %arg4[%c2, %c0_17, %c0_18] : memref<3x49x1xf32, #tpu.memory_space<vmem>>, vector<1x49x1xf32>
    %20 = vector.shape_cast %19 : vector<1x49x1xf32> to vector<49x1xf32>
    %21 = vector.broadcast %20 : vector<49x1xf32> to vector<49x16xf32>
    %22 = arith.mulf %18, %21 : vector<49x16xf32>
    %c0_19 = arith.constant 0 : index
    %c2_20 = arith.constant 2 : index
    %c0_21 = arith.constant 0 : index
    %c0_22 = arith.constant 0 : index
    %23 = vector.load %arg2[%c0_19, %c2_20, %c0_21, %c0_22] : memref<3x3x16x16xf32, #tpu.memory_space<vmem>>, vector<1x1x16x16xf32>
    %24 = vector.shape_cast %23 : vector<1x1x16x16xf32> to vector<16x16xf32>
    %cst_23 = arith.constant dense<0.000000e+00> : vector<49x16xf32>
    %25 = tpu.matmul %22, %24, %cst_23 {dimension_numbers = #tpu.dot_dimension_numbers<[1], [0], [0], [1], [0, 0, 1, 1], [], []>, precision = #tpu.contract_precision<fp32>} : vector<49x16xf32>, vector<16x16xf32>, vector<49x16xf32> -> vector<49x16xf32>
    %26 = arith.addf %16, %25 : vector<49x16xf32>
    %c0_24 = arith.constant 0 : index
    %c13 = arith.constant 13 : index
    %c0_25 = arith.constant 0 : index
    %27 = vector.load %arg1[%c0_24, %c13, %c0_25] : memref<1x77x16xf32, #tpu.memory_space<vmem>>, vector<1x49x16xf32>
    %28 = vector.shape_cast %27 : vector<1x49x16xf32> to vector<49x16xf32>
    %c0_26 = arith.constant 0 : index
    %c0_27 = arith.constant 0 : index
    %c0_28 = arith.constant 0 : index
    %29 = vector.load %arg4[%c0_26, %c0_27, %c0_28] : memref<3x49x1xf32, #tpu.memory_space<vmem>>, vector<1x49x1xf32>
    %30 = vector.shape_cast %29 : vector<1x49x1xf32> to vector<49x1xf32>
    %31 = vector.broadcast %30 : vector<49x1xf32> to vector<49x16xf32>
    %32 = arith.mulf %28, %31 : vector<49x16xf32>
    %c1_29 = arith.constant 1 : index
    %c0_30 = arith.constant 0 : index
    %c0_31 = arith.constant 0 : index
    %c0_32 = arith.constant 0 : index
    %33 = vector.load %arg2[%c1_29, %c0_30, %c0_31, %c0_32] : memref<3x3x16x16xf32, #tpu.memory_space<vmem>>, vector<1x1x16x16xf32>
    %34 = vector.shape_cast %33 : vector<1x1x16x16xf32> to vector<16x16xf32>
    %cst_33 = arith.constant dense<0.000000e+00> : vector<49x16xf32>
    %35 = tpu.matmul %32, %34, %cst_33 {dimension_numbers = #tpu.dot_dimension_numbers<[1], [0], [0], [1], [0, 0, 1, 1], [], []>, precision = #tpu.contract_precision<fp32>} : vector<49x16xf32>, vector<16x16xf32>, vector<49x16xf32> -> vector<49x16xf32>
    %36 = arith.addf %26, %35 : vector<49x16xf32>
    %c0_34 = arith.constant 0 : index
    %c14 = arith.constant 14 : index
    %c0_35 = arith.constant 0 : index
    %37 = vector.load %arg1[%c0_34, %c14, %c0_35] : memref<1x77x16xf32, #tpu.memory_space<vmem>>, vector<1x49x16xf32>
    %38 = vector.shape_cast %37 : vector<1x49x16xf32> to vector<49x16xf32>
    %c1_36 = arith.constant 1 : index
    %c1_37 = arith.constant 1 : index
    %c0_38 = arith.constant 0 : index
    %c0_39 = arith.constant 0 : index
    %39 = vector.load %arg2[%c1_36, %c1_37, %c0_38, %c0_39] : memref<3x3x16x16xf32, #tpu.memory_space<vmem>>, vector<1x1x16x16xf32>
    %40 = vector.shape_cast %39 : vector<1x1x16x16xf32> to vector<16x16xf32>
    %cst_40 = arith.constant dense<0.000000e+00> : vector<49x16xf32>
    %41 = tpu.matmul %38, %40, %cst_40 {dimension_numbers = #tpu.dot_dimension_numbers<[1], [0], [0], [1], [0, 0, 1, 1], [], []>, precision = #tpu.contract_precision<fp32>} : vector<49x16xf32>, vector<16x16xf32>, vector<49x16xf32> -> vector<49x16xf32>
    %42 = arith.addf %36, %41 : vector<49x16xf32>
    %c0_41 = arith.constant 0 : index
    %c15 = arith.constant 15 : index
    %c0_42 = arith.constant 0 : index
    %43 = vector.load %arg1[%c0_41, %c15, %c0_42] : memref<1x77x16xf32, #tpu.memory_space<vmem>>, vector<1x49x16xf32>
    %44 = vector.shape_cast %43 : vector<1x49x16xf32> to vector<49x16xf32>
    %c2_43 = arith.constant 2 : index
    %c0_44 = arith.constant 0 : index
    %c0_45 = arith.constant 0 : index
    %45 = vector.load %arg4[%c2_43, %c0_44, %c0_45] : memref<3x49x1xf32, #tpu.memory_space<vmem>>, vector<1x49x1xf32>
    %46 = vector.shape_cast %45 : vector<1x49x1xf32> to vector<49x1xf32>
    %47 = vector.broadcast %46 : vector<49x1xf32> to vector<49x16xf32>
    %48 = arith.mulf %44, %47 : vector<49x16xf32>
    %c1_46 = arith.constant 1 : index
    %c2_47 = arith.constant 2 : index
    %c0_48 = arith.constant 0 : index
    %c0_49 = arith.constant 0 : index
    %49 = vector.load %arg2[%c1_46, %c2_47, %c0_48, %c0_49] : memref<3x3x16x16xf32, #tpu.memory_space<vmem>>, vector<1x1x16x16xf32>
    %50 = vector.shape_cast %49 : vector<1x1x16x16xf32> to vector<16x16xf32>
    %cst_50 = arith.constant dense<0.000000e+00> : vector<49x16xf32>
    %51 = tpu.matmul %48, %50, %cst_50 {dimension_numbers = #tpu.dot_dimension_numbers<[1], [0], [0], [1], [0, 0, 1, 1], [], []>, precision = #tpu.contract_precision<fp32>} : vector<49x16xf32>, vector<16x16xf32>, vector<49x16xf32> -> vector<49x16xf32>
    %52 = arith.addf %42, %51 : vector<49x16xf32>
    %c0_51 = arith.constant 0 : index
    %c20 = arith.constant 20 : index
    %c0_52 = arith.constant 0 : index
    %53 = vector.load %arg1[%c0_51, %c20, %c0_52] : memref<1x77x16xf32, #tpu.memory_space<vmem>>, vector<1x49x16xf32>
    %54 = vector.shape_cast %53 : vector<1x49x16xf32> to vector<49x16xf32>
    %c0_53 = arith.constant 0 : index
    %c0_54 = arith.constant 0 : index
    %c0_55 = arith.constant 0 : index
    %55 = vector.load %arg4[%c0_53, %c0_54, %c0_55] : memref<3x49x1xf32, #tpu.memory_space<vmem>>, vector<1x49x1xf32>
    %56 = vector.shape_cast %55 : vector<1x49x1xf32> to vector<49x1xf32>
    %57 = vector.broadcast %56 : vector<49x1xf32> to vector<49x16xf32>
    %58 = arith.mulf %54, %57 : vector<49x16xf32>
    %c2_56 = arith.constant 2 : index
    %c0_57 = arith.constant 0 : index
    %c0_58 = arith.constant 0 : index
    %c0_59 = arith.constant 0 : index
    %59 = vector.load %arg2[%c2_56, %c0_57, %c0_58, %c0_59] : memref<3x3x16x16xf32, #tpu.memory_space<vmem>>, vector<1x1x16x16xf32>
    %60 = vector.shape_cast %59 : vector<1x1x16x16xf32> to vector<16x16xf32>
    %cst_60 = arith.constant dense<0.000000e+00> : vector<49x16xf32>
    %61 = tpu.matmul %58, %60, %cst_60 {dimension_numbers = #tpu.dot_dimension_numbers<[1], [0], [0], [1], [0, 0, 1, 1], [], []>, precision = #tpu.contract_precision<fp32>} : vector<49x16xf32>, vector<16x16xf32>, vector<49x16xf32> -> vector<49x16xf32>
    %62 = arith.addf %52, %61 : vector<49x16xf32>
    %c0_61 = arith.constant 0 : index
    %c21 = arith.constant 21 : index
    %c0_62 = arith.constant 0 : index
    %63 = vector.load %arg1[%c0_61, %c21, %c0_62] : memref<1x77x16xf32, #tpu.memory_space<vmem>>, vector<1x49x16xf32>
    %64 = vector.shape_cast %63 : vector<1x49x16xf32> to vector<49x16xf32>
    %c2_63 = arith.constant 2 : index
    %c1_64 = arith.constant 1 : index
    %c0_65 = arith.constant 0 : index
    %c0_66 = arith.constant 0 : index
    %65 = vector.load %arg2[%c2_63, %c1_64, %c0_65, %c0_66] : memref<3x3x16x16xf32, #tpu.memory_space<vmem>>, vector<1x1x16x16xf32>
    %66 = vector.shape_cast %65 : vector<1x1x16x16xf32> to vector<16x16xf32>
    %cst_67 = arith.constant dense<0.000000e+00> : vector<49x16xf32>
    %67 = tpu.matmul %64, %66, %cst_67 {dimension_numbers = #tpu.dot_dimension_numbers<[1], [0], [0], [1], [0, 0, 1, 1], [], []>, precision = #tpu.contract_precision<fp32>} : vector<49x16xf32>, vector<16x16xf32>, vector<49x16xf32> -> vector<49x16xf32>
    %68 = arith.addf %62, %67 : vector<49x16xf32>
    %c0_68 = arith.constant 0 : index
    %c22 = arith.constant 22 : index
    %c0_69 = arith.constant 0 : index
    %69 = vector.load %arg1[%c0_68, %c22, %c0_69] : memref<1x77x16xf32, #tpu.memory_space<vmem>>, vector<1x49x16xf32>
    %70 = vector.shape_cast %69 : vector<1x49x16xf32> to vector<49x16xf32>
    %c2_70 = arith.constant 2 : index
    %c0_71 = arith.constant 0 : index
    %c0_72 = arith.constant 0 : index
    %71 = vector.load %arg4[%c2_70, %c0_71, %c0_72] : memref<3x49x1xf32, #tpu.memory_space<vmem>>, vector<1x49x1xf32>
    %72 = vector.shape_cast %71 : vector<1x49x1xf32> to vector<49x1xf32>
    %73 = vector.broadcast %72 : vector<49x1xf32> to vector<49x16xf32>
    %74 = arith.mulf %70, %73 : vector<49x16xf32>
    %c2_73 = arith.constant 2 : index
    %c2_74 = arith.constant 2 : index
    %c0_75 = arith.constant 0 : index
    %c0_76 = arith.constant 0 : index
    %75 = vector.load %arg2[%c2_73, %c2_74, %c0_75, %c0_76] : memref<3x3x16x16xf32, #tpu.memory_space<vmem>>, vector<1x1x16x16xf32>
    %76 = vector.shape_cast %75 : vector<1x1x16x16xf32> to vector<16x16xf32>
    %cst_77 = arith.constant dense<0.000000e+00> : vector<49x16xf32>
    %77 = tpu.matmul %74, %76, %cst_77 {dimension_numbers = #tpu.dot_dimension_numbers<[1], [0], [0], [1], [0, 0, 1, 1], [], []>, precision = #tpu.contract_precision<fp32>} : vector<49x16xf32>, vector<16x16xf32>, vector<49x16xf32> -> vector<49x16xf32>
    %78 = arith.addf %68, %77 : vector<49x16xf32>
    %c0_78 = arith.constant 0 : index
    %c0_79 = arith.constant 0 : index
    %79 = vector.load %arg3[%c0_78, %c0_79] : memref<1x16xf32, #tpu.memory_space<vmem>>, vector<1x16xf32>
    %80 = vector.broadcast %79 : vector<1x16xf32> to vector<49x16xf32>
    %81 = arith.addf %78, %80 : vector<49x16xf32>
    %cst_80 = arith.constant 0.000000e+00 : f32
    %82 = vector.broadcast %cst_80 : f32 to vector<49x16xf32>
    %83 = arith.maximumf %81, %82 : vector<49x16xf32>
    %c0_81 = arith.constant 0 : index
    %c0_82 = arith.constant 0 : index
    %c0_83 = arith.constant 0 : index
    %84 = vector.load %arg5[%c0_81, %c0_82, %c0_83] : memref<1x49x16xf32, #tpu.memory_space<vmem>>, vector<1x49x16xf32>
    %85 = vector.shape_cast %84 : vector<1x49x16xf32> to vector<49x16xf32>
    %86 = vector.shape_cast %83 : vector<49x16xf32> to vector<1x49x16xf32>
    tpu.vector_store %arg5[%c0_81, %c0_82, %c0_83], %86 {strides = array<i32>} : memref<1x49x16xf32, #tpu.memory_space<vmem>>, vector<1x49x16xf32>,
    return
  }
  func.func @transform_0(%arg0: i32) -> (i32, i32, i32) {
    %c0_i32 = arith.constant 0 : i32
    %c0_i32_0 = arith.constant 0 : i32
    %c0_i32_1 = arith.constant 0 : i32
    return %arg0, %c0_i32, %c0_i32_0 : i32, i32, i32
  }
  func.func @transform_1(%arg0: i32) -> (i32, i32, i32, i32) {
    %c0_i32 = arith.constant 0 : i32
    %c0_i32_0 = arith.constant 0 : i32
    %c0_i32_1 = arith.constant 0 : i32
    %c0_i32_2 = arith.constant 0 : i32
    %c0_i32_3 = arith.constant 0 : i32
    return %c0_i32, %c0_i32_0, %c0_i32_1, %c0_i32_2 : i32, i32, i32, i32
  }
  func.func @transform_2(%arg0: i32) -> (i32, i32) {
    %c0_i32 = arith.constant 0 : i32
    %c0_i32_0 = arith.constant 0 : i32
    %c0_i32_1 = arith.constant 0 : i32
    return %c0_i32, %c0_i32_0 : i32, i32
  }
  func.func @transform_3(%arg0: i32) -> (i32, i32, i32) {
    %c0_i32 = arith.constant 0 : i32
    %c0_i32_0 = arith.constant 0 : i32
    %c0_i32_1 = arith.constant 0 : i32
    %c0_i32_2 = arith.constant 0 : i32
    return %c0_i32, %c0_i32_0, %c0_i32_1 : i32, i32, i32
  }
  func.func @transform_4(%arg0: i32) -> (i32, i32, i32) {
    %c0_i32 = arith.constant 0 : i32
    %c0_i32_0 = arith.constant 0 : i32
    %c0_i32_1 = arith.constant 0 : i32
    return %arg0, %c0_i32, %c0_i32_0 : i32, i32, i32
  }
}

module attributes {stable_mosaic.version = 11 : i64} {
  func.func @_mm_bias_relu_kernel(%arg0: i32, %arg1: i32, %arg2: i32, %arg3: memref<8x512xf32, #tpu.memory_space<vmem>>, %arg4: memref<512x128xf32, #tpu.memory_space<vmem>>, %arg5: memref<1x128xf32, #tpu.memory_space<vmem>>, %arg6: memref<8x128xf32, #tpu.memory_space<vmem>>, %arg7: memref<8x128xf32, #tpu.memory_space<vmem>>) attributes {dimension_semantics = [#tpu.dimension_semantics<parallel>, #tpu.dimension_semantics<parallel>, #tpu.dimension_semantics<arbitrary>], iteration_bounds = array<i64: 1, 1, 2>, scalar_prefetch = 0 : i64, scratch_operands = 1 : i64, tpu.core_type = #tpu.core_type<tc>, window_params = [{transform_indices = @transform_0, window_bounds = array<i64: 8, 512>}, {transform_indices = @transform_1, window_bounds = array<i64: 512, 128>}, {transform_indices = @transform_2, window_bounds = array<i64: 1, 128>}, {transform_indices = @transform_3, window_bounds = array<i64: 8, 128>}]} {
    %c0_i32 = arith.constant 0 : i32
    %0 = arith.cmpi eq, %arg2, %c0_i32 : i32
    %1 = arith.extui %0 : i1 to i32
    %c0_i32_0 = arith.constant 0 : i32
    %2 = arith.cmpi ne, %1, %c0_i32_0 : i32
    scf.if %2 {
      %cst_9 = arith.constant 0.000000e+00 : f32
      %12 = vector.broadcast %cst_9 : f32 to vector<8x128xf32>
      %c0_10 = arith.constant 0 : index
      %c0_11 = arith.constant 0 : index
      %13 = vector.load %arg7[%c0_10, %c0_11] : memref<8x128xf32, #tpu.memory_space<vmem>>, vector<8x128xf32>
      tpu.vector_store %arg7[%c0_10, %c0_11], %12 {strides = array<i32>} : memref<8x128xf32, #tpu.memory_space<vmem>>, vector<8x128xf32>,
    } else {
    }
    %c0 = arith.constant 0 : index
    %c0_1 = arith.constant 0 : index
    %3 = vector.load %arg7[%c0, %c0_1] : memref<8x128xf32, #tpu.memory_space<vmem>>, vector<8x128xf32>
    %c0_2 = arith.constant 0 : index
    %c0_3 = arith.constant 0 : index
    %4 = vector.load %arg3[%c0_2, %c0_3] : memref<8x512xf32, #tpu.memory_space<vmem>>, vector<8x512xf32>
    %c0_4 = arith.constant 0 : index
    %c0_5 = arith.constant 0 : index
    %5 = vector.load %arg4[%c0_4, %c0_5] : memref<512x128xf32, #tpu.memory_space<vmem>>, vector<512x128xf32>
    %cst = arith.constant dense<0.000000e+00> : vector<8x128xf32>
    %6 = tpu.matmul %4, %5, %cst {dimension_numbers = #tpu.dot_dimension_numbers<[1], [0], [0], [1], [0, 0, 1, 1], [], []>, precision = #tpu.contract_precision<fp32>} : vector<8x512xf32>, vector<512x128xf32>, vector<8x128xf32> -> vector<8x128xf32>
    %7 = arith.addf %3, %6 : vector<8x128xf32>
    %c0_6 = arith.constant 0 : index
    %c0_7 = arith.constant 0 : index
    %8 = vector.load %arg7[%c0_6, %c0_7] : memref<8x128xf32, #tpu.memory_space<vmem>>, vector<8x128xf32>
    tpu.vector_store %arg7[%c0_6, %c0_7], %7 {strides = array<i32>} : memref<8x128xf32, #tpu.memory_space<vmem>>, vector<8x128xf32>,
    %c1_i32 = arith.constant 1 : i32
    %9 = arith.cmpi eq, %arg2, %c1_i32 : i32
    %10 = arith.extui %9 : i1 to i32
    %c0_i32_8 = arith.constant 0 : i32
    %11 = arith.cmpi ne, %10, %c0_i32_8 : i32
    scf.if %11 {
      %c0_9 = arith.constant 0 : index
      %c0_10 = arith.constant 0 : index
      %12 = vector.load %arg7[%c0_9, %c0_10] : memref<8x128xf32, #tpu.memory_space<vmem>>, vector<8x128xf32>
      %c0_11 = arith.constant 0 : index
      %c0_12 = arith.constant 0 : index
      %13 = vector.load %arg5[%c0_11, %c0_12] : memref<1x128xf32, #tpu.memory_space<vmem>>, vector<1x128xf32>
      %14 = vector.broadcast %13 : vector<1x128xf32> to vector<8x128xf32>
      %15 = arith.addf %12, %14 : vector<8x128xf32>
      %cst_13 = arith.constant 0.000000e+00 : f32
      %16 = vector.broadcast %cst_13 : f32 to vector<8x128xf32>
      %17 = arith.maximumf %15, %16 : vector<8x128xf32>
      %c0_14 = arith.constant 0 : index
      %c0_15 = arith.constant 0 : index
      %18 = vector.load %arg6[%c0_14, %c0_15] : memref<8x128xf32, #tpu.memory_space<vmem>>, vector<8x128xf32>
      tpu.vector_store %arg6[%c0_14, %c0_15], %17 {strides = array<i32>} : memref<8x128xf32, #tpu.memory_space<vmem>>, vector<8x128xf32>,
    } else {
    }
    return
  }
  func.func @transform_0(%arg0: i32, %arg1: i32, %arg2: i32) -> (i32, i32) {
    %c0_i32 = arith.constant 0 : i32
    return %arg0, %arg2 : i32, i32
  }
  func.func @transform_1(%arg0: i32, %arg1: i32, %arg2: i32) -> (i32, i32) {
    %c0_i32 = arith.constant 0 : i32
    return %arg2, %arg1 : i32, i32
  }
  func.func @transform_2(%arg0: i32, %arg1: i32, %arg2: i32) -> (i32, i32) {
    %c0_i32 = arith.constant 0 : i32
    %c0_i32_0 = arith.constant 0 : i32
    return %c0_i32, %arg1 : i32, i32
  }
  func.func @transform_3(%arg0: i32, %arg1: i32, %arg2: i32) -> (i32, i32) {
    %c0_i32 = arith.constant 0 : i32
    return %arg0, %arg1 : i32, i32
  }
}

module attributes {stable_mosaic.version = 11 : i64} {
  func.func @_mm_bias_relu_kernel(%arg0: i32, %arg1: i32, %arg2: i32, %arg3: memref<8x128xf32, #tpu.memory_space<vmem>>, %arg4: memref<128x128xf32, #tpu.memory_space<vmem>>, %arg5: memref<1x128xf32, #tpu.memory_space<vmem>>, %arg6: memref<8x128xf32, #tpu.memory_space<vmem>>, %arg7: memref<8x128xf32, #tpu.memory_space<vmem>>) attributes {dimension_semantics = [#tpu.dimension_semantics<parallel>, #tpu.dimension_semantics<parallel>, #tpu.dimension_semantics<arbitrary>], iteration_bounds = array<i64: 1, 1, 1>, scalar_prefetch = 0 : i64, scratch_operands = 1 : i64, tpu.core_type = #tpu.core_type<tc>, window_params = [{transform_indices = @transform_0, window_bounds = array<i64: 8, 128>}, {transform_indices = @transform_1, window_bounds = array<i64: 128, 128>}, {transform_indices = @transform_2, window_bounds = array<i64: 1, 128>}, {transform_indices = @transform_3, window_bounds = array<i64: 8, 128>}]} {
    %c0_i32 = arith.constant 0 : i32
    %0 = arith.cmpi eq, %arg2, %c0_i32 : i32
    %1 = arith.extui %0 : i1 to i32
    %c0_i32_0 = arith.constant 0 : i32
    %2 = arith.cmpi ne, %1, %c0_i32_0 : i32
    scf.if %2 {
      %cst_10 = arith.constant 0.000000e+00 : f32
      %12 = vector.broadcast %cst_10 : f32 to vector<8x128xf32>
      %c0_11 = arith.constant 0 : index
      %c0_12 = arith.constant 0 : index
      %13 = vector.load %arg7[%c0_11, %c0_12] : memref<8x128xf32, #tpu.memory_space<vmem>>, vector<8x128xf32>
      tpu.vector_store %arg7[%c0_11, %c0_12], %12 {strides = array<i32>} : memref<8x128xf32, #tpu.memory_space<vmem>>, vector<8x128xf32>,
    } else {
    }
    %c0 = arith.constant 0 : index
    %c0_1 = arith.constant 0 : index
    %3 = vector.load %arg7[%c0, %c0_1] : memref<8x128xf32, #tpu.memory_space<vmem>>, vector<8x128xf32>
    %c0_2 = arith.constant 0 : index
    %c0_3 = arith.constant 0 : index
    %4 = vector.load %arg3[%c0_2, %c0_3] : memref<8x128xf32, #tpu.memory_space<vmem>>, vector<8x128xf32>
    %c0_4 = arith.constant 0 : index
    %c0_5 = arith.constant 0 : index
    %5 = vector.load %arg4[%c0_4, %c0_5] : memref<128x128xf32, #tpu.memory_space<vmem>>, vector<128x128xf32>
    %cst = arith.constant dense<0.000000e+00> : vector<8x128xf32>
    %6 = tpu.matmul %4, %5, %cst {dimension_numbers = #tpu.dot_dimension_numbers<[1], [0], [0], [1], [0, 0, 1, 1], [], []>, precision = #tpu.contract_precision<fp32>} : vector<8x128xf32>, vector<128x128xf32>, vector<8x128xf32> -> vector<8x128xf32>
    %7 = arith.addf %3, %6 : vector<8x128xf32>
    %c0_6 = arith.constant 0 : index
    %c0_7 = arith.constant 0 : index
    %8 = vector.load %arg7[%c0_6, %c0_7] : memref<8x128xf32, #tpu.memory_space<vmem>>, vector<8x128xf32>
    tpu.vector_store %arg7[%c0_6, %c0_7], %7 {strides = array<i32>} : memref<8x128xf32, #tpu.memory_space<vmem>>, vector<8x128xf32>,
    %c0_i32_8 = arith.constant 0 : i32
    %9 = arith.cmpi eq, %arg2, %c0_i32_8 : i32
    %10 = arith.extui %9 : i1 to i32
    %c0_i32_9 = arith.constant 0 : i32
    %11 = arith.cmpi ne, %10, %c0_i32_9 : i32
    scf.if %11 {
      %c0_10 = arith.constant 0 : index
      %c0_11 = arith.constant 0 : index
      %12 = vector.load %arg7[%c0_10, %c0_11] : memref<8x128xf32, #tpu.memory_space<vmem>>, vector<8x128xf32>
      %c0_12 = arith.constant 0 : index
      %c0_13 = arith.constant 0 : index
      %13 = vector.load %arg5[%c0_12, %c0_13] : memref<1x128xf32, #tpu.memory_space<vmem>>, vector<1x128xf32>
      %14 = vector.broadcast %13 : vector<1x128xf32> to vector<8x128xf32>
      %15 = arith.addf %12, %14 : vector<8x128xf32>
      %cst_14 = arith.constant 0.000000e+00 : f32
      %16 = vector.broadcast %cst_14 : f32 to vector<8x128xf32>
      %17 = arith.maximumf %15, %16 : vector<8x128xf32>
      %c0_15 = arith.constant 0 : index
      %c0_16 = arith.constant 0 : index
      %18 = vector.load %arg6[%c0_15, %c0_16] : memref<8x128xf32, #tpu.memory_space<vmem>>, vector<8x128xf32>
      tpu.vector_store %arg6[%c0_15, %c0_16], %17 {strides = array<i32>} : memref<8x128xf32, #tpu.memory_space<vmem>>, vector<8x128xf32>,
    } else {
    }
    return
  }
  func.func @transform_0(%arg0: i32, %arg1: i32, %arg2: i32) -> (i32, i32) {
    %c0_i32 = arith.constant 0 : i32
    return %arg0, %arg2 : i32, i32
  }
  func.func @transform_1(%arg0: i32, %arg1: i32, %arg2: i32) -> (i32, i32) {
    %c0_i32 = arith.constant 0 : i32
    return %arg2, %arg1 : i32, i32
  }
  func.func @transform_2(%arg0: i32, %arg1: i32, %arg2: i32) -> (i32, i32) {
    %c0_i32 = arith.constant 0 : i32
    %c0_i32_0 = arith.constant 0 : i32
    return %c0_i32, %arg1 : i32, i32
  }
  func.func @transform_3(%arg0: i32, %arg1: i32, %arg2: i32) -> (i32, i32) {
    %c0_i32 = arith.constant 0 : i32
    return %arg0, %arg1 : i32, i32
  }
}

</mosaic_0001>

<bundles_post_ra>
// kernel: fastrcnn_conv_fc_head.6
= control target key start
LH: loop header
LB: loop body
LE: loop exit
PB: predicated region body
PF: predicated region fallthrough
CT: control target
= control target key end

     0   :  { %s3068_s12 = smov 0   ;;  %s3070_s13 = smov 0   ;;  %s4054_s0 = inlined_call_operand.vmem [shape: f32[8,1024], index: 0, kind: input, shape index: {}]   ;;  %s4055_s1 = inlined_call_operand.vmem [shape: f32[1024,128], index: 1, kind: input, shape index: {}]   ;;  %s4056_s2 = inlined_call_operand.vmem [shape: f32[1,128], index: 2, kind: input, shape index: {}]   ;;  %s4057_s3 = inlined_call_operand.vmem [shape: f32[8,128], index: 3, kind: output, shape index: {}]  }
   0x1   :  { %s3072_s14 = smov 0  }
   0x2 LB: > { %s25_s15 = sadd.s32 1, %s3041_s13  ;;  %p2183_p0 = scmp.ge.s32.totalorder %s3045_s14, 1  ;;  %s3045_s14 = sphi %s3072_s14, %s13_s14   ;;  %s3041_s13 = sphi %s3070_s13, %s4263_s13   ;;  %s3037_s12 = sphi %s3068_s12, %s4262_s12  }
   0x3   : > { %p26_p1 = scmp.ge.s32.totalorder %s25_s15, 2  ;;  %p189_p2 = scmp.lt.s32.totalorder %s3045_s14, 3 }
   0x5   : > { %s4265_s15 = smov (%p26_p1, %s25_s15), 0  ;;  %p190_p3 = pnand %p2183_p0, %p189_p2 }
   0x7   : > { %193 = sbr.rel (%p190_p3) target bundleno = 480 (0x1e0), region = 32 }
   0xe   : > { %s2184_s16 = sshll.u32 %s3037_s12, 2  ;;  %s2186_s17 = sshll.u32 %s3037_s12, 6 }
   0xf   : > { %p233_p4 = scmp.lt.s32.totalorder %s2184_s16, 7  ;;  %p241_p5 = scmp.lt.s32.totalorder %s2186_s17, 127 }
  0x10   : > { %p2188_p6 = scmp.ne.s32.totalorder %s3037_s12, 0 }
  0x11   : > { %s4267_s16 = smov (!%p233_p4, %s2184_s16), 7  ;;  %s4269_s17 = smov (!%p241_p5, %s2186_s17), 127 }
  0x12   : > { %s2185_s18 = sshll.u32 %s4267_s16, 3  ;;  %s2187_s22 = sshll.u32 %s4269_s17, 3  ;;  %v3047_v0 = vmov (!%p2188_p6), 0.0  }
  0x13   : > { %s3093_s21 = scalar_lea.vmem %s4054_s0, %s2185_s18  ;;  %s3098_s25 = scalar_lea.vmem %s4055_s1, %s2187_s22  ;;  %263 = vst [vmem:[#allocation2] sm:$0xff] (!%p2188_p6), %v3047_v0 }
  0x14   : > { %262 = sbr.rel (%p2188_p6) target bundleno = 27 (0x1b), region = 36 }
  0x1b PF: > { %v285_v1 = vld [vmem:[%s3098_s25 + $0x80] sm:$0xff]  ;;  %v286_v2 = vld [vmem:[%s3098_s25 + $0x88] sm:$0xff]  ;;  %v287_v8 = vld [vmem:[%s3098_s25 + $0x90] sm:$0xff]  ;;  %p2189_p7 = scmp.ne.s32.totalorder %s3037_s12, 1 }
  0x1c   : > { %v269_v3 = vld [vmem:[%s3098_s25] sm:$0xff]  ;;  %v382_v4 = vand.u32 4294901760, %v285_v1  ;;  %v385_v5 = vand.u32 4294901760, %v286_v2  ;;  %v270_v6 = vld [vmem:[%s3098_s25 + $0x8] sm:$0xff]  ;;  %v288_v9 = vld [vmem:[%s3098_s25 + $0x98] sm:$0xff]  ;;  %v388_v11 = vand.u32 4294901760, %v287_v8 }
  0x1d   : > { %v334_v7 = vand.u32 4294901760, %v269_v3  ;;  %v337_v10 = vand.u32 4294901760, %v270_v6  ;;  %v391_v12 = vand.u32 4294901760, %v288_v9  ;;  %v271_v13 = vld [vmem:[%s3098_s25 + $0x10] sm:$0xff]  ;;  %v272_v14 = vld [vmem:[%s3098_s25 + $0x18] sm:$0xff]  ;;  %v289_v19 = vld [vmem:[%s3098_s25 + $0xa0] sm:$0xff] }
  0x1e   : > { %v3109_v15 = vpack.c.bf16 %v385_v5, %v382_v4  ;;  %v340_v17 = vand.u32 4294901760, %v271_v13  ;;  %v343_v18 = vand.u32 4294901760, %v272_v14  ;;  %v290_v20 = vld [vmem:[%s3098_s25 + $0xa8] sm:$0xff]  ;;  %v273_v24 = vld [vmem:[%s3098_s25 + $0x20] sm:$0xff]  ;;  %v3124_v26 = vsub.f32 %v287_v8, %v388_v11  ;;  %v291_v38 = vld [vmem:[%s3098_s25 + $0xb0] sm:$0xff] }
  0x1f   : > { %v3111_v16 = vsub.f32 %v269_v3, %v334_v7  ;;  %v3115_v21 = vpack.c.bf16 %v337_v10, %v334_v7  ;;  %v3117_v22 = vsub.f32 %v270_v6, %v337_v10  ;;  %v3119_v23 = vpack.c.bf16 %v391_v12, %v388_v11  ;;  %v274_v25 = vld [vmem:[%s3098_s25 + $0x28] sm:$0xff]  ;;  %v292_v43 = vld [vmem:[%s3098_s25 + $0xb8] sm:$0xff]  ;;  %v275_v56 = vld [vmem:[%s3098_s25 + $0x30] sm:$0xff] }
  0x20   : > { %2615 = vmatprep.subr.bf16.mxu0 %v3109_v15  ;;  %v3126_v27 = vsub.f32 %v288_v9, %v391_v12  ;;  %v3128_v28 = vpack.c.bf16 %v343_v18, %v340_v17  ;;  %v3130_v29 = vsub.f32 %v271_v13, %v340_v17  ;;  %v394_v30 = vand.u32 4294901760, %v289_v19  ;;  %v276_v57 = vld [vmem:[%s3098_s25 + $0x38] sm:$0xff]  ;;  %v293_v6 = vld [vmem:[%s3098_s25 + $0xc0] sm:$0xff]  ;;  %v294_v7 = vld [vmem:[%s3098_s25 + $0xc8] sm:$0xff] }
  0x21   : > { %2617 = vmatpush3.bf16.msra.mxu0 %v3115_v21  ;;  %v397_v31 = vand.u32 4294901760, %v290_v20  ;;  %v3133_v32 = vsub.f32 %v285_v1, %v382_v4  ;;  %v3135_v33 = vsub.f32 %v286_v2, %v385_v5  ;;  %v346_v34 = vand.u32 4294901760, %v273_v24  ;;  %v277_v12 = vld [vmem:[%s3098_s25 + $0x40] sm:$0xff] }
  0x22   : > { %2619 = vmatprep.subr.bf16.mxu0 %v3119_v23  ;;  %v349_v35 = vand.u32 4294901760, %v274_v25  ;;  %v4074_v36 = vand.u32 4294901760, %v3111_v16  ;;  %v4072_v37 = vand.u32 4294901760, %v3117_v22  ;;  %v3141_v39 = vsub.f32 %v272_v14, %v343_v18 }
  0x23   : > { %v3143_v40 = vpack.c.bf16 %v397_v31, %v394_v30  ;;  %v3145_v41 = vsub.f32 %v289_v19, %v394_v30  ;;  %v4077_v42 = vand.u32 4294901760, %v3133_v32  ;;  %v3149_v44 = vsub.f32 %v290_v20, %v397_v31  ;;  %v278_v30 = vld [vmem:[%s3098_s25 + $0x48] sm:$0xff] }
  0x24   : > { %v4076_v45 = vand.u32 4294901760, %v3135_v33  ;;  %v3152_v46 = vpack.c.bf16 %v349_v35, %v346_v34  ;;  %v3154_v47 = vsub.f32 %v273_v24, %v346_v34  ;;  %v449_v49 = vsub.f32 %v3111_v16, %v4074_v36 }
  0x25   : > { %2621 = vmatpush3.bf16.msra.mxu0 %v3128_v28  ;;  %v561_v48 = vsub.f32 %v3133_v32, %v4077_v42  ;;  %v456_v50 = vsub.f32 %v3117_v22, %v4072_v37  ;;  %v400_v51 = vand.u32 4294901760, %v291_v38  ;;  %v403_v53 = vand.u32 4294901760, %v292_v43  ;;  %v266_v42 = vld [vmem:[%s3093_s21 + $0x8] sm:$0xff] }
  0x26   : > { %2623 = vmatprep.subr.bf16.mxu0 %v3143_v40  ;;  %v568_v52 = vsub.f32 %v3135_v33, %v4076_v45  ;;  %v4070_v54 = vand.u32 4294901760, %v3124_v26  ;;  %v4069_v55 = vand.u32 4294901760, %v3126_v27  ;;  %v3174_v59 = vsub.f32 %v274_v25, %v349_v35 }
  0x27   : > { %v562_v58 = vand.u32 4294901760, %v561_v48  ;;  %v450_v60 = vand.u32 4294901760, %v449_v49  ;;  %v457_v61 = vand.u32 4294901760, %v456_v50  ;;  %v3176_v63 = vpack.c.bf16 %v403_v53, %v400_v51 }
  0x28   : > { %v569_v62 = vand.u32 4294901760, %v568_v52  ;;  %v3178_v0 = vsub.f32 %v291_v38, %v400_v51  ;;  %v575_v1 = vsub.f32 %v3124_v26, %v4070_v54  ;;  %v582_v3 = vsub.f32 %v3126_v27, %v4069_v55 }
  0x29   : > { %2625 = vmatpush3.bf16.msra.mxu0 %v3152_v46  ;;  %v2648_v2 = vpack.c.bf16 %v457_v61, %v450_v60  ;;  %v352_v4 = vand.u32 4294901760, %v275_v56  ;;  %v355_v5 = vand.u32 4294901760, %v276_v57  ;;  %v4067_v10 = vand.u32 4294901760, %v3130_v29 }
  0x2a   : > { %v2646_v8 = vpack.c.bf16 %v569_v62, %v562_v58  ;;  %2627 = vmatprep.subr.bf16.mxu0 %v3176_v63  ;;  %v576_v9 = vand.u32 4294901760, %v575_v1  ;;  %v4066_v11 = vand.u32 4294901760, %v3141_v39  ;;  %v3193_v13 = vsub.f32 %v292_v43, %v403_v53  ;;  %v295_v58 = vld [vmem:[%s3098_s25 + $0xd0] sm:$0xff] }
  0x2b   : > { %v583_v14 = vand.u32 4294901760, %v582_v3  ;;  %v3195_v17 = vpack.c.bf16 %v355_v5, %v352_v4  ;;  %v3197_v18 = vsub.f32 %v275_v56, %v352_v4  ;;  %v463_v19 = vsub.f32 %v3130_v29, %v4067_v10  ;;  %v299_v10 = vld [vmem:[%s3098_s25 + $0xf0] sm:$0xff] }
  0x2c   : > { %2647 = vmatprep.subr.bf16.mxu1 %v2646_v8  ;;  %v470_v20 = vsub.f32 %v3141_v39, %v4066_v11  ;;  %v406_v24 = vand.u32 4294901760, %v293_v6  ;;  %v409_v25 = vand.u32 4294901760, %v294_v7  ;;  %v4064_v34 = vand.u32 4294901760, %v3145_v41 }
  0x2d   : > { %2649 = vmatpush3.bf16.msra.mxu1 %v2648_v2  ;;  %v2650_v31 = vpack.c.bf16 %v583_v14, %v576_v9  ;;  %2629 = vmatpush3.bf16.msra.mxu0 %v3195_v17  ;;  %v4063_v35 = vand.u32 4294901760, %v3149_v44  ;;  %v358_v38 = vand.u32 4294901760, %v277_v12  ;;  %v3209_v43 = vsub.f32 %v276_v57, %v355_v5  ;;  %v296_v57 = vld [vmem:[%s3098_s25 + $0xd8] sm:$0xff]  ;;  %v279_v2 = vld [vmem:[%s3098_s25 + $0x50] sm:$0xff] }
  0x2e   : > { %v464_v48 = vand.u32 4294901760, %v463_v19  ;;  %v471_v49 = vand.u32 4294901760, %v470_v20  ;;  %v3211_v50 = vpack.c.bf16 %v409_v25, %v406_v24  ;;  %v3213_v51 = vsub.f32 %v293_v6, %v406_v24  ;;  %v280_v19 = vld [vmem:[%s3098_s25 + $0x58] sm:$0xff] }
  0x2f   : > { %2651 = vmatprep.subr.bf16.mxu1 %v2650_v31  ;;  %v589_v52 = vsub.f32 %v3145_v41, %v4064_v34  ;;  %v596_v53 = vsub.f32 %v3149_v44, %v4063_v35  ;;  %v361_v56 = vand.u32 4294901760, %v278_v30  ;;  %v3224_v61 = vsub.f32 %v294_v7, %v409_v25 }
  0x30   : > { %v2652_v60 = vpack.c.bf16 %v471_v49, %v464_v48  ;;  %2631 = vmatprep.subr.bf16.mxu0 %v3211_v50  ;;  %v4060_v62 = vand.u32 4294901760, %v3154_v47  ;;  %v4059_v1 = vand.u32 4294901760, %v3174_v59  ;;  %v3231_v6 = vsub.f32 %v277_v12, %v358_v38 }
  0x31   : > { %v590_v3 = vand.u32 4294901760, %v589_v52  ;;  %v597_v4 = vand.u32 4294901760, %v596_v53  ;;  %v3229_v5 = vpack.c.bf16 %v361_v56, %v358_v38  ;;  %v412_v9 = vand.u32 4294901760, %v295_v58 }
  0x32   : > { %2653 = vmatpush3.bf16.msra.mxu1 %v2652_v60  ;;  %v477_v8 = vsub.f32 %v3154_v47, %v4060_v62  ;;  %v484_v7 = vsub.f32 %v3174_v59, %v4059_v1  ;;  %v415_v14 = vand.u32 4294901760, %v296_v57  ;;  %v4058_v12 = vand.u32 4294901760, %v3178_v0 }
  0x33   : > { %v2654_v20 = vpack.c.bf16 %v597_v4, %v590_v3  ;;  %2633 = vmatpush3.bf16.msra.mxu0 %v3229_v5  ;;  %v4061_v24 = vand.u32 4294901760, %v3193_v13  ;;  %v364_v25 = vand.u32 4294901760, %v279_v2  ;;  %v3243_v31 = vsub.f32 %v278_v30, %v361_v56  ;;  %v297_v4 = vld [vmem:[%s3098_s25 + $0xe0] sm:$0xff]  ;;  %v298_v30 = vld [vmem:[%s3098_s25 + $0xe8] sm:$0xff] }
  0x34   : > { %v478_v38 = vand.u32 4294901760, %v477_v8  ;;  %v485_v48 = vand.u32 4294901760, %v484_v7  ;;  %v3245_v49 = vpack.c.bf16 %v415_v14, %v412_v9  ;;  %v3247_v52 = vsub.f32 %v295_v58, %v412_v9  ;;  %v281_v9 = vld [vmem:[%s3098_s25 + $0x60] sm:$0xff] }
  0x35   : > { %2655 = vmatprep.subr.bf16.mxu1 %v2654_v20  ;;  %v603_v53 = vsub.f32 %v3178_v0, %v4058_v12  ;;  %v610_v60 = vsub.f32 %v3193_v13, %v4061_v24  ;;  %v367_v3 = vand.u32 4294901760, %v280_v19  ;;  %v3258_v8 = vsub.f32 %v296_v57, %v415_v14  ;;  %v282_v24 = vld [vmem:[%s3098_s25 + $0x68] sm:$0xff] }
  0x36   : > { %v2656_v56 = vpack.c.bf16 %v485_v48, %v478_v38  ;;  %2635 = vmatprep.subr.bf16.mxu0 %v3245_v49  ;;  %v4062_v58 = vand.u32 4294901760, %v3197_v18  ;;  %v4065_v7 = vand.u32 4294901760, %v3209_v43  ;;  %v3265_v62 = vsub.f32 %v279_v2, %v364_v25 }
  0x37   : > { %v604_v20 = vand.u32 4294901760, %v603_v53  ;;  %v611_v12 = vand.u32 4294901760, %v610_v60  ;;  %v3263_v1 = vpack.c.bf16 %v367_v3, %v364_v25  ;;  %v418_v14 = vand.u32 4294901760, %v297_v4 }
  0x38   : > { %2657 = vmatpush3.bf16.msra.mxu1 %v2656_v56  ;;  %v491_v38 = vsub.f32 %v3197_v18, %v4062_v58  ;;  %v498_v57 = vsub.f32 %v3209_v43, %v4065_v7  ;;  %v421_v48 = vand.u32 4294901760, %v298_v30  ;;  %v4068_v2 = vand.u32 4294901760, %v3213_v51 }
  0x39   : > { %4149 = vst [vmem:[#allocation3_spill] sm:$0xff] %v3263_v1  ;;  %v2658_v53 = vpack.c.bf16 %v611_v12, %v604_v20  ;;  %2637 = vmatpush3.bf16.msra.mxu0 %v3263_v1  ;;  %v4071_v25 = vand.u32 4294901760, %v3224_v61  ;;  %v370_v60 = vand.u32 4294901760, %v281_v9  ;;  %v3277_v56 = vsub.f32 %v280_v19, %v367_v3  ;;  %v300_v19 = vld [vmem:[%s3098_s25 + $0xf8] sm:$0xff] }
  0x3a   : > { %v492_v58 = vand.u32 4294901760, %v491_v38  ;;  %v499_v35 = vand.u32 4294901760, %v498_v57  ;;  %v3279_v34 = vpack.c.bf16 %v421_v48, %v418_v14  ;;  %v3281_v7 = vsub.f32 %v297_v4, %v418_v14  ;;  %v283_v14 = vld [vmem:[%s3098_s25 + $0x70] sm:$0xff] }
  0x3b   : > { %2659 = vmatprep.subr.bf16.mxu1 %v2658_v53  ;;  %v617_v12 = vsub.f32 %v3213_v51, %v4068_v2  ;;  %v624_v20 = vsub.f32 %v3224_v61, %v4071_v25  ;;  %v373_v11 = vand.u32 4294901760, %v282_v24  ;;  %v3292_v38 = vsub.f32 %v298_v30, %v421_v48  ;;  %v284_v25 = vld [vmem:[%s3098_s25 + $0x78] sm:$0xff] }
  0x3c   : > { %4150 = vst [vmem:[#allocation4_spill] sm:$0xff] %v3279_v34  ;;  %v2660_v3 = vpack.c.bf16 %v499_v35, %v492_v58  ;;  %2639 = vmatprep.subr.bf16.mxu0 %v3279_v34  ;;  %v4073_v4 = vand.u32 4294901760, %v3231_v6  ;;  %v4075_v57 = vand.u32 4294901760, %v3243_v31  ;;  %v3299_v54 = vsub.f32 %v281_v9, %v370_v60 }
  0x3d   : > { %v618_v53 = vand.u32 4294901760, %v617_v12  ;;  %v625_v2 = vand.u32 4294901760, %v624_v20  ;;  %v3297_v55 = vpack.c.bf16 %v373_v11, %v370_v60  ;;  %v424_v58 = vand.u32 4294901760, %v299_v10 }
  0x3e   : > { %2661 = vmatpush3.bf16.msra.mxu1 %v2660_v3  ;;  %v505_v35 = vsub.f32 %v3231_v6, %v4073_v4  ;;  %v512_v30 = vsub.f32 %v3243_v31, %v4075_v57  ;;  %v427_v48 = vand.u32 4294901760, %v300_v19  ;;  %v4080_v12 = vand.u32 4294901760, %v3247_v52 }
  0x3f   : > { %4151 = vst [vmem:[#allocation5_spill] sm:$0xff] %v3297_v55  ;;  %v2662_v37 = vpack.c.bf16 %v625_v2, %v618_v53  ;;  %2641 = vmatpush3.bf16.msra.mxu0 %v3297_v55  ;;  %v4081_v9 = vand.u32 4294901760, %v3258_v8  ;;  %v376_v60 = vand.u32 4294901760, %v283_v14  ;;  %v3311_v20 = vsub.f32 %v282_v24, %v373_v11 }
  0x40   : > { %v506_v3 = vand.u32 4294901760, %v505_v35  ;;  %v513_v4 = vand.u32 4294901760, %v512_v30  ;;  %v3313_v36 = vpack.c.bf16 %v427_v48, %v424_v58  ;;  %v3315_v57 = vsub.f32 %v299_v10, %v424_v58  ;;  %v265_v10 = vld [vmem:[%s3093_s21] sm:$0xff] }
  0x41   : > { %2663 = vmatprep.subr.bf16.mxu1 %v2662_v37  ;;  %v631_v2 = vsub.f32 %v3247_v52, %v4080_v12  ;;  %v638_v53 = vsub.f32 %v3258_v8, %v4081_v9  ;;  %v379_v45 = vand.u32 4294901760, %v284_v25  ;;  %v3325_v11 = vsub.f32 %v300_v19, %v427_v48 }
  0x42   : > { %4152 = vst [vmem:[#allocation6_spill] sm:$0xff] %v3313_v36  ;;  %v2664_v55 = vpack.c.bf16 %v513_v4, %v506_v3  ;;  %2643 = vmatprep.subr.bf16.mxu0 %v3313_v36  ;;  %v4082_v24 = vand.u32 4294901760, %v3265_v62  ;;  %v4083_v37 = vand.u32 4294901760, %v3277_v56  ;;  %v3332_v12 = vsub.f32 %v283_v14, %v376_v60 }
  0x43   : > { %v632_v35 = vand.u32 4294901760, %v631_v2  ;;  %v639_v30 = vand.u32 4294901760, %v638_v53  ;;  %v3330_v58 = vpack.c.bf16 %v379_v45, %v376_v60  ;;  %v3340_v48 = vand.u32 4294901760, %v266_v42 }
  0x44   : > { %2665 = vmatpush3.bf16.msra.mxu1 %v2664_v55  ;;  %v519_v4 = vsub.f32 %v3265_v62, %v4082_v24  ;;  %v526_v19 = vsub.f32 %v3277_v56, %v4083_v37  ;;  %v4086_v3 = vand.u32 4294901760, %v3281_v7  ;;  %v4092_v2 = vand.u32 4294901760, %v3292_v38 }
  0x45   : > { %4153 = vst [vmem:[#allocation7_spill] sm:$0xff] %v3330_v58  ;;  %4154 = vst [vmem:[#allocation8_spill] sm:$0xff] %v3340_v48  ;;  %v2666_v9 = vpack.c.bf16 %v639_v30, %v632_v35  ;;  %2645 = vmatpush3.bf16.msra.mxu0 %v3330_v58  ;;  %v2678_v55 = vpack.c.bf16 %v3135_v33, %v3133_v32  ;;  %v3347_v14 = vand.u32 4294901760, %v265_v10  ;;  %670 = vmatprep.mubr.f32.mxu1 %v3340_v48 }
  0x46   : > { %v520_v60 = vand.u32 4294901760, %v519_v4  ;;  %v527_v53 = vand.u32 4294901760, %v526_v19  ;;  %v3350_v24 = vsub.f32 %v266_v42, %v3340_v48  ;;  %v645_v37 = vsub.f32 %v3281_v7, %v4086_v3 }
  0x47   : > { %2667 = vmatprep.subr.bf16.mxu1 %v2666_v9  ;;  %v652_v35 = vsub.f32 %v3292_v38, %v4092_v2  ;;  %2679 = vmatprep.subr.bf16.mxu0 %v2678_v55  ;;  %v3360_v30 = vsub.f32 %v265_v10, %v3347_v14  ;;  %v4091_v4 = vand.u32 4294901760, %v3299_v54  ;;  %v4093_v42 = vand.u32 4294901760, %v3311_v20 }
  0x48   : > { %v3364_v19 = vsub.f32 %v284_v25, %v379_v45  ;;  %v2668_v58 = vpack.c.bf16 %v527_v53, %v520_v60  ;;  %v4094_v3 = vand.u32 4294901760, %v3350_v24  ;;  %v646_v36 = vand.u32 4294901760, %v645_v37 }
  0x49   : > { %v653_v48 = vand.u32 4294901760, %v652_v35  ;;  %v437_v9 = vand.u32 4294901760, %v3360_v30  ;;  %v533_v55 = vsub.f32 %v3299_v54, %v4091_v4  ;;  %v540_v10 = vsub.f32 %v3311_v20, %v4093_v42 }
  0x4a   : > { %2669 = vmatpush3.bf16.msra.mxu1 %v2668_v58  ;;  %v432_v45 = vsub.f32 %v3350_v24, %v4094_v3  ;;  %v2680_v25 = vpack.c.bf16 %v3117_v22, %v3111_v16  ;;  %v4099_v37 = vand.u32 4294901760, %v3315_v57  ;;  %v4102_v60 = vand.u32 4294901760, %v3325_v11 }
  0x4b   : > { %v2670_v53 = vpack.c.bf16 %v653_v48, %v646_v36  ;;  %v438_v35 = vsub.f32 %v3360_v30, %v437_v9  ;;  %v534_v4 = vand.u32 4294901760, %v533_v55  ;;  %v541_v2 = vand.u32 4294901760, %v540_v10 }
  0x4c   : > { %v433_v42 = vand.u32 4294901760, %v432_v45  ;;  %v659_v58 = vsub.f32 %v3315_v57, %v4099_v37  ;;  %v666_v3 = vsub.f32 %v3325_v11, %v4102_v60  ;;  %v4101_v34 = vand.u32 4294901760, %v3332_v12 }
  0x4d   : > { %2671 = vmatprep.subr.bf16.mxu1 %v2670_v53  ;;  %v439_v1 = vand.u32 4294901760, %v438_v35  ;;  %v2672_v36 = vpack.c.bf16 %v541_v2, %v534_v4  ;;  %v2682_v48 = vpack.c.bf16 %v3126_v27, %v3124_v26  ;;  %v4100_v55 = vand.u32 4294901760, %v3364_v19 }
  0x4e   : > { %434 = vmatprep.mubr.f32.mxu0 %v433_v42  ;;  %v660_v10 = vand.u32 4294901760, %v659_v58  ;;  %v667_v45 = vand.u32 4294901760, %v666_v3  ;;  %v547_v37 = vsub.f32 %v3332_v12, %v4101_v34  ;;  %v2684_v35 = vpack.c.bf16 %v3141_v39, %v3130_v29 }
  0x4f   : > { %440 = vmatmul.mubr.f32.vlgmr.msra.gmra.mrb[0].mxu0 %v439_v1  ;;  %2673 = vmatpush3.bf16.msra.mxu1 %v2672_v36  ;;  %v554_v53 = vsub.f32 %v3364_v19, %v4100_v55  ;;  %v2686_v42 = vpack.c.bf16 %v3149_v44, %v3145_v41  ;;  %v2688_v1 = vpack.c.bf16 %v3174_v59, %v3154_v47  ;;  %v4156_v36 = vand.u32 4294901760, %v3135_v33 }
  0x50   : > { %2681 = vmatpush3.bf16.msra.mxu0 %v2680_v25  ;;  %v2674_v2 = vpack.c.bf16 %v667_v45, %v660_v10  ;;  %v548_v4 = vand.u32 4294901760, %v547_v37  ;;  %807 = vmatprep.mubr.f32.mxu0 %v3350_v24  ;;  %v2690_v58 = vpack.c.bf16 %v3193_v13, %v3178_v0  ;;  %v4155_v37 = vand.u32 4294901760, %v3133_v32 }
  0x51   : > { %2683 = vmatprep.subr.bf16.mxu0 %v2682_v48  ;;  %v555_v3 = vand.u32 4294901760, %v554_v53  ;;  %v4157_v45 = vand.u32 4294901760, %v3111_v16  ;;  %v4158_v48 = vand.u32 4294901760, %v3117_v22  ;;  %v4159_v55 = vand.u32 4294901760, %v3124_v26 }
  0x52   : > { %2675 = vmatprep.subr.bf16.mxu1 %v2674_v2  ;;  %v2742_v10 = vpack.c.bf16 %v4156_v36, %v4155_v37  ;;  %v4160_v2 = vand.u32 4294901760, %v3126_v27  ;;  %v4161_v60 = vand.u32 4294901760, %v3130_v29  ;;  %v4163_v32 = vand.u32 4294901760, %v3145_v41 }
  0x53   : > { %v2676_v25 = vpack.c.bf16 %v555_v3, %v548_v4  ;;  %v2744_v53 = vpack.c.bf16 %v4158_v48, %v4157_v45  ;;  %v4162_v4 = vand.u32 4294901760, %v3141_v39  ;;  %v4164_v33 = vand.u32 4294901760, %v3149_v44  ;;  %v4178_v48 = vld [vmem:[#allocation8_spill] sm:$0xff] }
  0x54   : > { %v2746_v34 = vpack.c.bf16 %v4160_v2, %v4159_v55  ;;  %2685 = vmatpush3.bf16.msra.mxu0 %v2684_v35  ;;  %v4165_v16 = vand.u32 4294901760, %v3154_v47  ;;  %v4166_v22 = vand.u32 4294901760, %v3174_v59  ;;  %v4167_v26 = vand.u32 4294901760, %v3178_v0  ;;  %v318_v2 = vld [vmem:[%s3098_s25 + $0x188] sm:$0xff] }
  0x55   : > { %v2748_v3 = vpack.c.bf16 %v4162_v4, %v4161_v60  ;;  %v2750_v37 = vpack.c.bf16 %v4164_v33, %v4163_v32  ;;  %v4168_v27 = vand.u32 4294901760, %v3193_v13  ;;  %2677 = vmatpush3.bf16.msra.mxu1 %v2676_v25  ;;  %2687 = vmatprep.subr.bf16.mxu0 %v2686_v42  ;;  %v4169_v29 = vand.u32 4294901760, %v3197_v18  ;;  %v301_v4 = vld [vmem:[%s3098_s25 + $0x100] sm:$0xff]  ;;  %v302_v32 = vld [vmem:[%s3098_s25 + $0x108] sm:$0xff]  ;;  %v4179_v33 = vld [vmem:[#allocation5_spill] sm:$0xff] }
  0x56   : > { %v3433_v36 = vpack.c.bf16 %v4166_v22, %v4165_v16  ;;  %v4170_v39 = vand.u32 4294901760, %v3209_v43  ;;  %v4171_v44 = vand.u32 4294901760, %v3213_v51  ;;  %v4172_v47 = vand.u32 4294901760, %v3224_v61  ;;  %2711 = vmatprep.subr.bf16.mxu1 %v3109_v15  ;;  %v4180_v16 = vld [vmem:[#allocation6_spill] sm:$0xff] }
  0x57   : > { %v3439_v55 = vpack.c.bf16 %v4168_v27, %v4167_v26  ;;  %v4173_v0 = vand.u32 4294901760, %v3231_v6  ;;  %v4174_v13 = vand.u32 4294901760, %v3243_v31  ;;  %v2692_v35 = vpack.c.bf16 %v3209_v43, %v3197_v18 }
  0x58   : > { %v3445_v41 = vpack.c.bf16 %v4170_v39, %v4169_v29  ;;  %v3451_v59 = vpack.c.bf16 %v4172_v47, %v4171_v44  ;;  %672 = vmatmul.mubr.f32.vlgmr.msra.gmra.mrb[0].mxu1 %v3347_v14  ;;  %2689 = vmatpush3.bf16.msra.mxu0 %v2688_v1  ;;  %v2694_v42 = vpack.c.bf16 %v3224_v61, %v3213_v51  ;;  %v4175_v25 = vand.u32 4294901760, %v3350_v24  ;;  %v4176_v24 = vld [vmem:[#allocation3_spill] sm:$0xff]  ;;  %v4177_v1 = vld [vmem:[#allocation4_spill] sm:$0xff]  ;;  %v320_v39 = vld [vmem:[%s3098_s25 + $0x198] sm:$0xff] }
  0x59   : > { %v3457_v60 = vpack.c.bf16 %v4174_v13, %v4173_v0  ;;  %2713 = vmatpush3.bf16.msra.mxu1 %v3115_v21  ;;  %2691 = vmatprep.subr.bf16.mxu0 %v2690_v58  ;;  %v2696_v45 = vpack.c.bf16 %v3243_v31, %v3231_v6  ;;  %v2698_v18 = vpack.c.bf16 %v3258_v8, %v3247_v52  ;;  %v317_v58 = vld [vmem:[%s3098_s25 + $0x180] sm:$0xff]  ;;  %v1247_v22 = vand.u32 4294901760, %v318_v2  ;;  %v4181_v29 = vld [vmem:[#allocation7_spill] sm:$0xff]  ;;  %v303_v47 = vld [vmem:[%s3098_s25 + $0x110] sm:$0xff] }
  0x5a   : > { %2715 = vmatprep.subr.bf16.mxu1 %v3119_v23  ;;  %914 = vmatprep.mubr.f32.mxu1 %v4175_v25  ;;  %v2700_v43 = vpack.c.bf16 %v3277_v56, %v3265_v62  ;;  %v2702_v51 = vpack.c.bf16 %v3292_v38, %v3281_v7  ;;  %v2704_v61 = vpack.c.bf16 %v3311_v20, %v3299_v54  ;;  %v1196_v26 = vand.u32 4294901760, %v301_v4  ;;  %v304_v0 = vld [vmem:[%s3098_s25 + $0x118] sm:$0xff] }
  0x5b   : > { %v2706_v6 = vpack.c.bf16 %v3325_v11, %v3315_v57  ;;  %v2708_v31 = vpack.c.bf16 %v3364_v19, %v3332_v12  ;;  %v1199_v27 = vand.u32 4294901760, %v302_v32  ;;  %v1253_v25 = vand.u32 4294901760, %v320_v39 }
  0x5c   : > { %2693 = vmatpush3.bf16.msra.mxu0 %v2692_v35  ;;  %v3511_v13 = vsub.f32 %v301_v4, %v1196_v26  ;;  %v306_v4 = vld [vmem:[%s3098_s25 + $0x128] sm:$0xff] }
  0x5d   : > { %2717 = vmatpush3.bf16.msra.mxu1 %v3128_v28  ;;  %2695 = vmatprep.subr.bf16.mxu0 %v2694_v42  ;;  %v3513_v35 = vsub.f32 %v302_v32, %v1199_v27 }
  0x5e   : > { %2719 = vmatprep.subr.bf16.mxu1 %v3143_v40 }
  0x5f   : > { %v4103_v32 = vand.u32 4294901760, %v3513_v35 }
  0x60   : > { %2697 = vmatpush3.bf16.msra.mxu0 %v2696_v45  ;;  %v4184_v45 = vand.u32 4294901760, %v3265_v62  ;;  %v4189_v62 = vand.u32 4294901760, %v3311_v20 }
  0x61   : > { %2721 = vmatpush3.bf16.msra.mxu1 %v3152_v46  ;;  %2699 = vmatprep.subr.bf16.mxu0 %v2698_v18  ;;  %v4185_v18 = vand.u32 4294901760, %v3277_v56 }
  0x62   : > { %2723 = vmatprep.subr.bf16.mxu1 %v3176_v63 }
  0x64   : > { %2701 = vmatpush3.bf16.msra.mxu0 %v2700_v43  ;;  %v1205_v43 = vand.u32 4294901760, %v304_v0 }
  0x65   : > { %2725 = vmatpush3.bf16.msra.mxu1 %v3195_v17  ;;  %2703 = vmatprep.subr.bf16.mxu0 %v2702_v51  ;;  %v321_v51 = vld [vmem:[%s3098_s25 + $0x1a0] sm:$0xff] }
  0x66   : > { %2727 = vmatprep.subr.bf16.mxu1 %v3211_v50 }
  0x68   : > { %2705 = vmatpush3.bf16.msra.mxu0 %v2704_v61  ;;  %v322_v61 = vld [vmem:[%s3098_s25 + $0x1a8] sm:$0xff] }
  0x69   : > { %2729 = vmatpush3.bf16.msra.mxu1 %v3229_v5  ;;  %2707 = vmatprep.subr.bf16.mxu0 %v2706_v6  ;;  %v4192_v6 = vand.u32 4294901760, %v3332_v12  ;;  %v3566_v12 = vpack.c.bf16 %v1199_v27, %v1196_v26 }
  0x6a   : > { %2731 = vmatprep.subr.bf16.mxu1 %v3245_v49 }
  0x6b   : > { %4194 = vst [vmem:[#allocation3_spill] sm:$0xff] %v3566_v12 }
  0x6c   : > { %2709 = vmatpush3.bf16.msra.mxu0 %v2708_v31  ;;  %v4193_v31 = vand.u32 4294901760, %v3364_v19 }
  0x6d   : > { %2733 = vmatpush3.bf16.msra.mxu1 %v4176_v24  ;;  %2743 = vmatprep.subr.bf16.mxu0 %v2742_v10  ;;  %v1244_v10 = vand.u32 4294901760, %v317_v58 }
  0x6e   : > { %2735 = vmatprep.subr.bf16.mxu1 %v4177_v1 }
  0x6f   : > { %810 = vmatmul.mubr.f32.vlgmr.msra.gmra.mrb[2].mxu0 %v3360_v30  ;;  %v3505_v44 = vsub.f32 %v317_v58, %v1244_v10  ;;  %v2764_v30 = vpack.c.bf16 %v4185_v18, %v4184_v45  ;;  %v3553_v58 = vpack.c.bf16 %v4193_v31, %v4192_v6  ;;  %v3558_v20 = vpack.c.bf16 %v1247_v22, %v1244_v10  ;;  %v323_v18 = vld [vmem:[%s3098_s25 + $0x1b0] sm:$0xff] }
  0x70   : > { %2745 = vmatpush3.bf16.msra.mxu0 %v2744_v53  ;;  %1084 = vmatprep.mubr.f32.mxu0 %v4178_v48  ;;  %v319_v53 = vld [vmem:[%s3098_s25 + $0x190] sm:$0xff] }
  0x71   : > { %2737 = vmatpush3.bf16.msra.mxu1 %v4179_v33  ;;  %2747 = vmatprep.subr.bf16.mxu0 %v2746_v34  ;;  %v3509_v34 = vsub.f32 %v318_v2, %v1247_v22  ;;  %v1250_v42 = vand.u32 4294901760, %v319_v53  ;;  %v3574_v22 = vsub.f32 %v320_v39, %v1253_v25 }
  0x72   : > { %2739 = vmatprep.subr.bf16.mxu1 %v4180_v16 }
  0x73   : > { %v4112_v2 = vand.u32 4294901760, %v3509_v34  ;;  %v3568_v19 = vpack.c.bf16 %v1253_v25, %v1250_v42  ;;  %v3572_v10 = vsub.f32 %v319_v53, %v1250_v42  ;;  %v3588_v53 = vsub.f32 %v304_v0, %v1205_v43 }
  0x74   : > { %2749 = vmatpush3.bf16.msra.mxu0 %v2748_v3  ;;  %v4182_v3 = vand.u32 4294901760, %v3247_v52  ;;  %v4187_v52 = vand.u32 4294901760, %v3292_v38 }
  0x75   : > { %2741 = vmatpush3.bf16.msra.mxu1 %v4181_v29  ;;  %2751 = vmatprep.subr.bf16.mxu0 %v2750_v37  ;;  %4195 = vst [vmem:[#allocation4_spill] sm:$0xff] %v3568_v19  ;;  %v1430_v39 = vsub.f32 %v3509_v34, %v4112_v2 }
  0x76   : > { %2775 = vmatprep.subr.bf16.mxu1 %v3109_v15  ;;  %v4183_v15 = vand.u32 4294901760, %v3258_v8 }
  0x78   : > { %918 = vmatmul.mubr.f32.vlgmr.msra.gmra.mrb[2].mxu1 %v437_v9  ;;  %2753 = vmatpush3.bf16.msra.mxu0 %v3433_v36  ;;  %v2762_v37 = vpack.c.bf16 %v4183_v15, %v4182_v3  ;;  %v4186_v9 = vand.u32 4294901760, %v3281_v7  ;;  %v1202_v36 = vand.u32 4294901760, %v303_v47  ;;  %v4191_v7 = vand.u32 4294901760, %v3325_v11 }
  0x79   : > { %2777 = vmatpush3.bf16.msra.mxu1 %v3115_v21  ;;  %2755 = vmatprep.subr.bf16.mxu0 %v3439_v55  ;;  %v4188_v21 = vand.u32 4294901760, %v3299_v54  ;;  %v4190_v55 = vand.u32 4294901760, %v3315_v57  ;;  %v268_v54 = vld [vmem:[%s3093_s21 + $0x18] sm:$0xff]  ;;  %v305_v57 = vld [vmem:[%s3098_s25 + $0x120] sm:$0xff]  ;;  %v4111_v11 = vand.u32 4294901760, %v3511_v13  ;;  %v1259_v3 = vand.u32 4294901760, %v322_v61 }
  0x7a   : > { %v3532_v8 = vpack.c.bf16 %v4187_v52, %v4186_v9  ;;  %2779 = vmatprep.subr.bf16.mxu1 %v3119_v23  ;;  %1188 = vmatprep.mubr.f32.mxu1 %v4178_v48  ;;  %v4113_v23 = vand.u32 4294901760, %v3505_v44  ;;  %v1256_v48 = vand.u32 4294901760, %v321_v51  ;;  %v3576_v15 = vpack.c.bf16 %v1205_v43, %v1202_v36 }
  0x7b   : > { %v3541_v56 = vpack.c.bf16 %v4189_v62, %v4188_v21  ;;  %v3547_v38 = vpack.c.bf16 %v4191_v7, %v4190_v55  ;;  %v3578_v45 = vand.u32 4294901760, %v268_v54  ;;  %v1208_v27 = vand.u32 4294901760, %v305_v57  ;;  %v308_v62 = vld [vmem:[%s3098_s25 + $0x138] sm:$0xff] }
  0x7c   : > { %2757 = vmatpush3.bf16.msra.mxu0 %v3445_v41  ;;  %4196 = vst [vmem:[#allocation8_spill] sm:$0xff] %v3576_v15  ;;  %v3581_v41 = vsub.f32 %v303_v47, %v1202_v36  ;;  %v1423_v26 = vsub.f32 %v3505_v44, %v4113_v23  ;;  %v1318_v47 = vsub.f32 %v3513_v35, %v4103_v32  ;;  %v1262_v52 = vand.u32 4294901760, %v323_v18  ;;  %v325_v32 = vld [vmem:[%s3098_s25 + $0x1c0] sm:$0xff]  ;;  %v312_v23 = vld [vmem:[%s3098_s25 + $0x158] sm:$0xff] }
  0x7d   : > { %2781 = vmatpush3.bf16.msra.mxu1 %v3128_v28  ;;  %2759 = vmatprep.subr.bf16.mxu0 %v3451_v59  ;;  %4197 = vst [vmem:[#allocation5_spill] sm:$0xff] %v3578_v45  ;;  %v1211_v28 = vand.u32 4294901760, %v306_v4  ;;  %v324_v59 = vld [vmem:[%s3098_s25 + $0x1b8] sm:$0xff]  ;;  %v3600_v42 = vpack.c.bf16 %v1259_v3, %v1256_v48  ;;  %v3602_v25 = vsub.f32 %v321_v51, %v1256_v48  ;;  %v4107_v43 = vand.u32 4294901760, %v3572_v10 }
  0x7e   : > { %2783 = vmatprep.subr.bf16.mxu1 %v3143_v40  ;;  %v1311_v40 = vsub.f32 %v3511_v13, %v4111_v11  ;;  %v3604_v0 = vsub.f32 %v322_v61, %v1259_v3  ;;  %v3607_v9 = vsub.f32 %v268_v54, %v3578_v45  ;;  %v1265_v36 = vand.u32 4294901760, %v324_v59 }
  0x7f   : > { %4198 = vst [vmem:[#allocation6_spill] sm:$0xff] %v3600_v42  ;;  %v4104_v21 = vand.u32 4294901760, %v3574_v22  ;;  %v1424_v51 = vand.u32 4294901760, %v1423_v26  ;;  %v3615_v61 = vpack.c.bf16 %v1211_v28, %v1208_v27  ;;  %v3617_v55 = vsub.f32 %v305_v57, %v1208_v27 }
  0x80   : > { %2761 = vmatpush3.bf16.msra.mxu0 %v3457_v60  ;;  %v307_v60 = vld [vmem:[%s3098_s25 + $0x130] sm:$0xff]  ;;  %v3619_v7 = vsub.f32 %v306_v4, %v1211_v28  ;;  %v1319_v6 = vand.u32 4294901760, %v1318_v47  ;;  %v4106_v31 = vand.u32 4294901760, %v3581_v41  ;;  %v1217_v48 = vand.u32 4294901760, %v308_v62  ;;  %v326_v28 = vld [vmem:[%s3098_s25 + $0x1c8] sm:$0xff] }
  0x81   : > { %2785 = vmatpush3.bf16.msra.mxu1 %v3152_v46  ;;  %2763 = vmatprep.subr.bf16.mxu0 %v2762_v37  ;;  %4199 = vst [vmem:[#allocation7_spill] sm:$0xff] %v3615_v61  ;;  %v1431_v46 = vand.u32 4294901760, %v1430_v39  ;;  %v1312_v37 = vand.u32 4294901760, %v1311_v40  ;;  %v1214_v54 = vand.u32 4294901760, %v307_v60  ;;  %v4105_v3 = vand.u32 4294901760, %v3588_v53 }
  0x82   : > { %2787 = vmatprep.subr.bf16.mxu1 %v3176_v63  ;;  %v4117_v63 = vand.u32 4294901760, %v3607_v9  ;;  %v3627_v57 = vpack.c.bf16 %v1265_v36, %v1262_v52  ;;  %v1437_v4 = vsub.f32 %v3572_v10, %v4107_v43  ;;  %v3636_v26 = vsub.f32 %v323_v18, %v1262_v52 }
  0x83   : > { %v3638_v27 = vsub.f32 %v324_v59, %v1265_v36  ;;  %v3643_v39 = vpack.c.bf16 %v1431_v46, %v1424_v51  ;;  %v3645_v40 = vpack.c.bf16 %v1319_v6, %v1312_v37  ;;  %v1325_v47 = vsub.f32 %v3581_v41, %v4106_v31  ;;  %v309_v46 = vld [vmem:[%s3098_s25 + $0x140] sm:$0xff]  ;;  %v310_v31 = vld [vmem:[%s3098_s25 + $0x148] sm:$0xff] }
  0x84   : > { %2765 = vmatpush3.bf16.msra.mxu0 %v2764_v30  ;;  %4200 = vst [vmem:[#allocation9_spill] sm:$0xff] %v3627_v57  ;;  %v1444_v30 = vsub.f32 %v3574_v22, %v4104_v21  ;;  %v1268_v21 = vand.u32 4294901760, %v325_v32  ;;  %v1332_v18 = vsub.f32 %v3588_v53, %v4105_v3  ;;  %v4110_v59 = vand.u32 4294901760, %v3617_v55 }
  0x85   : > { %2789 = vmatpush3.bf16.msra.mxu1 %v3195_v17  ;;  %2767 = vmatprep.subr.bf16.mxu0 %v3532_v8  ;;  %v4109_v17 = vand.u32 4294901760, %v3602_v25  ;;  %v4108_v8 = vand.u32 4294901760, %v3604_v0  ;;  %v1294_v52 = vsub.f32 %v3607_v9, %v4117_v63  ;;  %v1438_v36 = vand.u32 4294901760, %v1437_v4  ;;  %v329_v63 = vld [vmem:[%s3098_s25 + $0x1e0] sm:$0xff] }
  0x86   : > { %2791 = vmatprep.subr.bf16.mxu1 %v3211_v50  ;;  %v3651_v50 = vpack.c.bf16 %v1217_v48, %v1214_v54  ;;  %v1445_v51 = vand.u32 4294901760, %v1444_v30  ;;  %v4115_v37 = vand.u32 4294901760, %v3619_v7  ;;  %v3665_v6 = vsub.f32 %v307_v60, %v1214_v54 }
  0x87   : > { %v3667_v3 = vsub.f32 %v308_v62, %v1217_v48  ;;  %v1326_v4 = vand.u32 4294901760, %v1325_v47  ;;  %v3675_v30 = vsub.f32 %v325_v32, %v1268_v21  ;;  %v4114_v43 = vand.u32 4294901760, %v3636_v26  ;;  %v327_v48 = vld [vmem:[%s3098_s25 + $0x1d0] sm:$0xff] }
  0x88   : > { %2769 = vmatpush3.bf16.msra.mxu0 %v3541_v56  ;;  %4201 = vst [vmem:[#allocation10_spill] sm:$0xff] %v3651_v50  ;;  %v1271_v56 = vand.u32 4294901760, %v326_v28  ;;  %v1333_v60 = vand.u32 4294901760, %v1332_v18  ;;  %v1220_v62 = vand.u32 4294901760, %v309_v46  ;;  %v1339_v54 = vsub.f32 %v3617_v55, %v4110_v59 }
  0x89   : > { %2793 = vmatpush3.bf16.msra.mxu1 %v3229_v5  ;;  %2771 = vmatprep.subr.bf16.mxu0 %v3547_v38  ;;  %v1451_v5 = vsub.f32 %v3602_v25, %v4109_v17  ;;  %v1458_v38 = vsub.f32 %v3604_v0, %v4108_v8  ;;  %v328_v8 = vld [vmem:[%s3098_s25 + $0x1d8] sm:$0xff]  ;;  %v1295_v47 = vand.u32 4294901760, %v1294_v52  ;;  %v3688_v32 = vpack.c.bf16 %v1445_v51, %v1438_v36  ;;  %v311_v52 = vld [vmem:[%s3098_s25 + $0x150] sm:$0xff] }
  0x8a   : > { %2795 = vmatprep.subr.bf16.mxu1 %v3245_v49  ;;  %v4116_v49 = vand.u32 4294901760, %v3638_v27  ;;  %v3690_v17 = vpack.c.bf16 %v1271_v56, %v1268_v21  ;;  %v3696_v18 = vsub.f32 %v326_v28, %v1271_v56  ;;  %v1223_v2 = vand.u32 4294901760, %v310_v31 }
  0x8b   : > { %v1452_v59 = vand.u32 4294901760, %v1451_v5  ;;  %v1459_v11 = vand.u32 4294901760, %v1458_v38  ;;  %v1277_v36 = vand.u32 4294901760, %v328_v8  ;;  %v1465_v21 = vsub.f32 %v3636_v26, %v4114_v43 }
  0x8c   : > { %2773 = vmatpush3.bf16.msra.mxu0 %v3553_v58  ;;  %4202 = vst [vmem:[#allocation11_spill] sm:$0xff] %v3690_v17  ;;  %v1346_v58 = vsub.f32 %v3619_v7, %v4115_v37  ;;  %v3708_v28 = vpack.c.bf16 %v1333_v60, %v1326_v4  ;;  %v3710_v51 = vsub.f32 %v309_v46, %v1220_v62  ;;  %v1340_v56 = vand.u32 4294901760, %v1339_v54  ;;  %v330_v54 = vld [vmem:[%s3098_s25 + $0x1e8] sm:$0xff] }
  0x8d   : > { %2797 = vmatpush3.bf16.msra.mxu1 %v4176_v24  ;;  %2807 = vmatprep.subr.bf16.mxu0 %v3558_v20  ;;  %v1274_v24 = vand.u32 4294901760, %v327_v48  ;;  %v1226_v43 = vand.u32 4294901760, %v311_v52  ;;  %v1229_v37 = vand.u32 4294901760, %v312_v23  ;;  %v3718_v4 = vpack.c.bf16 %v1459_v11, %v1452_v59 }
  0x8e   : > { %2799 = vmatprep.subr.bf16.mxu1 %v4177_v1  ;;  %v1472_v1 = vsub.f32 %v3638_v27, %v4116_v49  ;;  %v1347_v38 = vand.u32 4294901760, %v1346_v58  ;;  %v4124_v49 = vand.u32 4294901760, %v3667_v3  ;;  %v3720_v46 = vpack.c.bf16 %v1223_v2, %v1220_v62 }
  0x8f   : > { %1086 = vmatmul.mubr.f32.vlgmr.msra.gmra.mrb[4].mxu0 %v3347_v14  ;;  %v3722_v60 = vsub.f32 %v310_v31, %v1223_v2  ;;  %v1466_v5 = vand.u32 4294901760, %v1465_v21  ;;  %v3735_v11 = vsub.f32 %v328_v8, %v1277_v36  ;;  %v4206_v2 = vand.u32 4294901760, %v3665_v6 }
  0x90   : > { %2809 = vmatpush3.bf16.msra.mxu0 %v3566_v12  ;;  %1296 = vmatprep.mubr.f32.mxu0 %v1295_v47  ;;  %v3726_v47 = vpack.c.bf16 %v1277_v36, %v1274_v24  ;;  %v1473_v58 = vand.u32 4294901760, %v1472_v1  ;;  %v3730_v12 = vld [vmem:[%s3098_s25 + $0x160] sm:$0xff]  ;;  %v1280_v59 = vand.u32 4294901760, %v329_v63  ;;  %v3742_v62 = vpack.c.bf16 %v1347_v38, %v1340_v56  ;;  %v3758_v1 = vld [vmem:[%s3098_s25 + $0x168] sm:$0xff] }
  0x91   : > { %2801 = vmatpush3.bf16.msra.mxu1 %v4179_v33  ;;  %2811 = vmatprep.subr.bf16.mxu0 %v3568_v19  ;;  %v4122_v33 = vand.u32 4294901760, %v3675_v30  ;;  %v4123_v19 = vand.u32 4294901760, %v3696_v18  ;;  %4205 = vst [vmem:[#allocation14_spill] sm:$0xff] %v3735_v11  ;;  %v1353_v31 = vsub.f32 %v3665_v6, %v4206_v2  ;;  %v3744_v21 = vpack.c.bf16 %v1229_v37, %v1226_v43 }
  0x92   : > { %2803 = vmatprep.subr.bf16.mxu1 %v4180_v16  ;;  %4203 = vst [vmem:[#allocation12_spill] sm:$0xff] %v3726_v47  ;;  %v3733_v16 = vsub.f32 %v327_v48, %v1274_v24  ;;  %v1360_v8 = vsub.f32 %v3667_v3, %v4124_v49  ;;  %v1283_v48 = vand.u32 4294901760, %v330_v54  ;;  %v3750_v24 = vsub.f32 %v311_v52, %v1226_v43 }
  0x93   : > { %v3752_v36 = vsub.f32 %v312_v23, %v1229_v37  ;;  %v4125_v56 = vand.u32 4294901760, %v3730_v12  ;;  %v2850_v38 = vpack.c.bf16 %v1473_v58, %v1466_v5  ;;  %v1486_v2 = vsub.f32 %v3696_v18, %v4123_v19  ;;  %v3767_v23 = vld [vmem:[%s3098_s25 + $0x1f0] sm:$0xff]  ;;  %v3770_v37 = vld [vmem:[%s3098_s25 + $0x1f8] sm:$0xff] }
  0x94   : > { %2813 = vmatpush3.bf16.msra.mxu0 %v3576_v15  ;;  %4204 = vst [vmem:[#allocation13_spill] sm:$0xff] %v3733_v16  ;;  %v1354_v52 = vand.u32 4294901760, %v1353_v31  ;;  %v267_v19 = vld [vmem:[%s3093_s21 + $0x10] sm:$0xff]  ;;  %v1361_v49 = vand.u32 4294901760, %v1360_v8  ;;  %v3781_v43 = vpack.c.bf16 %v1283_v48, %v1280_v59  ;;  %v1235_v31 = vand.u32 4294901760, %v3758_v1 }
  0x95   : > { %2805 = vmatpush3.bf16.msra.mxu1 %v4181_v29  ;;  %2815 = vmatprep.subr.bf16.mxu0 %v3600_v42  ;;  %v1479_v29 = vsub.f32 %v3675_v30, %v4122_v33  ;;  %v3774_v33 = vsub.f32 %v329_v63, %v1280_v59  ;;  %v3790_v5 = vsub.f32 %v3730_v12, %v4125_v56  ;;  %v1286_v58 = vand.u32 4294901760, %v3767_v23  ;;  %v3798_v59 = vld [vmem:[%s3098_s25 + $0x178] sm:$0xff] }
  0x96   : > { %2839 = vmatprep.subr.bf16.mxu1 %v3643_v39  ;;  %v3795_v39 = vld [vmem:[%s3098_s25 + $0x170] sm:$0xff]  ;;  %v4207_v8 = vand.u32 4294901760, %v3710_v51  ;;  %v3807_v56 = vand.u32 4294901760, %v267_v19  ;;  %v4210_v42 = vand.u32 4294901760, %v3735_v11  ;;  %v3821_v15 = vsub.f32 %v3758_v1, %v1235_v31 }
  0x97   : > { %v1480_v63 = vand.u32 4294901760, %v1479_v29 }
  0x98   : > { %1190 = vmatmul.mubr.f32.vlgmr.msra.gmra.mrb[4].mxu1 %v3347_v14  ;;  %2817 = vmatpush3.bf16.msra.mxu0 %v3615_v61  ;;  %v3783_v14 = vsub.f32 %v330_v54, %v1283_v48  ;;  %v1487_v54 = vand.u32 4294901760, %v1486_v2  ;;  %v4208_v48 = vand.u32 4294901760, %v3722_v60  ;;  %v1500_v2 = vsub.f32 %v3735_v11, %v4210_v42 }
  0x99   : > { %2841 = vmatpush3.bf16.msra.mxu1 %v3645_v40  ;;  %2819 = vmatprep.subr.bf16.mxu0 %v3627_v57  ;;  %v1289_v40 = vand.u32 4294901760, %v3770_v37  ;;  %v4209_v57 = vand.u32 4294901760, %v3733_v16  ;;  %v3827_v42 = vsub.f32 %v3767_v23, %v1286_v58  ;;  %v4211_v23 = vand.u32 4294901760, %v3750_v24 }
  0x9a   : > { %2843 = vmatprep.subr.bf16.mxu1 %v3688_v32  ;;  %1532 = vmatprep.mubr.f32.mxu1 %v3578_v45  ;;  %v1367_v32 = vsub.f32 %v3710_v51, %v4207_v8  ;;  %v1374_v29 = vsub.f32 %v3722_v60, %v4208_v48  ;;  %v2852_v48 = vpack.c.bf16 %v1361_v49, %v1354_v52  ;;  %v4146_v8 = vand.u32 4294901760, %v3783_v14 }
  0x9b   : > { %v1493_v61 = vsub.f32 %v3733_v16, %v4209_v57  ;;  %v1241_v57 = vand.u32 4294901760, %v3798_v59  ;;  %v3830_v45 = vsub.f32 %v3770_v37, %v1289_v40  ;;  %v2854_v49 = vpack.c.bf16 %v1487_v54, %v1480_v63 }
  0x9c   : > { %2821 = vmatpush3.bf16.msra.mxu0 %v3651_v50  ;;  %v1238_v50 = vand.u32 4294901760, %v3795_v39  ;;  %v1368_v52 = vand.u32 4294901760, %v1367_v32  ;;  %v1375_v1 = vand.u32 4294901760, %v1374_v29  ;;  %v1381_v16 = vsub.f32 %v3750_v24, %v4211_v23 }
  0x9d   : > { %2845 = vmatpush3.bf16.msra.mxu1 %v3708_v28  ;;  %2823 = vmatprep.subr.bf16.mxu0 %v3690_v17  ;;  %v3835_v17 = vsub.f32 %v267_v19, %v3807_v56  ;;  %v1494_v11 = vand.u32 4294901760, %v1493_v61  ;;  %v4212_v37 = vand.u32 4294901760, %v3752_v36  ;;  %v3850_v19 = vsub.f32 %v3798_v59, %v1241_v57 }
  0x9e   : > { %2847 = vmatprep.subr.bf16.mxu1 %v3718_v4  ;;  %v1501_v4 = vand.u32 4294901760, %v1500_v2  ;;  %v3847_v63 = vsub.f32 %v3795_v39, %v1238_v50  ;;  %v4213_v32 = vand.u32 4294901760, %v3774_v33  ;;  %v1520_v2 = vand.u32 4294901760, %v3827_v42 }
  0x9f   : > { %v1388_v28 = vsub.f32 %v3752_v36, %v4212_v37  ;;  %v4214_v59 = vand.u32 4294901760, %v3730_v12  ;;  %v3866_v37 = vpack.c.bf16 %v1289_v40, %v1286_v58  ;;  %v2856_v54 = vpack.c.bf16 %v1375_v1, %v1368_v52 }
  0xa0   : > { %2825 = vmatpush3.bf16.msra.mxu0 %v3720_v46  ;;  %v1507_v29 = vsub.f32 %v3774_v33, %v4213_v32  ;;  %v2858_v32 = vpack.c.bf16 %v1501_v4, %v1494_v11  ;;  %v1382_v61 = vand.u32 4294901760, %v1381_v16  ;;  %v4216_v12 = vand.u32 4294901760, %v3821_v15 }
  0xa1   : > { %2849 = vmatpush3.bf16.msra.mxu1 %v3742_v62  ;;  %2827 = vmatprep.subr.bf16.mxu0 %v3726_v47  ;;  %v1514_v62 = vsub.f32 %v3783_v14, %v4146_v8  ;;  %v3864_v23 = vpack.c.bf16 %v1235_v31, %v4214_v59  ;;  %v1389_v47 = vand.u32 4294901760, %v1388_v28  ;;  %v4215_v8 = vand.u32 4294901760, %v3790_v5 }
  0xa2   : > { %2851 = vmatprep.subr.bf16.mxu1 %v2850_v38  ;;  %v1299_v38 = vand.u32 4294901760, %v3835_v17  ;;  %v1402_v58 = vsub.f32 %v3821_v15, %v4216_v12  ;;  %v4147_v31 = vand.u32 4294901760, %v3847_v63  ;;  %v4148_v40 = vand.u32 4294901760, %v3850_v19 }
  0xa3   : > { %v1395_v39 = vsub.f32 %v3790_v5, %v4215_v8  ;;  %v1508_v52 = vand.u32 4294901760, %v1507_v29  ;;  %v1515_v11 = vand.u32 4294901760, %v1514_v62  ;;  %v1521_v16 = vsub.f32 %v3827_v42, %v1520_v2 }
  0xa4   : > { %2829 = vmatpush3.bf16.msra.mxu0 %v3744_v21  ;;  %v1300_v8 = vsub.f32 %v3835_v17, %v1299_v38  ;;  %v3889_v1 = vpack.c.bf16 %v1241_v57, %v1238_v50  ;;  %v2860_v4 = vpack.c.bf16 %v1389_v47, %v1382_v61  ;;  %v1403_v62 = vand.u32 4294901760, %v1402_v58 }
  0xa5   : > { %2853 = vmatpush3.bf16.msra.mxu1 %v2852_v48  ;;  %2831 = vmatprep.subr.bf16.mxu0 %v3781_v43  ;;  %v4217_v48 = vand.u32 4294901760, %v3830_v45  ;;  %v1396_v29 = vand.u32 4294901760, %v1395_v39  ;;  %v1409_v59 = vsub.f32 %v3847_v63, %v4147_v31  ;;  %v1416_v12 = vsub.f32 %v3850_v19, %v4148_v40 }
  0xa6   : > { %2855 = vmatprep.subr.bf16.mxu1 %v2854_v49  ;;  %v2870_v49 = vpack.c.bf16 %v3509_v34, %v3505_v44  ;;  %v2862_v50 = vpack.c.bf16 %v1515_v11, %v1508_v52  ;;  %v1522_v57 = vand.u32 4294901760, %v1521_v16  ;;  %v1301_v61 = vand.u32 4294901760, %v1300_v8  ;;  %v4218_v8 = vld [vmem:[#allocation3_spill] sm:$0xff] }
  0xa7   : > { %v1528_v28 = vsub.f32 %v3830_v45, %v4217_v48  ;;  %v2864_v39 = vpack.c.bf16 %v1403_v62, %v1396_v29  ;;  %v2874_v58 = vpack.c.bf16 %v3574_v22, %v3572_v10  ;;  %v1410_v48 = vand.u32 4294901760, %v1409_v59  ;;  %v4221_v62 = vld [vmem:[#allocation8_spill] sm:$0xff]  ;;  %v4222_v59 = vld [vmem:[#allocation13_spill] sm:$0xff] }
  0xa8   : > { %2833 = vmatpush3.bf16.msra.mxu0 %v3864_v23  ;;  %v1417_v31 = vand.u32 4294901760, %v1416_v12  ;;  %v2878_v11 = vpack.c.bf16 %v3604_v0, %v3602_v25  ;;  %v2880_v16 = vpack.c.bf16 %v3619_v7, %v3617_v55  ;;  %v2888_v29 = vpack.c.bf16 %v3722_v60, %v3710_v51  ;;  %v4223_v12 = vld [vmem:[#allocation14_spill] sm:$0xff] }
  0xa9   : > { %2857 = vmatpush3.bf16.msra.mxu1 %v2856_v54  ;;  %2835 = vmatprep.subr.bf16.mxu0 %v3866_v37  ;;  %v1529_v47 = vand.u32 4294901760, %v1528_v28  ;;  %v2872_v54 = vpack.c.bf16 %v3513_v35, %v3511_v13  ;;  %v2882_v28 = vpack.c.bf16 %v3638_v27, %v3636_v26 }
  0xaa   : > { %2859 = vmatprep.subr.bf16.mxu1 %v2858_v32  ;;  %v2876_v32 = vpack.c.bf16 %v3588_v53, %v3581_v41  ;;  %v2868_v52 = vpack.c.bf16 %v1417_v31, %v1410_v48  ;;  %v2884_v31 = vpack.c.bf16 %v3667_v3, %v3665_v6  ;;  %v2898_v48 = vpack.c.bf16 %v3830_v45, %v3827_v42 }
  0xab   : > { %v2866_v40 = vpack.c.bf16 %v1529_v47, %v1522_v57  ;;  %v4224_v57 = vld [vmem:[#allocation6_spill] sm:$0xff]  ;;  %v2892_v47 = vpack.c.bf16 %v3752_v36, %v3750_v24 }
  0xac   : > { %2837 = vmatpush3.bf16.msra.mxu0 %v3889_v1 }
  0xad   : > { %2861 = vmatpush3.bf16.msra.mxu1 %v2860_v4  ;;  %2871 = vmatprep.subr.bf16.mxu0 %v2870_v49  ;;  %v4219_v4 = vld [vmem:[#allocation4_spill] sm:$0xff]  ;;  %v4220_v49 = vand.u32 4294901760, %v3607_v9 }
  0xae   : > { %2863 = vmatprep.subr.bf16.mxu1 %v2862_v50  ;;  %v2890_v50 = vpack.c.bf16 %v4223_v12, %v4222_v59 }
  0xaf   : > { %1302 = vmatmul.mubr.f32.vlgmr.msra.gmra.mrb[6].mxu0 %v1301_v61  ;;  %v4225_v61 = vld [vmem:[#allocation7_spill] sm:$0xff] }
  0xb0   : > { %2873 = vmatpush3.bf16.msra.mxu0 %v2872_v54  ;;  %1669 = vmatprep.mubr.f32.mxu0 %v3607_v9  ;;  %v2894_v9 = vpack.c.bf16 %v3783_v14, %v3774_v33  ;;  %v4226_v54 = vld [vmem:[#allocation9_spill] sm:$0xff] }
  0xb1   : > { %2865 = vmatpush3.bf16.msra.mxu1 %v2864_v39  ;;  %2875 = vmatprep.subr.bf16.mxu0 %v2874_v58  ;;  %v2896_v39 = vpack.c.bf16 %v3821_v15, %v3790_v5  ;;  %v4227_v58 = vld [vmem:[#allocation10_spill] sm:$0xff] }
  0xb2   : > { %2867 = vmatprep.subr.bf16.mxu1 %v2866_v40  ;;  %v2886_v40 = vpack.c.bf16 %v3696_v18, %v3675_v30 }
  0xb4   : > { %2877 = vmatpush3.bf16.msra.mxu0 %v2876_v32  ;;  %v4228_v32 = vld [vmem:[#allocation11_spill] sm:$0xff] }
  0xb5   : > { %2869 = vmatpush3.bf16.msra.mxu1 %v2868_v52  ;;  %2879 = vmatprep.subr.bf16.mxu0 %v2878_v11  ;;  %v2900_v52 = vpack.c.bf16 %v3850_v19, %v3847_v63  ;;  %v4229_v11 = vand.u32 4294901760, %v3505_v44  ;;  %v4236_v44 = vand.u32 4294901760, %v3581_v41  ;;  %v4242_v41 = vand.u32 4294901760, %v3619_v7 }
  0xb6   : > { %2903 = vmatprep.subr.bf16.mxu1 %v3558_v20  ;;  %v4247_v7 = vand.u32 4294901760, %v3675_v30  ;;  %v4252_v30 = vand.u32 4294901760, %v4223_v12  ;;  %v4258_v12 = vand.u32 4294901760, %v3821_v15 }
  0xb8   : > { %1534 = vmatmul.mubr.f32.vlgmr.msra.gmra.mrb[6].mxu1 %v3807_v56  ;;  %2881 = vmatpush3.bf16.msra.mxu0 %v2880_v16  ;;  %v4230_v16 = vand.u32 4294901760, %v3509_v34  ;;  %v4237_v34 = vand.u32 4294901760, %v3588_v53  ;;  %v4243_v53 = vand.u32 4294901760, %v3636_v26  ;;  %v4248_v26 = vand.u32 4294901760, %v3696_v18 }
  0xb9   : > { %2905 = vmatpush3.bf16.msra.mxu1 %v4218_v8  ;;  %2883 = vmatprep.subr.bf16.mxu0 %v2882_v28  ;;  %v4253_v18 = vand.u32 4294901760, %v3750_v24  ;;  %v4259_v24 = vand.u32 4294901760, %v3830_v45 }
  0xba   : > { %2907 = vmatprep.subr.bf16.mxu1 %v4219_v4  ;;  %1776 = vmatprep.mubr.f32.mxu1 %v4220_v49  ;;  %v2934_v28 = vpack.c.bf16 %v4230_v16, %v4229_v11  ;;  %v4233_v49 = vand.u32 4294901760, %v3513_v35  ;;  %v4238_v35 = vld [vmem:[#allocation5_spill] sm:$0xff]  ;;  %v4244_v11 = vand.u32 4294901760, %v3638_v27  ;;  %v2950_v27 = vpack.c.bf16 %v4248_v26, %v4247_v7 }
  0xbc   : > { %2885 = vmatpush3.bf16.msra.mxu0 %v2884_v31  ;;  %v4231_v31 = vld [vmem:[#allocation12_spill] sm:$0xff]  ;;  %v2946_v16 = vpack.c.bf16 %v4244_v11, %v4243_v53 }
  0xbd   : > { %2909 = vmatpush3.bf16.msra.mxu1 %v4221_v62  ;;  %2887 = vmatprep.subr.bf16.mxu0 %v2886_v40  ;;  %v4232_v40 = vand.u32 4294901760, %v3511_v13  ;;  %v2940_v13 = vpack.c.bf16 %v4237_v34, %v4236_v44 }
  0xbe   : > { %2911 = vmatprep.subr.bf16.mxu1 %v4224_v57 }
  0xc0   : > { %2889 = vmatpush3.bf16.msra.mxu0 %v2888_v29  ;;  %v2936_v29 = vpack.c.bf16 %v4233_v49, %v4232_v40 }
  0xc1   : > { %2913 = vmatpush3.bf16.msra.mxu1 %v4225_v61  ;;  %2891 = vmatprep.subr.bf16.mxu0 %v2890_v50  ;;  %v4234_v50 = vand.u32 4294901760, %v3572_v10  ;;  %v4239_v10 = vand.u32 4294901760, %v3602_v25  ;;  %v4245_v25 = vand.u32 4294901760, %v3665_v6 }
  0xc2   : > { %2915 = vmatprep.subr.bf16.mxu1 %v4226_v54 }
  0xc4   : > { %2893 = vmatpush3.bf16.msra.mxu0 %v2892_v47  ;;  %v4235_v47 = vand.u32 4294901760, %v3574_v22  ;;  %v4240_v22 = vand.u32 4294901760, %v3604_v0  ;;  %v4246_v0 = vand.u32 4294901760, %v3667_v3  ;;  %v4251_v3 = vand.u32 4294901760, %v4222_v59 }
  0xc5   : > { %2917 = vmatpush3.bf16.msra.mxu1 %v4227_v58  ;;  %2895 = vmatprep.subr.bf16.mxu0 %v2894_v9  ;;  %v4257_v59 = vand.u32 4294901760, %v3790_v5 }
  0xc6   : > { %2919 = vmatprep.subr.bf16.mxu1 %v4228_v32  ;;  %v2938_v9 = vpack.c.bf16 %v4235_v47, %v4234_v50 }
  0xc8   : > { %2897 = vmatpush3.bf16.msra.mxu0 %v2896_v39  ;;  %v2942_v39 = vpack.c.bf16 %v4240_v22, %v4239_v10 }
  0xc9   : > { %2921 = vmatpush3.bf16.msra.mxu1 %v3720_v46  ;;  %2899 = vmatprep.subr.bf16.mxu0 %v2898_v48  ;;  %v4241_v48 = vand.u32 4294901760, %v3617_v55  ;;  %v2948_v55 = vpack.c.bf16 %v4246_v0, %v4245_v25 }
  0xca   : > { %2923 = vmatprep.subr.bf16.mxu1 %v4231_v31 }
  0xcc   : > { %2901 = vmatpush3.bf16.msra.mxu0 %v2900_v52  ;;  %v2944_v52 = vpack.c.bf16 %v4242_v41, %v4241_v48 }
  0xcd   : > { %2925 = vmatpush3.bf16.msra.mxu1 %v3744_v21  ;;  %2935 = vmatprep.subr.bf16.mxu0 %v2934_v28 }
  0xce   : > { %2927 = vmatprep.subr.bf16.mxu1 %v3781_v43 }
  0xcf   : > { %1672 = vmatmul.mubr.f32.vlgmr.msra.gmra.mrb[8].mxu0 %v3835_v17  ;;  %v4250_v17 = vand.u32 4294901760, %v3722_v60  ;;  %v4256_v60 = vand.u32 4294901760, %v3783_v14  ;;  %v4261_v14 = vand.u32 4294901760, %v3850_v19 }
  0xd0   : > { %2937 = vmatpush3.bf16.msra.mxu0 %v2936_v29  ;;  %1946 = vmatprep.mubr.f32.mxu0 %v4238_v35 }
  0xd1   : > { %2929 = vmatpush3.bf16.msra.mxu1 %v3864_v23  ;;  %2939 = vmatprep.subr.bf16.mxu0 %v2938_v9 }
  0xd2   : > { %2931 = vmatprep.subr.bf16.mxu1 %v3866_v37 }
  0xd4   : > { %2941 = vmatpush3.bf16.msra.mxu0 %v2940_v13 }
  0xd5   : > { %2933 = vmatpush3.bf16.msra.mxu1 %v3889_v1  ;;  %2943 = vmatprep.subr.bf16.mxu0 %v2942_v39 }
  0xd6   : > { %2967 = vmatprep.subr.bf16.mxu1 %v3558_v20  ;;  %v4249_v20 = vand.u32 4294901760, %v3710_v51  ;;  %v4255_v51 = vand.u32 4294901760, %v3774_v33  ;;  %v4260_v33 = vand.u32 4294901760, %v3847_v63 }
  0xd8   : > { %1780 = vmatmul.mubr.f32.vlgmr.msra.gmra.mrb[8].mxu1 %v1299_v38  ;;  %2945 = vmatpush3.bf16.msra.mxu0 %v2944_v52  ;;  %v2952_v6 = vpack.c.bf16 %v4250_v17, %v4249_v20  ;;  %v2954_v38 = vpack.c.bf16 %v4252_v30, %v4251_v3 }
  0xd9   : > { %2969 = vmatpush3.bf16.msra.mxu1 %v4218_v8  ;;  %2947 = vmatprep.subr.bf16.mxu0 %v2946_v16  ;;  %v4254_v8 = vand.u32 4294901760, %v3752_v36  ;;  %v2962_v36 = vpack.c.bf16 %v4259_v24, %v1520_v2 }
  0xda   : > { %2971 = vmatprep.subr.bf16.mxu1 %v4219_v4  ;;  %2050 = vmatprep.mubr.f32.mxu1 %v4238_v35 }
  0xdb   : > { %v2956_v4 = vpack.c.bf16 %v4254_v8, %v4253_v18  ;;  %v2190_v18 = vld [vmem:[%s4056_s2] ss:$0 sm:$0xff] (!%p2189_p7) }
  0xdc   : > { %2949 = vmatpush3.bf16.msra.mxu0 %v2948_v55 }
  0xdd   : > { %2973 = vmatpush3.bf16.msra.mxu1 %v4221_v62  ;;  %2951 = vmatprep.subr.bf16.mxu0 %v2950_v27  ;;  %v2958_v62 = vpack.c.bf16 %v4256_v60, %v4255_v51 }
  0xde   : > { %2975 = vmatprep.subr.bf16.mxu1 %v4224_v57  ;;  %v2960_v57 = vpack.c.bf16 %v4258_v12, %v4257_v59 }
  0xe0   : > { %2953 = vmatpush3.bf16.msra.mxu0 %v2952_v6  ;;  %v264_v6 = vld [vmem:[#allocation2] sm:$0xff] }
  0xe1   : > { %2977 = vmatpush3.bf16.msra.mxu1 %v4225_v61  ;;  %2955 = vmatprep.subr.bf16.mxu0 %v2954_v38  ;;  %v2964_v61 = vpack.c.bf16 %v4261_v14, %v4260_v33 }
  0xe2   : > { %2979 = vmatprep.subr.bf16.mxu1 %v4226_v54 }
  0xe4   : > { %2957 = vmatpush3.bf16.msra.mxu0 %v2956_v4 }
  0xe5   : > { %2981 = vmatpush3.bf16.msra.mxu1 %v4227_v58  ;;  %2959 = vmatprep.subr.bf16.mxu0 %v2958_v62 }
  0xe6   : > { %2983 = vmatprep.subr.bf16.mxu1 %v4228_v32 }
  0xe8   : > { %2961 = vmatpush3.bf16.msra.mxu0 %v2960_v57 }
  0xe9   : > { %2985 = vmatpush3.bf16.msra.mxu1 %v3720_v46  ;;  %2963 = vmatprep.subr.bf16.mxu0 %v2962_v36 }
  0xea   : > { %2987 = vmatprep.subr.bf16.mxu1 %v4231_v31 }
  0xec   : > { %2965 = vmatpush3.bf16.msra.mxu0 %v2964_v61 }
  0xed   : > { %2989 = vmatpush3.bf16.msra.mxu1 %v3744_v21 }
  0xee   : > { %2991 = vmatprep.subr.bf16.mxu1 %v3781_v43 }
  0xef   : > { %1948 = vmatmul.mubr.f32.vlgmr.msra.gmra.mrb[10].mxu0 %v3807_v56 }
  0xf1   : > { %2993 = vmatpush3.bf16.msra.mxu1 %v3864_v23 }
  0xf2   : > { %2995 = vmatprep.subr.bf16.mxu1 %v3866_v37 }
  0xf5   : > { %2997 = vmatpush3.bf16.msra.mxu1 %v3889_v1 }
  0xf8   : > { %2052 = vmatmul.mubr.f32.vlgmr.msra.gmra.mrb[10].mxu1 %v3807_v56 }
 0x122   : > { %v2226_v15 = vpop.f32.mrb[0].mxu0 }
 0x123   : > { %v2227_v45 = vpop.f32.mrb[1].mxu0 }
 0x124   : > { %v2228_v46 = vadd.f32 %v2227_v45, %v2226_v15 }
 0x12b   : > { %v2261_v5 = vpop.f32.mrb[0].mxu1 }
 0x12c   : > { %v2262_v42 = vpop.f32.mrb[1].mxu1 }
 0x12d   : > { %v2263_v63 = vadd.f32 %v2262_v42, %v2261_v5 }
 0x12f   : > { %v674_v19 = vadd.f32 %v2263_v63, %v2228_v46 }
 0x142   : > { %v2296_v21 = vpop.f32.mrb[2].mxu0 }
 0x143   : > { %v2297_v2 = vpop.f32.mrb[3].mxu0 }
 0x144   : > { %v2298_v43 = vadd.f32 %v2297_v2, %v2296_v21 }
 0x146   : > { %v812_v54 = vadd.f32 %v2298_v43, %v674_v19 }
 0x14b   : > { %v2331_v58 = vpop.f32.mrb[2].mxu1 }
 0x14c   : > { %v2332_v32 = vpop.f32.mrb[3].mxu1 }
 0x14d   : > { %v2333_v23 = vadd.f32 %v2332_v32, %v2331_v58 }
 0x14f   : > { %v920_v28 = vadd.f32 %v2333_v23, %v812_v54 }
 0x162   : > { %v2366_v37 = vpop.f32.mrb[4].mxu0 }
 0x163   : > { %v2367_v31 = vpop.f32.mrb[5].mxu0 }
 0x164   : > { %v2368_v1 = vadd.f32 %v2367_v31, %v2366_v37 }
 0x166   : > { %v1088_v40 = vadd.f32 %v2368_v1, %v920_v28 }
 0x16b   : > { %v2401_v56 = vpop.f32.mrb[4].mxu1 }
 0x16c   : > { %v2402_v49 = vpop.f32.mrb[5].mxu1 }
 0x16d   : > { %v2403_v29 = vadd.f32 %v2402_v49, %v2401_v56 }
 0x16f   : > { %v1192_v50 = vadd.f32 %v2403_v29, %v1088_v40 }
 0x182   : > { %v2436_v47 = vpop.f32.mrb[6].mxu0 }
 0x183   : > { %v2437_v9 = vpop.f32.mrb[7].mxu0 }
 0x184   : > { %v2438_v44 = vadd.f32 %v2437_v9, %v2436_v47 }
 0x186   : > { %v1304_v34 = vadd.f32 %v2438_v44, %v1192_v50 }
 0x18b   : > { %v2471_v13 = vpop.f32.mrb[6].mxu1 }
 0x18c   : > { %v2472_v35 = vpop.f32.mrb[7].mxu1 }
 0x18d   : > { %v2473_v10 = vadd.f32 %v2472_v35, %v2471_v13 }
 0x18f   : > { %v1536_v22 = vadd.f32 %v2473_v10, %v1304_v34 }
 0x1a2   : > { %v2506_v39 = vpop.f32.mrb[8].mxu0 }
 0x1a3   : > { %v2507_v48 = vpop.f32.mrb[9].mxu0 }
 0x1a4   : > { %v2508_v41 = vadd.f32 %v2507_v48, %v2506_v39 }
 0x1a6   : > { %v1674_v52 = vadd.f32 %v2508_v41, %v1536_v22 }
 0x1ab   : > { %v2541_v53 = vpop.f32.mrb[8].mxu1 }
 0x1ac   : > { %v2542_v11 = vpop.f32.mrb[9].mxu1 }
 0x1ad   : > { %v2543_v16 = vadd.f32 %v2542_v11, %v2541_v53 }
 0x1af   : > { %v1782_v25 = vadd.f32 %v2543_v16, %v1674_v52 }
 0x1c2   : > { %v2576_v0 = vpop.f32.mrb[10].mxu0 }
 0x1c3   : > { %v2577_v55 = vpop.f32.mrb[11].mxu0 }
 0x1c4   : > { %v2578_v7 = vadd.f32 %v2577_v55, %v2576_v0 }
 0x1c6   : > { %v1950_v26 = vadd.f32 %v2578_v7, %v1782_v25 }
 0x1cb   : > { %v2611_v27 = vpop.f32.mrb[10].mxu1 }
 0x1cc   : > { %v2612_v20 = vpop.f32.mrb[11].mxu1 }
 0x1cd   : > { %v2613_v17 = vadd.f32 %v2612_v20, %v2611_v27  ;;  %2062 = sbr.rel (%p2189_p7) target bundleno = 480 (0x1e0), region = 40 }
 0x1cf   : > { %v2054_v3 = vadd.f32 %v2613_v17, %v1950_v26 }
 0x1d1   : > { %v2057_v30 = vadd.f32 %v2054_v3, %v264_v6 }
 0x1d3   : > { %2058 = vst [vmem:[#allocation2] sm:$0xff] %v2057_v30 }
 0x1da   : > { %v2063_v38 = vld [vmem:[#allocation2] sm:$0xff] }
 0x1db   : > { %v2071_v8 = vadd.f32 %v2190_v18, %v2063_v38 }
 0x1dd   : > { %v2072_v4 = vmax.f32 %v2071_v8, 0.0 }
 0x1df   : > { %2073 = vst [vmem:[%s4057_s3] sm:$0xff] %v2072_v4 }
 0x1e0 PF: > { %s13_s14 = sadd.s32 1, %s3045_s14   ;;  %s4262_s12 = smov %s3041_s13 }
 0x1e1   : > { %p10_p8 = scmp.ge.s32.totalorder %s13_s14, 4   ;;  %s4263_s13 = smov %s4265_s15 }
 0x1e3   :  { %12 = sbr.rel (!%p10_p8) target bundleno = 2 (0x2), region = 76 }

// kernel: fastrcnn_conv_fc_head.7
= control target key start
LH: loop header
LB: loop body
LE: loop exit
PB: predicated region body
PF: predicated region fallthrough
CT: control target
= control target key end

     0   :  { %v1158_v0 = vmov 0.0|0.0   ;;  %vm1159_vm0 = vmmov 0   ;;  %v1160_v10 = vmov 0.0   ;;  %s1501_s1 = inlined_call_operand.vmem [shape: f32[128,128], index: 1, kind: input, shape index: {}]   ;;  %s1502_s0 = inlined_call_operand.vmem [shape: f32[8,128], index: 0, kind: input, shape index: {}]   ;;  %s1503_s2 = inlined_call_operand.vmem [shape: f32[1,128], index: 2, kind: input, shape index: {}]   ;;  %s1504_s3 = inlined_call_operand.vmem [shape: f32[8,128], index: 3, kind: output, shape index: {}]  }
   0x1   :  { %1011 = vmatprep.subr.bf16.mxu0 %v1158_v0  ;;  %v21_v1 = vld [vmem:[%s1501_s1] sm:$0xff]  ;;  %v22_v2 = vld [vmem:[%s1501_s1 + $0x8] sm:$0xff]  ;;  %v23_v3 = vld [vmem:[%s1501_s1 + $0x10] sm:$0xff]  ;;  %1035 = vmatprep.subr.bf16.mxu1 %v1158_v0 }
   0x2   :  { %v38_v4 = vand.u32 4294901760, %v21_v1  ;;  %v41_v5 = vand.u32 4294901760, %v22_v2  ;;  %v24_v6 = vld [vmem:[%s1501_s1 + $0x18] sm:$0xff]  ;;  %v44_v7 = vand.u32 4294901760, %v23_v3  ;;  %v25_v8 = vld [vmem:[%s1501_s1 + $0x20] sm:$0xff]  ;;  %v26_v9 = vld [vmem:[%s1501_s1 + $0x28] sm:$0xff]  ;;  %833 = vmatprep.mubr.msk.f32.mxu0 %vm1159_vm0, %v1160_v10  ;;  %868 = vmatprep.mubr.msk.f32.mxu1 %vm1159_vm0, %v1160_v10 }
   0x3   :  { %v47_v11 = vand.u32 4294901760, %v24_v6  ;;  %v50_v12 = vand.u32 4294901760, %v25_v8  ;;  %v53_v13 = vand.u32 4294901760, %v26_v9  ;;  %v27_v14 = vld [vmem:[%s1501_s1 + $0x30] sm:$0xff]  ;;  %v28_v19 = vld [vmem:[%s1501_s1 + $0x38] sm:$0xff]  ;;  %v29_v20 = vld [vmem:[%s1501_s1 + $0x40] sm:$0xff] }
   0x4   :  { %v1208_v15 = vpack.c.bf16 %v41_v5, %v38_v4  ;;  %v1210_v16 = vsub.f32 %v21_v1, %v38_v4  ;;  %v1212_v17 = vsub.f32 %v22_v2, %v41_v5  ;;  %v1214_v18 = vsub.f32 %v23_v3, %v44_v7  ;;  %v30_v27 = vld [vmem:[%s1501_s1 + $0x48] sm:$0xff]  ;;  %v31_v40 = vld [vmem:[%s1501_s1 + $0x50] sm:$0xff]  ;;  %v32_v41 = vld [vmem:[%s1501_s1 + $0x58] sm:$0xff] }
   0x5   :  { %v1222_v21 = vpack.c.bf16 %v47_v11, %v44_v7  ;;  %v1224_v22 = vsub.f32 %v24_v6, %v47_v11  ;;  %v1227_v23 = vsub.f32 %v25_v8, %v50_v12  ;;  %v56_v26 = vand.u32 4294901760, %v27_v14  ;;  %v1273_v50 = vld [vmem:[%s1501_s1 + $0x60] sm:$0xff]  ;;  %v34_v59 = vld [vmem:[%s1501_s1 + $0x68] sm:$0xff]  ;;  %v35_v1 = vld [vmem:[%s1501_s1 + $0x70] sm:$0xff] }
   0x6   :  { %1013 = vmatpush3.bf16.msra.mxu0 %v1208_v15  ;;  %v131_v24 = vand.u32 4294901760, %v1210_v16  ;;  %v138_v25 = vand.u32 4294901760, %v1212_v17  ;;  %v59_v28 = vand.u32 4294901760, %v28_v19  ;;  %v145_v29 = vand.u32 4294901760, %v1214_v18  ;;  %v36_v6 = vld [vmem:[%s1501_s1 + $0x78] sm:$0xff] }
   0x7   :  { %1014 = vmatprep.subr.bf16.mxu0 %v1158_v0  ;;  %v152_v30 = vand.u32 4294901760, %v1224_v22  ;;  %v62_v31 = vand.u32 4294901760, %v29_v20  ;;  %v1237_v32 = vsub.f32 %v26_v9, %v53_v13  ;;  %v1245_v35 = vsub.f32 %v27_v14, %v56_v26 }
   0x8   :  { %v132_v33 = vsub.f32 %v1210_v16, %v131_v24  ;;  %v139_v34 = vsub.f32 %v1212_v17, %v138_v25  ;;  %v1247_v36 = vsub.f32 %v28_v19, %v59_v28  ;;  %v146_v37 = vsub.f32 %v1214_v18, %v145_v29 }
   0x9   :  { %v153_v38 = vsub.f32 %v1224_v22, %v152_v30  ;;  %v65_v39 = vand.u32 4294901760, %v30_v27  ;;  %v1262_v42 = vpack.c.bf16 %v53_v13, %v50_v12  ;;  %v1264_v45 = vpack.c.bf16 %v59_v28, %v56_v26 }
   0xa   :  { %1016 = vmatpush3.bf16.msra.mxu0 %v1222_v21  ;;  %v133_v43 = vand.u32 4294901760, %v132_v33  ;;  %v140_v44 = vand.u32 4294901760, %v139_v34  ;;  %v147_v46 = vand.u32 4294901760, %v146_v37  ;;  %v1267_v48 = vsub.f32 %v29_v20, %v62_v31 }
   0xb   :  { %1017 = vmatprep.subr.bf16.mxu0 %v1158_v0  ;;  %v154_v47 = vand.u32 4294901760, %v153_v38  ;;  %v159_v49 = vand.u32 4294901760, %v1227_v23  ;;  %v166_v52 = vand.u32 4294901760, %v1237_v32  ;;  %v68_v53 = vand.u32 4294901760, %v31_v40 }
   0xc   :  { %v1036_v51 = vpack.c.bf16 %v140_v44, %v133_v43  ;;  %v71_v54 = vand.u32 4294901760, %v32_v41  ;;  %v1276_v55 = vsub.f32 %v30_v27, %v65_v39  ;;  %v173_v57 = vand.u32 4294901760, %v1245_v35 }
   0xd   :  { %v160_v56 = vsub.f32 %v1227_v23, %v159_v49  ;;  %v180_v58 = vand.u32 4294901760, %v1247_v36  ;;  %v1039_v60 = vpack.c.bf16 %v154_v47, %v147_v46  ;;  %v1287_v61 = vpack.c.bf16 %v65_v39, %v62_v31  ;;  %v20_v31 = vld [vmem:[%s1502_s0] sm:$0xff] }
   0xe   :  { %1019 = vmatpush3.bf16.msra.mxu0 %v1262_v42  ;;  %1037 = vmatpush3.bf16.msra.mxu1 %v1036_v51  ;;  %v167_v62 = vsub.f32 %v1237_v32, %v166_v52  ;;  %v74_v63 = vand.u32 4294901760, %v1273_v50  ;;  %v1298_v3 = vsub.f32 %v31_v40, %v68_v53  ;;  %v174_v4 = vsub.f32 %v1245_v35, %v173_v57 }
   0xf   :  { %1020 = vmatprep.subr.bf16.mxu0 %v1158_v0  ;;  %1038 = vmatprep.subr.bf16.mxu1 %v1158_v0  ;;  %v161_v2 = vand.u32 4294901760, %v160_v56  ;;  %v181_v5 = vsub.f32 %v1247_v36, %v180_v58  ;;  %v1309_v8 = vsub.f32 %v32_v41, %v71_v54  ;;  %v77_v9 = vand.u32 4294901760, %v34_v59 }
  0x10   :  { %v168_v7 = vand.u32 4294901760, %v167_v62  ;;  %v187_v11 = vand.u32 4294901760, %v1267_v48  ;;  %v175_v12 = vand.u32 4294901760, %v174_v4  ;;  %v194_v14 = vand.u32 4294901760, %v1276_v55 }
  0x11   :  { %v182_v13 = vand.u32 4294901760, %v181_v5  ;;  %v80_v19 = vand.u32 4294901760, %v35_v1  ;;  %v1315_v26 = vsub.f32 %v1273_v50, %v74_v63  ;;  %v1317_v27 = vsub.f32 %v34_v59, %v77_v9 }
  0x12   :  { %1022 = vmatpush3.bf16.msra.mxu0 %v1264_v45  ;;  %1040 = vmatpush3.bf16.msra.mxu1 %v1039_v60  ;;  %v1042_v20 = vpack.c.bf16 %v168_v7, %v161_v2  ;;  %v83_v28 = vand.u32 4294901760, %v36_v6  ;;  %v188_v33 = vsub.f32 %v1267_v48, %v187_v11  ;;  %v195_v34 = vsub.f32 %v1276_v55, %v194_v14 }
  0x13   :  { %1023 = vmatprep.subr.bf16.mxu0 %v1158_v0  ;;  %1041 = vmatprep.subr.bf16.mxu1 %v1158_v0  ;;  %v201_v37 = vand.u32 4294901760, %v1298_v3  ;;  %v1331_v38 = vpack.c.bf16 %v71_v54, %v68_v53  ;;  %v1045_v39 = vpack.c.bf16 %v182_v13, %v175_v12  ;;  %v1333_v40 = vsub.f32 %v35_v1, %v80_v19 }
  0x14   :  { %v208_v41 = vand.u32 4294901760, %v1309_v8  ;;  %v189_v43 = vand.u32 4294901760, %v188_v33  ;;  %v196_v44 = vand.u32 4294901760, %v195_v34  ;;  %v1339_v47 = vand.u32 4294901760, %v20_v31 }
  0x15   :  { %v202_v46 = vsub.f32 %v1298_v3, %v201_v37  ;;  %v1342_v50 = vsub.f32 %v36_v6, %v83_v28  ;;  %v215_v53 = vand.u32 4294901760, %v1315_v26  ;;  %v222_v54 = vand.u32 4294901760, %v1317_v27 }
  0x16   :  { %1025 = vmatpush3.bf16.msra.mxu0 %v1287_v61  ;;  %1043 = vmatpush3.bf16.msra.mxu1 %v1042_v20  ;;  %v209_v51 = vsub.f32 %v1309_v8, %v208_v41  ;;  %v1352_v56 = vsub.f32 %v20_v31, %v1339_v47  ;;  %v1354_v59 = vpack.c.bf16 %v77_v9, %v74_v63  ;;  %v229_v2 = vand.u32 4294901760, %v1333_v40 }
  0x17   :  { %1026 = vmatprep.subr.bf16.mxu0 %v1158_v0  ;;  %1044 = vmatprep.subr.bf16.mxu1 %v1158_v0  ;;  %v1048_v60 = vpack.c.bf16 %v196_v44, %v189_v43  ;;  %v203_v62 = vand.u32 4294901760, %v202_v46  ;;  %v216_v5 = vsub.f32 %v1315_v26, %v215_v53  ;;  %v223_v6 = vsub.f32 %v1317_v27, %v222_v54 }
  0x18   :  { %v120_v1 = vand.u32 4294901760, %v1352_v56  ;;  %v210_v4 = vand.u32 4294901760, %v209_v51  ;;  %v236_v63 = vand.u32 4294901760, %v1342_v50  ;;  %v1368_v7 = vpack.c.bf16 %v83_v28, %v80_v19 }
  0x19   :  { %v230_v12 = vsub.f32 %v1333_v40, %v229_v2  ;;  %v217_v20 = vand.u32 4294901760, %v216_v5  ;;  %v224_v31 = vand.u32 4294901760, %v223_v6  ;;  %v1060_v34 = vpack.c.bf16 %v1212_v17, %v1210_v16 }
  0x1a   :  { %1028 = vmatpush3.bf16.msra.mxu0 %v1331_v38  ;;  %1046 = vmatpush3.bf16.msra.mxu1 %v1045_v39  ;;  %v121_v9 = vsub.f32 %v1352_v56, %v120_v1  ;;  %v1051_v13 = vpack.c.bf16 %v210_v4, %v203_v62  ;;  %v237_v33 = vsub.f32 %v1342_v50, %v236_v63 }
  0x1b   :  { %1029 = vmatprep.subr.bf16.mxu0 %v1158_v0  ;;  %1047 = vmatprep.subr.bf16.mxu1 %v1158_v0  ;;  %v1054_v28 = vpack.c.bf16 %v224_v31, %v217_v20  ;;  %v231_v39 = vand.u32 4294901760, %v230_v12  ;;  %v1063_v46 = vpack.c.bf16 %v1224_v22, %v1214_v18  ;;  %v1066_v51 = vpack.c.bf16 %v1237_v32, %v1227_v23 }
  0x1c   :  { %v122_v19 = vand.u32 4294901760, %v121_v9  ;;  %v238_v43 = vand.u32 4294901760, %v237_v33  ;;  %v1072_v62 = vpack.c.bf16 %v1276_v55, %v1267_v48  ;;  %v1075_v4 = vpack.c.bf16 %v1309_v8, %v1298_v3 }
  0x1d   :  { %v1078_v5 = vpack.c.bf16 %v1317_v27, %v1315_v26  ;;  %v1081_v6 = vpack.c.bf16 %v1342_v50, %v1333_v40  ;;  %v1108_v9 = vpack.c.bf16 %v138_v25, %v131_v24  ;;  %v1111_v12 = vpack.c.bf16 %v152_v30, %v145_v29 }
  0x1e   :  { %1031 = vmatpush3.bf16.msra.mxu0 %v1354_v59  ;;  %1049 = vmatpush3.bf16.msra.mxu1 %v1048_v60  ;;  %v1057_v44 = vpack.c.bf16 %v238_v43, %v231_v39  ;;  %v1069_v60 = vpack.c.bf16 %v1247_v36, %v1245_v35  ;;  %v1114_v16 = vpack.c.bf16 %v166_v52, %v159_v49 }
  0x1f   :  { %1032 = vmatprep.subr.bf16.mxu0 %v1158_v0  ;;  %1050 = vmatprep.subr.bf16.mxu1 %v1158_v0  ;;  %v1117_v17 = vpack.c.bf16 %v180_v58, %v173_v57  ;;  %v1126_v18 = vpack.c.bf16 %v222_v54, %v215_v53 }
  0x22   :  { %1034 = vmatpush3.bf16.msra.mxu0 %v1368_v7  ;;  %1052 = vmatpush3.bf16.msra.mxu1 %v1051_v13 }
  0x23   :  { %1053 = vmatprep.subr.bf16.mxu1 %v1158_v0  ;;  %1059 = vmatprep.subr.bf16.mxu0 %v1158_v0 }
  0x25   :  { %834 = vmatmul.mubr.f32.vlgmr.msra.gmra.mrb[0].mxu0 %v122_v19 }
  0x26   :  { %1055 = vmatpush3.bf16.msra.mxu1 %v1054_v28  ;;  %1061 = vmatpush3.bf16.msra.mxu0 %v1060_v34 }
  0x27   :  { %1056 = vmatprep.subr.bf16.mxu1 %v1158_v0  ;;  %1062 = vmatprep.subr.bf16.mxu0 %v1158_v0 }
  0x28   :  { %903 = vmatprep.mubr.msk.f32.mxu0 %vm1159_vm0, %v1160_v10 }
  0x2a   :  { %1058 = vmatpush3.bf16.msra.mxu1 %v1057_v44  ;;  %1064 = vmatpush3.bf16.msra.mxu0 %v1063_v46 }
  0x2b   :  { %1065 = vmatprep.subr.bf16.mxu0 %v1158_v0  ;;  %1083 = vmatprep.subr.bf16.mxu1 %v1158_v0 }
  0x2d   :  { %869 = vmatmul.mubr.f32.vlgmr.msra.gmra.mrb[0].mxu1 %v1339_v47 }
  0x2e   :  { %1067 = vmatpush3.bf16.msra.mxu0 %v1066_v51  ;;  %1085 = vmatpush3.bf16.msra.mxu1 %v1208_v15 }
  0x2f   :  { %1068 = vmatprep.subr.bf16.mxu0 %v1158_v0  ;;  %1086 = vmatprep.subr.bf16.mxu1 %v1158_v0 }
  0x30   :  { %938 = vmatprep.mubr.msk.f32.mxu1 %vm1159_vm0, %v1160_v10 }
  0x32   :  { %1070 = vmatpush3.bf16.msra.mxu0 %v1069_v60  ;;  %1088 = vmatpush3.bf16.msra.mxu1 %v1222_v21 }
  0x33   :  { %1071 = vmatprep.subr.bf16.mxu0 %v1158_v0  ;;  %1089 = vmatprep.subr.bf16.mxu1 %v1158_v0 }
  0x36   :  { %1073 = vmatpush3.bf16.msra.mxu0 %v1072_v62  ;;  %1091 = vmatpush3.bf16.msra.mxu1 %v1262_v42 }
  0x37   :  { %1074 = vmatprep.subr.bf16.mxu0 %v1158_v0  ;;  %1092 = vmatprep.subr.bf16.mxu1 %v1158_v0 }
  0x3a   :  { %1076 = vmatpush3.bf16.msra.mxu0 %v1075_v4  ;;  %1094 = vmatpush3.bf16.msra.mxu1 %v1264_v45 }
  0x3b   :  { %1077 = vmatprep.subr.bf16.mxu0 %v1158_v0  ;;  %1095 = vmatprep.subr.bf16.mxu1 %v1158_v0 }
  0x3e   :  { %1079 = vmatpush3.bf16.msra.mxu0 %v1078_v5  ;;  %1097 = vmatpush3.bf16.msra.mxu1 %v1287_v61 }
  0x3f   :  { %1080 = vmatprep.subr.bf16.mxu0 %v1158_v0  ;;  %1098 = vmatprep.subr.bf16.mxu1 %v1158_v0 }
  0x42   :  { %1082 = vmatpush3.bf16.msra.mxu0 %v1081_v6  ;;  %1100 = vmatpush3.bf16.msra.mxu1 %v1331_v38 }
  0x43   :  { %1101 = vmatprep.subr.bf16.mxu1 %v1158_v0  ;;  %1107 = vmatprep.subr.bf16.mxu0 %v1158_v0 }
  0x45   :  { %904 = vmatmul.mubr.f32.vlgmr.msra.gmra.mrb[2].mxu0 %v1352_v56 }
  0x46   :  { %1103 = vmatpush3.bf16.msra.mxu1 %v1354_v59  ;;  %1109 = vmatpush3.bf16.msra.mxu0 %v1108_v9 }
  0x47   :  { %1104 = vmatprep.subr.bf16.mxu1 %v1158_v0  ;;  %1110 = vmatprep.subr.bf16.mxu0 %v1158_v0 }
  0x48   :  { %973 = vmatprep.mubr.msk.f32.mxu0 %vm1159_vm0, %v1160_v10 }
  0x4a   :  { %1106 = vmatpush3.bf16.msra.mxu1 %v1368_v7  ;;  %1112 = vmatpush3.bf16.msra.mxu0 %v1111_v12 }
  0x4b   :  { %1113 = vmatprep.subr.bf16.mxu0 %v1158_v0  ;;  %1131 = vmatprep.subr.bf16.mxu1 %v1158_v0 }
  0x4d   :  { %939 = vmatmul.mubr.f32.vlgmr.msra.gmra.mrb[2].mxu1 %v120_v1 }
  0x4e   :  { %1115 = vmatpush3.bf16.msra.mxu0 %v1114_v16  ;;  %1133 = vmatpush3.bf16.msra.mxu1 %v1208_v15  ;;  %v1120_v15 = vpack.c.bf16 %v194_v14, %v187_v11 }
  0x4f   :  { %1116 = vmatprep.subr.bf16.mxu0 %v1158_v0  ;;  %1134 = vmatprep.subr.bf16.mxu1 %v1158_v0 }
  0x50   :  { %1008 = vmatprep.mubr.msk.f32.mxu1 %vm1159_vm0, %v1160_v10  ;;  %v1123_v10 = vpack.c.bf16 %v208_v41, %v201_v37 }
  0x52   :  { %1118 = vmatpush3.bf16.msra.mxu0 %v1117_v17  ;;  %1136 = vmatpush3.bf16.msra.mxu1 %v1222_v21  ;;  %v1129_v21 = vpack.c.bf16 %v236_v63, %v229_v2 }
  0x53   :  { %1119 = vmatprep.subr.bf16.mxu0 %v1158_v0  ;;  %1137 = vmatprep.subr.bf16.mxu1 %v1158_v0 }
  0x56   :  { %1121 = vmatpush3.bf16.msra.mxu0 %v1120_v15  ;;  %1139 = vmatpush3.bf16.msra.mxu1 %v1262_v42 }
  0x57   :  { %1122 = vmatprep.subr.bf16.mxu0 %v1158_v0  ;;  %1140 = vmatprep.subr.bf16.mxu1 %v1158_v0 }
  0x5a   :  { %1124 = vmatpush3.bf16.msra.mxu0 %v1123_v10  ;;  %1142 = vmatpush3.bf16.msra.mxu1 %v1264_v45 }
  0x5b   :  { %1125 = vmatprep.subr.bf16.mxu0 %v1158_v0  ;;  %1143 = vmatprep.subr.bf16.mxu1 %v1158_v0 }
  0x5e   :  { %1127 = vmatpush3.bf16.msra.mxu0 %v1126_v18  ;;  %1145 = vmatpush3.bf16.msra.mxu1 %v1287_v61 }
  0x5f   :  { %1128 = vmatprep.subr.bf16.mxu0 %v1158_v0  ;;  %1146 = vmatprep.subr.bf16.mxu1 %v1158_v0 }
  0x62   :  { %1130 = vmatpush3.bf16.msra.mxu0 %v1129_v21  ;;  %1148 = vmatpush3.bf16.msra.mxu1 %v1331_v38 }
  0x63   :  { %1149 = vmatprep.subr.bf16.mxu1 %v1158_v0 }
  0x65   :  { %974 = vmatmul.mubr.f32.vlgmr.msra.gmra.mrb[4].mxu0 %v1339_v47 }
  0x66   :  { %1151 = vmatpush3.bf16.msra.mxu1 %v1354_v59 }
  0x67   :  { %1152 = vmatprep.subr.bf16.mxu1 %v1158_v0  ;;  %v698_v0 = vld [vmem:[%s1503_s2] ss:$0 sm:$0xff] }
  0x6a   :  { %1154 = vmatpush3.bf16.msra.mxu1 %v1368_v7 }
  0x6d   :  { %1009 = vmatmul.mubr.f32.vlgmr.msra.gmra.mrb[4].mxu1 %v1339_v47 }
  0xf8   :  { %v124_v22 = vpop.f32.mrb[0].mxu0 }
  0xf9   :  { %v835_v23 = vpop.f32.mrb[1].mxu0 }
 0x100   :  { %v275_v24 = vpop.f32.mrb[0].mxu1 }
 0x101   :  { %v276_v25 = vadd.f32 %v275_v24, %v124_v22  ;;  %v870_v29 = vpop.f32.mrb[1].mxu1 }
 0x118   :  { %v379_v30 = vpop.f32.mrb[2].mxu0 }
 0x119   :  { %v380_v32 = vadd.f32 %v379_v30, %v276_v25  ;;  %v905_v35 = vpop.f32.mrb[3].mxu0 }
 0x120   :  { %v468_v36 = vpop.f32.mrb[2].mxu1 }
 0x121   :  { %v469_v42 = vadd.f32 %v468_v36, %v380_v32  ;;  %v940_v45 = vpop.f32.mrb[3].mxu1 }
 0x138   :  { %v587_v48 = vpop.f32.mrb[4].mxu0 }
 0x139   :  { %v588_v49 = vadd.f32 %v587_v48, %v469_v42  ;;  %v975_v52 = vpop.f32.mrb[5].mxu0 }
 0x140   :  { %v674_v55 = vpop.f32.mrb[4].mxu1 }
 0x141   :  { %v675_v57 = vadd.f32 %v674_v55, %v588_v49  ;;  %v1010_v58 = vpop.f32.mrb[5].mxu1 }
 0x143   :  { %v691_v61 = vadd.f32 %v698_v0, %v675_v57 }
 0x145   :  { %v692_v3 = vmax.f32 %v691_v61, 0.0 }
 0x147   :  { %693 = vst [vmem:[%s1504_s3] sm:$0xff] %v692_v3 }

// kernel: fastrcnn_conv_fc_head.4
= control target key start
LH: loop header
LB: loop body
LE: loop exit
PB: predicated region body
PF: predicated region fallthrough
CT: control target
= control target key end

     0   :  { %s8820_s15 = smov 0   ;;  %s11708_s0 = inlined_call_operand.vmem [shape: f32[4,77,8], index: 0, kind: input, shape index: {}]   ;;  %s11709_s1 = inlined_call_operand.vmem [shape: f32[3,3,8,16], index: 1, kind: input, shape index: {}]   ;;  %s11710_s2 = inlined_call_operand.vmem [shape: f32[1,16], index: 2, kind: input, shape index: {}]   ;;  %s11711_s3 = inlined_call_operand.vmem [shape: f32[3,49,1], index: 3, kind: input, shape index: {}]   ;;  %s11712_s4 = inlined_call_operand.vmem [shape: f32[4,49,16], index: 4, kind: output, shape index: {}]  }
   0x1 LB: > { %s7065_s16 = sadd.s32 4294967295, %s8790_s15   ;;  %p7069_p0 = scmp.ge.s32.totalorder %s8790_s15, 1  ;;  %s8790_s15 = sphi %s8820_s15, %s14_s15  }
   0x2   : > { %p162_p1 = scmp.lt.s32.totalorder %s8790_s15, 5 }
   0x4   : > { %p163_p2 = pnand %p7069_p0, %p162_p1 }
   0x6   : > { %166 = sbr.rel (%p163_p2) target bundleno = 1075 (0x433), region = 36 }
   0xd   : > { %v207_v0 = vld [vmem:[%s11711_s3 + $0x10] sm:$0xff]  ;;  %v205_v1 = vld [vmem:[%s11711_s3] sm:$0xff]  ;;  %v8792_v2 = vmov 0   ;;  %p188_p3 = scmp.lt.s32.totalorder %s7065_s16, 3  ;;  %v7072_v3 = vld [vmem:[%s11709_s1 + $0x8] sm:$0xff]  ;;  %v11714_v6 = vmov 0.0  }
   0xe   : > { %8778 = vset.pattern.permute.xlu1 %v8792_v2  ;;  %8777 = vset.pattern.permute.xlu0 %v8792_v2  ;;  %v208_v4 = vld [vmem:[%s11711_s3 + $0x18] sm:$0xff]  ;;  %v206_v5 = vld [vmem:[%s11711_s3 + $0x8] sm:$0xff]  ;;  %v8844_v7 = vand.u32 4294901760, %v7072_v3  ;;  %vm8794_vm0 = vmmov 0   ;;  %vm264_vm1 = vcmask 64512   ;;  %v209_v10 = vld [vmem:[%s11711_s3 + $0x20] sm:$0xff] }
   0xf   : > { %224 = vperm.xlu1 %8778, %v207_v0   ;;  %214 = vperm.xlu0 %8777, %v205_v1   ;;  %s11736_s16 = smov (!%p188_p3, %s7065_s16), 3  ;;  %v210_v9 = vld [vmem:[%s11711_s3 + $0x28] sm:$0xff]  ;;  %v7073_v25 = vld [vmem:[%s11711_s3 + $0x70] sm:$0xff]  ;;  %v7075_v36 = vld [vmem:[%s11711_s3 + $0x80] sm:$0xff]  ;;  %vm7001_vm2 = vcmask 130048   ;;  %vm7008_vm3 = vcmask 122880  }
  0x10   : > { %7522 = vmatprep.subr.mxu0 %v11714_v6  ;;  %7524 = vmatprep.mubr.msk.f32.mxu0 %vm8794_vm0, %v11714_v6  ;;  %s8764_s27 = smul.u32 80, %s11736_s16  ;;  %v8856_v8 = vsub.f32 %v7072_v3, %v8844_v7  ;;  %v211_v26 = vld [vmem:[%s11711_s3 + $0x30] sm:$0x1]  ;;  %v7074_v37 = vld [vmem:[%s11711_s3 + $0x78] sm:$0xff]  ;;  %v7076_v47 = vld [vmem:[%s11711_s3 + $0x88] sm:$0xff] }
  0x11   : > { %7545 = vmatprep.subr.mxu1 %v11714_v6  ;;  %7547 = vmatprep.mubr.msk.f32.mxu1 %vm8794_vm0, %v11714_v6  ;;  %v7077_v46 = vld [vmem:[%s11711_s3 + $0x90] sm:$0xff]  ;;  %v7079_v54 = vld [vmem:[%s11711_s3 + $0xa0] sm:$0x1]  ;;  %v7078_v55 = vld [vmem:[%s11711_s3 + $0x98] sm:$0xff] }
  0x12   : > { %7523 = vmatpush3.msra.mxu0 %v8844_v7  ;;  %s8867_s8 = scalar_lea.vmem %s11708_s0, %s8764_s27  ;;  %v425_v11 = vand.u32 4294901760, %v8856_v8 }
  0x13   : > { %229 = vperm.xlu1 %8778, %v208_v4   ;;  %219 = vperm.xlu0 %8777, %v206_v5   ;;  %v255_v12 = vld [vmem:[%s8867_s8 + $0x7] sm:$0xff]  ;;  %v256_v13 = vld [vmem:[%s8867_s8 + $0xf] sm:$0xff]  ;;  %v257_v14 = vld [vmem:[%s8867_s8 + $0x17] sm:$0xff] }
  0x14   : > { %7568 = vmatprep.subr.mxu0 %v11714_v6  ;;  %v266_v15 = vsel %vm264_vm1, %v255_v12, 0  ;;  %v426_v16 = vsub.f32 %v8856_v8, %v425_v11  ;;  %v269_v17 = vsel %vm264_vm1, %v256_v13, 0  ;;  %v272_v18 = vsel %vm264_vm1, %v257_v14, 0  ;;  %v258_v19 = vld [vmem:[%s8867_s8 + $0x1f] sm:$0xff]  ;;  %v259_v20 = vld [vmem:[%s8867_s8 + $0x27] sm:$0xff]  ;;  %v260_v33 = vld [vmem:[%s8867_s8 + $0x2f] sm:$0xff] }
  0x15   : > { %v8882_v21 = vand.u32 4294901760, %v266_v15  ;;  %v8884_v22 = vand.u32 4294901760, %v269_v17  ;;  %v8886_v23 = vand.u32 4294901760, %v272_v18  ;;  %v275_v24 = vsel %vm264_vm1, %v258_v19, 0  ;;  %v261_v45 = vld [vmem:[%s8867_s8 + $0x37] sm:$0x1] }
  0x16   : > { %v427_v27 = vand.u32 4294901760, %v426_v16  ;;  %v8895_v28 = vand.u32 4294901760, %v275_v24  ;;  %v278_v32 = vsel %vm264_vm1, %v259_v20, 0  ;;  %v281_v39 = vsel %vm264_vm1, %v260_v33, 0  ;;  %v198_v14 = vld [vmem:[%s8867_s8 + $0x6] sm:$0xff]  ;;  %v200_v20 = vld [vmem:[%s8867_s8 + $0x16] sm:$0xff] }
  0x17   : > { %239 = vperm.xlu1 %8778, %v210_v9   ;;  %234 = vperm.xlu0 %8777, %v209_v10   ;;  %v8898_v29 = vsub.f32 %v266_v15, %v8882_v21  ;;  %v8901_v30 = vsub.f32 %v269_v17, %v8884_v22  ;;  %v8904_v31 = vsub.f32 %v272_v18, %v8886_v23  ;;  %v8917_v38 = vand.u32 4294901760, %v278_v32 }
  0x18   : > { %7546 = vmatpush3.msra.mxu1 %v427_v27  ;;  %v8931_v43 = vsub.f32 %v275_v24, %v8895_v28  ;;  %v8943_v48 = vand.u32 4294901760, %v281_v39  ;;  %v284_v53 = vsel %vm264_vm1, %v261_v45, 0 }
  0x19   : > { %v354_v34 = vand.u32 4294901760, %v8898_v29  ;;  %v364_v35 = vand.u32 4294901760, %v8901_v30  ;;  %7548 = vmatmul.mubr.f32.vlgmr.msra.gmra.mrb[0].mxu1 %v8882_v21  ;;  %7591 = vmatprep.subr.mxu1 %v11714_v6  ;;  %v374_v42 = vand.u32 4294901760, %v8904_v31  ;;  %v8952_v52 = vsub.f32 %v278_v32, %v8917_v38 }
  0x1a   : > { %7550 = vmatprep.mubr.msk.f32.mxu1 %vm8794_vm0, %v11714_v6  ;;  %7592 = vmatpush3.msra.mxu1 %v8844_v7  ;;  %v384_v51 = vand.u32 4294901760, %v8931_v43  ;;  %v8966_v56 = vsub.f32 %v281_v39, %v8943_v48  ;;  %v8975_v60 = vand.u32 4294901760, %v284_v53 }
  0x1b   : > { %1732 = vperm.xlu1 %8778, %v7073_v25   ;;  %244 = vperm.xlu0 %8777, %v211_v26   ;;  %v355_v40 = vsub.f32 %v8898_v29, %v354_v34  ;;  %v365_v41 = vsub.f32 %v8901_v30, %v364_v35  ;;  %v375_v50 = vsub.f32 %v8904_v31, %v374_v42  ;;  %v394_v59 = vand.u32 4294901760, %v8952_v52 }
  0x1c   : > { %7637 = vmatprep.subr.mxu1 %v11714_v6  ;;  %v385_v58 = vsub.f32 %v8931_v43, %v384_v51  ;;  %v404_v63 = vand.u32 4294901760, %v8966_v56  ;;  %v413_v0 = vsub.f32 %v284_v53, %v8975_v60 }
  0x1d   : > { %v356_v44 = vand.u32 4294901760, %v355_v40  ;;  %7551 = vmatmul.mubr.f32.gmra.mrb[2].mxu1 %v8884_v22  ;;  %v366_v49 = vand.u32 4294901760, %v365_v41  ;;  %v376_v57 = vand.u32 4294901760, %v375_v50  ;;  %v395_v62 = vsub.f32 %v8952_v52, %v394_v59  ;;  %v203_v41 = vld [vmem:[%s8867_s8 + $0x2e] sm:$0xff] }
  0x1e   : > { %7553 = vmatprep.mubr.msk.f32.mxu1 %vm8794_vm0, %v11714_v6  ;;  %v386_v61 = vand.u32 4294901760, %v385_v58  ;;  %v405_v2 = vsub.f32 %v8966_v56, %v404_v63  ;;  %v414_v3 = vand.u32 4294901760, %v413_v0 }
  0x1f   : > { %1742 = vperm.xlu1 %8778, %v7075_v36   ;;  %1737 = vperm.xlu0 %8777, %v7074_v37   ;;  %v396_v1 = vand.u32 4294901760, %v395_v62  ;;  %v202_v37 = vld [vmem:[%s8867_s8 + $0x26] sm:$0xff] }
  0x20   : > { %7525 = vmatmul.mubr.f32.vlgmr.msra.gmra.mrb[0].mxu0 %v356_v44  ;;  %v406_v4 = vand.u32 4294901760, %v405_v2  ;;  %v415_v5 = vsub.f32 %v413_v0, %v414_v3 }
  0x21   : > { %7527 = vmatprep.mubr.msk.f32.mxu0 %vm8794_vm0, %v11714_v6  ;;  %7569 = vmatpush3.msra.mxu0 %v8856_v8 }
  0x22   : > { %7554 = vmatmul.mubr.f32.gmra.mrb[4].mxu1 %v8886_v23  ;;  %7614 = vmatprep.subr.mxu0 %v11714_v6  ;;  %v416_v9 = vand.u32 4294901760, %v415_v5 }
  0x23   : > { %1752 = vperm.xlu1 %8778, %v7077_v46   ;;  %1747 = vperm.xlu0 %8777, %v7076_v47  }
  0x24   : > { %7528 = vmatmul.mubr.f32.gmra.mrb[2].mxu0 %v366_v49  ;;  %7556 = vmatprep.mubr.msk.f32.mxu1 %vm8794_vm0, %v11714_v6 }
  0x25   : > { %7530 = vmatprep.mubr.msk.f32.mxu0 %vm8794_vm0, %v11714_v6 }
  0x26   : > { %7557 = vmatmul.mubr.f32.gmra.mrb[6].mxu1 %v8895_v28 }
  0x27   : > { %1762 = vperm.xlu1 %8778, %v7079_v54   ;;  %1757 = vperm.xlu0 %8777, %v7078_v55  }
  0x28   : > { %7531 = vmatmul.mubr.f32.gmra.mrb[4].mxu0 %v376_v57  ;;  %7559 = vmatprep.mubr.msk.f32.mxu1 %vm8794_vm0, %v11714_v6 }
  0x29   : > { %7533 = vmatprep.mubr.msk.f32.mxu0 %vm8794_vm0, %v11714_v6 }
  0x2a   : > { %7560 = vmatmul.mubr.f32.gmra.mrb[8].mxu1 %v8917_v38 }
  0x2b   : > { %7562 = vmatprep.mubr.msk.f32.mxu1 %vm8794_vm0, %v11714_v6 }
  0x2c   : > { %7534 = vmatmul.mubr.f32.gmra.mrb[6].mxu0 %v386_v61 }
  0x2d   : > { %7536 = vmatprep.mubr.msk.f32.mxu0 %vm8794_vm0, %v11714_v6 }
  0x2e   : > { %7563 = vmatmul.mubr.f32.gmra.mrb[10].mxu1 %v8943_v48 }
  0x2f   : > { %7565 = vmatprep.mubr.msk.f32.mxu1 %vm8794_vm0, %v11714_v6 }
  0x30   : > { %7537 = vmatmul.mubr.f32.gmra.mrb[8].mxu0 %v396_v1 }
  0x31   : > { %7539 = vmatprep.mubr.msk.f32.mxu0 %vm8794_vm0, %v11714_v6 }
  0x32   : > { %7566 = vmatmul.mubr.f32.gmra.mrb[12].mxu1 %v8975_v60 }
  0x33   : > { %7593 = vmatprep.mubr.msk.f32.mxu1 %vm8794_vm0, %v11714_v6 }
  0x34   : > { %7540 = vmatmul.mubr.f32.gmra.mrb[10].mxu0 %v406_v4 }
  0x35   : > { %7542 = vmatprep.mubr.msk.f32.mxu0 %vm8794_vm0, %v11714_v6 }
  0x36   : > { %7594 = vmatmul.mubr.f32.vlgmr.msra.gmra.mrb[14].mxu1 %v354_v34 }
  0x37   : > { %7596 = vmatprep.mubr.msk.f32.mxu1 %vm8794_vm0, %v11714_v6  ;;  %7638 = vmatpush3.msra.mxu1 %v8844_v7  ;;  %v254_v7 = vld [vmem:[%s11709_s1] sm:$0xff] }
  0x38   : > { %7543 = vmatmul.mubr.f32.gmra.mrb[12].mxu0 %v416_v9  ;;  %7683 = vmatprep.subr.mxu1 %v11714_v6  ;;  %v9031_v10 = vand.u32 4294901760, %v254_v7 }
  0x39   : > { %7570 = vmatprep.mubr.msk.f32.mxu0 %vm8794_vm0, %v11714_v6 }
  0x3a   : > { %7597 = vmatmul.mubr.f32.gmra.mrb[16].mxu1 %v364_v35  ;;  %v9041_v8 = vsub.f32 %v254_v7, %v9031_v10  ;;  %v7080_v7 = vld [vmem:[%s11709_s1 + $0x10] sm:$0xff] }
  0x3b   : > { %7599 = vmatprep.mubr.msk.f32.mxu1 %vm8794_vm0, %v11714_v6 }
  0x3c   : > { %7571 = vmatmul.mubr.f32.vlgmr.msra.gmra.mrb[14].mxu0 %v8898_v29  ;;  %v201_v29 = vld [vmem:[%s8867_s8 + $0x1e] sm:$0xff] }
  0x3d   : > { %7573 = vmatprep.mubr.msk.f32.mxu0 %vm8794_vm0, %v11714_v6  ;;  %7615 = vmatpush3.msra.mxu0 %v425_v11  ;;  %v1150_v11 = vand.u32 4294901760, %v9041_v8 }
  0x3e   : > { %7660 = vmatprep.subr.mxu0 %v11714_v6  ;;  %7600 = vmatmul.mubr.f32.gmra.mrb[18].mxu1 %v374_v42 }
  0x3f   : > { %7602 = vmatprep.mubr.msk.f32.mxu1 %vm8794_vm0, %v11714_v6  ;;  %v1151_v12 = vsub.f32 %v9041_v8, %v1150_v11 }
  0x40   : > { %7574 = vmatmul.mubr.f32.gmra.mrb[16].mxu0 %v8901_v30 }
  0x41   : > { %7576 = vmatprep.mubr.msk.f32.mxu0 %vm8794_vm0, %v11714_v6  ;;  %v1152_v13 = vand.u32 4294901760, %v1151_v12 }
  0x42   : > { %7603 = vmatmul.mubr.f32.gmra.mrb[20].mxu1 %v384_v51 }
  0x43   : > { %7605 = vmatprep.mubr.msk.f32.mxu1 %vm8794_vm0, %v11714_v6 }
  0x44   : > { %7577 = vmatmul.mubr.f32.gmra.mrb[18].mxu0 %v8904_v31 }
  0x45   : > { %7579 = vmatprep.mubr.msk.f32.mxu0 %vm8794_vm0, %v11714_v6 }
  0x46   : > { %7606 = vmatmul.mubr.f32.gmra.mrb[22].mxu1 %v394_v59 }
  0x47   : > { %7608 = vmatprep.mubr.msk.f32.mxu1 %vm8794_vm0, %v11714_v6 }
  0x48   : > { %7580 = vmatmul.mubr.f32.gmra.mrb[20].mxu0 %v8931_v43 }
  0x49   : > { %7582 = vmatprep.mubr.msk.f32.mxu0 %vm8794_vm0, %v11714_v6 }
  0x4a   : > { %7609 = vmatmul.mubr.f32.gmra.mrb[24].mxu1 %v404_v63 }
  0x4b   : > { %7611 = vmatprep.mubr.msk.f32.mxu1 %vm8794_vm0, %v11714_v6 }
  0x4c   : > { %7583 = vmatmul.mubr.f32.gmra.mrb[22].mxu0 %v8952_v52 }
  0x4d   : > { %7585 = vmatprep.mubr.msk.f32.mxu0 %vm8794_vm0, %v11714_v6 }
  0x4e   : > { %7612 = vmatmul.mubr.f32.gmra.mrb[26].mxu1 %v414_v3 }
  0x4f   : > { %7639 = vmatprep.mubr.msk.f32.mxu1 %vm8794_vm0, %v11714_v6 }
  0x50   : > { %7586 = vmatmul.mubr.f32.gmra.mrb[24].mxu0 %v8966_v56 }
  0x51   : > { %7588 = vmatprep.mubr.msk.f32.mxu0 %vm8794_vm0, %v11714_v6 }
  0x52   : > { %7640 = vmatmul.mubr.f32.vlgmr.msra.gmra.mrb[28].mxu1 %v8882_v21 }
  0x53   : > { %7642 = vmatprep.mubr.msk.f32.mxu1 %vm8794_vm0, %v11714_v6  ;;  %7684 = vmatpush3.msra.mxu1 %v1152_v13 }
  0x54   : > { %7589 = vmatmul.mubr.f32.gmra.mrb[26].mxu0 %v413_v0  ;;  %7729 = vmatprep.subr.mxu1 %v11714_v6 }
  0x55   : > { %7616 = vmatprep.mubr.msk.f32.mxu0 %vm8794_vm0, %v11714_v6 }
  0x56   : > { %7643 = vmatmul.mubr.f32.gmra.mrb[30].mxu1 %v8884_v22 }
  0x57   : > { %7645 = vmatprep.mubr.msk.f32.mxu1 %vm8794_vm0, %v11714_v6 }
  0x58   : > { %7617 = vmatmul.mubr.f32.vlgmr.msra.gmra.mrb[28].mxu0 %v8882_v21 }
  0x59   : > { %7619 = vmatprep.mubr.msk.f32.mxu0 %vm8794_vm0, %v11714_v6  ;;  %7661 = vmatpush3.msra.mxu0 %v9031_v10 }
  0x5a   : > { %7706 = vmatprep.subr.mxu0 %v11714_v6  ;;  %7646 = vmatmul.mubr.f32.gmra.mrb[32].mxu1 %v8886_v23 }
  0x5b   : > { %7648 = vmatprep.mubr.msk.f32.mxu1 %vm8794_vm0, %v11714_v6 }
  0x5c   : > { %7620 = vmatmul.mubr.f32.gmra.mrb[30].mxu0 %v8884_v22 }
  0x5d   : > { %7622 = vmatprep.mubr.msk.f32.mxu0 %vm8794_vm0, %v11714_v6 }
  0x5e   : > { %7649 = vmatmul.mubr.f32.gmra.mrb[34].mxu1 %v8895_v28 }
  0x5f   : > { %7651 = vmatprep.mubr.msk.f32.mxu1 %vm8794_vm0, %v11714_v6 }
  0x60   : > { %7623 = vmatmul.mubr.f32.gmra.mrb[32].mxu0 %v8886_v23  ;;  %v199_v23 = vld [vmem:[%s8867_s8 + $0xe] sm:$0xff] }
  0x61   : > { %7625 = vmatprep.mubr.msk.f32.mxu0 %vm8794_vm0, %v11714_v6 }
  0x62   : > { %7652 = vmatmul.mubr.f32.gmra.mrb[36].mxu1 %v8917_v38 }
  0x63   : > { %7654 = vmatprep.mubr.msk.f32.mxu1 %vm8794_vm0, %v11714_v6 }
  0x64   : > { %7626 = vmatmul.mubr.f32.gmra.mrb[34].mxu0 %v8895_v28 }
  0x65   : > { %7628 = vmatprep.mubr.msk.f32.mxu0 %vm8794_vm0, %v11714_v6 }
  0x66   : > { %7655 = vmatmul.mubr.f32.gmra.mrb[38].mxu1 %v8943_v48 }
  0x67   : > { %7657 = vmatprep.mubr.msk.f32.mxu1 %vm8794_vm0, %v11714_v6 }
  0x68   : > { %7629 = vmatmul.mubr.f32.gmra.mrb[36].mxu0 %v8917_v38 }
  0x69   : > { %7631 = vmatprep.mubr.msk.f32.mxu0 %vm8794_vm0, %v11714_v6 }
  0x6a   : > { %7658 = vmatmul.mubr.f32.gmra.mrb[40].mxu1 %v8975_v60 }
  0x6b   : > { %7685 = vmatprep.mubr.msk.f32.mxu1 %vm8794_vm0, %v11714_v6 }
  0x6c   : > { %7632 = vmatmul.mubr.f32.gmra.mrb[38].mxu0 %v8943_v48  ;;  %v204_v48 = vld [vmem:[%s8867_s8 + $0x36] sm:$0x1] }
  0x6d   : > { %7634 = vmatprep.mubr.msk.f32.mxu0 %vm8794_vm0, %v11714_v6 }
  0x70   : > { %7635 = vmatmul.mubr.f32.gmra.mrb[40].mxu0 %v8975_v60 }
  0x71   : > { %7662 = vmatprep.mubr.msk.f32.mxu0 %vm8794_vm0, %v11714_v6 }
  0x8e   : > { %v9110_v15 = vpop.permute.xlu0 %214  ;;  %v9112_v16 = vpop.permute.xlu1 %224 }
  0x8f   : > { %v247_v17 = vmul.f32 %v9110_v15, %v198_v14  ;;  %v249_v26 = vmul.f32 %v9112_v16, %v200_v20 }
  0x91   : > { %v991_v18 = vsel %vm264_vm1, %v247_v17, 0  ;;  %v997_v33 = vsel %vm264_vm1, %v249_v26, 0 }
  0x92   : > { %v9116_v19 = vand.u32 4294901760, %v991_v18  ;;  %v9122_v22 = vpop.permute.xlu0 %219  ;;  %v9126_v24 = vpop.permute.xlu1 %229  ;;  %v9150_v38 = vand.u32 4294901760, %v997_v33 }
  0x93   : > { %v248_v27 = vmul.f32 %v9122_v22, %v199_v23  ;;  %v250_v34 = vmul.f32 %v9126_v24, %v201_v29 }
  0x94   : > { %v9120_v21 = vsub.f32 %v991_v18, %v9116_v19  ;;  %7686 = vmatmul.mubr.f32.vlgmr.msra.gmra.mrb[42].mxu1 %v9116_v19  ;;  %v9217_v0 = vsub.f32 %v997_v33, %v9150_v38 }
  0x95   : > { %7688 = vmatprep.mubr.msk.f32.mxu1 %vm8794_vm0, %v11714_v6  ;;  %7730 = vmatpush3.msra.mxu1 %v9031_v10  ;;  %v994_v30 = vsel %vm264_vm1, %v248_v27, 0  ;;  %v1000_v39 = vsel %vm264_vm1, %v250_v34, 0 }
  0x96   : > { %v1079_v25 = vand.u32 4294901760, %v9120_v21  ;;  %7775 = vmatprep.subr.mxu1 %v11714_v6  ;;  %v9138_v32 = vand.u32 4294901760, %v994_v30  ;;  %v9142_v35 = vpop.permute.xlu1 %239  ;;  %v9144_v36 = vpop.permute.xlu0 %234  ;;  %v9164_v43 = vand.u32 4294901760, %v1000_v39  ;;  %v1099_v2 = vand.u32 4294901760, %v9217_v0 }
  0x97   : > { %v251_v40 = vmul.f32 %v9144_v36, %v202_v37  ;;  %v252_v44 = vmul.f32 %v9142_v35, %v203_v41 }
  0x98   : > { %v1080_v28 = vsub.f32 %v9120_v21, %v1079_v25  ;;  %7689 = vmatmul.mubr.f32.gmra.mrb[44].mxu1 %v9138_v32  ;;  %v9197_v57 = vsub.f32 %v994_v30, %v9138_v32  ;;  %v1100_v3 = vsub.f32 %v9217_v0, %v1099_v2  ;;  %v1108_v4 = vsub.f32 %v1000_v39, %v9164_v43 }
  0x99   : > { %7691 = vmatprep.mubr.msk.f32.mxu1 %vm8794_vm0, %v11714_v6  ;;  %v1003_v45 = vsel %vm264_vm1, %v251_v40, 0  ;;  %v1006_v50 = vsel %vm264_vm1, %v252_v44, 0  ;;  %v1717_v44 = vld [vmem:[%s8867_s8 + $0x18] sm:$0xff] }
  0x9a   : > { %v1081_v31 = vand.u32 4294901760, %v1080_v28  ;;  %v9160_v42 = vpop.permute.xlu1 %1732  ;;  %v9171_v47 = vpop.permute.xlu0 %244  ;;  %v9177_v49 = vand.u32 4294901760, %v1003_v45  ;;  %v9184_v52 = vand.u32 4294901760, %v1006_v50  ;;  %v1089_v60 = vand.u32 4294901760, %v9197_v57 }
  0x9b   : > { %v9169_v46 = vmul.f32 %v9160_v42, %v200_v20  ;;  %v253_v51 = vmul.f32 %v9171_v47, %v204_v48  ;;  %v1101_v9 = vand.u32 4294901760, %v1100_v3  ;;  %v1109_v13 = vand.u32 4294901760, %v1108_v4 }
  0x9c   : > { %7663 = vmatmul.mubr.f32.vlgmr.msra.gmra.mrb[42].mxu0 %v1081_v31  ;;  %7692 = vmatmul.mubr.f32.gmra.mrb[46].mxu1 %v9150_v38  ;;  %v1090_v61 = vsub.f32 %v9197_v57, %v1089_v60  ;;  %v9232_v5 = vsub.f32 %v1003_v45, %v9177_v49  ;;  %v9242_v12 = vsub.f32 %v1006_v50, %v9184_v52 }
  0x9d   : > { %7707 = vmatpush3.msra.mxu0 %v9041_v8  ;;  %7665 = vmatprep.mubr.msk.f32.mxu0 %vm8794_vm0, %v11714_v6  ;;  %v1009_v53 = vsel %vm264_vm1, %v253_v51, 0  ;;  %v1110_v17 = vsub.f32 %v1108_v4, %v1109_v13  ;;  %v1715_v8 = vld [vmem:[%s8867_s8 + $0x8] sm:$0xff] }
  0x9e   : > { %7752 = vmatprep.subr.mxu0 %v11714_v6  ;;  %7694 = vmatprep.mubr.msk.f32.mxu1 %vm8794_vm0, %v11714_v6  ;;  %v9187_v54 = vpop.permute.xlu1 %1742  ;;  %v9192_v55 = vand.u32 4294901760, %v1009_v53  ;;  %v9194_v56 = vpop.permute.xlu0 %1737  ;;  %v1091_v62 = vand.u32 4294901760, %v1090_v61  ;;  %v1119_v14 = vand.u32 4294901760, %v9232_v5  ;;  %v1129_v26 = vand.u32 4294901760, %v9242_v12 }
  0x9f   : > { %v9200_v58 = vmul.f32 %v9187_v54, %v202_v37  ;;  %v9204_v59 = vmul.f32 %v9194_v56, %v201_v29  ;;  %v1111_v23 = vand.u32 4294901760, %v1110_v17  ;;  %v1767_v51 = vmul.f32 %v9187_v54, %v1717_v44 }
  0xa0   : > { %7695 = vmatmul.mubr.f32.gmra.mrb[48].mxu1 %v9164_v43  ;;  %7666 = vmatmul.mubr.f32.gmra.mrb[44].mxu0 %v1091_v62  ;;  %v9251_v20 = vsub.f32 %v1009_v53, %v9192_v55  ;;  %v1130_v28 = vsub.f32 %v9242_v12, %v1129_v26 }
  0xa1   : > { %7697 = vmatprep.mubr.msk.f32.mxu1 %vm8794_vm0, %v11714_v6  ;;  %11721 = vst [vmem:[#allocation2_spill] sm:$0xff] %v9200_v58  ;;  %7668 = vmatprep.mubr.msk.f32.mxu0 %vm8794_vm0, %v11714_v6 }
  0xa2   : > { %v9214_v63 = vpop.permute.xlu0 %1747  ;;  %v1139_v29 = vand.u32 4294901760, %v9251_v20  ;;  %v1131_v31 = vand.u32 4294901760, %v1130_v28 }
  0xa3   : > { %v9222_v1 = vmul.f32 %v9214_v63, %v203_v41 }
  0xa4   : > { %7698 = vmatmul.mubr.f32.gmra.mrb[50].mxu1 %v9177_v49  ;;  %7669 = vmatmul.mubr.f32.gmra.mrb[46].mxu0 %v1101_v9  ;;  %v1140_v33 = vsub.f32 %v9251_v20, %v1139_v29  ;;  %v9351_v9 = vpop.permute.xlu1 %1752 }
  0xa5   : > { %7700 = vmatprep.mubr.msk.f32.mxu1 %vm8794_vm0, %v11714_v6  ;;  %11722 = vst [vmem:[#allocation3_spill] sm:$0xff] %v9222_v1  ;;  %7671 = vmatprep.mubr.msk.f32.mxu0 %vm8794_vm0, %v11714_v6  ;;  %11723 = vst [vmem:[#allocation4_spill] sm:$0xff] %v9351_v9 }
  0xa6   : > { %v1141_v37 = vand.u32 4294901760, %v1140_v33 }
  0xa8   : > { %7701 = vmatmul.mubr.f32.gmra.mrb[52].mxu1 %v9184_v52  ;;  %7672 = vmatmul.mubr.f32.gmra.mrb[48].mxu0 %v1111_v23 }
  0xa9   : > { %7703 = vmatprep.mubr.msk.f32.mxu1 %vm8794_vm0, %v11714_v6  ;;  %7674 = vmatprep.mubr.msk.f32.mxu0 %vm8794_vm0, %v11714_v6 }
  0xac   : > { %7704 = vmatmul.mubr.f32.gmra.mrb[54].mxu1 %v9192_v55 }
  0xad   : > { %7731 = vmatprep.mubr.msk.f32.mxu1 %vm8794_vm0, %v11714_v6 }
  0xb0   : > { %7732 = vmatmul.mubr.f32.vlgmr.msra.gmra.mrb[56].mxu1 %v1079_v25  ;;  %v1120_v25 = vsub.f32 %v9232_v5, %v1119_v14 }
  0xb1   : > { %7734 = vmatprep.mubr.msk.f32.mxu1 %vm8794_vm0, %v11714_v6  ;;  %7776 = vmatpush3.msra.mxu1 %v9031_v10  ;;  %v9239_v10 = vand.u32 4294901760, %v7080_v7 }
  0xb2   : > { %7821 = vmatprep.subr.mxu1 %v11714_v6  ;;  %v1121_v27 = vand.u32 4294901760, %v1120_v25 }
  0xb3   : > { %v9248_v18 = vsub.f32 %v7080_v7, %v9239_v10  ;;  %v1719_v7 = vld [vmem:[%s8867_s8 + $0x28] sm:$0xff] }
  0xb4   : > { %7735 = vmatmul.mubr.f32.gmra.mrb[58].mxu1 %v1089_v60  ;;  %7675 = vmatmul.mubr.f32.gmra.mrb[50].mxu0 %v1121_v27  ;;  %v1720_v27 = vld [vmem:[%s8867_s8 + $0x30] sm:$0xff] }
  0xb5   : > { %7737 = vmatprep.mubr.msk.f32.mxu1 %vm8794_vm0, %v11714_v6  ;;  %v1934_v30 = vand.u32 4294901760, %v9248_v18  ;;  %7677 = vmatprep.mubr.msk.f32.mxu0 %vm8794_vm0, %v11714_v6 }
  0xb7   : > { %v1935_v34 = vsub.f32 %v9248_v18, %v1934_v30 }
  0xb8   : > { %7738 = vmatmul.mubr.f32.gmra.mrb[60].mxu1 %v1099_v2  ;;  %7678 = vmatmul.mubr.f32.gmra.mrb[52].mxu0 %v1131_v31  ;;  %v9345_v2 = vsel %vm264_vm1, %v1767_v51, 0 }
  0xb9   : > { %7740 = vmatprep.mubr.msk.f32.mxu1 %vm8794_vm0, %v11714_v6  ;;  %7680 = vmatprep.mubr.msk.f32.mxu0 %vm8794_vm0, %v11714_v6  ;;  %v1936_v39 = vand.u32 4294901760, %v1935_v34 }
  0xbc   : > { %7741 = vmatmul.mubr.f32.gmra.mrb[62].mxu1 %v1109_v13  ;;  %7681 = vmatmul.mubr.f32.gmra.mrb[54].mxu0 %v1141_v37  ;;  %v9360_v13 = vand.u32 4294901760, %v9345_v2 }
  0xbd   : > { %7743 = vmatprep.mubr.msk.f32.mxu1 %vm8794_vm0, %v11714_v6  ;;  %7708 = vmatprep.mubr.msk.f32.mxu0 %vm8794_vm0, %v11714_v6 }
  0xc0   : > { %7744 = vmatmul.mubr.f32.gmra.mrb[64].mxu1 %v1119_v14  ;;  %7709 = vmatmul.mubr.f32.vlgmr.msra.gmra.mrb[56].mxu0 %v9120_v21  ;;  %v1716_v21 = vld [vmem:[%s8867_s8 + $0x10] sm:$0xff] }
  0xc1   : > { %7746 = vmatprep.mubr.msk.f32.mxu1 %vm8794_vm0, %v11714_v6  ;;  %7753 = vmatpush3.msra.mxu0 %v1150_v11  ;;  %v1765_v11 = vmul.f32 %v9160_v42, %v1715_v8  ;;  %v1766_v41 = vmul.f32 %v9194_v56, %v1716_v21  ;;  %v9389_v8 = vpop.permute.xlu1 %1762 }
  0xc2   : > { %7711 = vmatprep.mubr.msk.f32.mxu0 %vm8794_vm0, %v11714_v6  ;;  %7798 = vmatprep.subr.mxu0 %v11714_v6  ;;  %11725 = vst [vmem:[#allocation6_spill] sm:$0xff] %v9389_v8 }
  0xc3   : > { %v9316_v40 = vsel %vm264_vm1, %v1765_v11, 0  ;;  %v9331_v53 = vsel %vm264_vm1, %v1766_v41, 0  ;;  %v1721_v11 = vld [vmem:[%s8867_s8 + $0x38] sm:$0x1] }
  0xc4   : > { %7747 = vmatmul.mubr.f32.gmra.mrb[66].mxu1 %v1129_v26  ;;  %7712 = vmatmul.mubr.f32.gmra.mrb[58].mxu0 %v9197_v57  ;;  %v9327_v48 = vand.u32 4294901760, %v9316_v40  ;;  %v1718_v57 = vld [vmem:[%s8867_s8 + $0x20] sm:$0xff]  ;;  %v9341_v61 = vand.u32 4294901760, %v9331_v53  ;;  %v9371_v26 = vpop.permute.xlu0 %1757 }
  0xc5   : > { %7749 = vmatprep.mubr.msk.f32.mxu1 %vm8794_vm0, %v11714_v6  ;;  %7714 = vmatprep.mubr.msk.f32.mxu0 %vm8794_vm0, %v11714_v6  ;;  %v1768_v3 = vmul.f32 %v9214_v63, %v1718_v57  ;;  %11724 = vst [vmem:[#allocation5_spill] sm:$0xff] %v9371_v26  ;;  %v1770_v37 = vmul.f32 %v9371_v26, %v1720_v27 }
  0xc7   : > { %v9403_v51 = vsel %vm264_vm1, %v1770_v37, 0 }
  0xc8   : > { %7750 = vmatmul.mubr.f32.gmra.mrb[68].mxu1 %v1139_v29  ;;  %7715 = vmatmul.mubr.f32.gmra.mrb[60].mxu0 %v9217_v0 }
  0xc9   : > { %7777 = vmatprep.mubr.msk.f32.mxu1 %vm8794_vm0, %v11714_v6  ;;  %7717 = vmatprep.mubr.msk.f32.mxu0 %vm8794_vm0, %v11714_v6 }
  0xcc   : > { %7778 = vmatmul.mubr.f32.vlgmr.msra.gmra.mrb[70].mxu1 %v9116_v19  ;;  %7718 = vmatmul.mubr.f32.gmra.mrb[62].mxu0 %v1108_v4 }
  0xcd   : > { %7780 = vmatprep.mubr.msk.f32.mxu1 %vm8794_vm0, %v11714_v6  ;;  %7822 = vmatpush3.msra.mxu1 %v1936_v39 }
  0xce   : > { %7867 = vmatprep.subr.mxu1 %v11714_v6  ;;  %7720 = vmatprep.mubr.msk.f32.mxu0 %vm8794_vm0, %v11714_v6 }
  0xd0   : > { %7781 = vmatmul.mubr.f32.gmra.mrb[72].mxu1 %v9138_v32  ;;  %7721 = vmatmul.mubr.f32.gmra.mrb[64].mxu0 %v9232_v5 }
  0xd1   : > { %7783 = vmatprep.mubr.msk.f32.mxu1 %vm8794_vm0, %v11714_v6  ;;  %7723 = vmatprep.mubr.msk.f32.mxu0 %vm8794_vm0, %v11714_v6 }
  0xd4   : > { %7784 = vmatmul.mubr.f32.gmra.mrb[74].mxu1 %v9150_v38  ;;  %7724 = vmatmul.mubr.f32.gmra.mrb[66].mxu0 %v9242_v12 }
  0xd5   : > { %7786 = vmatprep.mubr.msk.f32.mxu1 %vm8794_vm0, %v11714_v6  ;;  %7726 = vmatprep.mubr.msk.f32.mxu0 %vm8794_vm0, %v11714_v6 }
  0xd8   : > { %7787 = vmatmul.mubr.f32.gmra.mrb[76].mxu1 %v9164_v43  ;;  %7727 = vmatmul.mubr.f32.gmra.mrb[68].mxu0 %v9251_v20  ;;  %v9367_v20 = vsel %vm264_vm1, %v1768_v3, 0 }
  0xd9   : > { %7789 = vmatprep.mubr.msk.f32.mxu1 %vm8794_vm0, %v11714_v6  ;;  %7754 = vmatprep.mubr.msk.f32.mxu0 %vm8794_vm0, %v11714_v6  ;;  %v9381_v29 = vand.u32 4294901760, %v9367_v20 }
  0xdc   : > { %7790 = vmatmul.mubr.f32.gmra.mrb[78].mxu1 %v9177_v49  ;;  %7755 = vmatmul.mubr.f32.vlgmr.msra.gmra.mrb[70].mxu0 %v9116_v19  ;;  %v1769_v19 = vmul.f32 %v9351_v9, %v1719_v7 }
  0xdd   : > { %7792 = vmatprep.mubr.msk.f32.mxu1 %vm8794_vm0, %v11714_v6  ;;  %7799 = vmatpush3.msra.mxu0 %v9239_v10 }
  0xde   : > { %7757 = vmatprep.mubr.msk.f32.mxu0 %vm8794_vm0, %v11714_v6  ;;  %7844 = vmatprep.subr.mxu0 %v11714_v6  ;;  %v9384_v34 = vsel %vm264_vm1, %v1769_v19, 0 }
  0xdf   : > { %v9399_v41 = vand.u32 4294901760, %v9384_v34 }
  0xe0   : > { %7793 = vmatmul.mubr.f32.gmra.mrb[80].mxu1 %v9184_v52  ;;  %7758 = vmatmul.mubr.f32.gmra.mrb[72].mxu0 %v9138_v32 }
  0xe1   : > { %7795 = vmatprep.mubr.msk.f32.mxu1 %vm8794_vm0, %v11714_v6  ;;  %7760 = vmatprep.mubr.msk.f32.mxu0 %vm8794_vm0, %v11714_v6 }
  0xe4   : > { %7796 = vmatmul.mubr.f32.gmra.mrb[82].mxu1 %v9192_v55  ;;  %7761 = vmatmul.mubr.f32.gmra.mrb[74].mxu0 %v9150_v38 }
  0xe5   : > { %7823 = vmatprep.mubr.msk.f32.mxu1 %vm8794_vm0, %v11714_v6  ;;  %7763 = vmatprep.mubr.msk.f32.mxu0 %vm8794_vm0, %v11714_v6 }
  0xe8   : > { %7824 = vmatmul.mubr.f32.vlgmr.msra.gmra.mrb[84].mxu1 %v9327_v48  ;;  %7764 = vmatmul.mubr.f32.gmra.mrb[76].mxu0 %v9164_v43 }
  0xe9   : > { %7826 = vmatprep.mubr.msk.f32.mxu1 %vm8794_vm0, %v11714_v6  ;;  %7868 = vmatpush3.msra.mxu1 %v9239_v10 }
  0xea   : > { %7913 = vmatprep.subr.mxu1 %v11714_v6  ;;  %7766 = vmatprep.mubr.msk.f32.mxu0 %vm8794_vm0, %v11714_v6 }
  0xec   : > { %v494_v45 = vpop.f32.mrb[0].mxu1  ;;  %7827 = vmatmul.mubr.f32.gmra.mrb[86].mxu1 %v9341_v61  ;;  %7767 = vmatmul.mubr.f32.gmra.mrb[78].mxu0 %v9177_v49 }
  0xed   : > { %v7549_v50 = vpop.f32.mrb[1].mxu1  ;;  %7829 = vmatprep.mubr.msk.f32.mxu1 %vm8794_vm0, %v11714_v6  ;;  %7769 = vmatprep.mubr.msk.f32.mxu0 %vm8794_vm0, %v11714_v6 }
  0xee   : > { %v1771_v50 = vmul.f32 %v9389_v8, %v1721_v11 }
  0xf0   : > { %v500_v60 = vpop.f32.mrb[2].mxu1  ;;  %7830 = vmatmul.mubr.f32.gmra.mrb[88].mxu1 %v9360_v13  ;;  %v9421_v43 = vsel %vm264_vm1, %v1771_v50, 0  ;;  %7770 = vmatmul.mubr.f32.gmra.mrb[80].mxu0 %v9184_v52 }
  0xf1   : > { %v7552_v0 = vpop.f32.mrb[3].mxu1  ;;  %7832 = vmatprep.mubr.msk.f32.mxu1 %vm8794_vm0, %v11714_v6  ;;  %v9437_v19 = vand.u32 4294901760, %v9421_v43  ;;  %7772 = vmatprep.mubr.msk.f32.mxu0 %vm8794_vm0, %v11714_v6 }
  0xf2   : > { %v9418_v0 = vand.u32 4294901760, %v9403_v51 }
  0xf3   : > { %v358_v62 = vpop.f32.mrb[0].mxu0 }
  0xf4   : > { %v7526_v4 = vpop.f32.mrb[1].mxu0  ;;  %v9349_v5 = vadd.f32 %v494_v45, %v358_v62  ;;  %7833 = vmatmul.mubr.f32.gmra.mrb[90].mxu1 %v9381_v29  ;;  %v9415_v62 = vsub.f32 %v9316_v40, %v9327_v48  ;;  %7773 = vmatmul.mubr.f32.gmra.mrb[82].mxu0 %v9192_v55 }
  0xf5   : > { %v506_v12 = vpop.f32.mrb[4].mxu1  ;;  %7835 = vmatprep.mubr.msk.f32.mxu1 %vm8794_vm0, %v11714_v6  ;;  %7800 = vmatprep.mubr.msk.f32.mxu0 %vm8794_vm0, %v11714_v6 }
  0xf6   : > { %v7555_v17 = vpop.f32.mrb[5].mxu1 }
  0xf7   : > { %v368_v14 = vpop.f32.mrb[2].mxu0  ;;  %v9434_v17 = vsub.f32 %v9331_v53, %v9341_v61 }
  0xf8   : > { %v7529_v23 = vpop.f32.mrb[3].mxu0  ;;  %v9369_v25 = vadd.f32 %v500_v60, %v368_v14  ;;  %7836 = vmatmul.mubr.f32.gmra.mrb[92].mxu1 %v9399_v41  ;;  %v1863_v14 = vand.u32 4294901760, %v9415_v62 }
  0xf9   : > { %v512_v28 = vpop.f32.mrb[6].mxu1  ;;  %7838 = vmatprep.mubr.msk.f32.mxu1 %vm8794_vm0, %v11714_v6  ;;  %v1873_v37 = vand.u32 4294901760, %v9434_v17 }
  0xfa   : > { %v7558_v33 = vpop.f32.mrb[7].mxu1 }
  0xfb   : > { %v378_v31 = vpop.f32.mrb[4].mxu0  ;;  %v9450_v33 = vsub.f32 %v9345_v2, %v9360_v13  ;;  %v9462_v2 = vsub.f32 %v9367_v20, %v9381_v29  ;;  %v1874_v50 = vsub.f32 %v9434_v17, %v1873_v37 }
  0xfc   : > { %v7532_v32 = vpop.f32.mrb[5].mxu0  ;;  %v9387_v39 = vadd.f32 %v506_v12, %v378_v31  ;;  %7839 = vmatmul.mubr.f32.gmra.mrb[94].mxu1 %v9418_v0  ;;  %v1864_v31 = vsub.f32 %v9415_v62, %v1863_v14 }
  0xfd   : > { %v518_v21 = vpop.f32.mrb[8].mxu1  ;;  %7841 = vmatprep.mubr.msk.f32.mxu1 %vm8794_vm0, %v11714_v6 }
  0xfe   : > { %v7561_v45 = vpop.f32.mrb[9].mxu1 }
  0xff   : > { %v388_v44 = vpop.f32.mrb[6].mxu0  ;;  %v1865_v45 = vand.u32 4294901760, %v1864_v31  ;;  %v9489_v31 = vsub.f32 %v9403_v51, %v9418_v0 }
 0x100   : > { %v7535_v38 = vpop.f32.mrb[7].mxu0  ;;  %v9405_v57 = vadd.f32 %v512_v28, %v388_v44  ;;  %7842 = vmatmul.mubr.f32.gmra.mrb[96].mxu1 %v9437_v19 }
 0x101   : > { %v524_v60 = vpop.f32.mrb[10].mxu1  ;;  %7869 = vmatprep.mubr.msk.f32.mxu1 %vm8794_vm0, %v11714_v6  ;;  %v1883_v38 = vand.u32 4294901760, %v9450_v33  ;;  %7801 = vmatmul.mubr.f32.vlgmr.msra.gmra.mrb[84].mxu0 %v1865_v45 }
 0x102   : > { %v7564_v4 = vpop.f32.mrb[11].mxu1  ;;  %7845 = vmatpush3.msra.mxu0 %v9248_v18  ;;  %7803 = vmatprep.mubr.msk.f32.mxu0 %vm8794_vm0, %v11714_v6 }
 0x103   : > { %v398_v3 = vpop.f32.mrb[8].mxu0  ;;  %7890 = vmatprep.subr.mxu0 %v11714_v6 }
 0x104   : > { %v7538_v7 = vpop.f32.mrb[9].mxu0  ;;  %v9423_v12 = vadd.f32 %v518_v21, %v398_v3  ;;  %7870 = vmatmul.mubr.f32.vlgmr.msra.gmra.mrb[98].mxu1 %v1863_v14  ;;  %v1893_v14 = vand.u32 4294901760, %v9462_v2 }
 0x105   : > { %v530_v40 = vpop.f32.mrb[12].mxu1  ;;  %7872 = vmatprep.mubr.msk.f32.mxu1 %vm8794_vm0, %v11714_v6  ;;  %7914 = vmatpush3.msra.mxu1 %v9239_v10  ;;  %v9476_v10 = vsub.f32 %v9384_v34, %v9399_v41  ;;  %v7081_v34 = vld [vmem:[%s11709_s1 + $0x18] sm:$0xff] }
 0x106   : > { %v7567_v49 = vpop.f32.mrb[13].mxu1  ;;  %7959 = vmatprep.subr.mxu1 %v11714_v6 }
 0x107   : > { %v408_v23 = vpop.f32.mrb[10].mxu0 }
 0x108   : > { %v7541_v27 = vpop.f32.mrb[11].mxu0  ;;  %v9439_v28 = vadd.f32 %v524_v60, %v408_v23  ;;  %7873 = vmatmul.mubr.f32.gmra.mrb[100].mxu1 %v1873_v37 }
 0x109   : > { %v720_v53 = vpop.f32.mrb[14].mxu1  ;;  %7875 = vmatprep.mubr.msk.f32.mxu1 %vm8794_vm0, %v11714_v6 }
 0x10a   : > { %v7595_v11 = vpop.f32.mrb[15].mxu1 }
 0x10b   : > { %v418_v32 = vpop.f32.mrb[12].mxu0  ;;  %v1894_v11 = vsub.f32 %v9462_v2, %v1893_v14 }
 0x10c   : > { %v7544_v52 = vpop.f32.mrb[13].mxu0  ;;  %v9453_v21 = vadd.f32 %v530_v40, %v418_v32  ;;  %v1875_v40 = vand.u32 4294901760, %v1874_v50  ;;  %7876 = vmatmul.mubr.f32.gmra.mrb[102].mxu1 %v1883_v38 }
 0x10d   : > { %v728_v44 = vpop.f32.mrb[16].mxu1  ;;  %7878 = vmatprep.mubr.msk.f32.mxu1 %vm8794_vm0, %v11714_v6  ;;  %v1903_v52 = vand.u32 4294901760, %v9476_v10 }
 0x10e   : > { %v7598_v60 = vpop.f32.mrb[17].mxu1  ;;  %7804 = vmatmul.mubr.f32.gmra.mrb[86].mxu0 %v1875_v40 }
 0x10f   : > { %v604_v55 = vpop.f32.mrb[14].mxu0  ;;  %7806 = vmatprep.mubr.msk.f32.mxu0 %vm8794_vm0, %v11714_v6  ;;  %v9504_v60 = vsub.f32 %v9421_v43, %v9437_v19  ;;  %v1904_v40 = vsub.f32 %v9476_v10, %v1903_v52 }
 0x110   : > { %v605_v3 = vadd.f32 %v604_v55, %v9349_v5  ;;  %v7572_v4 = vpop.f32.mrb[15].mxu0  ;;  %v1884_v5 = vsub.f32 %v9450_v33, %v1883_v38  ;;  %v9499_v38 = vand.u32 4294901760, %v7081_v34  ;;  %7879 = vmatmul.mubr.f32.gmra.mrb[104].mxu1 %v1893_v14 }
 0x111   : > { %v736_v7 = vpop.f32.mrb[18].mxu1  ;;  %7881 = vmatprep.mubr.msk.f32.mxu1 %vm8794_vm0, %v11714_v6  ;;  %v1895_v4 = vand.u32 4294901760, %v1894_v11 }
 0x112   : > { %v9472_v20 = vadd.f32 %v720_v53, %v605_v3  ;;  %v7601_v49 = vpop.f32.mrb[19].mxu1  ;;  %v1885_v32 = vand.u32 4294901760, %v1884_v5 }
 0x113   : > { %v611_v23 = vpop.f32.mrb[16].mxu0 }
 0x114   : > { %v612_v27 = vadd.f32 %v611_v23, %v9369_v25  ;;  %v7575_v53 = vpop.f32.mrb[17].mxu0  ;;  %7807 = vmatmul.mubr.f32.gmra.mrb[88].mxu0 %v1885_v32  ;;  %v9515_v23 = vsub.f32 %v7081_v34, %v9499_v38  ;;  %7882 = vmatmul.mubr.f32.gmra.mrb[106].mxu1 %v1903_v52  ;;  %v1923_v34 = vand.u32 4294901760, %v9504_v60 }
 0x115   : > { %v744_v25 = vpop.f32.mrb[20].mxu1  ;;  %7809 = vmatprep.mubr.msk.f32.mxu0 %vm8794_vm0, %v11714_v6  ;;  %7884 = vmatprep.mubr.msk.f32.mxu1 %vm8794_vm0, %v11714_v6  ;;  %v1905_v53 = vand.u32 4294901760, %v1904_v40 }
 0x116   : > { %v9495_v37 = vadd.f32 %v728_v44, %v612_v27  ;;  %v7604_v50 = vpop.f32.mrb[21].mxu1 }
 0x117   : > { %v618_v45 = vpop.f32.mrb[18].mxu0 }
 0x118   : > { %v619_v51 = vadd.f32 %v618_v45, %v9387_v39  ;;  %v7578_v55 = vpop.f32.mrb[19].mxu0  ;;  %v1913_v39 = vand.u32 4294901760, %v9489_v31  ;;  %7810 = vmatmul.mubr.f32.gmra.mrb[90].mxu0 %v1895_v4  ;;  %v1924_v4 = vsub.f32 %v9504_v60, %v1923_v34 }
 0x119   : > { %v752_v3 = vpop.f32.mrb[22].mxu1  ;;  %7812 = vmatprep.mubr.msk.f32.mxu0 %vm8794_vm0, %v11714_v6 }
 0x11a   : > { %v9510_v44 = vadd.f32 %v736_v7, %v619_v51  ;;  %v7607_v14 = vpop.f32.mrb[23].mxu1  ;;  %v1914_v32 = vsub.f32 %v9489_v31, %v1913_v39  ;;  %7885 = vmatmul.mubr.f32.gmra.mrb[108].mxu1 %v1913_v39 }
 0x11b   : > { %v625_v5 = vpop.f32.mrb[20].mxu0  ;;  %7887 = vmatprep.mubr.msk.f32.mxu1 %vm8794_vm0, %v11714_v6 }
 0x11c   : > { %v626_v43 = vadd.f32 %v625_v5, %v9405_v57  ;;  %v7581_v49 = vpop.f32.mrb[21].mxu0  ;;  %v2682_v57 = vand.u32 4294901760, %v9515_v23  ;;  %7813 = vmatmul.mubr.f32.gmra.mrb[92].mxu0 %v1905_v53  ;;  %v1915_v55 = vand.u32 4294901760, %v1914_v32 }
 0x11d   : > { %v760_v27 = vpop.f32.mrb[24].mxu1  ;;  %7815 = vmatprep.mubr.msk.f32.mxu0 %vm8794_vm0, %v11714_v6  ;;  %v1925_v49 = vand.u32 4294901760, %v1924_v4 }
 0x11e   : > { %v9522_v7 = vadd.f32 %v744_v25, %v626_v43  ;;  %v7610_v45 = vpop.f32.mrb[25].mxu1  ;;  %7888 = vmatmul.mubr.f32.gmra.mrb[110].mxu1 %v1923_v34 }
 0x11f   : > { %v632_v11 = vpop.f32.mrb[22].mxu0  ;;  %7915 = vmatprep.mubr.msk.f32.mxu1 %vm8794_vm0, %v11714_v6 }
 0x120   : > { %v633_v52 = vadd.f32 %v632_v11, %v9423_v12  ;;  %v7584_v50 = vpop.f32.mrb[23].mxu0  ;;  %v2683_v12 = vsub.f32 %v9515_v23, %v2682_v57  ;;  %7816 = vmatmul.mubr.f32.gmra.mrb[94].mxu0 %v1915_v55 }
 0x121   : > { %v768_v51 = vpop.f32.mrb[26].mxu1  ;;  %7818 = vmatprep.mubr.msk.f32.mxu0 %vm8794_vm0, %v11714_v6 }
 0x122   : > { %v9532_v25 = vadd.f32 %v752_v3, %v633_v52  ;;  %v7613_v5 = vpop.f32.mrb[27].mxu1  ;;  %v2684_v32 = vand.u32 4294901760, %v2683_v12  ;;  %7916 = vmatmul.mubr.f32.vlgmr.msra.gmra.mrb[112].mxu1 %v9327_v48 }
 0x123   : > { %v639_v40 = vpop.f32.mrb[24].mxu0  ;;  %7918 = vmatprep.mubr.msk.f32.mxu1 %vm8794_vm0, %v11714_v6 }
 0x124   : > { %v640_v39 = vadd.f32 %v639_v40, %v9439_v28  ;;  %v7587_v14 = vpop.f32.mrb[25].mxu0  ;;  %7819 = vmatmul.mubr.f32.gmra.mrb[96].mxu0 %v1925_v49  ;;  %7960 = vmatpush3.msra.mxu1 %v2684_v32 }
 0x125   : > { %v950_v43 = vpop.f32.mrb[28].mxu1  ;;  %7846 = vmatprep.mubr.msk.f32.mxu0 %vm8794_vm0, %v11714_v6  ;;  %8005 = vmatprep.subr.mxu1 %v11714_v6 }
 0x126   : > { %v9543_v3 = vadd.f32 %v760_v27, %v640_v39  ;;  %v7641_v11 = vpop.f32.mrb[29].mxu1  ;;  %7919 = vmatmul.mubr.f32.gmra.mrb[114].mxu1 %v9341_v61 }
 0x127   : > { %v646_v53 = vpop.f32.mrb[26].mxu0  ;;  %7921 = vmatprep.mubr.msk.f32.mxu1 %vm8794_vm0, %v11714_v6  ;;  %v2506_v11 = vld [vmem:[%s8867_s8 + $0xd] sm:$0xff] }
 0x128   : > { %v647_v45 = vadd.f32 %v646_v53, %v9453_v21  ;;  %v7590_v52 = vpop.f32.mrb[27].mxu0  ;;  %7847 = vmatmul.mubr.f32.vlgmr.msra.gmra.mrb[98].mxu0 %v9415_v62 }
 0x129   : > { %v956_v27 = vpop.f32.mrb[30].mxu1  ;;  %7891 = vmatpush3.msra.mxu0 %v1934_v30  ;;  %7849 = vmatprep.mubr.msk.f32.mxu0 %vm8794_vm0, %v11714_v6 }
 0x12a   : > { %v9551_v28 = vadd.f32 %v768_v51, %v647_v45  ;;  %v7644_v50 = vpop.f32.mrb[31].mxu1  ;;  %7936 = vmatprep.subr.mxu0 %v11714_v6  ;;  %7922 = vmatmul.mubr.f32.gmra.mrb[116].mxu1 %v9360_v13 }
 0x12b   : > { %v842_v34 = vpop.f32.mrb[28].mxu0  ;;  %7924 = vmatprep.mubr.msk.f32.mxu1 %vm8794_vm0, %v11714_v6 }
 0x12c   : > { %v843_v55 = vadd.f32 %v842_v34, %v9472_v20  ;;  %v7618_v4 = vpop.f32.mrb[29].mxu0  ;;  %7850 = vmatmul.mubr.f32.gmra.mrb[100].mxu0 %v9434_v17  ;;  %v2513_v34 = vmul.f32 %v2506_v11, %v9110_v15 }
 0x12d   : > { %v962_v51 = vpop.f32.mrb[32].mxu1  ;;  %7852 = vmatprep.mubr.msk.f32.mxu0 %vm8794_vm0, %v11714_v6 }
 0x12e   : > { %v9561_v21 = vadd.f32 %v950_v43, %v843_v55  ;;  %v7647_v40 = vpop.f32.mrb[33].mxu1  ;;  %7925 = vmatmul.mubr.f32.gmra.mrb[118].mxu1 %v9381_v29 }
 0x12f   : > { %v848_v20 = vpop.f32.mrb[30].mxu0  ;;  %7927 = vmatprep.mubr.msk.f32.mxu1 %vm8794_vm0, %v11714_v6  ;;  %v2523_v40 = vsel %vm264_vm1, %v2513_v34, 0 }
 0x130   : > { %v849_v62 = vadd.f32 %v848_v20, %v9495_v37  ;;  %v7621_v12 = vpop.f32.mrb[31].mxu0  ;;  %7853 = vmatmul.mubr.f32.gmra.mrb[102].mxu0 %v9450_v33 }
 0x131   : > { %v968_v30 = vpop.f32.mrb[34].mxu1  ;;  %7855 = vmatprep.mubr.msk.f32.mxu0 %vm8794_vm0, %v11714_v6  ;;  %v2508_v12 = vld [vmem:[%s8867_s8 + $0x1d] sm:$0xff] }
 0x132   : > { %v9573_v18 = vadd.f32 %v956_v27, %v849_v62  ;;  %v7650_v39 = vpop.f32.mrb[35].mxu1  ;;  %7928 = vmatmul.mubr.f32.gmra.mrb[120].mxu1 %v9399_v41 }
 0x133   : > { %v854_v5 = vpop.f32.mrb[32].mxu0  ;;  %7930 = vmatprep.mubr.msk.f32.mxu1 %vm8794_vm0, %v11714_v6 }
 0x134   : > { %v855_v14 = vadd.f32 %v854_v5, %v9510_v44  ;;  %v7624_v37 = vpop.f32.mrb[33].mxu0  ;;  %7856 = vmatmul.mubr.f32.gmra.mrb[104].mxu0 %v9462_v2  ;;  %v2507_v2 = vld [vmem:[%s8867_s8 + $0x15] sm:$0xff]  ;;  %v9617_v5 = vand.u32 4294901760, %v2523_v40 }
 0x135   : > { %v974_v43 = vpop.f32.mrb[36].mxu1  ;;  %7858 = vmatprep.mubr.msk.f32.mxu0 %vm8794_vm0, %v11714_v6 }
 0x136   : > { %v9582_v17 = vadd.f32 %v962_v51, %v855_v14  ;;  %v7653_v53 = vpop.f32.mrb[37].mxu1  ;;  %7931 = vmatmul.mubr.f32.gmra.mrb[122].mxu1 %v9418_v0 }
 0x137   : > { %v860_v49 = vpop.f32.mrb[34].mxu0  ;;  %7933 = vmatprep.mubr.msk.f32.mxu1 %vm8794_vm0, %v11714_v6 }
 0x138   : > { %v861_v32 = vadd.f32 %v860_v49, %v9522_v7  ;;  %v7627_v44 = vpop.f32.mrb[35].mxu0  ;;  %7859 = vmatmul.mubr.f32.gmra.mrb[106].mxu0 %v9476_v10 }
 0x139   : > { %v980_v45 = vpop.f32.mrb[38].mxu1  ;;  %7861 = vmatprep.mubr.msk.f32.mxu0 %vm8794_vm0, %v11714_v6 }
 0x13a   : > { %v9592_v33 = vadd.f32 %v968_v30, %v861_v32  ;;  %v7656_v27 = vpop.f32.mrb[39].mxu1  ;;  %7934 = vmatmul.mubr.f32.gmra.mrb[124].mxu1 %v9437_v19 }
 0x13b   : > { %v866_v52 = vpop.f32.mrb[36].mxu0  ;;  %7961 = vmatprep.mubr.msk.f32.mxu1 %vm8794_vm0, %v11714_v6 }
 0x13c   : > { %v867_v7 = vadd.f32 %v866_v52, %v9532_v25  ;;  %v7630_v50 = vpop.f32.mrb[37].mxu0  ;;  %v2514_v25 = vmul.f32 %v2507_v2, %v9122_v22  ;;  %7862 = vmatmul.mubr.f32.gmra.mrb[108].mxu0 %v9489_v31 }
 0x13d   : > { %v986_v4 = vpop.f32.mrb[40].mxu1  ;;  %7864 = vmatprep.mubr.msk.f32.mxu0 %vm8794_vm0, %v11714_v6 }
 0x13e   : > { %v9603_v55 = vadd.f32 %v974_v43, %v867_v7  ;;  %v7659_v20 = vpop.f32.mrb[41].mxu1  ;;  %v2526_v14 = vsel %vm264_vm1, %v2514_v25, 0  ;;  %v2509_v43 = vld [vmem:[%s8867_s8 + $0x25] sm:$0xff]  ;;  %7962 = vmatmul.mubr.f32.vlgmr.msra.gmra.mrb[126].mxu1 %v9617_v5  ;;  %v2512_v7 = vld [vmem:[%s8867_s8 + $0x3d] sm:$0x1] }
 0x13f   : > { %v872_v51 = vpop.f32.mrb[38].mxu0  ;;  %7964 = vmatprep.mubr.msk.f32.mxu1 %vm8794_vm0, %v11714_v6  ;;  %v9631_v53 = vand.u32 4294901760, %v2526_v14  ;;  %8006 = vmatpush3.msra.mxu1 %v9499_v38  ;;  %v2516_v32 = vmul.f32 %v2509_v43, %v9126_v24  ;;  %v2519_v2 = vmul.f32 %v2512_v7, %v9171_v47  ;;  %v7082_v43 = vld [vmem:[%s11709_s1 + $0x20] sm:$0xff] }
 0x140   : > { %v873_v10 = vadd.f32 %v872_v51, %v9543_v3  ;;  %v7633_v62 = vpop.f32.mrb[39].mxu0  ;;  %v2515_v3 = vmul.f32 %v2508_v12, %v9112_v16  ;;  %7865 = vmatmul.mubr.f32.gmra.mrb[110].mxu0 %v9504_v60  ;;  %8051 = vmatprep.subr.mxu1 %v11714_v6  ;;  %v2510_v60 = vld [vmem:[%s8867_s8 + $0x2d] sm:$0xff] }
 0x141   : > { %7892 = vmatprep.mubr.msk.f32.mxu0 %vm8794_vm0, %v11714_v6  ;;  %v2532_v11 = vsel %vm264_vm1, %v2516_v32, 0  ;;  %v2541_v51 = vsel %vm264_vm1, %v2519_v2, 0  ;;  %v9692_v20 = vsub.f32 %v2526_v14, %v9631_v53 }
 0x142   : > { %v9615_v30 = vadd.f32 %v980_v45, %v873_v10  ;;  %7965 = vmatmul.mubr.f32.gmra.mrb[128].mxu1 %v9631_v53  ;;  %v2517_v45 = vmul.f32 %v2510_v60, %v9144_v36  ;;  %v9657_v52 = vand.u32 4294901760, %v2532_v11 }
 0x143   : > { %v878_v39 = vpop.f32.mrb[40].mxu0  ;;  %7967 = vmatprep.mubr.msk.f32.mxu1 %vm8794_vm0, %v11714_v6  ;;  %v2621_v10 = vand.u32 4294901760, %v9692_v20 }
 0x144   : > { %v879_v31 = vadd.f32 %v878_v39, %v9551_v28  ;;  %v7636_v37 = vpop.f32.mrb[41].mxu0  ;;  %v2529_v28 = vsel %vm264_vm1, %v2515_v3, 0  ;;  %7893 = vmatmul.mubr.f32.vlgmr.msra.gmra.mrb[112].mxu0 %v9327_v48  ;;  %v2511_v48 = vld [vmem:[%s8867_s8 + $0x35] sm:$0xff]  ;;  %v2535_v34 = vsel %vm264_vm1, %v2517_v45, 0  ;;  %v9713_v62 = vsub.f32 %v2532_v11, %v9657_v52 }
 0x145   : > { %7937 = vmatpush3.msra.mxu0 %v9499_v38  ;;  %7895 = vmatprep.mubr.msk.f32.mxu0 %vm8794_vm0, %v11714_v6  ;;  %v9643_v44 = vand.u32 4294901760, %v2529_v28  ;;  %v2518_v27 = vmul.f32 %v2511_v48, %v9142_v35  ;;  %v2622_v12 = vsub.f32 %v9692_v20, %v2621_v10  ;;  %v9742_v45 = vand.u32 4294901760, %v7082_v43 }
 0x146   : > { %v9629_v49 = vadd.f32 %v986_v4, %v879_v31  ;;  %7982 = vmatprep.subr.mxu0 %v11714_v6  ;;  %v2641_v37 = vand.u32 4294901760, %v9713_v62 }
 0x147   : > { %7968 = vmatmul.mubr.f32.gmra.mrb[130].mxu1 %v9643_v44  ;;  %v2538_v50 = vsel %vm264_vm1, %v2518_v27, 0  ;;  %v2623_v14 = vand.u32 4294901760, %v2622_v12 }
 0x148   : > { %7896 = vmatmul.mubr.f32.gmra.mrb[114].mxu0 %v9341_v61  ;;  %7970 = vmatprep.mubr.msk.f32.mxu1 %vm8794_vm0, %v11714_v6  ;;  %v9668_v61 = vand.u32 4294901760, %v2535_v34  ;;  %v9681_v4 = vand.u32 4294901760, %v2538_v50  ;;  %v2642_v60 = vsub.f32 %v9713_v62, %v2641_v37 }
 0x149   : > { %7898 = vmatprep.mubr.msk.f32.mxu0 %vm8794_vm0, %v11714_v6 }
 0x14a   : > { %v9723_v3 = vsub.f32 %v2535_v34, %v9668_v61  ;;  %v2643_v34 = vand.u32 4294901760, %v2642_v60 }
 0x14b   : > { %7971 = vmatmul.mubr.f32.gmra.mrb[132].mxu1 %v9657_v52 }
 0x14c   : > { %7899 = vmatmul.mubr.f32.gmra.mrb[116].mxu0 %v9360_v13  ;;  %7973 = vmatprep.mubr.msk.f32.mxu1 %vm8794_vm0, %v11714_v6  ;;  %v9679_v13 = vsub.f32 %v2523_v40, %v9617_v5  ;;  %v9694_v40 = vand.u32 4294901760, %v2541_v51  ;;  %v2651_v11 = vand.u32 4294901760, %v9723_v3 }
 0x14d   : > { %7901 = vmatprep.mubr.msk.f32.mxu0 %vm8794_vm0, %v11714_v6 }
 0x14e   : > { %v9745_v48 = vsub.f32 %v2541_v51, %v9694_v40  ;;  %v2652_v7 = vsub.f32 %v9723_v3, %v2651_v11 }
 0x14f   : > { %7974 = vmatmul.mubr.f32.gmra.mrb[134].mxu1 %v9668_v61 }
 0x150   : > { %7902 = vmatmul.mubr.f32.gmra.mrb[118].mxu0 %v9381_v29  ;;  %7976 = vmatprep.mubr.msk.f32.mxu1 %vm8794_vm0, %v11714_v6  ;;  %v2611_v29 = vand.u32 4294901760, %v9679_v13 }
 0x151   : > { %7904 = vmatprep.mubr.msk.f32.mxu0 %vm8794_vm0, %v11714_v6 }
 0x152   : > { %v2612_v25 = vsub.f32 %v9679_v13, %v2611_v29 }
 0x153   : > { %7977 = vmatmul.mubr.f32.gmra.mrb[136].mxu1 %v9681_v4 }
 0x154   : > { %7905 = vmatmul.mubr.f32.gmra.mrb[120].mxu0 %v9399_v41  ;;  %7979 = vmatprep.mubr.msk.f32.mxu1 %vm8794_vm0, %v11714_v6  ;;  %v9703_v41 = vsub.f32 %v2529_v28, %v9643_v44  ;;  %v9734_v28 = vsub.f32 %v2538_v50, %v9681_v4 }
 0x155   : > { %7907 = vmatprep.mubr.msk.f32.mxu0 %vm8794_vm0, %v11714_v6 }
 0x156   : > { %v2631_v39 = vand.u32 4294901760, %v9703_v41  ;;  %v2661_v50 = vand.u32 4294901760, %v9734_v28 }
 0x157   : > { %7980 = vmatmul.mubr.f32.gmra.mrb[138].mxu1 %v9694_v40 }
 0x158   : > { %7908 = vmatmul.mubr.f32.gmra.mrb[122].mxu0 %v9418_v0  ;;  %8007 = vmatprep.mubr.msk.f32.mxu1 %vm8794_vm0, %v11714_v6  ;;  %v2613_v0 = vand.u32 4294901760, %v2612_v25  ;;  %v2632_v31 = vsub.f32 %v9703_v41, %v2631_v39  ;;  %v9756_v25 = vsub.f32 %v7082_v43, %v9742_v45 }
 0x159   : > { %7910 = vmatprep.mubr.msk.f32.mxu0 %vm8794_vm0, %v11714_v6 }
 0x15a   : > { %v2633_v32 = vand.u32 4294901760, %v2632_v31  ;;  %v2671_v31 = vand.u32 4294901760, %v9745_v48 }
 0x15b   : > { %8008 = vmatmul.mubr.f32.vlgmr.msra.gmra.mrb[140].mxu1 %v2611_v29 }
 0x15c   : > { %7911 = vmatmul.mubr.f32.gmra.mrb[124].mxu0 %v9437_v19  ;;  %8010 = vmatprep.mubr.msk.f32.mxu1 %vm8794_vm0, %v11714_v6  ;;  %v2672_v43 = vsub.f32 %v9745_v48, %v2671_v31 }
 0x15d   : > { %7938 = vmatprep.mubr.msk.f32.mxu0 %vm8794_vm0, %v11714_v6  ;;  %8052 = vmatpush3.msra.mxu1 %v9499_v38 }
 0x15e   : > { %8097 = vmatprep.subr.mxu1 %v11714_v6 }
 0x15f   : > { %8011 = vmatmul.mubr.f32.gmra.mrb[142].mxu1 %v2621_v10 }
 0x160   : > { %7939 = vmatmul.mubr.f32.vlgmr.msra.gmra.mrb[126].mxu0 %v2613_v0  ;;  %8013 = vmatprep.mubr.msk.f32.mxu1 %vm8794_vm0, %v11714_v6 }
 0x161   : > { %7983 = vmatpush3.msra.mxu0 %v9515_v23  ;;  %7941 = vmatprep.mubr.msk.f32.mxu0 %vm8794_vm0, %v11714_v6 }
 0x162   : > { %8028 = vmatprep.subr.mxu0 %v11714_v6 }
 0x163   : > { %8014 = vmatmul.mubr.f32.gmra.mrb[144].mxu1 %v2631_v39  ;;  %v2653_v39 = vand.u32 4294901760, %v2652_v7 }
 0x164   : > { %7942 = vmatmul.mubr.f32.gmra.mrb[128].mxu0 %v2623_v14  ;;  %8016 = vmatprep.mubr.msk.f32.mxu1 %vm8794_vm0, %v11714_v6  ;;  %v2662_v14 = vsub.f32 %v9734_v28, %v2661_v50 }
 0x165   : > { %7944 = vmatprep.mubr.msk.f32.mxu0 %vm8794_vm0, %v11714_v6 }
 0x167   : > { %v1219_v19 = vpop.f32.mrb[42].mxu1  ;;  %8017 = vmatmul.mubr.f32.gmra.mrb[146].mxu1 %v2641_v37 }
 0x168   : > { %v7687_v38 = vpop.f32.mrb[43].mxu1  ;;  %7945 = vmatmul.mubr.f32.gmra.mrb[130].mxu0 %v2633_v32  ;;  %8019 = vmatprep.mubr.msk.f32.mxu1 %vm8794_vm0, %v11714_v6 }
 0x169   : > { %7947 = vmatprep.mubr.msk.f32.mxu0 %vm8794_vm0, %v11714_v6 }
 0x16b   : > { %v9751_v27 = vpop.f32.mrb[44].mxu1  ;;  %8020 = vmatmul.mubr.f32.gmra.mrb[148].mxu1 %v2651_v11 }
 0x16c   : > { %v7690_v2 = vpop.f32.mrb[45].mxu1  ;;  %7948 = vmatmul.mubr.f32.gmra.mrb[132].mxu0 %v2643_v34  ;;  %8022 = vmatprep.mubr.msk.f32.mxu1 %vm8794_vm0, %v11714_v6  ;;  %v2673_v34 = vand.u32 4294901760, %v2672_v43 }
 0x16d   : > { %7950 = vmatprep.mubr.msk.f32.mxu0 %vm8794_vm0, %v11714_v6 }
 0x16f   : > { %v1083_v29 = vpop.f32.mrb[42].mxu0  ;;  %v9763_v0 = vpop.f32.mrb[46].mxu1  ;;  %8023 = vmatmul.mubr.f32.gmra.mrb[150].mxu1 %v2661_v50 }
 0x170   : > { %v1084_v51 = vadd.f32 %v1083_v29, %v9561_v21  ;;  %v7664_v10 = vpop.f32.mrb[43].mxu0  ;;  %v7693_v37 = vpop.f32.mrb[47].mxu1  ;;  %v11713_v21 = vand.u32 4294901760, %v9756_v25  ;;  %7951 = vmatmul.mubr.f32.gmra.mrb[134].mxu0 %v2653_v39  ;;  %8025 = vmatprep.mubr.msk.f32.mxu1 %vm8794_vm0, %v11714_v6 }
 0x171   : > { %7953 = vmatprep.mubr.msk.f32.mxu0 %vm8794_vm0, %v11714_v6  ;;  %v3254_v37 = vld [vmem:[%s8867_s8 + $0xe] sm:$0xff] }
 0x172   : > { %v9765_v12 = vadd.f32 %v1219_v19, %v1084_v51  ;;  %v2663_v19 = vand.u32 4294901760, %v2662_v14  ;;  %v3424_v60 = vsub.f32 %v9756_v25, %v11713_v21 }
 0x173   : > { %v9774_v38 = vpop.f32.mrb[48].mxu1  ;;  %8026 = vmatmul.mubr.f32.gmra.mrb[152].mxu1 %v2671_v31 }
 0x174   : > { %v7696_v32 = vpop.f32.mrb[49].mxu1  ;;  %7954 = vmatmul.mubr.f32.gmra.mrb[136].mxu0 %v2663_v19  ;;  %8053 = vmatprep.mubr.msk.f32.mxu1 %vm8794_vm0, %v11714_v6  ;;  %v3425_v50 = vand.u32 4294901760, %v3424_v60 }
 0x175   : > { %7956 = vmatprep.mubr.msk.f32.mxu0 %vm8794_vm0, %v11714_v6 }
 0x177   : > { %v9784_v11 = vpop.f32.mrb[50].mxu1  ;;  %8054 = vmatmul.mubr.f32.vlgmr.msra.gmra.mrb[154].mxu1 %v9617_v5 }
 0x178   : > { %v7699_v7 = vpop.f32.mrb[51].mxu1  ;;  %7957 = vmatmul.mubr.f32.gmra.mrb[138].mxu0 %v2673_v34  ;;  %8056 = vmatprep.mubr.msk.f32.mxu1 %vm8794_vm0, %v11714_v6 }
 0x179   : > { %7984 = vmatprep.mubr.msk.f32.mxu0 %vm8794_vm0, %v11714_v6  ;;  %8098 = vmatpush3.msra.mxu1 %v3425_v50 }
 0x17a   : > { %8143 = vmatprep.subr.mxu1 %v11714_v6 }
 0x17b   : > { %v9791_v2 = vpop.f32.mrb[52].mxu1  ;;  %8057 = vmatmul.mubr.f32.gmra.mrb[156].mxu1 %v9631_v53 }
 0x17c   : > { %v7702_v29 = vpop.f32.mrb[53].mxu1  ;;  %7985 = vmatmul.mubr.f32.vlgmr.msra.gmra.mrb[140].mxu0 %v9679_v13  ;;  %8059 = vmatprep.mubr.msk.f32.mxu1 %vm8794_vm0, %v11714_v6 }
 0x17d   : > { %8029 = vmatpush3.msra.mxu0 %v2682_v57  ;;  %7987 = vmatprep.mubr.msk.f32.mxu0 %vm8794_vm0, %v11714_v6 }
 0x17e   : > { %8074 = vmatprep.subr.mxu0 %v11714_v6 }
 0x17f   : > { %v9800_v51 = vpop.f32.mrb[54].mxu1  ;;  %8060 = vmatmul.mubr.f32.gmra.mrb[158].mxu1 %v9643_v44 }
 0x180   : > { %v7705_v10 = vpop.f32.mrb[55].mxu1  ;;  %7988 = vmatmul.mubr.f32.gmra.mrb[142].mxu0 %v9692_v20  ;;  %8062 = vmatprep.mubr.msk.f32.mxu1 %vm8794_vm0, %v11714_v6  ;;  %v1093_v20 = vpop.f32.mrb[44].mxu0 }
 0x181   : > { %7990 = vmatprep.mubr.msk.f32.mxu0 %vm8794_vm0, %v11714_v6  ;;  %v1094_v14 = vadd.f32 %v1093_v20, %v9573_v18  ;;  %v7667_v31 = vpop.f32.mrb[45].mxu0  ;;  %v3257_v10 = vld [vmem:[%s8867_s8 + $0x26] sm:$0xff] }
 0x182   : > { %v1103_v43 = vpop.f32.mrb[46].mxu0 }
 0x183   : > { %v9811_v23 = vpop.f32.mrb[56].mxu1  ;;  %8063 = vmatmul.mubr.f32.gmra.mrb[160].mxu1 %v9657_v52  ;;  %v1104_v32 = vadd.f32 %v1103_v43, %v9582_v17  ;;  %v3256_v17 = vld [vmem:[%s8867_s8 + $0x1e] sm:$0xff] }
 0x184   : > { %v7733_v57 = vpop.f32.mrb[57].mxu1  ;;  %7991 = vmatmul.mubr.f32.gmra.mrb[144].mxu0 %v9703_v41  ;;  %8065 = vmatprep.mubr.msk.f32.mxu1 %vm8794_vm0, %v11714_v6  ;;  %v9829_v41 = vadd.f32 %v9751_v27, %v1094_v14  ;;  %v3255_v27 = vld [vmem:[%s8867_s8 + $0x16] sm:$0xff] }
 0x185   : > { %7993 = vmatprep.mubr.msk.f32.mxu0 %vm8794_vm0, %v11714_v6  ;;  %v9855_v34 = vsel %vm264_vm1, %v3255_v27, 0 }
 0x186   : > { %v9866_v29 = vand.u32 4294901760, %v9855_v34 }
 0x187   : > { %v9819_v13 = vpop.f32.mrb[58].mxu1  ;;  %8066 = vmatmul.mubr.f32.gmra.mrb[162].mxu1 %v9668_v61 }
 0x188   : > { %v7736_v39 = vpop.f32.mrb[59].mxu1  ;;  %7994 = vmatmul.mubr.f32.gmra.mrb[146].mxu0 %v9713_v62  ;;  %8068 = vmatprep.mubr.msk.f32.mxu1 %vm8794_vm0, %v11714_v6  ;;  %v9841_v62 = vsel %vm264_vm1, %v3254_v37, 0  ;;  %v9890_v37 = vsel %vm264_vm1, %v3257_v10, 0 }
 0x189   : > { %7996 = vmatprep.mubr.msk.f32.mxu0 %vm8794_vm0, %v11714_v6  ;;  %v9848_v60 = vand.u32 4294901760, %v9841_v62 }
 0x18b   : > { %v9832_v19 = vpop.f32.mrb[60].mxu1  ;;  %8069 = vmatmul.mubr.f32.gmra.mrb[164].mxu1 %v9681_v4 }
 0x18c   : > { %7997 = vmatmul.mubr.f32.gmra.mrb[148].mxu0 %v9723_v3  ;;  %v7739_v18 = vpop.f32.mrb[61].mxu1  ;;  %8071 = vmatprep.mubr.msk.f32.mxu1 %vm8794_vm0, %v11714_v6  ;;  %v7670_v3 = vpop.f32.mrb[47].mxu0 }
 0x18d   : > { %7999 = vmatprep.mubr.msk.f32.mxu0 %vm8794_vm0, %v11714_v6 }
 0x18f   : > { %8072 = vmatmul.mubr.f32.gmra.mrb[166].mxu1 %v9694_v40  ;;  %v9861_v7 = vpop.f32.mrb[62].mxu1 }
 0x190   : > { %8000 = vmatmul.mubr.f32.gmra.mrb[150].mxu0 %v9734_v28  ;;  %8099 = vmatprep.mubr.msk.f32.mxu1 %vm8794_vm0, %v11714_v6  ;;  %v9858_v28 = vadd.f32 %v9763_v0, %v1104_v32  ;;  %v7742_v50 = vpop.f32.mrb[63].mxu1  ;;  %v9873_v0 = vsel %vm264_vm1, %v3256_v17, 0 }
 0x191   : > { %8002 = vmatprep.mubr.msk.f32.mxu0 %vm8794_vm0, %v11714_v6  ;;  %v9884_v31 = vand.u32 4294901760, %v9873_v0 }
 0x193   : > { %8100 = vmatmul.mubr.f32.vlgmr.msra.gmra.mrb[168].mxu1 %v9848_v60  ;;  %v9877_v57 = vpop.f32.mrb[64].mxu1 }
 0x194   : > { %8003 = vmatmul.mubr.f32.gmra.mrb[152].mxu0 %v9745_v48  ;;  %8102 = vmatprep.mubr.msk.f32.mxu1 %vm8794_vm0, %v11714_v6  ;;  %v1113_v48 = vpop.f32.mrb[48].mxu0  ;;  %v7745_v14 = vpop.f32.mrb[65].mxu1 }
 0x195   : > { %8030 = vmatprep.mubr.msk.f32.mxu0 %vm8794_vm0, %v11714_v6  ;;  %8144 = vmatpush3.msra.mxu1 %v9742_v45  ;;  %v1114_v20 = vadd.f32 %v1113_v48, %v9592_v33  ;;  %v7673_v39 = vpop.f32.mrb[49].mxu0  ;;  %v3258_v33 = vld [vmem:[%s8867_s8 + $0x2e] sm:$0xff] }
 0x196   : > { %8189 = vmatprep.subr.mxu1 %v11714_v6  ;;  %v9912_v17 = vsel %vm264_vm1, %v3258_v33, 0  ;;  %v3260_v33 = vld [vmem:[%s8867_s8 + $0x3e] sm:$0x1] }
 0x197   : > { %8103 = vmatmul.mubr.f32.gmra.mrb[170].mxu1 %v9866_v29  ;;  %v9893_v18 = vadd.f32 %v9774_v38, %v1114_v20  ;;  %v9899_v27 = vpop.f32.mrb[66].mxu1  ;;  %v9905_v38 = vand.u32 4294901760, %v9890_v37  ;;  %v9924_v14 = vand.u32 4294901760, %v9912_v17 }
 0x198   : > { %8031 = vmatmul.mubr.f32.vlgmr.msra.gmra.mrb[154].mxu0 %v9617_v5  ;;  %8105 = vmatprep.mubr.msk.f32.mxu1 %vm8794_vm0, %v11714_v6  ;;  %v1123_v5 = vpop.f32.mrb[50].mxu0  ;;  %v7748_v3 = vpop.f32.mrb[67].mxu1 }
 0x199   : > { %8075 = vmatpush3.msra.mxu0 %v9742_v45  ;;  %8033 = vmatprep.mubr.msk.f32.mxu0 %vm8794_vm0, %v11714_v6  ;;  %v1124_v43 = vadd.f32 %v1123_v5, %v9603_v55  ;;  %v7676_v32 = vpop.f32.mrb[51].mxu0  ;;  %v9943_v3 = vsub.f32 %v9841_v62, %v9848_v60 }
 0x19a   : > { %8120 = vmatprep.subr.mxu0 %v11714_v6  ;;  %v1133_v50 = vpop.f32.mrb[52].mxu0 }
 0x19b   : > { %8106 = vmatmul.mubr.f32.gmra.mrb[172].mxu1 %v9884_v31  ;;  %v9915_v55 = vadd.f32 %v9784_v11, %v1124_v43  ;;  %v9918_v10 = vpop.f32.mrb[68].mxu1  ;;  %v1134_v48 = vadd.f32 %v1133_v50, %v9615_v30  ;;  %v7679_v20 = vpop.f32.mrb[53].mxu0 }
 0x19c   : > { %8034 = vmatmul.mubr.f32.gmra.mrb[156].mxu0 %v9631_v53  ;;  %8108 = vmatprep.mubr.msk.f32.mxu1 %vm8794_vm0, %v11714_v6  ;;  %v3259_v53 = vld [vmem:[%s8867_s8 + $0x36] sm:$0xff]  ;;  %v7751_v39 = vpop.f32.mrb[69].mxu1 }
 0x19d   : > { %8036 = vmatprep.mubr.msk.f32.mxu0 %vm8794_vm0, %v11714_v6  ;;  %v9931_v11 = vsel %vm264_vm1, %v3259_v53, 0  ;;  %v9934_v30 = vadd.f32 %v9791_v2, %v1134_v48  ;;  %v3352_v39 = vand.u32 4294901760, %v9943_v3 }
 0x19e   : > { %v9947_v53 = vand.u32 4294901760, %v9931_v11 }
 0x19f   : > { %8109 = vmatmul.mubr.f32.gmra.mrb[174].mxu1 %v9905_v38  ;;  %v9937_v5 = vpop.f32.mrb[70].mxu1 }
 0x1a0   : > { %8037 = vmatmul.mubr.f32.gmra.mrb[158].mxu0 %v9643_v44  ;;  %8111 = vmatprep.mubr.msk.f32.mxu1 %vm8794_vm0, %v11714_v6  ;;  %v1143_v44 = vpop.f32.mrb[54].mxu0  ;;  %v7779_v50 = vpop.f32.mrb[71].mxu1 }
 0x1a1   : > { %8039 = vmatprep.mubr.msk.f32.mxu0 %vm8794_vm0, %v11714_v6  ;;  %v1144_v43 = vadd.f32 %v1143_v44, %v9629_v49  ;;  %v7682_v32 = vpop.f32.mrb[55].mxu0  ;;  %v9954_v49 = vsel %vm264_vm1, %v3260_v33, 0  ;;  %v9966_v44 = vsub.f32 %v9855_v34, %v9866_v29  ;;  %v3353_v50 = vsub.f32 %v9943_v3, %v3352_v39 }
 0x1a2   : > { %v1329_v2 = vpop.f32.mrb[56].mxu0 }
 0x1a3   : > { %8112 = vmatmul.mubr.f32.gmra.mrb[176].mxu1 %v9924_v14  ;;  %v9959_v62 = vpop.f32.mrb[72].mxu1  ;;  %v1330_v48 = vadd.f32 %v1329_v2, %v9765_v12  ;;  %v7710_v20 = vpop.f32.mrb[57].mxu0  ;;  %v3362_v2 = vand.u32 4294901760, %v9966_v44 }
 0x1a4   : > { %8040 = vmatmul.mubr.f32.gmra.mrb[160].mxu0 %v9657_v52  ;;  %8114 = vmatprep.mubr.msk.f32.mxu1 %vm8794_vm0, %v11714_v6  ;;  %v9957_v52 = vadd.f32 %v9800_v51, %v1144_v43  ;;  %v7782_v32 = vpop.f32.mrb[73].mxu1  ;;  %v9970_v51 = vand.u32 4294901760, %v9954_v49  ;;  %v1336_v12 = vpop.f32.mrb[58].mxu0  ;;  %v9987_v20 = vsub.f32 %v9873_v0, %v9884_v31 }
 0x1a5   : > { %8042 = vmatprep.mubr.msk.f32.mxu0 %vm8794_vm0, %v11714_v6  ;;  %v1337_v34 = vadd.f32 %v1336_v12, %v9829_v41  ;;  %v7713_v43 = vpop.f32.mrb[59].mxu0  ;;  %v9999_v41 = vsub.f32 %v9890_v37, %v9905_v38 }
 0x1a6   : > { %v3354_v43 = vand.u32 4294901760, %v3353_v50  ;;  %v3372_v21 = vand.u32 4294901760, %v9987_v20  ;;  %v10062_v1 = vsub.f32 %v9954_v49, %v9970_v51 }
 0x1a7   : > { %8115 = vmatmul.mubr.f32.gmra.mrb[178].mxu1 %v9947_v53  ;;  %v9979_v33 = vpop.f32.mrb[74].mxu1 }
 0x1a8   : > { %8043 = vmatmul.mubr.f32.gmra.mrb[162].mxu0 %v9668_v61  ;;  %8117 = vmatprep.mubr.msk.f32.mxu1 %vm8794_vm0, %v11714_v6  ;;  %v9977_v61 = vadd.f32 %v9811_v23, %v1330_v48  ;;  %v7785_v32 = vpop.f32.mrb[75].mxu1  ;;  %v9995_v23 = vadd.f32 %v9819_v13, %v1337_v34  ;;  %v11726_v13 = vmov 0.0  }
 0x1a9   : > { %8045 = vmatprep.mubr.msk.f32.mxu0 %vm8794_vm0, %v11714_v6  ;;  %v3363_v32 = vsub.f32 %v9966_v44, %v3362_v2 }
 0x1ab   : > { %8118 = vmatmul.mubr.f32.gmra.mrb[180].mxu1 %v9970_v51  ;;  %v10001_v48 = vpop.f32.mrb[76].mxu1  ;;  %v3364_v50 = vand.u32 4294901760, %v3363_v32 }
 0x1ac   : > { %8046 = vmatmul.mubr.f32.gmra.mrb[164].mxu0 %v9681_v4  ;;  %8145 = vmatprep.mubr.msk.f32.mxu1 %vm8794_vm0, %v11714_v6  ;;  %v1343_v4 = vpop.f32.mrb[60].mxu0 }
 0x1ad   : > { %8048 = vmatprep.mubr.msk.f32.mxu0 %vm8794_vm0, %v11714_v6  ;;  %v1344_v0 = vadd.f32 %v1343_v4, %v9858_v28  ;;  %v7716_v12 = vpop.f32.mrb[61].mxu0  ;;  %v7788_v6 = vpop.f32.mrb[77].mxu1  ;;  %v3373_v4 = vsub.f32 %v9987_v20, %v3372_v21 }
 0x1ae   : > { %v1350_v28 = vpop.f32.mrb[62].mxu0 }
 0x1af   : > { %8146 = vmatmul.mubr.f32.vlgmr.msra.gmra.mrb[182].mxu1 %v3352_v39  ;;  %v10012_v37 = vadd.f32 %v9832_v19, %v1344_v0  ;;  %v10016_v34 = vpop.f32.mrb[78].mxu1  ;;  %v1351_v6 = vadd.f32 %v1350_v28, %v9893_v18  ;;  %v7719_v39 = vpop.f32.mrb[63].mxu0  ;;  %v10023_v19 = vsub.f32 %v9912_v17, %v9924_v14 }
 0x1b0   : > { %8049 = vmatmul.mubr.f32.gmra.mrb[166].mxu0 %v9694_v40  ;;  %8148 = vmatprep.mubr.msk.f32.mxu1 %vm8794_vm0, %v11726_v13  ;;  %v3382_v40 = vand.u32 4294901760, %v9999_v41  ;;  %v7791_v0 = vpop.f32.mrb[79].mxu1  ;;  %v1357_v18 = vpop.f32.mrb[64].mxu0 }
 0x1b1   : > { %8076 = vmatprep.mubr.msk.f32.mxu0 %vm8794_vm0, %v11726_v13  ;;  %8190 = vmatpush3.msra.mxu1 %v9742_v45  ;;  %v10029_v45 = vadd.f32 %v9861_v7, %v1351_v6  ;;  %v7722_v32 = vpop.f32.mrb[65].mxu0  ;;  %v3374_v7 = vand.u32 4294901760, %v3373_v4  ;;  %v3392_v28 = vand.u32 4294901760, %v10023_v19  ;;  %v10044_v6 = vsub.f32 %v9931_v11, %v9947_v53 }
 0x1b2   : > { %8235 = vmatprep.subr.mxu1 %v11726_v13  ;;  %v3383_v12 = vsub.f32 %v9999_v41, %v3382_v40 }
 0x1b3   : > { %8149 = vmatmul.mubr.f32.gmra.mrb[184].mxu1 %v3362_v2  ;;  %v10035_v17 = vpop.f32.mrb[80].mxu1  ;;  %v7083_v2 = vld [vmem:[%s11709_s1 + $0x28] sm:$0xff] }
 0x1b4   : > { %8077 = vmatmul.mubr.f32.vlgmr.msra.gmra.mrb[168].mxu0 %v3354_v43  ;;  %8151 = vmatprep.mubr.msk.f32.mxu1 %vm8794_vm0, %v11726_v13  ;;  %v1358_v43 = vadd.f32 %v1357_v18, %v9915_v55  ;;  %v7794_v39 = vpop.f32.mrb[81].mxu1  ;;  %v10053_v55 = vand.u32 4294901760, %v7083_v2  ;;  %v3384_v4 = vand.u32 4294901760, %v3383_v12 }
 0x1b5   : > { %8121 = vmatpush3.msra.mxu0 %v9756_v25  ;;  %8079 = vmatprep.mubr.msk.f32.mxu0 %vm8794_vm0, %v11726_v13  ;;  %v3402_v39 = vand.u32 4294901760, %v10044_v6 }
 0x1b6   : > { %8166 = vmatprep.subr.mxu0 %v11726_v13  ;;  %v10051_v0 = vadd.f32 %v9877_v57, %v1358_v43  ;;  %v10072_v12 = vsub.f32 %v7083_v2, %v10053_v55 }
 0x1b7   : > { %8152 = vmatmul.mubr.f32.gmra.mrb[186].mxu1 %v3372_v21  ;;  %v10055_v18 = vpop.f32.mrb[82].mxu1  ;;  %v3393_v21 = vsub.f32 %v10023_v19, %v3392_v28 }
 0x1b8   : > { %8080 = vmatmul.mubr.f32.gmra.mrb[170].mxu0 %v3364_v50  ;;  %8154 = vmatprep.mubr.msk.f32.mxu1 %vm8794_vm0, %v11726_v13  ;;  %v1364_v50 = vpop.f32.mrb[66].mxu0  ;;  %v7797_v57 = vpop.f32.mrb[83].mxu1 }
 0x1b9   : > { %8082 = vmatprep.mubr.msk.f32.mxu0 %vm8794_vm0, %v11726_v13  ;;  %v1365_v11 = vadd.f32 %v1364_v50, %v9934_v30  ;;  %v7725_v32 = vpop.f32.mrb[67].mxu0  ;;  %v3412_v57 = vand.u32 4294901760, %v10062_v1 }
 0x1ba   : > { %v1371_v43 = vpop.f32.mrb[68].mxu0  ;;  %v3403_v32 = vsub.f32 %v10044_v6, %v3402_v39 }
 0x1bb   : > { %8155 = vmatmul.mubr.f32.gmra.mrb[188].mxu1 %v3382_v40  ;;  %v10069_v30 = vadd.f32 %v9899_v27, %v1365_v11  ;;  %v1372_v49 = vadd.f32 %v1371_v43, %v9957_v52  ;;  %v7728_v50 = vpop.f32.mrb[69].mxu0  ;;  %v3394_v40 = vand.u32 4294901760, %v3393_v21  ;;  %v11716_v52 = vand.u32 4294901760, %v10072_v12 }
 0x1bc   : > { %8083 = vmatmul.mubr.f32.gmra.mrb[172].mxu0 %v3374_v7  ;;  %8157 = vmatprep.mubr.msk.f32.mxu1 %vm8794_vm0, %v11726_v13  ;;  %v10074_v7 = vpop.f32.mrb[84].mxu1  ;;  %v1567_v2 = vpop.f32.mrb[70].mxu0 }
 0x1bd   : > { %8085 = vmatprep.mubr.msk.f32.mxu0 %vm8794_vm0, %v11726_v13  ;;  %v7825_v58 = vpop.f32.mrb[85].mxu1  ;;  %v10084_v27 = vadd.f32 %v9918_v10, %v1372_v49  ;;  %v1568_v11 = vadd.f32 %v1567_v2, %v9977_v61  ;;  %v7756_v21 = vpop.f32.mrb[71].mxu0  ;;  %v4172_v61 = vsub.f32 %v10072_v12, %v11716_v52 }
 0x1be   : > { %v3404_v58 = vand.u32 4294901760, %v3403_v32  ;;  %v1573_v49 = vpop.f32.mrb[72].mxu0 }
 0x1bf   : > { %8158 = vmatmul.mubr.f32.gmra.mrb[190].mxu1 %v3392_v28  ;;  %v3413_v28 = vsub.f32 %v10062_v1, %v3412_v57  ;;  %v10096_v10 = vadd.f32 %v9937_v5, %v1568_v11  ;;  %v7759_v32 = vpop.f32.mrb[73].mxu0  ;;  %v4173_v11 = vand.u32 4294901760, %v4172_v61 }
 0x1c0   : > { %8086 = vmatmul.mubr.f32.gmra.mrb[174].mxu0 %v3384_v4  ;;  %8160 = vmatprep.mubr.msk.f32.mxu1 %vm8794_vm0, %v11726_v13  ;;  %v10087_v4 = vpop.f32.mrb[86].mxu1  ;;  %v1579_v21 = vpop.f32.mrb[74].mxu0  ;;  %v11727_v32 = vand.u32 4294901760, %v9756_v25 }
 0x1c1   : > { %8088 = vmatprep.mubr.msk.f32.mxu0 %vm8794_vm0, %v11726_v13  ;;  %v7828_v43 = vpop.f32.mrb[87].mxu1 }
 0x1c3   : > { %8161 = vmatmul.mubr.f32.gmra.mrb[192].mxu1 %v3402_v39  ;;  %v10101_v50 = vpop.f32.mrb[88].mxu1  ;;  %v3414_v39 = vand.u32 4294901760, %v3413_v28 }
 0x1c4   : > { %8089 = vmatmul.mubr.f32.gmra.mrb[176].mxu0 %v3394_v40  ;;  %8163 = vmatprep.mubr.msk.f32.mxu1 %vm8794_vm0, %v11726_v13  ;;  %v1574_v40 = vadd.f32 %v1573_v49, %v9995_v23  ;;  %v7831_v2 = vpop.f32.mrb[89].mxu1  ;;  %v1580_v23 = vadd.f32 %v1579_v21, %v10012_v37  ;;  %v7762_v49 = vpop.f32.mrb[75].mxu0 }
 0x1c5   : > { %8091 = vmatprep.mubr.msk.f32.mxu0 %vm8794_vm0, %v11726_v13 }
 0x1c6   : > { %v10109_v5 = vadd.f32 %v9959_v62, %v1574_v40  ;;  %v10120_v62 = vadd.f32 %v9979_v33, %v1580_v23 }
 0x1c7   : > { %8164 = vmatmul.mubr.f32.gmra.mrb[194].mxu1 %v3412_v57  ;;  %v10111_v43 = vpop.f32.mrb[90].mxu1  ;;  %v1585_v57 = vpop.f32.mrb[76].mxu0 }
 0x1c8   : > { %8092 = vmatmul.mubr.f32.gmra.mrb[178].mxu0 %v3404_v58  ;;  %8191 = vmatprep.mubr.msk.f32.mxu1 %vm8794_vm0, %v11726_v13  ;;  %v7834_v58 = vpop.f32.mrb[91].mxu1  ;;  %v1586_v37 = vadd.f32 %v1585_v57, %v10029_v45  ;;  %v7765_v61 = vpop.f32.mrb[77].mxu0 }
 0x1c9   : > { %8094 = vmatprep.mubr.msk.f32.mxu0 %vm8794_vm0, %v11726_v13  ;;  %v1591_v45 = vpop.f32.mrb[78].mxu0 }
 0x1ca   : > { %v10133_v33 = vadd.f32 %v10001_v48, %v1586_v37  ;;  %v7768_v2 = vpop.f32.mrb[79].mxu0  ;;  %v8779_v37 = vld [vmem:[%s8867_s8 + $0xf] sm:$0xff] }
 0x1cb   : > { %8192 = vmatmul.mubr.f32.vlgmr.msra.gmra.mrb[196].mxu1 %v9848_v60  ;;  %v10122_v28 = vpop.f32.mrb[92].mxu1  ;;  %v4002_v61 = vmul.f32 %v8779_v37, %v9160_v42 }
 0x1cc   : > { %8095 = vmatmul.mubr.f32.gmra.mrb[180].mxu0 %v3414_v39  ;;  %8194 = vmatprep.mubr.msk.f32.mxu1 %vm8794_vm0, %v11726_v13  ;;  %v7837_v40 = vpop.f32.mrb[93].mxu1 }
 0x1cd   : > { %8122 = vmatprep.mubr.msk.f32.mxu0 %vm8794_vm0, %v11726_v13  ;;  %8236 = vmatpush3.msra.mxu1 %v4173_v11  ;;  %v1597_v11 = vpop.f32.mrb[80].mxu0  ;;  %v10188_v42 = vsel %vm264_vm1, %v4002_v61, 0 }
 0x1ce   : > { %8281 = vmatprep.subr.mxu1 %v11726_v13  ;;  %v7771_v23 = vpop.f32.mrb[81].mxu0 }
 0x1cf   : > { %8195 = vmatmul.mubr.f32.gmra.mrb[198].mxu1 %v9866_v29  ;;  %v10138_v39 = vpop.f32.mrb[94].mxu1  ;;  %v1603_v49 = vpop.f32.mrb[82].mxu0 }
 0x1d0   : > { %8123 = vmatmul.mubr.f32.vlgmr.msra.gmra.mrb[182].mxu0 %v9943_v3  ;;  %8197 = vmatprep.mubr.msk.f32.mxu1 %vm8794_vm0, %v11726_v13  ;;  %v1592_v3 = vadd.f32 %v1591_v45, %v10051_v0  ;;  %v7840_v25 = vpop.f32.mrb[95].mxu1  ;;  %v1598_v0 = vadd.f32 %v1597_v11, %v10069_v30  ;;  %v1604_v30 = vadd.f32 %v1603_v49, %v10084_v27  ;;  %v7774_v57 = vpop.f32.mrb[83].mxu0 }
 0x1d1   : > { %8167 = vmatpush3.msra.mxu0 %v11727_v32  ;;  %8125 = vmatprep.mubr.msk.f32.mxu0 %vm8794_vm0, %v11726_v13 }
 0x1d2   : > { %8212 = vmatprep.subr.mxu0 %v11726_v13  ;;  %v10148_v48 = vadd.f32 %v10016_v34, %v1592_v3  ;;  %v10160_v34 = vadd.f32 %v10035_v17, %v1598_v0  ;;  %v10172_v17 = vadd.f32 %v10055_v18, %v1604_v30  ;;  %v8780_v18 = vld [vmem:[%s8867_s8 + $0x17] sm:$0xff]  ;;  %v8781_v0 = vld [vmem:[%s8867_s8 + $0x1f] sm:$0xff] }
 0x1d3   : > { %8198 = vmatmul.mubr.f32.gmra.mrb[200].mxu1 %v9884_v31  ;;  %v10150_v21 = vpop.f32.mrb[96].mxu1 }
 0x1d4   : > { %8126 = vmatmul.mubr.f32.gmra.mrb[184].mxu0 %v9966_v44  ;;  %8200 = vmatprep.mubr.msk.f32.mxu1 %vm8794_vm0, %v11726_v13  ;;  %v7843_v44 = vpop.f32.mrb[97].mxu1  ;;  %v1867_v27 = vpop.f32.mrb[84].mxu0 }
 0x1d5   : > { %8128 = vmatprep.mubr.msk.f32.mxu0 %vm8794_vm0, %v11726_v13  ;;  %v7802_v32 = vpop.f32.mrb[85].mxu0 }
 0x1d7   : > { %8201 = vmatmul.mubr.f32.gmra.mrb[202].mxu1 %v9905_v38  ;;  %v10162_v58 = vpop.f32.mrb[98].mxu1 }
 0x1d8   : > { %8129 = vmatmul.mubr.f32.gmra.mrb[186].mxu0 %v9987_v20  ;;  %8203 = vmatprep.mubr.msk.f32.mxu1 %vm8794_vm0, %v11726_v13  ;;  %v7871_v20 = vpop.f32.mrb[99].mxu1 }
 0x1d9   : > { %8131 = vmatprep.mubr.msk.f32.mxu0 %vm8794_vm0, %v11726_v13  ;;  %v8782_v20 = vld [vmem:[%s8867_s8 + $0x27] sm:$0xff] }
 0x1db   : > { %8204 = vmatmul.mubr.f32.gmra.mrb[204].mxu1 %v9924_v14  ;;  %v10176_v40 = vpop.f32.mrb[100].mxu1 }
 0x1dc   : > { %8132 = vmatmul.mubr.f32.gmra.mrb[188].mxu0 %v9999_v41  ;;  %8206 = vmatprep.mubr.msk.f32.mxu1 %vm8794_vm0, %v11726_v13  ;;  %v10179_v41 = vadd.f32 %v10074_v7, %v1867_v27  ;;  %v7874_v45 = vpop.f32.mrb[101].mxu1  ;;  %v4003_v7 = vmul.f32 %v8780_v18, %v9194_v56  ;;  %v10204_v56 = vand.u32 4294901760, %v10188_v42 }
 0x1dd   : > { %8134 = vmatprep.mubr.msk.f32.mxu0 %vm8794_vm0, %v11726_v13 }
 0x1de   : > { %v10209_v23 = vsel %vm264_vm1, %v4003_v7, 0 }
 0x1df   : > { %8207 = vmatmul.mubr.f32.gmra.mrb[206].mxu1 %v9947_v53  ;;  %v10192_v2 = vpop.f32.mrb[102].mxu1 }
 0x1e0   : > { %8135 = vmatmul.mubr.f32.gmra.mrb[190].mxu0 %v10023_v19  ;;  %8209 = vmatprep.mubr.msk.f32.mxu1 %vm8794_vm0, %v11726_v13  ;;  %v7877_v11 = vpop.f32.mrb[103].mxu1 }
 0x1e1   : > { %8137 = vmatprep.mubr.msk.f32.mxu0 %vm8794_vm0, %v11726_v13  ;;  %v1877_v3 = vpop.f32.mrb[86].mxu0 }
 0x1e2   : > { %v10195_v19 = vadd.f32 %v10087_v4, %v1877_v3  ;;  %v7805_v25 = vpop.f32.mrb[87].mxu0  ;;  %v4004_v4 = vmul.f32 %v8781_v0, %v9187_v54  ;;  %v10223_v54 = vand.u32 4294901760, %v10209_v23 }
 0x1e3   : > { %8210 = vmatmul.mubr.f32.gmra.mrb[208].mxu1 %v9970_v51  ;;  %v10211_v44 = vpop.f32.mrb[104].mxu1  ;;  %v4000_v25 = vld [vmem:[%s8867_s8 + $0x37] sm:$0xff] }
 0x1e4   : > { %8138 = vmatmul.mubr.f32.gmra.mrb[192].mxu0 %v10044_v6  ;;  %8237 = vmatprep.mubr.msk.f32.mxu1 %vm8794_vm0, %v11726_v13  ;;  %v7880_v57 = vpop.f32.mrb[105].mxu1 }
 0x1e5   : > { %8140 = vmatprep.mubr.msk.f32.mxu0 %vm8794_vm0, %v11726_v13 }
 0x1e7   : > { %v1887_v6 = vpop.f32.mrb[88].mxu0  ;;  %8238 = vmatmul.mubr.f32.vlgmr.msra.gmra.mrb[210].mxu1 %v10204_v56  ;;  %v10231_v61 = vpop.f32.mrb[106].mxu1 }
 0x1e8   : > { %v10214_v49 = vadd.f32 %v10101_v50, %v1887_v6  ;;  %v7808_v30 = vpop.f32.mrb[89].mxu0  ;;  %8141 = vmatmul.mubr.f32.gmra.mrb[194].mxu0 %v10062_v1  ;;  %8240 = vmatprep.mubr.msk.f32.mxu1 %vm8794_vm0, %v11726_v13  ;;  %v10227_v50 = vsel %vm264_vm1, %v4004_v4, 0  ;;  %v4005_v1 = vmul.f32 %v8782_v20, %v9214_v63  ;;  %v7883_v45 = vpop.f32.mrb[107].mxu1 }
 0x1e9   : > { %8168 = vmatprep.mubr.msk.f32.mxu0 %vm8794_vm0, %v11726_v13  ;;  %8282 = vmatpush3.msra.mxu1 %v10053_v55  ;;  %v10243_v63 = vand.u32 4294901760, %v10227_v50 }
 0x1ea   : > { %8327 = vmatprep.subr.mxu1 %v11726_v13 }
 0x1eb   : > { %v1897_v37 = vpop.f32.mrb[90].mxu0  ;;  %8241 = vmatmul.mubr.f32.gmra.mrb[212].mxu1 %v10223_v54 }
 0x1ec   : > { %v10235_v27 = vadd.f32 %v10111_v43, %v1897_v37  ;;  %v7811_v32 = vpop.f32.mrb[91].mxu0  ;;  %8169 = vmatmul.mubr.f32.vlgmr.msra.gmra.mrb[196].mxu0 %v9848_v60  ;;  %8243 = vmatprep.mubr.msk.f32.mxu1 %vm8794_vm0, %v11726_v13  ;;  %v8783_v43 = vld [vmem:[%s8867_s8 + $0x2f] sm:$0xff]  ;;  %v10251_v60 = vsel %vm264_vm1, %v4005_v1, 0 }
 0x1ed   : > { %8213 = vmatpush3.msra.mxu0 %v10053_v55  ;;  %8171 = vmatprep.mubr.msk.f32.mxu0 %vm8794_vm0, %v11726_v13  ;;  %v4006_v18 = vmul.f32 %v8783_v43, %v9351_v9  ;;  %v10253_v3 = vpop.f32.mrb[108].mxu1  ;;  %v10266_v6 = vand.u32 4294901760, %v10251_v60 }
 0x1ee   : > { %8258 = vmatprep.subr.mxu0 %v11726_v13  ;;  %v7886_v4 = vpop.f32.mrb[109].mxu1 }
 0x1ef   : > { %v1907_v7 = vpop.f32.mrb[92].mxu0  ;;  %8244 = vmatmul.mubr.f32.gmra.mrb[214].mxu1 %v10243_v63  ;;  %v10269_v30 = vsel %vm264_vm1, %v4006_v18, 0  ;;  %v10300_v4 = vsub.f32 %v10188_v42, %v10204_v56 }
 0x1f0   : > { %v10257_v11 = vadd.f32 %v10122_v28, %v1907_v7  ;;  %v7814_v0 = vpop.f32.mrb[93].mxu0  ;;  %8172 = vmatmul.mubr.f32.gmra.mrb[198].mxu0 %v9866_v29  ;;  %8246 = vmatprep.mubr.msk.f32.mxu1 %vm8794_vm0, %v11726_v13  ;;  %v4007_v28 = vmul.f32 %v4000_v25, %v9371_v26  ;;  %v4001_v29 = vld [vmem:[%s8867_s8 + $0x3f] sm:$0x1]  ;;  %v10285_v45 = vand.u32 4294901760, %v10269_v30 }
 0x1f1   : > { %8174 = vmatprep.mubr.msk.f32.mxu0 %vm8794_vm0, %v11726_v13  ;;  %v10272_v20 = vpop.f32.mrb[110].mxu1  ;;  %v4008_v43 = vmul.f32 %v4001_v29, %v9389_v8 }
 0x1f2   : > { %v7889_v32 = vpop.f32.mrb[111].mxu1 }
 0x1f3   : > { %v1917_v57 = vpop.f32.mrb[94].mxu0  ;;  %8247 = vmatmul.mubr.f32.gmra.mrb[216].mxu1 %v10266_v6  ;;  %v4100_v32 = vand.u32 4294901760, %v10300_v4 }
 0x1f4   : > { %v10276_v1 = vadd.f32 %v10138_v39, %v1917_v57  ;;  %v7817_v37 = vpop.f32.mrb[95].mxu0  ;;  %8175 = vmatmul.mubr.f32.gmra.mrb[200].mxu0 %v9884_v31  ;;  %8249 = vmatprep.mubr.msk.f32.mxu1 %vm8794_vm0, %v11726_v13  ;;  %v10289_v39 = vsel %vm264_vm1, %v4007_v28, 0 }
 0x1f5   : > { %8177 = vmatprep.mubr.msk.f32.mxu0 %vm8794_vm0, %v11726_v13  ;;  %v10291_v7 = vpop.f32.mrb[112].mxu1  ;;  %v10307_v28 = vand.u32 4294901760, %v10289_v39 }
 0x1f6   : > { %v7917_v0 = vpop.f32.mrb[113].mxu1 }
 0x1f7   : > { %v1927_v18 = vpop.f32.mrb[96].mxu0  ;;  %8250 = vmatmul.mubr.f32.gmra.mrb[218].mxu1 %v10285_v45 }
 0x1f8   : > { %v10294_v31 = vadd.f32 %v10150_v21, %v1927_v18  ;;  %v7820_v25 = vpop.f32.mrb[97].mxu0  ;;  %8178 = vmatmul.mubr.f32.gmra.mrb[202].mxu0 %v9905_v38  ;;  %8252 = vmatprep.mubr.msk.f32.mxu1 %vm8794_vm0, %v11726_v13  ;;  %v10310_v21 = vsel %vm264_vm1, %v4008_v43, 0  ;;  %v10324_v43 = vsub.f32 %v10209_v23, %v10223_v54  ;;  %v4101_v23 = vsub.f32 %v10300_v4, %v4100_v32 }
 0x1f9   : > { %8180 = vmatprep.mubr.msk.f32.mxu0 %vm8794_vm0, %v11726_v13  ;;  %v10312_v57 = vpop.f32.mrb[114].mxu1 }
 0x1fa   : > { %v7920_v42 = vpop.f32.mrb[115].mxu1  ;;  %v4102_v52 = vand.u32 4294901760, %v4101_v23 }
 0x1fb   : > { %v2113_v38 = vpop.f32.mrb[98].mxu0  ;;  %8253 = vmatmul.mubr.f32.gmra.mrb[220].mxu1 %v10307_v28 }
 0x1fc   : > { %v2114_v29 = vadd.f32 %v2113_v38, %v10179_v41  ;;  %v7848_v37 = vpop.f32.mrb[99].mxu0  ;;  %8181 = vmatmul.mubr.f32.gmra.mrb[204].mxu0 %v9924_v14  ;;  %8255 = vmatprep.mubr.msk.f32.mxu1 %vm8794_vm0, %v11726_v13  ;;  %v10327_v41 = vand.u32 4294901760, %v10310_v21 }
 0x1fd   : > { %8183 = vmatprep.mubr.msk.f32.mxu0 %vm8794_vm0, %v11726_v13  ;;  %v10332_v25 = vpop.f32.mrb[116].mxu1 }
 0x1fe   : > { %v10330_v14 = vadd.f32 %v10162_v58, %v2114_v29  ;;  %v7923_v37 = vpop.f32.mrb[117].mxu1  ;;  %v10344_v58 = vsub.f32 %v10227_v50, %v10243_v63  ;;  %v10413_v8 = vsub.f32 %v10310_v21, %v10327_v41 }
 0x1ff   : > { %v2120_v18 = vpop.f32.mrb[100].mxu0  ;;  %8256 = vmatmul.mubr.f32.gmra.mrb[222].mxu1 %v10327_v41 }
 0x200   : > { %v2121_v0 = vadd.f32 %v2120_v18, %v10195_v19  ;;  %v7851_v38 = vpop.f32.mrb[101].mxu0  ;;  %8184 = vmatmul.mubr.f32.gmra.mrb[206].mxu0 %v9947_v53  ;;  %8283 = vmatprep.mubr.msk.f32.mxu1 %vm8794_vm0, %v11726_v13  ;;  %v4110_v19 = vand.u32 4294901760, %v10324_v43 }
 0x201   : > { %8186 = vmatprep.mubr.msk.f32.mxu0 %vm8794_vm0, %v11726_v13  ;;  %v10350_v42 = vpop.f32.mrb[118].mxu1 }
 0x202   : > { %v10348_v29 = vadd.f32 %v10176_v40, %v2121_v0  ;;  %v7926_v37 = vpop.f32.mrb[119].mxu1  ;;  %v10360_v40 = vsub.f32 %v10251_v60, %v10266_v6  ;;  %v4111_v50 = vsub.f32 %v10324_v43, %v4110_v19 }
 0x203   : > { %v2127_v53 = vpop.f32.mrb[102].mxu0  ;;  %8284 = vmatmul.mubr.f32.vlgmr.msra.gmra.mrb[224].mxu1 %v4100_v32 }
 0x204   : > { %v2128_v18 = vadd.f32 %v2127_v53, %v10214_v49  ;;  %v7854_v38 = vpop.f32.mrb[103].mxu0  ;;  %8187 = vmatmul.mubr.f32.gmra.mrb[208].mxu0 %v9970_v51  ;;  %8286 = vmatprep.mubr.msk.f32.mxu1 %vm8794_vm0, %v11726_v13  ;;  %v4120_v49 = vand.u32 4294901760, %v10344_v58 }
 0x205   : > { %8214 = vmatprep.mubr.msk.f32.mxu0 %vm8794_vm0, %v11726_v13  ;;  %8328 = vmatpush3.msra.mxu1 %v10053_v55  ;;  %v10368_v32 = vpop.f32.mrb[120].mxu1  ;;  %v10374_v38 = vsub.f32 %v10269_v30, %v10285_v45  ;;  %v4112_v55 = vand.u32 4294901760, %v4111_v50 }
 0x206   : > { %v10365_v0 = vadd.f32 %v10192_v2, %v2128_v18  ;;  %8373 = vmatprep.subr.mxu1 %v11726_v13  ;;  %v7929_v60 = vpop.f32.mrb[121].mxu1  ;;  %v4121_v2 = vsub.f32 %v10344_v58, %v4120_v49  ;;  %v4130_v18 = vand.u32 4294901760, %v10360_v40 }
 0x207   : > { %v2134_v51 = vpop.f32.mrb[104].mxu0  ;;  %8287 = vmatmul.mubr.f32.gmra.mrb[226].mxu1 %v4110_v19  ;;  %v7084_v19 = vld [vmem:[%s11709_s1 + $0x30] sm:$0xff] }
 0x208   : > { %v2135_v23 = vadd.f32 %v2134_v51, %v10235_v27  ;;  %v7857_v53 = vpop.f32.mrb[105].mxu0  ;;  %8215 = vmatmul.mubr.f32.vlgmr.msra.gmra.mrb[210].mxu0 %v4102_v52  ;;  %8289 = vmatprep.mubr.msk.f32.mxu1 %vm8794_vm0, %v11726_v13  ;;  %v4131_v60 = vsub.f32 %v10360_v40, %v4130_v18 }
 0x209   : > { %8259 = vmatpush3.msra.mxu0 %v10072_v12  ;;  %8217 = vmatprep.mubr.msk.f32.mxu0 %vm8794_vm0, %v11726_v13  ;;  %v10387_v30 = vpop.f32.mrb[122].mxu1  ;;  %v4122_v53 = vand.u32 4294901760, %v4121_v2 }
 0x20a   : > { %v10382_v27 = vadd.f32 %v10211_v44, %v2135_v23  ;;  %8304 = vmatprep.subr.mxu0 %v11726_v13  ;;  %v7932_v51 = vpop.f32.mrb[123].mxu1  ;;  %v10395_v44 = vsub.f32 %v10289_v39, %v10307_v28  ;;  %v4140_v23 = vand.u32 4294901760, %v10374_v38  ;;  %v4132_v2 = vand.u32 4294901760, %v4131_v60 }
 0x20b   : > { %v2141_v52 = vpop.f32.mrb[106].mxu0  ;;  %8290 = vmatmul.mubr.f32.gmra.mrb[228].mxu1 %v4120_v49  ;;  %v4160_v60 = vand.u32 4294901760, %v10413_v8 }
 0x20c   : > { %v2142_v37 = vadd.f32 %v2141_v52, %v10257_v11  ;;  %v7860_v50 = vpop.f32.mrb[107].mxu0  ;;  %8218 = vmatmul.mubr.f32.gmra.mrb[212].mxu0 %v4112_v55  ;;  %8292 = vmatprep.mubr.msk.f32.mxu1 %vm8794_vm0, %v11726_v13  ;;  %v10406_v55 = vand.u32 4294901760, %v7084_v19 }
 0x20d   : > { %8220 = vmatprep.mubr.msk.f32.mxu0 %vm8794_vm0, %v11726_v13  ;;  %v10408_v52 = vpop.f32.mrb[124].mxu1 }
 0x20e   : > { %v10404_v11 = vadd.f32 %v10231_v61, %v2142_v37  ;;  %v7935_v51 = vpop.f32.mrb[125].mxu1  ;;  %v4150_v61 = vand.u32 4294901760, %v10395_v44  ;;  %v4141_v37 = vsub.f32 %v10374_v38, %v4140_v23 }
 0x20f   : > { %v2148_v49 = vpop.f32.mrb[108].mxu0  ;;  %8293 = vmatmul.mubr.f32.gmra.mrb[230].mxu1 %v4130_v18  ;;  %v10425_v18 = vsub.f32 %v7084_v19, %v10406_v55 }
 0x210   : > { %v2149_v39 = vadd.f32 %v2148_v49, %v10276_v1  ;;  %v7863_v50 = vpop.f32.mrb[109].mxu0  ;;  %8221 = vmatmul.mubr.f32.gmra.mrb[214].mxu0 %v4122_v53  ;;  %8295 = vmatprep.mubr.msk.f32.mxu1 %vm8794_vm0, %v11726_v13  ;;  %v4151_v19 = vsub.f32 %v10395_v44, %v4150_v61 }
 0x211   : > { %8223 = vmatprep.mubr.msk.f32.mxu0 %vm8794_vm0, %v11726_v13  ;;  %v10427_v21 = vpop.f32.mrb[126].mxu1 }
 0x212   : > { %v10422_v1 = vadd.f32 %v10253_v3, %v2149_v39  ;;  %v7963_v51 = vpop.f32.mrb[127].mxu1  ;;  %v4142_v3 = vand.u32 4294901760, %v4141_v37  ;;  %v4152_v37 = vand.u32 4294901760, %v4151_v19 }
 0x213   : > { %v2155_v53 = vpop.f32.mrb[110].mxu0  ;;  %8296 = vmatmul.mubr.f32.gmra.mrb[232].mxu1 %v4140_v23 }
 0x214   : > { %v2156_v49 = vadd.f32 %v2155_v53, %v10294_v31  ;;  %v7866_v50 = vpop.f32.mrb[111].mxu0  ;;  %8224 = vmatmul.mubr.f32.gmra.mrb[216].mxu0 %v4132_v2  ;;  %8298 = vmatprep.mubr.msk.f32.mxu1 %vm8794_vm0, %v11726_v13  ;;  %v11719_v31 = vand.u32 4294901760, %v10425_v18 }
 0x215   : > { %8226 = vmatprep.mubr.msk.f32.mxu0 %vm8794_vm0, %v11726_v13  ;;  %v10440_v2 = vpop.f32.mrb[128].mxu1 }
 0x216   : > { %v10437_v39 = vadd.f32 %v10272_v20, %v2156_v49  ;;  %v7966_v51 = vpop.f32.mrb[129].mxu1  ;;  %v4161_v49 = vsub.f32 %v10413_v8, %v4160_v60  ;;  %v4920_v26 = vsub.f32 %v10425_v18, %v11719_v31 }
 0x217   : > { %v2351_v53 = vpop.f32.mrb[112].mxu0  ;;  %8299 = vmatmul.mubr.f32.gmra.mrb[234].mxu1 %v4150_v61 }
 0x218   : > { %v2352_v23 = vadd.f32 %v2351_v53, %v10330_v14  ;;  %v7894_v50 = vpop.f32.mrb[113].mxu0  ;;  %8227 = vmatmul.mubr.f32.gmra.mrb[218].mxu0 %v4142_v3  ;;  %8301 = vmatprep.mubr.msk.f32.mxu1 %vm8794_vm0, %v11726_v13  ;;  %v4162_v19 = vand.u32 4294901760, %v4161_v49 }
 0x219   : > { %8229 = vmatprep.mubr.msk.f32.mxu0 %vm8794_vm0, %v11726_v13 }
 0x21a   : > { %v2460_v20 = vadd.f32 %v10291_v7, %v2352_v23  ;;  %v10452_v53 = vpop.f32.mrb[130].mxu1  ;;  %v4921_v23 = vand.u32 4294901760, %v4920_v26 }
 0x21b   : > { %v2357_v14 = vpop.f32.mrb[114].mxu0  ;;  %v7969_v50 = vpop.f32.mrb[131].mxu1  ;;  %8302 = vmatmul.mubr.f32.gmra.mrb[236].mxu1 %v4160_v60 }
 0x21c   : > { %v2358_v61 = vadd.f32 %v2357_v14, %v10348_v29  ;;  %v7897_v3 = vpop.f32.mrb[115].mxu0  ;;  %8230 = vmatmul.mubr.f32.gmra.mrb[220].mxu0 %v4152_v37  ;;  %v10456_v51 = vadd.f32 %v2460_v20, %v10096_v10  ;;  %8329 = vmatprep.mubr.msk.f32.mxu1 %vm8794_vm0, %v11726_v13  ;;  %v11728_v14 = vand.u32 4294901760, %v10072_v12 }
 0x21d   : > { %8232 = vmatprep.mubr.msk.f32.mxu0 %vm8794_vm0, %v11726_v13 }
 0x21e   : > { %v2466_v7 = vadd.f32 %v10312_v57, %v2358_v61  ;;  %v10463_v9 = vpop.f32.mrb[132].mxu1 }
 0x21f   : > { %v2363_v31 = vpop.f32.mrb[116].mxu0  ;;  %v7972_v60 = vpop.f32.mrb[133].mxu1  ;;  %8330 = vmatmul.mubr.f32.vlgmr.msra.gmra.mrb[238].mxu1 %v10204_v56 }
 0x220   : > { %v2364_v29 = vadd.f32 %v2363_v31, %v10365_v0  ;;  %v7900_v37 = vpop.f32.mrb[117].mxu0  ;;  %8233 = vmatmul.mubr.f32.gmra.mrb[222].mxu0 %v4162_v19  ;;  %v10468_v10 = vadd.f32 %v2466_v7, %v10109_v5  ;;  %8332 = vmatprep.mubr.msk.f32.mxu1 %vm8794_vm0, %v11726_v13 }
 0x221   : > { %8260 = vmatprep.mubr.msk.f32.mxu0 %vm8794_vm0, %v11726_v13  ;;  %8374 = vmatpush3.msra.mxu1 %v4921_v23 }
 0x222   : > { %v2472_v26 = vadd.f32 %v10332_v25, %v2364_v29  ;;  %v10475_v20 = vpop.f32.mrb[134].mxu1  ;;  %8419 = vmatprep.subr.mxu1 %v11726_v13  ;;  %v4743_v29 = vld [vmem:[%s8867_s8 + $0x14] sm:$0xff] }
 0x223   : > { %v2369_v57 = vpop.f32.mrb[118].mxu0  ;;  %v7975_v5 = vpop.f32.mrb[135].mxu1  ;;  %8333 = vmatmul.mubr.f32.gmra.mrb[240].mxu1 %v10223_v54 }
 0x224   : > { %v2370_v0 = vadd.f32 %v2369_v57, %v10382_v27  ;;  %v7903_v31 = vpop.f32.mrb[119].mxu0  ;;  %8261 = vmatmul.mubr.f32.vlgmr.msra.gmra.mrb[224].mxu0 %v10300_v4  ;;  %v10482_v49 = vadd.f32 %v2472_v26, %v10120_v62  ;;  %8335 = vmatprep.mubr.msk.f32.mxu1 %vm8794_vm0, %v11726_v13  ;;  %v4750_v26 = vmul.f32 %v4743_v29, %v9110_v15 }
 0x225   : > { %8305 = vmatpush3.msra.mxu0 %v11728_v14  ;;  %8263 = vmatprep.mubr.msk.f32.mxu0 %vm8794_vm0, %v11726_v13  ;;  %v4745_v14 = vld [vmem:[%s8867_s8 + $0x24] sm:$0xff] }
 0x226   : > { %v2478_v25 = vadd.f32 %v10350_v42, %v2370_v0  ;;  %8350 = vmatprep.subr.mxu0 %v11726_v13  ;;  %v10492_v27 = vpop.f32.mrb[136].mxu1  ;;  %v10549_v15 = vsel %vm264_vm1, %v4750_v26, 0 }
 0x227   : > { %v2375_v4 = vpop.f32.mrb[120].mxu0  ;;  %v7978_v12 = vpop.f32.mrb[137].mxu1  ;;  %8336 = vmatmul.mubr.f32.gmra.mrb[242].mxu1 %v10243_v63 }
 0x228   : > { %v2376_v61 = vadd.f32 %v2375_v4, %v10404_v11  ;;  %v7906_v62 = vpop.f32.mrb[121].mxu0  ;;  %8264 = vmatmul.mubr.f32.gmra.mrb[226].mxu0 %v10324_v43  ;;  %v10498_v3 = vadd.f32 %v2478_v25, %v10133_v33  ;;  %8338 = vmatprep.mubr.msk.f32.mxu1 %vm8794_vm0, %v11726_v13 }
 0x229   : > { %8266 = vmatprep.mubr.msk.f32.mxu0 %vm8794_vm0, %v11726_v13 }
 0x22a   : > { %v2484_v42 = vadd.f32 %v10368_v32, %v2376_v61  ;;  %v10505_v11 = vpop.f32.mrb[138].mxu1  ;;  %v4752_v61 = vmul.f32 %v4745_v14, %v9112_v16 }
 0x22b   : > { %v2381_v50 = vpop.f32.mrb[122].mxu0  ;;  %v7981_v19 = vpop.f32.mrb[139].mxu1  ;;  %8339 = vmatmul.mubr.f32.gmra.mrb[244].mxu1 %v10266_v6 }
 0x22c   : > { %v2382_v43 = vadd.f32 %v2381_v50, %v10422_v1  ;;  %v7909_v7 = vpop.f32.mrb[123].mxu0  ;;  %8267 = vmatmul.mubr.f32.gmra.mrb[228].mxu0 %v10344_v58  ;;  %v10511_v33 = vadd.f32 %v2484_v42, %v10148_v48  ;;  %8341 = vmatprep.mubr.msk.f32.mxu1 %vm8794_vm0, %v11726_v13 }
 0x22d   : > { %8269 = vmatprep.mubr.msk.f32.mxu0 %vm8794_vm0, %v11726_v13 }
 0x22e   : > { %v2490_v32 = vadd.f32 %v10387_v30, %v2382_v43  ;;  %v10518_v1 = vpop.f32.mrb[140].mxu1 }
 0x22f   : > { %v2387_v23 = vpop.f32.mrb[124].mxu0  ;;  %v8009_v60 = vpop.f32.mrb[141].mxu1  ;;  %8342 = vmatmul.mubr.f32.gmra.mrb[246].mxu1 %v10285_v45 }
 0x230   : > { %v10522_v58 = vadd.f32 %v2490_v32, %v10160_v34  ;;  %v2388_v37 = vadd.f32 %v2387_v23, %v10437_v39  ;;  %v7912_v48 = vpop.f32.mrb[125].mxu0  ;;  %8270 = vmatmul.mubr.f32.gmra.mrb[230].mxu0 %v10360_v40  ;;  %8344 = vmatprep.mubr.msk.f32.mxu1 %vm8794_vm0, %v11726_v13  ;;  %v4744_v39 = vld [vmem:[%s8867_s8 + $0x1c] sm:$0xff]  ;;  %v4747_v32 = vld [vmem:[%s8867_s8 + $0x34] sm:$0xff] }
 0x231   : > { %8272 = vmatprep.mubr.msk.f32.mxu0 %vm8794_vm0, %v11726_v13 }
 0x232   : > { %v2496_v30 = vadd.f32 %v10408_v52, %v2388_v37  ;;  %v10533_v57 = vpop.f32.mrb[142].mxu1 }
 0x233   : > { %v2615_v34 = vpop.f32.mrb[126].mxu0  ;;  %v8012_v5 = vpop.f32.mrb[143].mxu1  ;;  %8345 = vmatmul.mubr.f32.gmra.mrb[248].mxu1 %v10307_v28 }
 0x234   : > { %v10537_v40 = vadd.f32 %v2496_v30, %v10172_v17  ;;  %v10540_v0 = vadd.f32 %v10427_v21, %v2615_v34  ;;  %v7940_v31 = vpop.f32.mrb[127].mxu0  ;;  %8273 = vmatmul.mubr.f32.gmra.mrb[232].mxu0 %v10374_v38  ;;  %8347 = vmatprep.mubr.msk.f32.mxu1 %vm8794_vm0, %v11726_v13  ;;  %v4751_v17 = vmul.f32 %v4744_v39, %v9122_v22  ;;  %v10565_v22 = vand.u32 4294901760, %v10549_v15  ;;  %v4748_v30 = vld [vmem:[%s8867_s8 + $0x3c] sm:$0xff] }
 0x235   : > { %8275 = vmatprep.mubr.msk.f32.mxu0 %vm8794_vm0, %v11726_v13  ;;  %v4755_v31 = vmul.f32 %v4748_v30, %v9142_v35 }
 0x236   : > { %v10552_v21 = vpop.f32.mrb[144].mxu1 }
 0x237   : > { %v2625_v52 = vpop.f32.mrb[128].mxu0  ;;  %v8015_v4 = vpop.f32.mrb[145].mxu1  ;;  %8348 = vmatmul.mubr.f32.gmra.mrb[250].mxu1 %v10327_v41 }
 0x238   : > { %v10556_v38 = vadd.f32 %v10440_v2, %v2625_v52  ;;  %v7943_v25 = vpop.f32.mrb[129].mxu0  ;;  %8276 = vmatmul.mubr.f32.gmra.mrb[234].mxu0 %v10395_v44  ;;  %8375 = vmatprep.mubr.msk.f32.mxu1 %vm8794_vm0, %v11726_v13  ;;  %v10569_v2 = vsel %vm264_vm1, %v4751_v17, 0  ;;  %v4746_v44 = vld [vmem:[%s8867_s8 + $0x2c] sm:$0xff]  ;;  %v10648_v4 = vsel %vm264_vm1, %v4755_v31, 0 }
 0x239   : > { %8278 = vmatprep.mubr.msk.f32.mxu0 %vm8794_vm0, %v11726_v13  ;;  %v10584_v16 = vand.u32 4294901760, %v10569_v2  ;;  %v4753_v7 = vmul.f32 %v4746_v44, %v9126_v24 }
 0x23a   : > { %v10571_v12 = vpop.f32.mrb[146].mxu1 }
 0x23b   : > { %v2635_v62 = vpop.f32.mrb[130].mxu0  ;;  %v8018_v43 = vpop.f32.mrb[147].mxu1  ;;  %8376 = vmatmul.mubr.f32.vlgmr.msra.gmra.mrb[252].mxu1 %v10565_v22 }
 0x23c   : > { %v10575_v42 = vadd.f32 %v10452_v53, %v2635_v62  ;;  %v7946_v50 = vpop.f32.mrb[131].mxu0  ;;  %8279 = vmatmul.mubr.f32.gmra.mrb[236].mxu0 %v10413_v8  ;;  %8378 = vmatprep.mubr.msk.f32.mxu1 %vm8794_vm0, %v11726_v13  ;;  %v10588_v53 = vsel %vm264_vm1, %v4752_v61, 0  ;;  %v10667_v43 = vand.u32 4294901760, %v10648_v4 }
 0x23d   : > { %8306 = vmatprep.mubr.msk.f32.mxu0 %vm8794_vm0, %v11726_v13  ;;  %8420 = vmatpush3.msra.mxu1 %v10406_v55  ;;  %v10604_v24 = vand.u32 4294901760, %v10588_v53 }
 0x23e   : > { %v10591_v19 = vpop.f32.mrb[148].mxu1  ;;  %8465 = vmatprep.subr.mxu1 %v11726_v13 }
 0x23f   : > { %v2645_v8 = vpop.f32.mrb[132].mxu0  ;;  %v8021_v37 = vpop.f32.mrb[149].mxu1  ;;  %8379 = vmatmul.mubr.f32.gmra.mrb[254].mxu1 %v10584_v16 }
 0x240   : > { %v10596_v23 = vadd.f32 %v10463_v9, %v2645_v8  ;;  %v7949_v29 = vpop.f32.mrb[133].mxu0  ;;  %8307 = vmatmul.mubr.f32.vlgmr.msra.gmra.mrb[238].mxu0 %v10204_v56  ;;  %8381 = vmatprep.mubr.msk.f32.mxu1 %vm8794_vm0, %v11726_v13  ;;  %v10610_v9 = vsel %vm264_vm1, %v4753_v7, 0  ;;  %v4754_v56 = vmul.f32 %v4747_v32, %v9144_v36  ;;  %v10684_v37 = vsub.f32 %v10569_v2, %v10584_v16 }
 0x241   : > { %8351 = vmatpush3.msra.mxu0 %v10406_v55  ;;  %8309 = vmatprep.mubr.msk.f32.mxu0 %vm8794_vm0, %v11726_v13  ;;  %v10626_v36 = vand.u32 4294901760, %v10610_v9 }
 0x242   : > { %8396 = vmatprep.subr.mxu0 %v11726_v13  ;;  %v10613_v60 = vpop.f32.mrb[150].mxu1 }
 0x243   : > { %v2655_v48 = vpop.f32.mrb[134].mxu0  ;;  %v8024_v39 = vpop.f32.mrb[151].mxu1  ;;  %8382 = vmatmul.mubr.f32.gmra.mrb[0].mxu1 %v10604_v24 }
 0x244   : > { %v10617_v26 = vadd.f32 %v10475_v20, %v2655_v48  ;;  %v7952_v34 = vpop.f32.mrb[135].mxu0  ;;  %8310 = vmatmul.mubr.f32.gmra.mrb[240].mxu0 %v10223_v54  ;;  %8384 = vmatprep.mubr.msk.f32.mxu1 %vm8794_vm0, %v11726_v13  ;;  %v10630_v20 = vsel %vm264_vm1, %v4754_v56, 0  ;;  %v4749_v54 = vld [vmem:[%s8867_s8 + $0x44] sm:$0x1] }
 0x245   : > { %8312 = vmatprep.mubr.msk.f32.mxu0 %vm8794_vm0, %v11726_v13  ;;  %v10645_v35 = vand.u32 4294901760, %v10630_v20 }
 0x246   : > { %v10632_v17 = vpop.f32.mrb[152].mxu1 }
 0x247   : > { %v2665_v5 = vpop.f32.mrb[136].mxu0  ;;  %v8027_v25 = vpop.f32.mrb[153].mxu1  ;;  %8385 = vmatmul.mubr.f32.gmra.mrb[2].mxu1 %v10626_v36 }
 0x248   : > { %v10636_v52 = vadd.f32 %v10492_v27, %v2665_v5  ;;  %v7955_v14 = vpop.f32.mrb[137].mxu0  ;;  %8313 = vmatmul.mubr.f32.gmra.mrb[242].mxu0 %v10243_v63  ;;  %8387 = vmatprep.mubr.msk.f32.mxu1 %vm8794_vm0, %v11726_v13  ;;  %v4756_v27 = vmul.f32 %v4749_v54, %v9171_v47  ;;  %v10664_v47 = vsub.f32 %v10549_v15, %v10565_v22 }
 0x249   : > { %8315 = vmatprep.mubr.msk.f32.mxu0 %vm8794_vm0, %v11726_v13 }
 0x24a   : > { %v10651_v62 = vpop.f32.mrb[154].mxu1  ;;  %v4848_v15 = vand.u32 4294901760, %v10664_v47 }
 0x24b   : > { %v2675_v61 = vpop.f32.mrb[138].mxu0  ;;  %v8055_v50 = vpop.f32.mrb[155].mxu1  ;;  %8388 = vmatmul.mubr.f32.gmra.mrb[4].mxu1 %v10645_v35 }
 0x24c   : > { %v10654_v63 = vadd.f32 %v10505_v11, %v2675_v61  ;;  %v7958_v44 = vpop.f32.mrb[139].mxu0  ;;  %8316 = vmatmul.mubr.f32.gmra.mrb[244].mxu0 %v10266_v6  ;;  %8390 = vmatprep.mubr.msk.f32.mxu1 %vm8794_vm0, %v11726_v13  ;;  %v10670_v11 = vsel %vm264_vm1, %v4756_v27, 0  ;;  %v4849_v2 = vsub.f32 %v10664_v47, %v4848_v15 }
 0x24d   : > { %8318 = vmatprep.mubr.msk.f32.mxu0 %vm8794_vm0, %v11726_v13 }
 0x24e   : > { %v10672_v7 = vpop.f32.mrb[156].mxu1  ;;  %v4850_v27 = vand.u32 4294901760, %v4849_v2 }
 0x24f   : > { %v2861_v6 = vpop.f32.mrb[140].mxu0  ;;  %v8058_v29 = vpop.f32.mrb[157].mxu1  ;;  %8391 = vmatmul.mubr.f32.gmra.mrb[6].mxu1 %v10667_v43 }
 0x250   : > { %v2862_v8 = vadd.f32 %v2861_v6, %v10540_v0  ;;  %v7986_v32 = vpop.f32.mrb[141].mxu0  ;;  %8319 = vmatmul.mubr.f32.gmra.mrb[246].mxu0 %v10285_v45  ;;  %8393 = vmatprep.mubr.msk.f32.mxu1 %vm8794_vm0, %v11726_v13  ;;  %v10687_v0 = vand.u32 4294901760, %v10670_v11 }
 0x251   : > { %8321 = vmatprep.mubr.msk.f32.mxu0 %vm8794_vm0, %v11726_v13 }
 0x252   : > { %v10690_v45 = vadd.f32 %v10518_v1, %v2862_v8  ;;  %v10692_v48 = vpop.f32.mrb[158].mxu1  ;;  %v10703_v1 = vsub.f32 %v10588_v53, %v10604_v24  ;;  %v10716_v53 = vsub.f32 %v10610_v9, %v10626_v36 }
 0x253   : > { %v2868_v56 = vpop.f32.mrb[142].mxu0  ;;  %v8061_v39 = vpop.f32.mrb[159].mxu1  ;;  %8394 = vmatmul.mubr.f32.gmra.mrb[8].mxu1 %v10687_v0 }
 0x254   : > { %v2869_v30 = vadd.f32 %v2868_v56, %v10556_v38  ;;  %v7989_v34 = vpop.f32.mrb[143].mxu0  ;;  %8322 = vmatmul.mubr.f32.gmra.mrb[248].mxu0 %v10307_v28  ;;  %8421 = vmatprep.mubr.msk.f32.mxu1 %vm8794_vm0, %v11726_v13  ;;  %v4858_v38 = vand.u32 4294901760, %v10684_v37  ;;  %v4878_v8 = vand.u32 4294901760, %v10716_v53  ;;  %v7085_v56 = vld [vmem:[%s11709_s1 + $0x38] sm:$0xff]  ;;  %v10756_v39 = vsub.f32 %v10648_v4, %v10667_v43 }
 0x255   : > { %8324 = vmatprep.mubr.msk.f32.mxu0 %vm8794_vm0, %v11726_v13 }
 0x256   : > { %v10708_v31 = vadd.f32 %v10533_v57, %v2869_v30  ;;  %v10710_v5 = vpop.f32.mrb[160].mxu1  ;;  %v4868_v57 = vand.u32 4294901760, %v10703_v1 }
 0x257   : > { %v2875_v28 = vpop.f32.mrb[144].mxu0  ;;  %v8064_v25 = vpop.f32.mrb[161].mxu1  ;;  %8422 = vmatmul.mubr.f32.vlgmr.msra.gmra.mrb[10].mxu1 %v4848_v15 }
 0x258   : > { %v2876_v54 = vadd.f32 %v2875_v28, %v10575_v42  ;;  %v7992_v14 = vpop.f32.mrb[145].mxu0  ;;  %8325 = vmatmul.mubr.f32.gmra.mrb[250].mxu0 %v10327_v41  ;;  %8424 = vmatprep.mubr.msk.f32.mxu1 %vm8794_vm0, %v11726_v13  ;;  %v4859_v42 = vsub.f32 %v10684_v37, %v4858_v38  ;;  %v10766_v28 = vand.u32 4294901760, %v7085_v56 }
 0x259   : > { %8352 = vmatprep.mubr.msk.f32.mxu0 %vm8794_vm0, %v11726_v13  ;;  %8466 = vmatpush3.msra.mxu1 %v10406_v55  ;;  %v4869_v55 = vsub.f32 %v10703_v1, %v4868_v57 }
 0x25a   : > { %v10725_v61 = vadd.f32 %v10552_v21, %v2876_v54  ;;  %v10728_v44 = vpop.f32.mrb[162].mxu1  ;;  %8511 = vmatprep.subr.mxu1 %v11726_v13  ;;  %v10739_v21 = vsub.f32 %v10630_v20, %v10645_v35  ;;  %v4860_v32 = vand.u32 4294901760, %v4859_v42  ;;  %v4898_v42 = vand.u32 4294901760, %v10756_v39 }
 0x25b   : > { %v2882_v41 = vpop.f32.mrb[146].mxu0  ;;  %v8067_v6 = vpop.f32.mrb[163].mxu1  ;;  %8425 = vmatmul.mubr.f32.gmra.mrb[12].mxu1 %v4858_v38  ;;  %v4870_v2 = vand.u32 4294901760, %v4869_v55 }
 0x25c   : > { %v2883_v9 = vadd.f32 %v2882_v41, %v10596_v23  ;;  %v7995_v50 = vpop.f32.mrb[147].mxu0  ;;  %8353 = vmatmul.mubr.f32.vlgmr.msra.gmra.mrb[252].mxu0 %v4850_v27  ;;  %8427 = vmatprep.mubr.msk.f32.mxu1 %vm8794_vm0, %v11726_v13  ;;  %v4888_v38 = vand.u32 4294901760, %v10739_v21  ;;  %v10779_v41 = vsub.f32 %v10670_v11, %v10687_v0 }
 0x25d   : > { %8397 = vmatpush3.msra.mxu0 %v10425_v18  ;;  %8355 = vmatprep.mubr.msk.f32.mxu0 %vm8794_vm0, %v11726_v13 }
 0x25e   : > { %v10742_v23 = vadd.f32 %v10571_v12, %v2883_v9  ;;  %8442 = vmatprep.subr.mxu0 %v11726_v13  ;;  %v10747_v15 = vpop.f32.mrb[164].mxu1  ;;  %v4879_v12 = vsub.f32 %v10716_v53, %v4878_v8  ;;  %v10785_v9 = vsub.f32 %v7085_v56, %v10766_v28  ;;  %v4908_v11 = vand.u32 4294901760, %v10779_v41 }
 0x25f   : > { %v2889_v29 = vpop.f32.mrb[148].mxu0  ;;  %v8070_v34 = vpop.f32.mrb[165].mxu1  ;;  %8428 = vmatmul.mubr.f32.gmra.mrb[14].mxu1 %v4868_v57 }
 0x260   : > { %v2890_v30 = vadd.f32 %v2889_v29, %v10617_v26  ;;  %v7998_v20 = vpop.f32.mrb[149].mxu0  ;;  %8356 = vmatmul.mubr.f32.gmra.mrb[254].mxu0 %v4860_v32  ;;  %8430 = vmatprep.mubr.msk.f32.mxu1 %vm8794_vm0, %v11726_v13  ;;  %v4880_v27 = vand.u32 4294901760, %v4879_v12  ;;  %v4899_v29 = vsub.f32 %v10756_v39, %v4898_v42 }
 0x261   : > { %8358 = vmatprep.mubr.msk.f32.mxu0 %vm8794_vm0, %v11726_v13 }
 0x262   : > { %v10764_v26 = vadd.f32 %v10591_v19, %v2890_v30  ;;  %v10768_v14 = vpop.f32.mrb[166].mxu1  ;;  %v4889_v19 = vsub.f32 %v10739_v21, %v4888_v38 }
 0x263   : > { %v2896_v54 = vpop.f32.mrb[150].mxu0  ;;  %v8073_v57 = vpop.f32.mrb[167].mxu1  ;;  %8431 = vmatmul.mubr.f32.gmra.mrb[16].mxu1 %v4878_v8 }
 0x264   : > { %v2897_v4 = vadd.f32 %v2896_v54, %v10636_v52  ;;  %v8001_v25 = vpop.f32.mrb[151].mxu0  ;;  %8359 = vmatmul.mubr.f32.gmra.mrb[0].mxu0 %v4870_v2  ;;  %8433 = vmatprep.mubr.msk.f32.mxu1 %vm8794_vm0, %v11726_v13 }
 0x265   : > { %8361 = vmatprep.mubr.msk.f32.mxu0 %vm8794_vm0, %v11726_v13 }
 0x266   : > { %v10782_v52 = vadd.f32 %v10613_v60, %v2897_v4  ;;  %v10787_v6 = vpop.f32.mrb[168].mxu1  ;;  %v4890_v60 = vand.u32 4294901760, %v4889_v19 }
 0x267   : > { %v2903_v50 = vpop.f32.mrb[152].mxu0  ;;  %8434 = vmatmul.mubr.f32.gmra.mrb[18].mxu1 %v4888_v38  ;;  %v8101_v32 = vpop.f32.mrb[169].mxu1  ;;  %v4900_v38 = vand.u32 4294901760, %v4899_v29 }
 0x268   : > { %v2904_v8 = vadd.f32 %v2903_v50, %v10654_v63  ;;  %v8004_v55 = vpop.f32.mrb[153].mxu0  ;;  %8362 = vmatmul.mubr.f32.gmra.mrb[2].mxu0 %v4880_v27  ;;  %8436 = vmatprep.mubr.msk.f32.mxu1 %vm8794_vm0, %v11726_v13  ;;  %v5660_v63 = vand.u32 4294901760, %v10785_v9 }
 0x269   : > { %8364 = vmatprep.mubr.msk.f32.mxu0 %vm8794_vm0, %v11726_v13 }
 0x26a   : > { %v10797_v56 = vadd.f32 %v10632_v17, %v2904_v8  ;;  %v10800_v20 = vpop.f32.mrb[170].mxu1  ;;  %v4909_v17 = vsub.f32 %v10779_v41, %v4908_v11  ;;  %v5661_v4 = vsub.f32 %v10785_v9, %v5660_v63 }
 0x26b   : > { %v3099_v30 = vpop.f32.mrb[154].mxu0  ;;  %8437 = vmatmul.mubr.f32.gmra.mrb[20].mxu1 %v4898_v42  ;;  %v8104_v2 = vpop.f32.mrb[171].mxu1 }
 0x26c   : > { %v3100_v34 = vadd.f32 %v3099_v30, %v10690_v45  ;;  %v8032_v12 = vpop.f32.mrb[155].mxu0  ;;  %8365 = vmatmul.mubr.f32.gmra.mrb[4].mxu0 %v4890_v60  ;;  %8439 = vmatprep.mubr.msk.f32.mxu1 %vm8794_vm0, %v11726_v13  ;;  %v5662_v8 = vand.u32 4294901760, %v5661_v4  ;;  %v11729_v2 = vand.u32 4294901760, %v10425_v18 }
 0x26d   : > { %8367 = vmatprep.mubr.msk.f32.mxu0 %vm8794_vm0, %v11726_v13 }
 0x26e   : > { %v3208_v54 = vadd.f32 %v10651_v62, %v3100_v34  ;;  %v10812_v25 = vpop.f32.mrb[172].mxu1  ;;  %v4910_v62 = vand.u32 4294901760, %v4909_v17 }
 0x26f   : > { %v3105_v45 = vpop.f32.mrb[156].mxu0  ;;  %8440 = vmatmul.mubr.f32.gmra.mrb[22].mxu1 %v4908_v11  ;;  %v8107_v42 = vpop.f32.mrb[173].mxu1 }
 0x270   : > { %v3106_v57 = vadd.f32 %v3105_v45, %v10708_v31  ;;  %v8035_v27 = vpop.f32.mrb[157].mxu0  ;;  %8368 = vmatmul.mubr.f32.gmra.mrb[6].mxu0 %v4900_v38  ;;  %v10816_v19 = vadd.f32 %v3208_v54, %v10456_v51  ;;  %8467 = vmatprep.mubr.msk.f32.mxu1 %vm8794_vm0, %v11726_v13 }
 0x271   : > { %8370 = vmatprep.mubr.msk.f32.mxu0 %vm8794_vm0, %v11726_v13 }
 0x272   : > { %v3214_v50 = vadd.f32 %v10672_v7, %v3106_v57  ;;  %v10823_v32 = vpop.f32.mrb[174].mxu1 }
 0x273   : > { %v3111_v55 = vpop.f32.mrb[158].mxu0  ;;  %8468 = vmatmul.mubr.f32.vlgmr.msra.gmra.mrb[24].mxu1 %v10565_v22  ;;  %v8110_v51 = vpop.f32.mrb[175].mxu1 }
 0x274   : > { %v3112_v31 = vadd.f32 %v3111_v55, %v10725_v61  ;;  %v8038_v29 = vpop.f32.mrb[159].mxu0  ;;  %8371 = vmatmul.mubr.f32.gmra.mrb[8].mxu0 %v4910_v62  ;;  %v10828_v60 = vadd.f32 %v3214_v50, %v10468_v10  ;;  %8470 = vmatprep.mubr.msk.f32.mxu1 %vm8794_vm0, %v11726_v13  ;;  %v5491_v62 = vld [vmem:[%s8867_s8 + $0x15] sm:$0xff] }
 0x275   : > { %8398 = vmatprep.mubr.msk.f32.mxu0 %vm8794_vm0, %v11726_v13  ;;  %8512 = vmatpush3.msra.mxu1 %v5662_v8 }
 0x276   : > { %v3220_v7 = vadd.f32 %v10692_v48, %v3112_v31  ;;  %v10835_v30 = vpop.f32.mrb[176].mxu1  ;;  %8557 = vmatprep.subr.mxu1 %v11726_v13 }
 0x277   : > { %v3117_v11 = vpop.f32.mrb[160].mxu0  ;;  %8471 = vmatmul.mubr.f32.gmra.mrb[26].mxu1 %v10584_v16  ;;  %v8113_v10 = vpop.f32.mrb[177].mxu1 }
 0x278   : > { %v3118_v61 = vadd.f32 %v3117_v11, %v10742_v23  ;;  %v8041_v34 = vpop.f32.mrb[161].mxu0  ;;  %8399 = vmatmul.mubr.f32.vlgmr.msra.gmra.mrb[10].mxu0 %v10664_v47  ;;  %v10842_v12 = vadd.f32 %v3220_v7, %v10482_v49  ;;  %8473 = vmatprep.mubr.msk.f32.mxu1 %vm8794_vm0, %v11726_v13 }
 0x279   : > { %8443 = vmatpush3.msra.mxu0 %v11729_v2  ;;  %8401 = vmatprep.mubr.msk.f32.mxu0 %vm8794_vm0, %v11726_v13 }
 0x27a   : > { %v3226_v48 = vadd.f32 %v10710_v5, %v3118_v61  ;;  %8488 = vmatprep.subr.mxu0 %v11726_v13  ;;  %v10852_v23 = vpop.f32.mrb[178].mxu1 }
 0x27b   : > { %v3123_v47 = vpop.f32.mrb[162].mxu0  ;;  %8474 = vmatmul.mubr.f32.gmra.mrb[28].mxu1 %v10604_v24  ;;  %v8116_v18 = vpop.f32.mrb[179].mxu1 }
 0x27c   : > { %v3124_v38 = vadd.f32 %v3123_v47, %v10764_v26  ;;  %v8044_v49 = vpop.f32.mrb[163].mxu0  ;;  %8402 = vmatmul.mubr.f32.gmra.mrb[12].mxu0 %v10684_v37  ;;  %v10858_v17 = vadd.f32 %v3226_v48, %v10498_v3  ;;  %8476 = vmatprep.mubr.msk.f32.mxu1 %vm8794_vm0, %v11726_v13 }
 0x27d   : > { %8404 = vmatprep.mubr.msk.f32.mxu0 %vm8794_vm0, %v11726_v13 }
 0x27e   : > { %v3232_v5 = vadd.f32 %v10728_v44, %v3124_v38  ;;  %v10865_v4 = vpop.f32.mrb[180].mxu1 }
 0x27f   : > { %v3129_v54 = vpop.f32.mrb[164].mxu0  ;;  %8477 = vmatmul.mubr.f32.gmra.mrb[30].mxu1 %v10626_v36  ;;  %v8119_v3 = vpop.f32.mrb[181].mxu1 }
 0x280   : > { %v10868_v26 = vadd.f32 %v3232_v5, %v10511_v33  ;;  %v3130_v37 = vadd.f32 %v3129_v54, %v10782_v52  ;;  %v8047_v45 = vpop.f32.mrb[165].mxu0  ;;  %8405 = vmatmul.mubr.f32.gmra.mrb[14].mxu0 %v10703_v1  ;;  %8479 = vmatprep.mubr.msk.f32.mxu1 %vm8794_vm0, %v11726_v13 }
 0x281   : > { %8407 = vmatprep.mubr.msk.f32.mxu0 %vm8794_vm0, %v11726_v13 }
 0x282   : > { %v3238_v44 = vadd.f32 %v10747_v15, %v3130_v37  ;;  %v10878_v33 = vpop.f32.mrb[182].mxu1 }
 0x283   : > { %v3135_v57 = vpop.f32.mrb[166].mxu0  ;;  %8480 = vmatmul.mubr.f32.gmra.mrb[32].mxu1 %v10645_v35  ;;  %v8147_v42 = vpop.f32.mrb[183].mxu1 }
 0x284   : > { %v10881_v52 = vadd.f32 %v3238_v44, %v10522_v58  ;;  %v3136_v1 = vadd.f32 %v3135_v57, %v10797_v56  ;;  %v8050_v27 = vpop.f32.mrb[167].mxu0  ;;  %8408 = vmatmul.mubr.f32.gmra.mrb[16].mxu0 %v10716_v53  ;;  %8482 = vmatprep.mubr.msk.f32.mxu1 %vm8794_vm0, %v11726_v13 }
 0x285   : > { %8410 = vmatprep.mubr.msk.f32.mxu0 %vm8794_vm0, %v11726_v13 }
 0x286   : > { %v3244_v15 = vadd.f32 %v10768_v14, %v3136_v1  ;;  %v10892_v50 = vpop.f32.mrb[184].mxu1  ;;  %v10907_v14 = vsel %vm264_vm1, %v5491_v62, 0 }
 0x287   : > { %v3356_v58 = vpop.f32.mrb[168].mxu0  ;;  %8483 = vmatmul.mubr.f32.gmra.mrb[34].mxu1 %v10667_v43  ;;  %v8150_v55 = vpop.f32.mrb[185].mxu1  ;;  %v10918_v51 = vand.u32 4294901760, %v10907_v14 }
 0x288   : > { %v10895_v56 = vadd.f32 %v3244_v15, %v10537_v40  ;;  %v10898_v53 = vadd.f32 %v10787_v6, %v3356_v58  ;;  %v8078_v8 = vpop.f32.mrb[169].mxu0  ;;  %8411 = vmatmul.mubr.f32.gmra.mrb[18].mxu0 %v10739_v21  ;;  %8485 = vmatprep.mubr.msk.f32.mxu1 %vm8794_vm0, %v11726_v13  ;;  %v5492_v40 = vld [vmem:[%s8867_s8 + $0x1d] sm:$0xff] }
 0x289   : > { %8413 = vmatprep.mubr.msk.f32.mxu0 %vm8794_vm0, %v11726_v13  ;;  %v10925_v11 = vsel %vm264_vm1, %v5492_v40, 0 }
 0x28a   : > { %v10910_v6 = vpop.f32.mrb[186].mxu1  ;;  %v10936_v2 = vand.u32 4294901760, %v10925_v11 }
 0x28b   : > { %v3366_v31 = vpop.f32.mrb[170].mxu0  ;;  %8486 = vmatmul.mubr.f32.gmra.mrb[36].mxu1 %v10687_v0  ;;  %v8153_v7 = vpop.f32.mrb[187].mxu1 }
 0x28c   : > { %v10913_v29 = vadd.f32 %v10800_v20, %v3366_v31  ;;  %v8081_v21 = vpop.f32.mrb[171].mxu0  ;;  %8414 = vmatmul.mubr.f32.gmra.mrb[20].mxu0 %v10756_v39  ;;  %8513 = vmatprep.mubr.msk.f32.mxu1 %vm8794_vm0, %v11726_v13  ;;  %v5493_v20 = vld [vmem:[%s8867_s8 + $0x25] sm:$0xff]  ;;  %v11012_v7 = vsub.f32 %v10907_v14, %v10918_v51 }
 0x28d   : > { %8416 = vmatprep.mubr.msk.f32.mxu0 %vm8794_vm0, %v11726_v13  ;;  %v10943_v47 = vsel %vm264_vm1, %v5493_v20, 0 }
 0x28e   : > { %v10928_v34 = vpop.f32.mrb[188].mxu1  ;;  %v10956_v5 = vand.u32 4294901760, %v10943_v47 }
 0x28f   : > { %v3376_v61 = vpop.f32.mrb[172].mxu0  ;;  %8514 = vmatmul.mubr.f32.vlgmr.msra.gmra.mrb[38].mxu1 %v10918_v51  ;;  %v8156_v48 = vpop.f32.mrb[189].mxu1 }
 0x290   : > { %v10931_v39 = vadd.f32 %v10812_v25, %v3376_v61  ;;  %v8084_v10 = vpop.f32.mrb[173].mxu0  ;;  %8417 = vmatmul.mubr.f32.gmra.mrb[22].mxu0 %v10779_v41  ;;  %8516 = vmatprep.mubr.msk.f32.mxu1 %vm8794_vm0, %v11726_v13  ;;  %v5494_v25 = vld [vmem:[%s8867_s8 + $0x2d] sm:$0xff] }
 0x291   : > { %8444 = vmatprep.mubr.msk.f32.mxu0 %vm8794_vm0, %v11726_v13  ;;  %8558 = vmatpush3.msra.mxu1 %v10766_v28  ;;  %v10962_v37 = vsel %vm264_vm1, %v5494_v25, 0  ;;  %v11031_v25 = vsub.f32 %v10925_v11, %v10936_v2 }
 0x292   : > { %v10947_v38 = vpop.f32.mrb[190].mxu1  ;;  %8603 = vmatprep.subr.mxu1 %v11726_v13  ;;  %v10976_v57 = vand.u32 4294901760, %v10962_v37 }
 0x293   : > { %v3386_v41 = vpop.f32.mrb[174].mxu0  ;;  %8517 = vmatmul.mubr.f32.gmra.mrb[40].mxu1 %v10936_v2  ;;  %v8159_v54 = vpop.f32.mrb[191].mxu1 }
 0x294   : > { %v10951_v49 = vadd.f32 %v10823_v32, %v3386_v41  ;;  %v8087_v18 = vpop.f32.mrb[175].mxu0  ;;  %8445 = vmatmul.mubr.f32.vlgmr.msra.gmra.mrb[24].mxu0 %v10565_v22  ;;  %8519 = vmatprep.mubr.msk.f32.mxu1 %vm8794_vm0, %v11726_v13  ;;  %v5495_v22 = vld [vmem:[%s8867_s8 + $0x35] sm:$0xff]  ;;  %v5589_v41 = vand.u32 4294901760, %v11012_v7 }
 0x295   : > { %8489 = vmatpush3.msra.mxu0 %v10766_v28  ;;  %8447 = vmatprep.mubr.msk.f32.mxu0 %vm8794_vm0, %v11726_v13  ;;  %v10983_v27 = vsel %vm264_vm1, %v5495_v22, 0 }
 0x296   : > { %8534 = vmatprep.subr.mxu0 %v11726_v13  ;;  %v10968_v45 = vpop.f32.mrb[192].mxu1  ;;  %v10994_v58 = vand.u32 4294901760, %v10983_v27 }
 0x297   : > { %v3396_v32 = vpop.f32.mrb[176].mxu0  ;;  %8520 = vmatmul.mubr.f32.gmra.mrb[42].mxu1 %v10956_v5  ;;  %v8162_v1 = vpop.f32.mrb[193].mxu1 }
 0x298   : > { %v10971_v3 = vadd.f32 %v10835_v30, %v3396_v32  ;;  %v8090_v44 = vpop.f32.mrb[177].mxu0  ;;  %8448 = vmatmul.mubr.f32.gmra.mrb[26].mxu0 %v10584_v16  ;;  %8522 = vmatprep.mubr.msk.f32.mxu1 %vm8794_vm0, %v11726_v13  ;;  %v5496_v30 = vld [vmem:[%s8867_s8 + $0x3d] sm:$0xff]  ;;  %v11052_v1 = vsub.f32 %v10943_v47, %v10956_v5 }
 0x299   : > { %8450 = vmatprep.mubr.msk.f32.mxu0 %vm8794_vm0, %v11726_v13  ;;  %v11001_v55 = vsel %vm264_vm1, %v5496_v30, 0  ;;  %v5590_v44 = vsub.f32 %v11012_v7, %v5589_v41  ;;  %v5599_v30 = vand.u32 4294901760, %v11031_v25 }
 0x29a   : > { %v10986_v15 = vpop.f32.mrb[194].mxu1  ;;  %v11016_v20 = vand.u32 4294901760, %v11001_v55 }
 0x29b   : > { %v3406_v42 = vpop.f32.mrb[178].mxu0  ;;  %8523 = vmatmul.mubr.f32.gmra.mrb[44].mxu1 %v10976_v57  ;;  %v8165_v8 = vpop.f32.mrb[195].mxu1 }
 0x29c   : > { %v10989_v16 = vadd.f32 %v10852_v23, %v3406_v42  ;;  %v8093_v62 = vpop.f32.mrb[179].mxu0  ;;  %8451 = vmatmul.mubr.f32.gmra.mrb[28].mxu0 %v10604_v24  ;;  %8525 = vmatprep.mubr.msk.f32.mxu1 %vm8794_vm0, %v11726_v13  ;;  %v5497_v23 = vld [vmem:[%s8867_s8 + $0x45] sm:$0x1]  ;;  %v11065_v42 = vsub.f32 %v10962_v37, %v10976_v57 }
 0x29d   : > { %8453 = vmatprep.mubr.msk.f32.mxu0 %vm8794_vm0, %v11726_v13 }
 0x29e   : > { %v11004_v31 = vpop.f32.mrb[196].mxu1 }
 0x29f   : > { %v3416_v40 = vpop.f32.mrb[180].mxu0  ;;  %8526 = vmatmul.mubr.f32.gmra.mrb[46].mxu1 %v10994_v58  ;;  %v8193_v61 = vpop.f32.mrb[197].mxu1 }
 0x2a0   : > { %v11007_v24 = vadd.f32 %v10865_v4, %v3416_v40  ;;  %v8096_v21 = vpop.f32.mrb[181].mxu0  ;;  %8454 = vmatmul.mubr.f32.gmra.mrb[30].mxu0 %v10626_v36  ;;  %8528 = vmatprep.mubr.msk.f32.mxu1 %vm8794_vm0, %v11726_v13  ;;  %v11023_v4 = vsel %vm264_vm1, %v5497_v23, 0  ;;  %v5591_v23 = vand.u32 4294901760, %v5590_v44  ;;  %v5600_v40 = vsub.f32 %v11031_v25, %v5599_v30 }
 0x2a1   : > { %8456 = vmatprep.mubr.msk.f32.mxu0 %vm8794_vm0, %v11726_v13  ;;  %v11036_v18 = vand.u32 4294901760, %v11023_v4  ;;  %v5609_v21 = vand.u32 4294901760, %v11052_v1 }
 0x2a2   : > { %v11025_v10 = vpop.f32.mrb[198].mxu1 }
 0x2a3   : > { %v3602_v36 = vpop.f32.mrb[182].mxu0  ;;  %8529 = vmatmul.mubr.f32.gmra.mrb[48].mxu1 %v11016_v20  ;;  %v8196_v54 = vpop.f32.mrb[199].mxu1 }
 0x2a4   : > { %v3603_v14 = vadd.f32 %v3602_v36, %v10898_v53  ;;  %v8124_v48 = vpop.f32.mrb[183].mxu0  ;;  %8457 = vmatmul.mubr.f32.gmra.mrb[32].mxu0 %v10645_v35  ;;  %8531 = vmatprep.mubr.msk.f32.mxu1 %vm8794_vm0, %v11726_v13 }
 0x2a5   : > { %8459 = vmatprep.mubr.msk.f32.mxu0 %vm8794_vm0, %v11726_v13  ;;  %v5601_v48 = vand.u32 4294901760, %v5600_v40 }
 0x2a6   : > { %v11043_v35 = vadd.f32 %v10878_v33, %v3603_v14  ;;  %v11045_v11 = vpop.f32.mrb[200].mxu1 }
 0x2a7   : > { %v3609_v53 = vpop.f32.mrb[184].mxu0  ;;  %8532 = vmatmul.mubr.f32.gmra.mrb[50].mxu1 %v11036_v18  ;;  %v8199_v33 = vpop.f32.mrb[201].mxu1 }
 0x2a8   : > { %v3610_v22 = vadd.f32 %v3609_v53, %v10913_v29  ;;  %v8127_v32 = vpop.f32.mrb[185].mxu0  ;;  %8460 = vmatmul.mubr.f32.gmra.mrb[34].mxu0 %v10667_v43  ;;  %8559 = vmatprep.mubr.msk.f32.mxu1 %vm8794_vm0, %v11726_v13 }
 0x2a9   : > { %8462 = vmatprep.mubr.msk.f32.mxu0 %vm8794_vm0, %v11726_v13 }
 0x2aa   : > { %v11061_v29 = vadd.f32 %v10892_v50, %v3610_v22  ;;  %v11067_v47 = vpop.f32.mrb[202].mxu1  ;;  %v7086_v22 = vld [vmem:[%s11709_s1 + $0x40] sm:$0xff] }
 0x2ab   : > { %v3616_v43 = vpop.f32.mrb[186].mxu0  ;;  %8560 = vmatmul.mubr.f32.vlgmr.msra.gmra.mrb[52].mxu1 %v5589_v41  ;;  %v8202_v50 = vpop.f32.mrb[203].mxu1  ;;  %v5610_v41 = vsub.f32 %v11052_v1, %v5609_v21 }
 0x2ac   : > { %v3617_v62 = vadd.f32 %v3616_v43, %v10931_v39  ;;  %v8130_v8 = vpop.f32.mrb[187].mxu0  ;;  %8463 = vmatmul.mubr.f32.gmra.mrb[36].mxu0 %v10687_v0  ;;  %8562 = vmatprep.mubr.msk.f32.mxu1 %vm8794_vm0, %v11726_v13  ;;  %v5619_v0 = vand.u32 4294901760, %v11065_v42 }
 0x2ad   : > { %8490 = vmatprep.mubr.msk.f32.mxu0 %vm8794_vm0, %v11726_v13  ;;  %8604 = vmatpush3.msra.mxu1 %v10766_v28 }
 0x2ae   : > { %v11078_v37 = vadd.f32 %v10910_v6, %v3617_v62  ;;  %v11082_v61 = vpop.f32.mrb[204].mxu1  ;;  %8649 = vmatprep.subr.mxu1 %v11726_v13  ;;  %v11089_v6 = vsub.f32 %v10983_v27, %v10994_v58  ;;  %v5620_v53 = vsub.f32 %v11065_v42, %v5619_v0 }
 0x2af   : > { %v3623_v39 = vpop.f32.mrb[188].mxu0  ;;  %8563 = vmatmul.mubr.f32.gmra.mrb[54].mxu1 %v5599_v30  ;;  %v8205_v28 = vpop.f32.mrb[205].mxu1  ;;  %v11109_v30 = vsub.f32 %v11001_v55, %v11016_v20 }
 0x2b0   : > { %v3624_v36 = vadd.f32 %v3623_v39, %v10951_v49  ;;  %v8133_v14 = vpop.f32.mrb[189].mxu0  ;;  %8491 = vmatmul.mubr.f32.vlgmr.msra.gmra.mrb[38].mxu0 %v5591_v23  ;;  %8565 = vmatprep.mubr.msk.f32.mxu1 %vm8794_vm0, %v11726_v13  ;;  %v5629_v33 = vand.u32 4294901760, %v11089_v6  ;;  %v5621_v23 = vand.u32 4294901760, %v5620_v53  ;;  %v11127_v39 = vsub.f32 %v11023_v4, %v11036_v18 }
 0x2b1   : > { %8535 = vmatpush3.msra.mxu0 %v10785_v9  ;;  %8493 = vmatprep.mubr.msk.f32.mxu0 %vm8794_vm0, %v11726_v13 }
 0x2b2   : > { %v11095_v54 = vadd.f32 %v10928_v34, %v3624_v36  ;;  %8580 = vmatprep.subr.mxu0 %v11726_v13  ;;  %v11101_v27 = vpop.f32.mrb[206].mxu1  ;;  %v5611_v34 = vand.u32 4294901760, %v5610_v41  ;;  %v5639_v36 = vand.u32 4294901760, %v11109_v30  ;;  %v5649_v53 = vand.u32 4294901760, %v11127_v39 }
 0x2b3   : > { %v3630_v49 = vpop.f32.mrb[190].mxu0  ;;  %8566 = vmatmul.mubr.f32.gmra.mrb[56].mxu1 %v5609_v21  ;;  %v8208_v43 = vpop.f32.mrb[207].mxu1  ;;  %v5630_v21 = vsub.f32 %v11089_v6, %v5629_v33 }
 0x2b4   : > { %v3631_v32 = vadd.f32 %v3630_v49, %v10971_v3  ;;  %v8136_v44 = vpop.f32.mrb[191].mxu0  ;;  %8494 = vmatmul.mubr.f32.gmra.mrb[40].mxu0 %v5601_v48  ;;  %8568 = vmatprep.mubr.msk.f32.mxu1 %vm8794_vm0, %v11726_v13  ;;  %v11119_v3 = vand.u32 4294901760, %v7086_v22  ;;  %v5640_v49 = vsub.f32 %v11109_v30, %v5639_v36 }
 0x2b5   : > { %8496 = vmatprep.mubr.msk.f32.mxu0 %vm8794_vm0, %v11726_v13 }
 0x2b6   : > { %v11117_v62 = vadd.f32 %v10947_v38, %v3631_v32  ;;  %v11121_v40 = vpop.f32.mrb[208].mxu1  ;;  %v11138_v14 = vsub.f32 %v7086_v22, %v11119_v3 }
 0x2b7   : > { %v3637_v8 = vpop.f32.mrb[192].mxu0  ;;  %8569 = vmatmul.mubr.f32.gmra.mrb[58].mxu1 %v5619_v0  ;;  %v8211_v38 = vpop.f32.mrb[209].mxu1  ;;  %v5631_v0 = vand.u32 4294901760, %v5630_v21 }
 0x2b8   : > { %v3638_v55 = vadd.f32 %v3637_v8, %v10989_v16  ;;  %v8139_v50 = vpop.f32.mrb[193].mxu0  ;;  %8497 = vmatmul.mubr.f32.gmra.mrb[42].mxu0 %v5611_v34  ;;  %8571 = vmatprep.mubr.msk.f32.mxu1 %vm8794_vm0, %v11726_v13  ;;  %v5641_v8 = vand.u32 4294901760, %v5640_v49 }
 0x2b9   : > { %8499 = vmatprep.mubr.msk.f32.mxu0 %vm8794_vm0, %v11726_v13 }
 0x2ba   : > { %v11135_v16 = vadd.f32 %v10968_v45, %v3638_v55  ;;  %v11140_v41 = vpop.f32.mrb[210].mxu1 }
 0x2bb   : > { %v3644_v48 = vpop.f32.mrb[194].mxu0  ;;  %v8239_v32 = vpop.f32.mrb[211].mxu1  ;;  %8572 = vmatmul.mubr.f32.gmra.mrb[60].mxu1 %v5629_v33  ;;  %v5650_v33 = vsub.f32 %v11127_v39, %v5649_v53 }
 0x2bc   : > { %v3645_v4 = vadd.f32 %v3644_v48, %v11007_v24  ;;  %v8142_v28 = vpop.f32.mrb[195].mxu0  ;;  %8500 = vmatmul.mubr.f32.gmra.mrb[44].mxu0 %v5621_v23  ;;  %8574 = vmatprep.mubr.msk.f32.mxu1 %vm8794_vm0, %v11726_v13  ;;  %v6408_v24 = vand.u32 4294901760, %v11138_v14 }
 0x2bd   : > { %8502 = vmatprep.mubr.msk.f32.mxu0 %vm8794_vm0, %v11726_v13  ;;  %v5651_v48 = vand.u32 4294901760, %v5650_v33 }
 0x2be   : > { %v11150_v45 = vadd.f32 %v10986_v15, %v3645_v4  ;;  %v11153_v44 = vpop.f32.mrb[212].mxu1  ;;  %v6409_v55 = vsub.f32 %v11138_v14, %v6408_v24 }
 0x2bf   : > { %v3840_v22 = vpop.f32.mrb[196].mxu0  ;;  %v8242_v23 = vpop.f32.mrb[213].mxu1  ;;  %8575 = vmatmul.mubr.f32.gmra.mrb[62].mxu1 %v5639_v36 }
 0x2c0   : > { %v3841_v34 = vadd.f32 %v3840_v22, %v11043_v35  ;;  %v8170_v43 = vpop.f32.mrb[197].mxu0  ;;  %8503 = vmatmul.mubr.f32.gmra.mrb[46].mxu0 %v5631_v0  ;;  %8577 = vmatprep.mubr.msk.f32.mxu1 %vm8794_vm0, %v11726_v13  ;;  %v6410_v28 = vand.u32 4294901760, %v6409_v55 }
 0x2c1   : > { %8505 = vmatprep.mubr.msk.f32.mxu0 %vm8794_vm0, %v11726_v13 }
 0x2c2   : > { %v3949_v15 = vadd.f32 %v11004_v31, %v3841_v34  ;;  %v11165_v50 = vpop.f32.mrb[214].mxu1 }
 0x2c3   : > { %v3846_v35 = vpop.f32.mrb[198].mxu0  ;;  %v8245_v4 = vpop.f32.mrb[215].mxu1  ;;  %8578 = vmatmul.mubr.f32.gmra.mrb[64].mxu1 %v5649_v53 }
 0x2c4   : > { %v11168_v21 = vadd.f32 %v3949_v15, %v10816_v19  ;;  %v3847_v36 = vadd.f32 %v3846_v35, %v11061_v29  ;;  %v8173_v38 = vpop.f32.mrb[199].mxu0  ;;  %8506 = vmatmul.mubr.f32.gmra.mrb[48].mxu0 %v5641_v8  ;;  %8605 = vmatprep.mubr.msk.f32.mxu1 %vm8794_vm0, %v11726_v13 }
 0x2c5   : > { %8508 = vmatprep.mubr.msk.f32.mxu0 %vm8794_vm0, %v11726_v13 }
 0x2c6   : > { %v3955_v31 = vadd.f32 %v11025_v10, %v3847_v36  ;;  %v11176_v49 = vpop.f32.mrb[216].mxu1 }
 0x2c7   : > { %v3852_v0 = vpop.f32.mrb[200].mxu0  ;;  %v8248_v53 = vpop.f32.mrb[217].mxu1  ;;  %8606 = vmatmul.mubr.f32.vlgmr.msra.gmra.mrb[66].mxu1 %v10918_v51 }
 0x2c8   : > { %v11179_v19 = vadd.f32 %v3955_v31, %v10828_v60  ;;  %v3853_v29 = vadd.f32 %v3852_v0, %v11078_v37  ;;  %v8176_v32 = vpop.f32.mrb[201].mxu0  ;;  %8509 = vmatmul.mubr.f32.gmra.mrb[50].mxu0 %v5651_v48  ;;  %8608 = vmatprep.mubr.msk.f32.mxu1 %vm8794_vm0, %v11726_v13 }
 0x2c9   : > { %8536 = vmatprep.mubr.msk.f32.mxu0 %vm8794_vm0, %v11726_v13  ;;  %8650 = vmatpush3.msra.mxu1 %v6410_v28 }
 0x2ca   : > { %v3961_v10 = vadd.f32 %v11045_v11, %v3853_v29  ;;  %v11188_v34 = vpop.f32.mrb[218].mxu1  ;;  %8695 = vmatprep.subr.mxu1 %v11726_v13  ;;  %v11278_v29 = vsel %vm264_vm1, %v9204_v59, 0 }
 0x2cb   : > { %v3858_v22 = vpop.f32.mrb[202].mxu0  ;;  %v8251_v8 = vpop.f32.mrb[219].mxu1  ;;  %8609 = vmatmul.mubr.f32.gmra.mrb[68].mxu1 %v10936_v2  ;;  %v11292_v59 = vand.u32 4294901760, %v11278_v29 }
 0x2cc   : > { %v11192_v60 = vadd.f32 %v3961_v10, %v10842_v12  ;;  %v3859_v37 = vadd.f32 %v3858_v22, %v11095_v54  ;;  %v8179_v43 = vpop.f32.mrb[203].mxu0  ;;  %8537 = vmatmul.mubr.f32.vlgmr.msra.gmra.mrb[52].mxu0 %v11012_v7  ;;  %8611 = vmatprep.mubr.msk.f32.mxu1 %vm8794_vm0, %v11726_v13  ;;  %v11730_v22 = vld [vmem:[#allocation2_spill] sm:$0xff] }
 0x2cd   : > { %8581 = vmatpush3.msra.mxu0 %v5660_v63  ;;  %8539 = vmatprep.mubr.msk.f32.mxu0 %vm8794_vm0, %v11726_v13  ;;  %v6236_v43 = vld [vmem:[%s8867_s8 + $0x36] sm:$0xff] }
 0x2ce   : > { %v3967_v11 = vadd.f32 %v11067_v47, %v3859_v37  ;;  %8626 = vmatprep.subr.mxu0 %v11726_v13  ;;  %v11205_v54 = vpop.f32.mrb[220].mxu1 }
 0x2cf   : > { %v3864_v12 = vpop.f32.mrb[204].mxu0  ;;  %v8254_v63 = vpop.f32.mrb[221].mxu1  ;;  %8612 = vmatmul.mubr.f32.gmra.mrb[70].mxu1 %v10956_v5 }
 0x2d0   : > { %v11208_v7 = vadd.f32 %v3967_v11, %v10858_v17  ;;  %v3865_v33 = vadd.f32 %v3864_v12, %v11117_v62  ;;  %v8182_v9 = vpop.f32.mrb[205].mxu0  ;;  %8540 = vmatmul.mubr.f32.gmra.mrb[54].mxu0 %v11031_v25  ;;  %8614 = vmatprep.mubr.msk.f32.mxu1 %vm8794_vm0, %v11726_v13  ;;  %v11732_v63 = vld [vmem:[#allocation3_spill] sm:$0xff] }
 0x2d1   : > { %8542 = vmatprep.mubr.msk.f32.mxu0 %vm8794_vm0, %v11726_v13 }
 0x2d2   : > { %v3973_v47 = vadd.f32 %v11082_v61, %v3865_v33  ;;  %v11218_v15 = vpop.f32.mrb[222].mxu1 }
 0x2d3   : > { %v3870_v23 = vpop.f32.mrb[206].mxu0  ;;  %v8257_v55 = vpop.f32.mrb[223].mxu1  ;;  %8615 = vmatmul.mubr.f32.gmra.mrb[72].mxu1 %v10976_v57 }
 0x2d4   : > { %v11221_v17 = vadd.f32 %v3973_v47, %v10868_v26  ;;  %v3871_v62 = vadd.f32 %v3870_v23, %v11135_v16  ;;  %v8185_v25 = vpop.f32.mrb[207].mxu0  ;;  %8543 = vmatmul.mubr.f32.gmra.mrb[56].mxu0 %v11052_v1  ;;  %8617 = vmatprep.mubr.msk.f32.mxu1 %vm8794_vm0, %v11726_v13 }
 0x2d5   : > { %8545 = vmatprep.mubr.msk.f32.mxu0 %vm8794_vm0, %v11726_v13 }
 0x2d6   : > { %v3979_v61 = vadd.f32 %v11101_v27, %v3871_v62  ;;  %v11231_v36 = vpop.f32.mrb[224].mxu1  ;;  %v6237_v62 = vld [vmem:[%s8867_s8 + $0x3e] sm:$0xff] }
 0x2d7   : > { %v3876_v35 = vpop.f32.mrb[208].mxu0  ;;  %v8285_v38 = vpop.f32.mrb[225].mxu1  ;;  %8618 = vmatmul.mubr.f32.gmra.mrb[74].mxu1 %v10994_v58 }
 0x2d8   : > { %v11234_v26 = vadd.f32 %v3979_v61, %v10881_v52  ;;  %v3877_v16 = vadd.f32 %v3876_v35, %v11150_v45  ;;  %v8188_v1 = vpop.f32.mrb[209].mxu0  ;;  %8546 = vmatmul.mubr.f32.gmra.mrb[58].mxu0 %v11065_v42  ;;  %8620 = vmatprep.mubr.msk.f32.mxu1 %vm8794_vm0, %v11726_v13 }
 0x2d9   : > { %8548 = vmatprep.mubr.msk.f32.mxu0 %vm8794_vm0, %v11726_v13 }
 0x2da   : > { %v3985_v27 = vadd.f32 %v11121_v40, %v3877_v16  ;;  %v11244_v4 = vpop.f32.mrb[226].mxu1  ;;  %v11260_v40 = vsel %vm264_vm1, %v9169_v46, 0 }
 0x2db   : > { %v4104_v48 = vpop.f32.mrb[210].mxu0  ;;  %v8288_v31 = vpop.f32.mrb[227].mxu1  ;;  %8621 = vmatmul.mubr.f32.gmra.mrb[76].mxu1 %v11016_v20  ;;  %v11274_v46 = vand.u32 4294901760, %v11260_v40 }
 0x2dc   : > { %v11247_v52 = vadd.f32 %v3985_v27, %v10895_v56  ;;  %v11250_v45 = vadd.f32 %v11140_v41, %v4104_v48  ;;  %v8216_v42 = vpop.f32.mrb[211].mxu0  ;;  %8549 = vmatmul.mubr.f32.gmra.mrb[60].mxu0 %v11089_v6  ;;  %8623 = vmatprep.mubr.msk.f32.mxu1 %vm8794_vm0, %v11726_v13 }
 0x2dd   : > { %8551 = vmatprep.mubr.msk.f32.mxu0 %vm8794_vm0, %v11726_v13 }
 0x2de   : > { %v11262_v28 = vpop.f32.mrb[228].mxu1 }
 0x2df   : > { %v4114_v56 = vpop.f32.mrb[212].mxu0  ;;  %v8291_v0 = vpop.f32.mrb[229].mxu1  ;;  %8624 = vmatmul.mubr.f32.gmra.mrb[78].mxu1 %v11036_v18 }
 0x2e0   : > { %v11265_v41 = vadd.f32 %v11153_v44, %v4114_v56  ;;  %v8219_v6 = vpop.f32.mrb[213].mxu0  ;;  %8552 = vmatmul.mubr.f32.gmra.mrb[62].mxu0 %v11109_v30  ;;  %8651 = vmatprep.mubr.msk.f32.mxu1 %vm8794_vm0, %v11726_v13 }
 0x2e1   : > { %8554 = vmatprep.mubr.msk.f32.mxu0 %vm8794_vm0, %v11726_v13  ;;  %v11734_v6 = vld [vmem:[#allocation6_spill] sm:$0xff] }
 0x2e2   : > { %v11280_v32 = vpop.f32.mrb[230].mxu1 }
 0x2e3   : > { %v4124_v44 = vpop.f32.mrb[214].mxu0  ;;  %v8294_v10 = vpop.f32.mrb[231].mxu1  ;;  %8652 = vmatmul.mubr.f32.vlgmr.msra.gmra.mrb[80].mxu1 %v11274_v46 }
 0x2e4   : > { %v11283_v30 = vadd.f32 %v11165_v50, %v4124_v44  ;;  %v8222_v53 = vpop.f32.mrb[215].mxu0  ;;  %8555 = vmatmul.mubr.f32.gmra.mrb[64].mxu0 %v11127_v39  ;;  %8654 = vmatprep.mubr.msk.f32.mxu1 %vm8794_vm0, %v11726_v13  ;;  %v11297_v50 = vsel %vm264_vm1, %v11730_v22, 0 }
 0x2e5   : > { %8582 = vmatprep.mubr.msk.f32.mxu0 %vm8794_vm0, %v11726_v13  ;;  %8696 = vmatpush3.msra.mxu1 %v11119_v3  ;;  %v11312_v33 = vand.u32 4294901760, %v11297_v50 }
 0x2e6   : > { %v11299_v39 = vpop.f32.mrb[232].mxu1  ;;  %8741 = vmatprep.subr.mxu1 %v11726_v13 }
 0x2e7   : > { %v4134_v37 = vpop.f32.mrb[216].mxu0  ;;  %v8297_v12 = vpop.f32.mrb[233].mxu1  ;;  %8655 = vmatmul.mubr.f32.gmra.mrb[82].mxu1 %v11292_v59 }
 0x2e8   : > { %v11304_v8 = vadd.f32 %v11176_v49, %v4134_v37  ;;  %v8225_v11 = vpop.f32.mrb[217].mxu0  ;;  %8583 = vmatmul.mubr.f32.vlgmr.msra.gmra.mrb[66].mxu0 %v10918_v51  ;;  %8657 = vmatprep.mubr.msk.f32.mxu1 %vm8794_vm0, %v11726_v13  ;;  %v11731_v49 = vld [vmem:[#allocation4_spill] sm:$0xff]  ;;  %v11320_v51 = vsel %vm264_vm1, %v11732_v63, 0  ;;  %v11369_v37 = vsub.f32 %v11260_v40, %v11274_v46  ;;  %v11393_v63 = vsub.f32 %v11278_v29, %v11292_v59 }
 0x2e9   : > { %8627 = vmatpush3.msra.mxu0 %v11119_v3  ;;  %8585 = vmatprep.mubr.msk.f32.mxu0 %vm8794_vm0, %v11726_v13  ;;  %v6243_v9 = vmul.f32 %v6236_v43, %v11731_v49  ;;  %v11335_v35 = vand.u32 4294901760, %v11320_v51 }
 0x2ea   : > { %8672 = vmatprep.subr.mxu0 %v11726_v13  ;;  %v11322_v23 = vpop.f32.mrb[234].mxu1 }
 0x2eb   : > { %v4144_v47 = vpop.f32.mrb[218].mxu0  ;;  %v8300_v61 = vpop.f32.mrb[235].mxu1  ;;  %8658 = vmatmul.mubr.f32.gmra.mrb[84].mxu1 %v11312_v33  ;;  %v11338_v16 = vsel %vm264_vm1, %v6243_v9, 0  ;;  %v6337_v9 = vand.u32 4294901760, %v11369_v37 }
 0x2ec   : > { %v11326_v25 = vadd.f32 %v11188_v34, %v4144_v47  ;;  %v8228_v55 = vpop.f32.mrb[219].mxu0  ;;  %8586 = vmatmul.mubr.f32.gmra.mrb[68].mxu0 %v10936_v2  ;;  %8660 = vmatprep.mubr.msk.f32.mxu1 %vm8794_vm0, %v11726_v13  ;;  %v11733_v34 = vld [vmem:[#allocation5_spill] sm:$0xff]  ;;  %v6238_v2 = vld [vmem:[%s8867_s8 + $0x46] sm:$0x1]  ;;  %v11354_v56 = vand.u32 4294901760, %v11338_v16  ;;  %s8765_s8 = smul.u32 56, %s11736_s16 }
 0x2ed   : > { %8588 = vmatprep.mubr.msk.f32.mxu0 %vm8794_vm0, %v11726_v13  ;;  %v6244_v1 = vmul.f32 %v6237_v62, %v11733_v34  ;;  %v6245_v0 = vmul.f32 %v6238_v2, %v11734_v6  ;;  %v6338_v29 = vsub.f32 %v11369_v37, %v6337_v9 }
 0x2ee   : > { %v11341_v27 = vpop.f32.mrb[236].mxu1  ;;  %s11684_s24 = scalar_lea.vmem %s11712_s4, %s8765_s8 }
 0x2ef   : > { %v4154_v38 = vpop.f32.mrb[220].mxu0  ;;  %v8303_v31 = vpop.f32.mrb[237].mxu1  ;;  %8661 = vmatmul.mubr.f32.gmra.mrb[86].mxu1 %v11335_v35  ;;  %v6339_v6 = vand.u32 4294901760, %v6338_v29 }
 0x2f0   : > { %v11345_v48 = vadd.f32 %v11205_v54, %v4154_v38  ;;  %v8231_v42 = vpop.f32.mrb[221].mxu0  ;;  %8589 = vmatmul.mubr.f32.gmra.mrb[70].mxu0 %v10956_v5  ;;  %8663 = vmatprep.mubr.msk.f32.mxu1 %vm8794_vm0, %v11726_v13  ;;  %v11358_v54 = vsel %vm264_vm1, %v6244_v1, 0 }
 0x2f1   : > { %8591 = vmatprep.mubr.msk.f32.mxu0 %vm8794_vm0, %v11726_v13  ;;  %v11376_v43 = vand.u32 4294901760, %v11358_v54 }
 0x2f2   : > { %v11360_v53 = vpop.f32.mrb[238].mxu1 }
 0x2f3   : > { %v4164_v44 = vpop.f32.mrb[222].mxu0  ;;  %v8331_v22 = vpop.f32.mrb[239].mxu1  ;;  %8664 = vmatmul.mubr.f32.gmra.mrb[88].mxu1 %v11354_v56 }
 0x2f4   : > { %v11363_v5 = vadd.f32 %v11218_v15, %v4164_v44  ;;  %v8234_v10 = vpop.f32.mrb[223].mxu0  ;;  %8592 = vmatmul.mubr.f32.gmra.mrb[72].mxu0 %v10976_v57  ;;  %8666 = vmatprep.mubr.msk.f32.mxu1 %vm8794_vm0, %v11726_v13  ;;  %v11379_v15 = vsel %vm264_vm1, %v6245_v0, 0  ;;  %v11431_v0 = vsub.f32 %v11320_v51, %v11335_v35 }
 0x2f5   : > { %8594 = vmatprep.mubr.msk.f32.mxu0 %vm8794_vm0, %v11726_v13 }
 0x2f6   : > { %v11381_v11 = vpop.f32.mrb[240].mxu1  ;;  %v6367_v51 = vand.u32 4294901760, %v11431_v0 }
 0x2f7   : > { %v4350_v57 = vpop.f32.mrb[224].mxu0  ;;  %v8334_v40 = vpop.f32.mrb[241].mxu1  ;;  %8667 = vmatmul.mubr.f32.gmra.mrb[90].mxu1 %v11376_v43 }
 0x2f8   : > { %v4351_v12 = vadd.f32 %v4350_v57, %v11250_v45  ;;  %v8262_v49 = vpop.f32.mrb[225].mxu0  ;;  %8595 = vmatmul.mubr.f32.gmra.mrb[74].mxu0 %v10994_v58  ;;  %8669 = vmatprep.mubr.msk.f32.mxu1 %vm8794_vm0, %v11726_v13  ;;  %v11396_v45 = vand.u32 4294901760, %v11379_v15 }
 0x2f9   : > { %8597 = vmatprep.mubr.msk.f32.mxu0 %vm8794_vm0, %v11726_v13 }
 0x2fa   : > { %v11399_v58 = vadd.f32 %v11231_v36, %v4351_v12  ;;  %v11401_v62 = vpop.f32.mrb[242].mxu1  ;;  %v11413_v36 = vsub.f32 %v11297_v50, %v11312_v33  ;;  %v11442_v12 = vsub.f32 %v11338_v16, %v11354_v56 }
 0x2fb   : > { %v4357_v47 = vpop.f32.mrb[226].mxu0  ;;  %v8337_v34 = vpop.f32.mrb[243].mxu1  ;;  %8670 = vmatmul.mubr.f32.gmra.mrb[92].mxu1 %v11396_v45 }
 0x2fc   : > { %v4358_v55 = vadd.f32 %v4357_v47, %v11265_v41  ;;  %v8265_v61 = vpop.f32.mrb[227].mxu0  ;;  %8598 = vmatmul.mubr.f32.gmra.mrb[76].mxu0 %v11016_v20  ;;  %8697 = vmatprep.mubr.msk.f32.mxu1 %vm8794_vm0, %v11726_v13  ;;  %v6347_v41 = vand.u32 4294901760, %v11393_v63  ;;  %v11466_v34 = vsub.f32 %v11358_v54, %v11376_v43 }
 0x2fd   : > { %8600 = vmatprep.mubr.msk.f32.mxu0 %vm8794_vm0, %v11726_v13  ;;  %v6368_v61 = vsub.f32 %v11431_v0, %v6367_v51 }
 0x2fe   : > { %v11417_v1 = vadd.f32 %v11244_v4, %v4358_v55  ;;  %v11419_v38 = vpop.f32.mrb[244].mxu1  ;;  %v6357_v4 = vand.u32 4294901760, %v11413_v36  ;;  %v6348_v50 = vsub.f32 %v11393_v63, %v6347_v41  ;;  %v6377_v55 = vand.u32 4294901760, %v11442_v12 }
 0x2ff   : > { %v4364_v20 = vpop.f32.mrb[228].mxu0  ;;  %v8340_v31 = vpop.f32.mrb[245].mxu1  ;;  %8698 = vmatmul.mubr.f32.vlgmr.msra.gmra.mrb[94].mxu1 %v6337_v9  ;;  %v6369_v54 = vand.u32 4294901760, %v6368_v61 }
 0x300   : > { %v4365_v2 = vadd.f32 %v4364_v20, %v11283_v30  ;;  %v8268_v42 = vpop.f32.mrb[229].mxu0  ;;  %8601 = vmatmul.mubr.f32.gmra.mrb[78].mxu0 %v11036_v18  ;;  %8700 = vmatprep.mubr.msk.f32.mxu1 %vm8794_vm0, %v11726_v13  ;;  %v6378_v31 = vsub.f32 %v11442_v12, %v6377_v55 }
 0x301   : > { %8628 = vmatprep.mubr.msk.f32.mxu0 %vm8794_vm0, %v11726_v13  ;;  %8742 = vmatpush3.msra.mxu1 %v11119_v3  ;;  %v6358_v3 = vsub.f32 %v11413_v36, %v6357_v4 }
 0x302   : > { %v11434_v30 = vadd.f32 %v11262_v28, %v4365_v2  ;;  %v11437_v44 = vpop.f32.mrb[246].mxu1  ;;  %v6349_v28 = vand.u32 4294901760, %v6348_v50 }
 0x303   : > { %v4371_v18 = vpop.f32.mrb[230].mxu0  ;;  %v8343_v57 = vpop.f32.mrb[247].mxu1  ;;  %8701 = vmatmul.mubr.f32.gmra.mrb[96].mxu1 %v6347_v41 }
 0x304   : > { %v4372_v10 = vadd.f32 %v4371_v18, %v11304_v8  ;;  %v8271_v22 = vpop.f32.mrb[231].mxu0  ;;  %8629 = vmatmul.mubr.f32.vlgmr.msra.gmra.mrb[80].mxu0 %v6339_v6  ;;  %8703 = vmatprep.mubr.msk.f32.mxu1 %vm8794_vm0, %v11726_v13  ;;  %v6387_v6 = vand.u32 4294901760, %v11466_v34 }
 0x305   : > { %8673 = vmatpush3.msra.mxu0 %v11138_v14  ;;  %8631 = vmatprep.mubr.msk.f32.mxu0 %vm8794_vm0, %v11726_v13 }
 0x306   : > { %v11450_v8 = vadd.f32 %v11280_v32, %v4372_v10  ;;  %8718 = vmatprep.subr.mxu0 %v11726_v13  ;;  %v11455_v49 = vpop.f32.mrb[248].mxu1  ;;  %v6359_v32 = vand.u32 4294901760, %v6358_v3 }
 0x307   : > { %v4378_v16 = vpop.f32.mrb[232].mxu0  ;;  %v8346_v47 = vpop.f32.mrb[249].mxu1  ;;  %8704 = vmatmul.mubr.f32.gmra.mrb[98].mxu1 %v6357_v4 }
 0x308   : > { %v4379_v40 = vadd.f32 %v4378_v16, %v11326_v25  ;;  %v8274_v9 = vpop.f32.mrb[233].mxu0  ;;  %8632 = vmatmul.mubr.f32.gmra.mrb[82].mxu0 %v6349_v28  ;;  %8706 = vmatprep.mubr.msk.f32.mxu1 %vm8794_vm0, %v11726_v13 }
 0x309   : > { %8634 = vmatprep.mubr.msk.f32.mxu0 %vm8794_vm0, %v11726_v13 }
 0x30a   : > { %v11469_v25 = vadd.f32 %v11299_v39, %v4379_v40  ;;  %v11471_v41 = vpop.f32.mrb[250].mxu1  ;;  %v11481_v39 = vsub.f32 %v11379_v15, %v11396_v45  ;;  %v6379_v15 = vand.u32 4294901760, %v6378_v31 }
 0x30b   : > { %v4385_v29 = vpop.f32.mrb[234].mxu0  ;;  %v8349_v42 = vpop.f32.mrb[251].mxu1  ;;  %8707 = vmatmul.mubr.f32.gmra.mrb[100].mxu1 %v6367_v51 }
 0x30c   : > { %v4386_v20 = vadd.f32 %v4385_v29, %v11345_v48  ;;  %v8277_v2 = vpop.f32.mrb[235].mxu0  ;;  %8635 = vmatmul.mubr.f32.gmra.mrb[84].mxu0 %v6359_v32  ;;  %8709 = vmatprep.mubr.msk.f32.mxu1 %vm8794_vm0, %v11726_v13  ;;  %v6397_v57 = vand.u32 4294901760, %v11481_v39 }
 0x30d   : > { %8637 = vmatprep.mubr.msk.f32.mxu0 %vm8794_vm0, %v11726_v13 }
 0x30e   : > { %v11485_v48 = vadd.f32 %v11322_v23, %v4386_v20  ;;  %v11487_v50 = vpop.f32.mrb[252].mxu1  ;;  %v6388_v23 = vsub.f32 %v11466_v34, %v6387_v6  ;;  %v6398_v9 = vsub.f32 %v11481_v39, %v6397_v57 }
 0x30f   : > { %v4392_v4 = vpop.f32.mrb[236].mxu0  ;;  %v8377_v22 = vpop.f32.mrb[253].mxu1  ;;  %8710 = vmatmul.mubr.f32.gmra.mrb[102].mxu1 %v6377_v55 }
 0x310   : > { %v4393_v18 = vadd.f32 %v4392_v4, %v11363_v5  ;;  %v8280_v10 = vpop.f32.mrb[237].mxu0  ;;  %8638 = vmatmul.mubr.f32.gmra.mrb[86].mxu0 %v6369_v54  ;;  %8712 = vmatprep.mubr.msk.f32.mxu1 %vm8794_vm0, %v11726_v13  ;;  %v6389_v47 = vand.u32 4294901760, %v6388_v23  ;;  %v6399_v2 = vand.u32 4294901760, %v6398_v9 }
 0x311   : > { %8640 = vmatprep.mubr.msk.f32.mxu0 %vm8794_vm0, %v11726_v13 }
 0x312   : > { %v11497_v3 = vadd.f32 %v11341_v27, %v4393_v18  ;;  %v11499_v5 = vpop.f32.mrb[254].mxu1 }
 0x313   : > { %v4588_v28 = vpop.f32.mrb[238].mxu0  ;;  %v8380_v40 = vpop.f32.mrb[255].mxu1  ;;  %8713 = vmatmul.mubr.f32.gmra.mrb[104].mxu1 %v6387_v6 }
 0x314   : > { %v4589_v51 = vadd.f32 %v4588_v28, %v11399_v58  ;;  %v8308_v16 = vpop.f32.mrb[239].mxu0  ;;  %8641 = vmatmul.mubr.f32.gmra.mrb[88].mxu0 %v6379_v15  ;;  %8715 = vmatprep.mubr.msk.f32.mxu1 %vm8794_vm0, %v11726_v13 }
 0x315   : > { %8643 = vmatprep.mubr.msk.f32.mxu0 %vm8794_vm0, %v11726_v13 }
 0x316   : > { %v4697_v27 = vadd.f32 %v11360_v53, %v4589_v51  ;;  %v11508_v32 = vpop.f32.mrb[0].mxu1 }
 0x317   : > { %v4594_v55 = vpop.f32.mrb[240].mxu0  ;;  %v8383_v20 = vpop.f32.mrb[1].mxu1  ;;  %8716 = vmatmul.mubr.f32.gmra.mrb[106].mxu1 %v6397_v57 }
 0x318   : > { %v11511_v58 = vadd.f32 %v4697_v27, %v11168_v21  ;;  %v4595_v61 = vadd.f32 %v4594_v55, %v11417_v1  ;;  %v8311_v29 = vpop.f32.mrb[241].mxu0  ;;  %8644 = vmatmul.mubr.f32.gmra.mrb[90].mxu0 %v6389_v47  ;;  %8743 = vmatprep.mubr.msk.f32.mxu1 %vm8794_vm0, %v11726_v13 }
 0x319   : > { %8646 = vmatprep.mubr.msk.f32.mxu0 %vm8794_vm0, %v11726_v13 }
 0x31a   : > { %v4703_v53 = vadd.f32 %v11381_v11, %v4595_v61  ;;  %v11519_v31 = vpop.f32.mrb[2].mxu1 }
 0x31b   : > { %v4600_v42 = vpop.f32.mrb[242].mxu0  ;;  %v8386_v6 = vpop.f32.mrb[3].mxu1  ;;  %8744 = vmatmul.mubr.f32.vlgmr.msra.gmra.mrb[108].mxu1 %v11274_v46 }
 0x31c   : > { %v11522_v21 = vadd.f32 %v4703_v53, %v11179_v19  ;;  %v4601_v1 = vadd.f32 %v4600_v42, %v11434_v30  ;;  %v8314_v54 = vpop.f32.mrb[243].mxu0  ;;  %8647 = vmatmul.mubr.f32.gmra.mrb[92].mxu0 %v6399_v2  ;;  %8746 = vmatprep.mubr.msk.f32.mxu1 %vm8794_vm0, %v11726_v13 }
 0x31d   : > { %8674 = vmatprep.mubr.msk.f32.mxu0 %vm8794_vm0, %v11726_v13 }
 0x31e   : > { %v4709_v11 = vadd.f32 %v11401_v62, %v4601_v1  ;;  %v11531_v18 = vpop.f32.mrb[4].mxu1 }
 0x31f   : > { %v4606_v4 = vpop.f32.mrb[244].mxu0  ;;  %v8389_v22 = vpop.f32.mrb[5].mxu1  ;;  %8747 = vmatmul.mubr.f32.gmra.mrb[110].mxu1 %v11292_v59 }
 0x320   : > { %v11534_v19 = vadd.f32 %v4709_v11, %v11192_v60  ;;  %v4607_v30 = vadd.f32 %v4606_v4, %v11450_v8  ;;  %v8317_v10 = vpop.f32.mrb[245].mxu0  ;;  %8675 = vmatmul.mubr.f32.vlgmr.msra.gmra.mrb[94].mxu0 %v11369_v37  ;;  %8749 = vmatprep.mubr.msk.f32.mxu1 %vm8794_vm0, %v11726_v13 }
 0x321   : > { %8719 = vmatpush3.msra.mxu0 %v6408_v24  ;;  %8677 = vmatprep.mubr.msk.f32.mxu0 %vm8794_vm0, %v11726_v13 }
 0x322   : > { %v4715_v62 = vadd.f32 %v11419_v38, %v4607_v30  ;;  %v11546_v15 = vpop.f32.mrb[6].mxu1 }
 0x323   : > { %v4612_v60 = vpop.f32.mrb[246].mxu0  ;;  %v8392_v14 = vpop.f32.mrb[7].mxu1  ;;  %8750 = vmatmul.mubr.f32.gmra.mrb[112].mxu1 %v11312_v33 }
 0x324   : > { %v11549_v8 = vadd.f32 %v4715_v62, %v11208_v7  ;;  %v4613_v37 = vadd.f32 %v4612_v60, %v11469_v25  ;;  %v8320_v57 = vpop.f32.mrb[247].mxu0  ;;  %8678 = vmatmul.mubr.f32.gmra.mrb[96].mxu0 %v11393_v63  ;;  %8752 = vmatprep.mubr.msk.f32.mxu1 %vm8794_vm0, %v11726_v13 }
 0x325   : > { %8680 = vmatprep.mubr.msk.f32.mxu0 %vm8794_vm0, %v11726_v13 }
 0x326   : > { %v4721_v24 = vadd.f32 %v11437_v44, %v4613_v37  ;;  %v11559_v23 = vpop.f32.mrb[8].mxu1 }
 0x327   : > { %v4618_v38 = vpop.f32.mrb[248].mxu0  ;;  %v8395_v28 = vpop.f32.mrb[9].mxu1  ;;  %8753 = vmatmul.mubr.f32.gmra.mrb[114].mxu1 %v11335_v35 }
 0x328   : > { %v11562_v7 = vadd.f32 %v4721_v24, %v11221_v17  ;;  %v4619_v25 = vadd.f32 %v4618_v38, %v11485_v48  ;;  %v8323_v63 = vpop.f32.mrb[249].mxu0  ;;  %8681 = vmatmul.mubr.f32.gmra.mrb[98].mxu0 %v11413_v36  ;;  %8755 = vmatprep.mubr.msk.f32.mxu1 %vm8794_vm0, %v11726_v13 }
 0x329   : > { %8683 = vmatprep.mubr.msk.f32.mxu0 %vm8794_vm0, %v11726_v13 }
 0x32a   : > { %v4727_v44 = vadd.f32 %v11455_v49, %v4619_v25  ;;  %v11572_v16 = vpop.f32.mrb[10].mxu1 }
 0x32b   : > { %v4624_v51 = vpop.f32.mrb[250].mxu0  ;;  %v8423_v40 = vpop.f32.mrb[11].mxu1  ;;  %8756 = vmatmul.mubr.f32.gmra.mrb[116].mxu1 %v11354_v56 }
 0x32c   : > { %v11575_v17 = vadd.f32 %v4727_v44, %v11234_v26  ;;  %v4625_v48 = vadd.f32 %v4624_v51, %v11497_v3  ;;  %v8326_v36 = vpop.f32.mrb[251].mxu0  ;;  %8684 = vmatmul.mubr.f32.gmra.mrb[100].mxu0 %v11431_v0  ;;  %8758 = vmatprep.mubr.msk.f32.mxu1 %vm8794_vm0, %v11726_v13 }
 0x32d   : > { %8686 = vmatprep.mubr.msk.f32.mxu0 %vm8794_vm0, %v11726_v13 }
 0x32e   : > { %v4733_v49 = vadd.f32 %v11471_v41, %v4625_v48  ;;  %v11585_v47 = vpop.f32.mrb[12].mxu1 }
 0x32f   : > { %v4852_v9 = vpop.f32.mrb[252].mxu0  ;;  %v8426_v27 = vpop.f32.mrb[13].mxu1  ;;  %8759 = vmatmul.mubr.f32.gmra.mrb[118].mxu1 %v11376_v43 }
 0x330   : > { %v11588_v26 = vadd.f32 %v4733_v49, %v11247_v52  ;;  %v4989_v3 = vadd.f32 %v11487_v50, %v4852_v9  ;;  %v8354_v0 = vpop.f32.mrb[253].mxu0  ;;  %8687 = vmatmul.mubr.f32.gmra.mrb[102].mxu0 %v11442_v12  ;;  %8761 = vmatprep.mubr.msk.f32.mxu1 %vm8794_vm0, %v11726_v13 }
 0x331   : > { %8689 = vmatprep.mubr.msk.f32.mxu0 %vm8794_vm0, %v11726_v13 }
 0x332   : > { %v11597_v55 = vpop.f32.mrb[14].mxu1 }
 0x333   : > { %v4862_v41 = vpop.f32.mrb[254].mxu0  ;;  %v8429_v50 = vpop.f32.mrb[15].mxu1  ;;  %8762 = vmatmul.mubr.f32.gmra.mrb[120].mxu1 %v11396_v45 }
 0x334   : > { %v4995_v52 = vadd.f32 %v11499_v5, %v4862_v41  ;;  %v8357_v61 = vpop.f32.mrb[255].mxu0  ;;  %8690 = vmatmul.mubr.f32.gmra.mrb[104].mxu0 %v11466_v34 }
 0x335   : > { %8692 = vmatprep.mubr.msk.f32.mxu0 %vm8794_vm0, %v11726_v13 }
 0x336   : > { %v5238_v29 = vpop.f32.mrb[16].mxu1 }
 0x337   : > { %v4872_v12 = vpop.f32.mrb[0].mxu0  ;;  %v8432_v53 = vpop.f32.mrb[17].mxu1 }
 0x338   : > { %v5001_v20 = vadd.f32 %v11508_v32, %v4872_v12  ;;  %v8360_v2 = vpop.f32.mrb[1].mxu0  ;;  %8693 = vmatmul.mubr.f32.gmra.mrb[106].mxu0 %v11481_v39 }
 0x339   : > { %8720 = vmatprep.mubr.msk.f32.mxu0 %vm8794_vm0, %v11726_v13 }
 0x33a   : > { %v5246_v42 = vpop.f32.mrb[18].mxu1 }
 0x33b   : > { %v4882_v5 = vpop.f32.mrb[2].mxu0  ;;  %v8435_v54 = vpop.f32.mrb[19].mxu1 }
 0x33c   : > { %v5007_v34 = vadd.f32 %v11519_v31, %v4882_v5  ;;  %v8363_v1 = vpop.f32.mrb[3].mxu0  ;;  %8721 = vmatmul.mubr.f32.vlgmr.msra.gmra.mrb[108].mxu0 %v11274_v46 }
 0x33d   : > { %8723 = vmatprep.mubr.msk.f32.mxu0 %vm8794_vm0, %v11726_v13 }
 0x33e   : > { %v5254_v32 = vpop.f32.mrb[20].mxu1 }
 0x33f   : > { %v4892_v6 = vpop.f32.mrb[4].mxu0  ;;  %v8438_v4 = vpop.f32.mrb[21].mxu1 }
 0x340   : > { %v5013_v11 = vadd.f32 %v11531_v18, %v4892_v6  ;;  %v8366_v39 = vpop.f32.mrb[5].mxu0  ;;  %8724 = vmatmul.mubr.f32.gmra.mrb[110].mxu0 %v11292_v59 }
 0x341   : > { %8726 = vmatprep.mubr.msk.f32.mxu0 %vm8794_vm0, %v11726_v13 }
 0x342   : > { %v5262_v31 = vpop.f32.mrb[22].mxu1 }
 0x343   : > { %v4902_v30 = vpop.f32.mrb[6].mxu0  ;;  %v8441_v22 = vpop.f32.mrb[23].mxu1 }
 0x344   : > { %v5019_v10 = vadd.f32 %v11546_v15, %v4902_v30  ;;  %v8369_v46 = vpop.f32.mrb[7].mxu0  ;;  %8727 = vmatmul.mubr.f32.gmra.mrb[112].mxu0 %v11312_v33 }
 0x345   : > { %8729 = vmatprep.mubr.msk.f32.mxu0 %vm8794_vm0, %v11726_v13 }
 0x346   : > { %v5444_v18 = vpop.f32.mrb[24].mxu1 }
 0x347   : > { %v4912_v62 = vpop.f32.mrb[8].mxu0  ;;  %v8469_v37 = vpop.f32.mrb[25].mxu1 }
 0x348   : > { %v5025_v60 = vadd.f32 %v11559_v23, %v4912_v62  ;;  %v8372_v59 = vpop.f32.mrb[9].mxu0  ;;  %8730 = vmatmul.mubr.f32.gmra.mrb[114].mxu0 %v11335_v35 }
 0x349   : > { %8732 = vmatprep.mubr.msk.f32.mxu0 %vm8794_vm0, %v11726_v13 }
 0x34a   : > { %v5450_v15 = vpop.f32.mrb[26].mxu1 }
 0x34b   : > { %v5098_v57 = vpop.f32.mrb[10].mxu0  ;;  %v8472_v33 = vpop.f32.mrb[27].mxu1 }
 0x34c   : > { %v5099_v14 = vadd.f32 %v5098_v57, %v4989_v3  ;;  %v8400_v24 = vpop.f32.mrb[11].mxu0  ;;  %8733 = vmatmul.mubr.f32.gmra.mrb[116].mxu0 %v11354_v56 }
 0x34d   : > { %8735 = vmatprep.mubr.msk.f32.mxu0 %vm8794_vm0, %v11726_v13 }
 0x34e   : > { %v5215_v38 = vadd.f32 %v11572_v16, %v5099_v14  ;;  %v5456_v25 = vpop.f32.mrb[28].mxu1 }
 0x34f   : > { %v5105_v23 = vpop.f32.mrb[12].mxu0  ;;  %v8475_v28 = vpop.f32.mrb[29].mxu1 }
 0x350   : > { %v5106_v63 = vadd.f32 %v5105_v23, %v4995_v52  ;;  %v8403_v35 = vpop.f32.mrb[13].mxu0  ;;  %8736 = vmatmul.mubr.f32.gmra.mrb[118].mxu0 %v11376_v43 }
 0x351   : > { %8738 = vmatprep.mubr.msk.f32.mxu0 %vm8794_vm0, %v11726_v13 }
 0x352   : > { %v5223_v44 = vadd.f32 %v11585_v47, %v5106_v63  ;;  %v5462_v56 = vpop.f32.mrb[30].mxu1 }
 0x353   : > { %v5112_v51 = vpop.f32.mrb[14].mxu0  ;;  %v8478_v40 = vpop.f32.mrb[31].mxu1 }
 0x354   : > { %v5113_v48 = vadd.f32 %v5112_v51, %v5001_v20  ;;  %v8406_v36 = vpop.f32.mrb[15].mxu0  ;;  %8739 = vmatmul.mubr.f32.gmra.mrb[120].mxu0 %v11396_v45 }
 0x356   : > { %v5231_v16 = vadd.f32 %v11597_v55, %v5113_v48  ;;  %v5468_v9 = vpop.f32.mrb[32].mxu1 }
 0x357   : > { %v5119_v49 = vpop.f32.mrb[16].mxu0  ;;  %v8481_v43 = vpop.f32.mrb[33].mxu1 }
 0x358   : > { %v5120_v3 = vadd.f32 %v5119_v49, %v5007_v34  ;;  %v8409_v0 = vpop.f32.mrb[17].mxu0 }
 0x35a   : > { %v5239_v27 = vadd.f32 %v5238_v29, %v5120_v3  ;;  %v5474_v52 = vpop.f32.mrb[34].mxu1 }
 0x35b   : > { %v5126_v41 = vpop.f32.mrb[18].mxu0  ;;  %v8484_v47 = vpop.f32.mrb[35].mxu1 }
 0x35c   : > { %v5127_v13 = vadd.f32 %v5126_v41, %v5013_v11  ;;  %v8412_v61 = vpop.f32.mrb[19].mxu0 }
 0x35e   : > { %v5247_v50 = vadd.f32 %v5246_v42, %v5127_v13  ;;  %v5480_v20 = vpop.f32.mrb[36].mxu1 }
 0x35f   : > { %v5133_v12 = vpop.f32.mrb[20].mxu0  ;;  %v8487_v45 = vpop.f32.mrb[37].mxu1 }
 0x360   : > { %v5134_v2 = vadd.f32 %v5133_v12, %v5019_v10  ;;  %v8415_v53 = vpop.f32.mrb[21].mxu0 }
 0x362   : > { %v5255_v5 = vadd.f32 %v5254_v32, %v5134_v2  ;;  %v5729_v55 = vpop.f32.mrb[38].mxu1 }
 0x363   : > { %v5140_v1 = vpop.f32.mrb[22].mxu0  ;;  %v8515_v34 = vpop.f32.mrb[39].mxu1 }
 0x364   : > { %v5141_v54 = vadd.f32 %v5140_v1, %v5025_v60  ;;  %v8418_v6 = vpop.f32.mrb[23].mxu0 }
 0x366   : > { %v5263_v39 = vadd.f32 %v5262_v31, %v5141_v54  ;;  %v5735_v29 = vpop.f32.mrb[40].mxu1 }
 0x367   : > { %v5336_v4 = vpop.f32.mrb[24].mxu0  ;;  %v8518_v11 = vpop.f32.mrb[41].mxu1 }
 0x368   : > { %v5337_v30 = vadd.f32 %v5336_v4, %v5215_v38  ;;  %v8446_v46 = vpop.f32.mrb[25].mxu0 }
 0x36a   : > { %v5445_v22 = vadd.f32 %v5444_v18, %v5337_v30  ;;  %v5741_v42 = vpop.f32.mrb[42].mxu1 }
 0x36b   : > { %v5342_v62 = vpop.f32.mrb[26].mxu0  ;;  %v8521_v10 = vpop.f32.mrb[43].mxu1 }
 0x36c   : > { %v5343_v59 = vadd.f32 %v5342_v62, %v5223_v44  ;;  %v8449_v37 = vpop.f32.mrb[27].mxu0  ;;  %v11635_v57 = vadd.f32 %v5445_v22, %v11511_v58 }
 0x36e   : > { %v5451_v32 = vadd.f32 %v5450_v15, %v5343_v59  ;;  %v5747_v60 = vpop.f32.mrb[44].mxu1 }
 0x36f   : > { %v5348_v14 = vpop.f32.mrb[28].mxu0  ;;  %v8524_v31 = vpop.f32.mrb[45].mxu1 }
 0x370   : > { %v5349_v24 = vadd.f32 %v5348_v14, %v5231_v16  ;;  %v8452_v33 = vpop.f32.mrb[29].mxu0  ;;  %v11638_v23 = vadd.f32 %v5451_v32, %v11522_v21 }
 0x372   : > { %v5457_v38 = vadd.f32 %v5456_v25, %v5349_v24  ;;  %v5753_v18 = vpop.f32.mrb[46].mxu1 }
 0x373   : > { %v5354_v63 = vpop.f32.mrb[30].mxu0  ;;  %v8527_v44 = vpop.f32.mrb[47].mxu1 }
 0x374   : > { %v5355_v35 = vadd.f32 %v5354_v63, %v5239_v27  ;;  %v8455_v28 = vpop.f32.mrb[31].mxu0  ;;  %v11641_v51 = vadd.f32 %v5457_v38, %v11534_v19 }
 0x376   : > { %v5463_v58 = vadd.f32 %v5462_v56, %v5355_v35  ;;  %v5759_v15 = vpop.f32.mrb[48].mxu1 }
 0x377   : > { %v5360_v48 = vpop.f32.mrb[32].mxu0  ;;  %v8530_v16 = vpop.f32.mrb[49].mxu1 }
 0x378   : > { %v5361_v36 = vadd.f32 %v5360_v48, %v5247_v50  ;;  %v8458_v40 = vpop.f32.mrb[33].mxu0  ;;  %v11644_v49 = vadd.f32 %v5463_v58, %v11549_v8 }
 0x37a   : > { %v5469_v21 = vadd.f32 %v5468_v9, %v5361_v36  ;;  %v5765_v25 = vpop.f32.mrb[50].mxu1 }
 0x37b   : > { %v5366_v3 = vpop.f32.mrb[34].mxu0  ;;  %v8533_v41 = vpop.f32.mrb[51].mxu1 }
 0x37c   : > { %v11647_v0 = vadd.f32 %v5469_v21, %v11562_v7  ;;  %v5367_v43 = vadd.f32 %v5366_v3, %v5255_v5  ;;  %v8461_v27 = vpop.f32.mrb[35].mxu0 }
 0x37e   : > { %v5475_v19 = vadd.f32 %v5474_v52, %v5367_v43  ;;  %v5955_v56 = vpop.f32.mrb[52].mxu1 }
 0x37f   : > { %v5372_v13 = vpop.f32.mrb[36].mxu0  ;;  %v8561_v12 = vpop.f32.mrb[53].mxu1 }
 0x380   : > { %v11650_v61 = vadd.f32 %v5475_v19, %v11575_v17  ;;  %v5373_v47 = vadd.f32 %v5372_v13, %v5263_v39  ;;  %v8464_v50 = vpop.f32.mrb[37].mxu0 }
 0x382   : > { %v5481_v8 = vadd.f32 %v5480_v20, %v5373_v47  ;;  %v5963_v9 = vpop.f32.mrb[54].mxu1 }
 0x383   : > { %v5593_v2 = vpop.f32.mrb[38].mxu0  ;;  %v8564_v5 = vpop.f32.mrb[55].mxu1 }
 0x384   : > { %v11653_v53 = vadd.f32 %v5481_v8, %v11588_v26  ;;  %v5730_v7 = vadd.f32 %v5729_v55, %v5593_v2  ;;  %v8492_v45 = vpop.f32.mrb[39].mxu0 }
 0x386   : > { %v5971_v54 = vpop.f32.mrb[56].mxu1 }
 0x387   : > { %v5603_v1 = vpop.f32.mrb[40].mxu0  ;;  %v8567_v34 = vpop.f32.mrb[57].mxu1 }
 0x388   : > { %v5736_v52 = vadd.f32 %v5735_v29, %v5603_v1  ;;  %v8495_v6 = vpop.f32.mrb[41].mxu0 }
 0x38a   : > { %v5979_v17 = vpop.f32.mrb[58].mxu1 }
 0x38b   : > { %v5613_v4 = vpop.f32.mrb[42].mxu0  ;;  %v8570_v46 = vpop.f32.mrb[59].mxu1 }
 0x38c   : > { %v5742_v30 = vadd.f32 %v5741_v42, %v5613_v4  ;;  %v8498_v39 = vpop.f32.mrb[43].mxu0 }
 0x38e   : > { %v5987_v20 = vpop.f32.mrb[60].mxu1 }
 0x38f   : > { %v5623_v11 = vpop.f32.mrb[44].mxu0  ;;  %v8573_v59 = vpop.f32.mrb[61].mxu1 }
 0x390   : > { %v5748_v22 = vadd.f32 %v5747_v60, %v5623_v11  ;;  %v8501_v62 = vpop.f32.mrb[45].mxu0 }
 0x392   : > { %v5995_v37 = vpop.f32.mrb[62].mxu1 }
 0x393   : > { %v5633_v26 = vpop.f32.mrb[46].mxu0  ;;  %v8576_v32 = vpop.f32.mrb[63].mxu1 }
 0x394   : > { %v5754_v55 = vadd.f32 %v5753_v18, %v5633_v26  ;;  %v8504_v10 = vpop.f32.mrb[47].mxu0 }
 0x396   : > { %v6003_v24 = vpop.f32.mrb[64].mxu1 }
 0x397   : > { %v5643_v14 = vpop.f32.mrb[48].mxu0  ;;  %v8579_v31 = vpop.f32.mrb[65].mxu1 }
 0x398   : > { %v5760_v29 = vadd.f32 %v5759_v15, %v5643_v14  ;;  %v8507_v33 = vpop.f32.mrb[49].mxu0 }
 0x39a   : > { %v6185_v63 = vpop.f32.mrb[66].mxu1 }
 0x39b   : > { %v5653_v38 = vpop.f32.mrb[50].mxu0  ;;  %v8607_v28 = vpop.f32.mrb[67].mxu1 }
 0x39c   : > { %v5766_v42 = vadd.f32 %v5765_v25, %v5653_v38  ;;  %v8510_v35 = vpop.f32.mrb[51].mxu0 }
 0x39e   : > { %v6191_v58 = vpop.f32.mrb[68].mxu1 }
 0x39f   : > { %v5839_v44 = vpop.f32.mrb[52].mxu0  ;;  %v8610_v36 = vpop.f32.mrb[69].mxu1 }
 0x3a0   : > { %v5840_v60 = vadd.f32 %v5839_v44, %v5730_v7  ;;  %v8538_v48 = vpop.f32.mrb[53].mxu0 }
 0x3a2   : > { %v5956_v40 = vadd.f32 %v5955_v56, %v5840_v60  ;;  %v6197_v18 = vpop.f32.mrb[70].mxu1 }
 0x3a3   : > { %v5846_v16 = vpop.f32.mrb[54].mxu0  ;;  %v8613_v43 = vpop.f32.mrb[71].mxu1 }
 0x3a4   : > { %v5847_v21 = vadd.f32 %v5846_v16, %v5736_v52  ;;  %v8541_v3 = vpop.f32.mrb[55].mxu0 }
 0x3a6   : > { %v5964_v27 = vadd.f32 %v5963_v9, %v5847_v21  ;;  %v6203_v41 = vpop.f32.mrb[72].mxu1 }
 0x3a7   : > { %v5853_v15 = vpop.f32.mrb[56].mxu0  ;;  %v8616_v47 = vpop.f32.mrb[73].mxu1 }
 0x3a8   : > { %v5854_v19 = vadd.f32 %v5853_v15, %v5742_v30  ;;  %v8544_v13 = vpop.f32.mrb[57].mxu0 }
 0x3aa   : > { %v5972_v25 = vadd.f32 %v5971_v54, %v5854_v19  ;;  %v6209_v12 = vpop.f32.mrb[74].mxu1 }
 0x3ab   : > { %v5860_v50 = vpop.f32.mrb[58].mxu0  ;;  %v8619_v7 = vpop.f32.mrb[75].mxu1 }
 0x3ac   : > { %v5861_v8 = vadd.f32 %v5860_v50, %v5748_v22  ;;  %v8547_v2 = vpop.f32.mrb[59].mxu0 }
 0x3ae   : > { %v5980_v45 = vadd.f32 %v5979_v17, %v5861_v8  ;;  %v6215_v56 = vpop.f32.mrb[76].mxu1 }
 0x3af   : > { %v5867_v5 = vpop.f32.mrb[60].mxu0  ;;  %v8622_v52 = vpop.f32.mrb[77].mxu1 }
 0x3b0   : > { %v5868_v1 = vadd.f32 %v5867_v5, %v5754_v55  ;;  %v8550_v6 = vpop.f32.mrb[61].mxu0 }
 0x3b2   : > { %v5988_v34 = vadd.f32 %v5987_v20, %v5868_v1  ;;  %v6221_v9 = vpop.f32.mrb[78].mxu1 }
 0x3b3   : > { %v5874_v4 = vpop.f32.mrb[62].mxu0  ;;  %v8625_v30 = vpop.f32.mrb[79].mxu1 }
 0x3b4   : > { %v5875_v39 = vadd.f32 %v5874_v4, %v5760_v29  ;;  %v8553_v46 = vpop.f32.mrb[63].mxu0 }
 0x3b6   : > { %v5996_v11 = vadd.f32 %v5995_v37, %v5875_v39  ;;  %v6477_v54 = vpop.f32.mrb[80].mxu1 }
 0x3b7   : > { %v5881_v62 = vpop.f32.mrb[64].mxu0  ;;  %v8653_v22 = vpop.f32.mrb[81].mxu1 }
 0x3b8   : > { %v5882_v59 = vadd.f32 %v5881_v62, %v5766_v42  ;;  %v8556_v26 = vpop.f32.mrb[65].mxu0 }
 0x3ba   : > { %v6004_v10 = vadd.f32 %v6003_v24, %v5882_v59  ;;  %v6483_v17 = vpop.f32.mrb[82].mxu1 }
 0x3bb   : > { %v6077_v32 = vpop.f32.mrb[66].mxu0  ;;  %v8656_v55 = vpop.f32.mrb[83].mxu1 }
 0x3bc   : > { %v6078_v14 = vadd.f32 %v6077_v32, %v5956_v40  ;;  %v8584_v33 = vpop.f32.mrb[67].mxu0 }
 0x3be   : > { %v6186_v31 = vadd.f32 %v6185_v63, %v6078_v14  ;;  %v6489_v20 = vpop.f32.mrb[84].mxu1 }
 0x3bf   : > { %v6083_v38 = vpop.f32.mrb[68].mxu0  ;;  %v8659_v37 = vpop.f32.mrb[85].mxu1 }
 0x3c0   : > { %v11656_v35 = vadd.f32 %v6186_v31, %v11635_v57  ;;  %v6084_v29 = vadd.f32 %v6083_v38, %v5964_v27  ;;  %v8587_v28 = vpop.f32.mrb[69].mxu0 }
 0x3c2   : > { %v6192_v44 = vadd.f32 %v6191_v58, %v6084_v29  ;;  %v6495_v42 = vpop.f32.mrb[86].mxu1 }
 0x3c3   : > { %v6089_v60 = vpop.f32.mrb[70].mxu0  ;;  %v8662_v40 = vpop.f32.mrb[87].mxu1 }
 0x3c4   : > { %v11659_v48 = vadd.f32 %v6192_v44, %v11638_v23  ;;  %v6090_v24 = vadd.f32 %v6089_v60, %v5972_v25  ;;  %v8590_v36 = vpop.f32.mrb[71].mxu0 }
 0x3c6   : > { %v6198_v16 = vadd.f32 %v6197_v18, %v6090_v24  ;;  %v6501_v63 = vpop.f32.mrb[88].mxu1 }
 0x3c7   : > { %v6095_v21 = vpop.f32.mrb[72].mxu0  ;;  %v8665_v27 = vpop.f32.mrb[89].mxu1 }
 0x3c8   : > { %v11662_v3 = vadd.f32 %v6198_v16, %v11641_v51  ;;  %v6096_v57 = vadd.f32 %v6095_v21, %v5980_v45  ;;  %v8593_v43 = vpop.f32.mrb[73].mxu0 }
 0x3ca   : > { %v6204_v15 = vadd.f32 %v6203_v41, %v6096_v57  ;;  %v6507_v58 = vpop.f32.mrb[90].mxu1 }
 0x3cb   : > { %v6101_v19 = vpop.f32.mrb[74].mxu0  ;;  %v8668_v25 = vpop.f32.mrb[91].mxu1 }
 0x3cc   : > { %v11665_v13 = vadd.f32 %v6204_v15, %v11644_v49  ;;  %v6102_v23 = vadd.f32 %v6101_v19, %v5988_v34  ;;  %v8596_v47 = vpop.f32.mrb[75].mxu0 }
 0x3ce   : > { %v6210_v50 = vadd.f32 %v6209_v12, %v6102_v23  ;;  %v6513_v18 = vpop.f32.mrb[92].mxu1 }
 0x3cf   : > { %v6107_v8 = vpop.f32.mrb[76].mxu0  ;;  %v8671_v45 = vpop.f32.mrb[93].mxu1 }
 0x3d0   : > { %v11668_v2 = vadd.f32 %v6210_v50, %v11647_v0  ;;  %v6108_v51 = vadd.f32 %v6107_v8, %v5996_v11  ;;  %v8599_v7 = vpop.f32.mrb[77].mxu0 }
 0x3d2   : > { %v6216_v5 = vadd.f32 %v6215_v56, %v6108_v51  ;;  %v6703_v41 = vpop.f32.mrb[94].mxu1 }
 0x3d3   : > { %v6113_v1 = vpop.f32.mrb[78].mxu0  ;;  %v8699_v34 = vpop.f32.mrb[95].mxu1 }
 0x3d4   : > { %v11671_v6 = vadd.f32 %v6216_v5, %v11650_v61  ;;  %v6114_v49 = vadd.f32 %v6113_v1, %v6004_v10  ;;  %v8602_v52 = vpop.f32.mrb[79].mxu0 }
 0x3d6   : > { %v6222_v4 = vadd.f32 %v6221_v9, %v6114_v49  ;;  %v6711_v12 = vpop.f32.mrb[96].mxu1 }
 0x3d7   : > { %v6341_v39 = vpop.f32.mrb[80].mxu0  ;;  %v8702_v11 = vpop.f32.mrb[97].mxu1 }
 0x3d8   : > { %v11674_v46 = vadd.f32 %v6222_v4, %v11653_v53  ;;  %v6478_v0 = vadd.f32 %v6477_v54, %v6341_v39  ;;  %v8630_v30 = vpop.f32.mrb[81].mxu0 }
 0x3da   : > { %v6719_v59 = vpop.f32.mrb[98].mxu1 }
 0x3db   : > { %v6351_v62 = vpop.f32.mrb[82].mxu0  ;;  %v8705_v22 = vpop.f32.mrb[99].mxu1 }
 0x3dc   : > { %v6484_v56 = vadd.f32 %v6483_v17, %v6351_v62  ;;  %v8633_v26 = vpop.f32.mrb[83].mxu0 }
 0x3de   : > { %v6727_v61 = vpop.f32.mrb[100].mxu1 }
 0x3df   : > { %v6361_v32 = vpop.f32.mrb[84].mxu0  ;;  %v8708_v33 = vpop.f32.mrb[101].mxu1 }
 0x3e0   : > { %v6490_v14 = vadd.f32 %v6489_v20, %v6361_v32  ;;  %v8636_v10 = vpop.f32.mrb[85].mxu0 }
 0x3e2   : > { %v6735_v9 = vpop.f32.mrb[102].mxu1 }
 0x3e3   : > { %v6371_v55 = vpop.f32.mrb[86].mxu0  ;;  %v8711_v29 = vpop.f32.mrb[103].mxu1 }
 0x3e4   : > { %v6496_v31 = vadd.f32 %v6495_v42, %v6371_v55  ;;  %v8639_v38 = vpop.f32.mrb[87].mxu0 }
 0x3e6   : > { %v6743_v28 = vpop.f32.mrb[104].mxu1 }
 0x3e7   : > { %v6381_v53 = vpop.f32.mrb[88].mxu0  ;;  %v8714_v44 = vpop.f32.mrb[105].mxu1 }
 0x3e8   : > { %v6502_v54 = vadd.f32 %v6501_v63, %v6381_v53  ;;  %v8642_v37 = vpop.f32.mrb[89].mxu0 }
 0x3ea   : > { %v6751_v24 = vpop.f32.mrb[106].mxu1 }
 0x3eb   : > { %v6391_v60 = vpop.f32.mrb[90].mxu0  ;;  %v8717_v40 = vpop.f32.mrb[107].mxu1 }
 0x3ec   : > { %v6508_v17 = vadd.f32 %v6507_v58, %v6391_v60  ;;  %v8645_v36 = vpop.f32.mrb[91].mxu0 }
 0x3ee   : > { %v6933_v21 = vpop.f32.mrb[108].mxu1 }
 0x3ef   : > { %v6401_v16 = vpop.f32.mrb[92].mxu0  ;;  %v8745_v43 = vpop.f32.mrb[109].mxu1 }
 0x3f0   : > { %v6514_v20 = vadd.f32 %v6513_v18, %v6401_v16  ;;  %v8648_v57 = vpop.f32.mrb[93].mxu0 }
 0x3f2   : > { %v6939_v15 = vpop.f32.mrb[110].mxu1 }
 0x3f3   : > { %v6587_v27 = vpop.f32.mrb[94].mxu0  ;;  %v8748_v23 = vpop.f32.mrb[111].mxu1 }
 0x3f4   : > { %v6588_v42 = vadd.f32 %v6587_v27, %v6478_v0  ;;  %v8676_v19 = vpop.f32.mrb[95].mxu0 }
 0x3f6   : > { %v6704_v47 = vadd.f32 %v6703_v41, %v6588_v42  ;;  %v6945_v63 = vpop.f32.mrb[112].mxu1 }
 0x3f7   : > { %v6594_v25 = vpop.f32.mrb[96].mxu0  ;;  %v8751_v51 = vpop.f32.mrb[113].mxu1 }
 0x3f8   : > { %v6595_v50 = vadd.f32 %v6594_v25, %v6484_v56  ;;  %v8679_v8 = vpop.f32.mrb[97].mxu0 }
 0x3fa   : > { %v6712_v7 = vadd.f32 %v6711_v12, %v6595_v50  ;;  %v6951_v45 = vpop.f32.mrb[114].mxu1 }
 0x3fb   : > { %v6601_v58 = vpop.f32.mrb[98].mxu0  ;;  %v8754_v49 = vpop.f32.mrb[115].mxu1 }
 0x3fc   : > { %v6602_v5 = vadd.f32 %v6601_v58, %v6490_v14  ;;  %v8682_v1 = vpop.f32.mrb[99].mxu0 }
 0x3fe   : > { %v6720_v18 = vadd.f32 %v6719_v59, %v6602_v5  ;;  %v6957_v34 = vpop.f32.mrb[116].mxu1 }
 0x3ff   : > { %v6608_v52 = vpop.f32.mrb[100].mxu0  ;;  %v8757_v0 = vpop.f32.mrb[117].mxu1 }
 0x400   : > { %v6609_v4 = vadd.f32 %v6608_v52, %v6496_v31  ;;  %v8685_v39 = vpop.f32.mrb[101].mxu0 }
 0x402   : > { %v6728_v30 = vadd.f32 %v6727_v61, %v6609_v4  ;;  %v6963_v41 = vpop.f32.mrb[118].mxu1 }
 0x403   : > { %v6615_v11 = vpop.f32.mrb[102].mxu0  ;;  %v8760_v56 = vpop.f32.mrb[119].mxu1 }
 0x404   : > { %v6616_v62 = vadd.f32 %v6615_v11, %v6502_v54  ;;  %v8688_v26 = vpop.f32.mrb[103].mxu0  ;;  %v7087_v54 = vld [vmem:[%s11710_s2] ss:$0 sm:$0xff] }
 0x406   : > { %v6736_v22 = vadd.f32 %v6735_v9, %v6616_v62  ;;  %v6969_v32 = vpop.f32.mrb[120].mxu1 }
 0x407   : > { %v6622_v12 = vpop.f32.mrb[104].mxu0  ;;  %v8763_v33 = vpop.f32.mrb[121].mxu1 }
 0x408   : > { %v6623_v10 = vadd.f32 %v6622_v12, %v6508_v17  ;;  %v8691_v14 = vpop.f32.mrb[105].mxu0 }
 0x40a   : > { %v6744_v55 = vadd.f32 %v6743_v28, %v6623_v10 }
 0x40b   : > { %v6629_v59 = vpop.f32.mrb[106].mxu0 }
 0x40c   : > { %v6630_v38 = vadd.f32 %v6629_v59, %v6514_v20  ;;  %v8694_v29 = vpop.f32.mrb[107].mxu0 }
 0x40e   : > { %v6752_v31 = vadd.f32 %v6751_v24, %v6630_v38 }
 0x40f   : > { %v6825_v53 = vpop.f32.mrb[108].mxu0 }
 0x410   : > { %v6826_v37 = vadd.f32 %v6825_v53, %v6704_v47  ;;  %v8722_v61 = vpop.f32.mrb[109].mxu0 }
 0x412   : > { %v6934_v44 = vadd.f32 %v6933_v21, %v6826_v37 }
 0x413   : > { %v6831_v9 = vpop.f32.mrb[110].mxu0 }
 0x414   : > { %v6973_v60 = vadd.f32 %v6934_v44, %v11656_v35  ;;  %v6832_v17 = vadd.f32 %v6831_v9, %v6712_v7  ;;  %v8725_v36 = vpop.f32.mrb[111].mxu0 }
 0x416   : > { %v6987_v40 = vadd.f32 %v7087_v54, %v6973_v60  ;;  %v6940_v28 = vadd.f32 %v6939_v15, %v6832_v17 }
 0x417   : > { %v6837_v24 = vpop.f32.mrb[112].mxu0 }
 0x418   : > { %v6994_v16 = vmax.f32 %v6987_v40, 0.0  ;;  %v6974_v21 = vadd.f32 %v6940_v28, %v11659_v48  ;;  %v6838_v20 = vadd.f32 %v6837_v24, %v6720_v18  ;;  %v8728_v57 = vpop.f32.mrb[113].mxu0 }
 0x41a   : > { %7002 = vst.msk [vmem:[%s11684_s24] sm:$0xff] %vm7001_vm2, %v6994_v16  ;;  %v6988_v35 = vadd.f32 %v7087_v54, %v6974_v21  ;;  %v6946_v43 = vadd.f32 %v6945_v63, %v6838_v20 }
 0x41b   : > { %v6843_v27 = vpop.f32.mrb[114].mxu0 }
 0x41c   : > { %v6995_v15 = vmax.f32 %v6988_v35, 0.0  ;;  %v6975_v42 = vadd.f32 %v6946_v43, %v11662_v3  ;;  %v6844_v19 = vadd.f32 %v6843_v27, %v6728_v30  ;;  %v8731_v23 = vpop.f32.mrb[115].mxu0 }
 0x41e   : > { %7003 = vst.msk [vmem:[%s11684_s24 + $0x8] sm:$0xff] %vm7001_vm2, %v6995_v15  ;;  %v6989_v47 = vadd.f32 %v7087_v54, %v6975_v42  ;;  %v6952_v25 = vadd.f32 %v6951_v45, %v6844_v19 }
 0x41f   : > { %v6849_v50 = vpop.f32.mrb[116].mxu0 }
 0x420   : > { %v6996_v48 = vmax.f32 %v6989_v47, 0.0  ;;  %v6976_v8 = vadd.f32 %v6952_v25, %v11665_v13  ;;  %v6850_v51 = vadd.f32 %v6849_v50, %v6736_v22  ;;  %v8734_v7 = vpop.f32.mrb[117].mxu0 }
 0x422   : > { %7004 = vst.msk [vmem:[%s11684_s24 + $0x10] sm:$0xff] %vm7001_vm2, %v6996_v48  ;;  %v6990_v63 = vadd.f32 %v7087_v54, %v6976_v8  ;;  %v6958_v58 = vadd.f32 %v6957_v34, %v6850_v51 }
 0x423   : > { %v6855_v5 = vpop.f32.mrb[118].mxu0 }
 0x424   : > { %v6997_v3 = vmax.f32 %v6990_v63, 0.0  ;;  %v6977_v1 = vadd.f32 %v6958_v58, %v11668_v2  ;;  %v6856_v49 = vadd.f32 %v6855_v5, %v6744_v55  ;;  %v8737_v18 = vpop.f32.mrb[119].mxu0 }
 0x426   : > { %7005 = vst.msk [vmem:[%s11684_s24 + $0x18] sm:$0xff] %vm7001_vm2, %v6997_v3  ;;  %v6991_v45 = vadd.f32 %v7087_v54, %v6977_v1  ;;  %v6964_v52 = vadd.f32 %v6963_v41, %v6856_v49 }
 0x427   : > { %v6861_v13 = vpop.f32.mrb[120].mxu0 }
 0x428   : > { %v6998_v4 = vmax.f32 %v6991_v45, 0.0  ;;  %v6978_v39 = vadd.f32 %v6964_v52, %v11671_v6  ;;  %v6862_v0 = vadd.f32 %v6861_v13, %v6752_v31  ;;  %v8740_v30 = vpop.f32.mrb[121].mxu0 }
 0x42a   : > { %7006 = vst.msk [vmem:[%s11684_s24 + $0x20] sm:$0xff] %vm7001_vm2, %v6998_v4  ;;  %v6992_v34 = vadd.f32 %v7087_v54, %v6978_v39  ;;  %v6970_v11 = vadd.f32 %v6969_v32, %v6862_v0 }
 0x42c   : > { %v6999_v62 = vmax.f32 %v6992_v34, 0.0  ;;  %v6979_v2 = vadd.f32 %v6970_v11, %v11674_v46 }
 0x42e   : > { %7007 = vst.msk [vmem:[%s11684_s24 + $0x28] sm:$0xff] %vm7001_vm2, %v6999_v62  ;;  %v6993_v26 = vadd.f32 %v7087_v54, %v6979_v2 }
 0x430   : > { %v7000_v56 = vmax.f32 %v6993_v26, 0.0 }
 0x432   : > { %7009 = vst.msk [vmem:[%s11684_s24 + $0x30] sm:$0x1] %vm7008_vm3, %v7000_v56 }
 0x433 PF: > { %s14_s15 = sadd.s32 1, %s8790_s15  }
 0x434   : > { %p11_p4 = scmp.ge.s32.totalorder %s14_s15, 6  }
 0x436   :  { %13 = sbr.rel (!%p11_p4) target bundleno = 1 (0x1), region = 75 }

// kernel: fastrcnn_conv_fc_head.5
= control target key start
LH: loop header
LB: loop body
LE: loop exit
PB: predicated region body
PF: predicated region fallthrough
CT: control target
= control target key end

     0   :  { %s9279_s15 = smov 0   ;;  %s12434_s0 = inlined_call_operand.vmem [shape: f32[4,77,16], index: 0, kind: input, shape index: {}]   ;;  %s12435_s1 = inlined_call_operand.vmem [shape: f32[3,3,16,16], index: 1, kind: input, shape index: {}]   ;;  %s12436_s2 = inlined_call_operand.vmem [shape: f32[1,16], index: 2, kind: input, shape index: {}]   ;;  %s12437_s3 = inlined_call_operand.vmem [shape: f32[3,49,1], index: 3, kind: input, shape index: {}]   ;;  %s12438_s4 = inlined_call_operand.vmem [shape: f32[4,49,16], index: 4, kind: output, shape index: {}]  }
   0x1 LB: > { %s7190_s16 = sadd.s32 4294967295, %s9248_s15   ;;  %p7194_p0 = scmp.ge.s32.totalorder %s9248_s15, 1  ;;  %s9248_s15 = sphi %s9279_s15, %s14_s15  }
   0x2   : > { %p162_p1 = scmp.lt.s32.totalorder %s9248_s15, 5 }
   0x4   : > { %p163_p2 = pnand %p7194_p0, %p162_p1 }
   0x6   : > { %166 = sbr.rel (%p163_p2) target bundleno = 1077 (0x435), region = 36 }
   0xd   : > { %v207_v0 = vld [vmem:[%s12437_s3 + $0x10] sm:$0xff]  ;;  %v205_v1 = vld [vmem:[%s12437_s3] sm:$0xff]  ;;  %v9250_v2 = vmov 0   ;;  %p188_p3 = scmp.lt.s32.totalorder %s7190_s16, 3  ;;  %v208_v4 = vld [vmem:[%s12437_s3 + $0x18] sm:$0xff]  ;;  %v12443_v6 = vmov 0.0|0.0  }
   0xe   : > { %9236 = vset.pattern.permute.xlu1 %v9250_v2  ;;  %9235 = vset.pattern.permute.xlu0 %v9250_v2  ;;  %v7197_v3 = vld [vmem:[%s12435_s1 + $0x10] sm:$0xff]  ;;  %v206_v5 = vld [vmem:[%s12437_s3 + $0x8] sm:$0xff]  ;;  %v7198_v7 = vld [vmem:[%s12435_s1 + $0x18] sm:$0xff]  ;;  %vm9252_vm0 = vmmov 0   ;;  %v12448_v10 = vmov 0.0   ;;  %vm266_vm1 = vcmask 130048  }
   0xf   : > { %224 = vperm.xlu1 %9236, %v207_v0   ;;  %214 = vperm.xlu0 %9235, %v205_v1   ;;  %v289_v8 = vand.u32 4294901760, %v7197_v3  ;;  %s12512_s16 = smov (!%p188_p3, %s7190_s16), 3  ;;  %v292_v9 = vand.u32 4294901760, %v7198_v7  ;;  %v210_v14 = vld [vmem:[%s12437_s3 + $0x28] sm:$0xff]  ;;  %v209_v15 = vld [vmem:[%s12437_s3 + $0x20] sm:$0xff]  ;;  %v7199_v31 = vld [vmem:[%s12437_s3 + $0x70] sm:$0xff] }
  0x10   : > { %9059 = vmatprep.subr.bf16.mxu0 %v12443_v6  ;;  %9062 = vmatprep.subr.bf16.mxu1 %v12443_v6  ;;  %s9221_s29 = smul.u32 80, %s12512_s16  ;;  %v211_v32 = vld [vmem:[%s12437_s3 + $0x30] sm:$0x1]  ;;  %v7201_v45 = vld [vmem:[%s12437_s3 + $0x80] sm:$0xff]  ;;  %v7200_v46 = vld [vmem:[%s12437_s3 + $0x78] sm:$0xff]  ;;  %vm7133_vm2 = vcmask 122880  }
  0x11   : > { %7713 = vmatprep.mubr.msk.f32.mxu0 %vm9252_vm0, %v12448_v10  ;;  %7738 = vmatprep.mubr.msk.f32.mxu1 %vm9252_vm0, %v12448_v10  ;;  %v9313_v11 = vsub.f32 %v7197_v3, %v289_v8  ;;  %v9316_v12 = vpack.c.bf16 %v292_v9, %v289_v8  ;;  %v9318_v13 = vsub.f32 %v7198_v7, %v292_v9  ;;  %v7203_v56 = vld [vmem:[%s12437_s3 + $0x90] sm:$0xff]  ;;  %v7202_v57 = vld [vmem:[%s12437_s3 + $0x88] sm:$0xff]  ;;  %v7205_v0 = vld [vmem:[%s12437_s3 + $0xa0] sm:$0x1] }
  0x12   : > { %s9330_s10 = scalar_lea.vmem %s12434_s0, %s9221_s29  ;;  %v7204_v1 = vld [vmem:[%s12437_s3 + $0x98] sm:$0xff] }
  0x13   : > { %229 = vperm.xlu1 %9236, %v208_v4   ;;  %219 = vperm.xlu0 %9235, %v206_v5   ;;  %v428_v16 = vand.u32 4294901760, %v9313_v11  ;;  %v435_v17 = vand.u32 4294901760, %v9318_v13  ;;  %v256_v18 = vld [vmem:[%s9330_s10 + $0x7] sm:$0xff]  ;;  %v257_v19 = vld [vmem:[%s9330_s10 + $0xf] sm:$0xff]  ;;  %v258_v20 = vld [vmem:[%s9330_s10 + $0x17] sm:$0xff]  ;;  %v9066_v53 = vpack.c.bf16 %v9318_v13, %v9313_v11 }
  0x14   : > { %9061 = vmatpush3.bf16.msra.mxu0 %v9316_v12  ;;  %v268_v22 = vsel %vm266_vm1, %v256_v18, 0  ;;  %v271_v23 = vsel %vm266_vm1, %v257_v19, 0  ;;  %v274_v24 = vsel %vm266_vm1, %v258_v20, 0  ;;  %v259_v25 = vld [vmem:[%s9330_s10 + $0x1f] sm:$0xff]  ;;  %v260_v26 = vld [vmem:[%s9330_s10 + $0x27] sm:$0xff]  ;;  %v261_v40 = vld [vmem:[%s9330_s10 + $0x2f] sm:$0xff] }
  0x15   : > { %v429_v21 = vsub.f32 %v9313_v11, %v428_v16  ;;  %9065 = vmatprep.subr.bf16.mxu0 %v12443_v6  ;;  %v436_v27 = vsub.f32 %v9318_v13, %v435_v17  ;;  %v9349_v28 = vand.u32 4294901760, %v268_v22  ;;  %v9351_v29 = vand.u32 4294901760, %v271_v23  ;;  %v262_v55 = vld [vmem:[%s9330_s10 + $0x37] sm:$0x1]  ;;  %v9459_v18 = vld [vmem:[%s12435_s1] sm:$0xff]  ;;  %v9464_v19 = vld [vmem:[%s12435_s1 + $0x8] sm:$0xff] }
  0x16   : > { %v9353_v30 = vand.u32 4294901760, %v274_v24  ;;  %v277_v34 = vsel %vm266_vm1, %v259_v25, 0  ;;  %v280_v35 = vsel %vm266_vm1, %v260_v26, 0  ;;  %v283_v48 = vsel %vm266_vm1, %v261_v40, 0 }
  0x17   : > { %239 = vperm.xlu1 %9236, %v210_v14   ;;  %234 = vperm.xlu0 %9235, %v209_v15   ;;  %v430_v33 = vand.u32 4294901760, %v429_v21  ;;  %v437_v36 = vand.u32 4294901760, %v436_v27  ;;  %v9364_v37 = vsub.f32 %v268_v22, %v9349_v28  ;;  %v9367_v38 = vsub.f32 %v271_v23, %v9351_v29 }
  0x18   : > { %v9370_v39 = vsub.f32 %v274_v24, %v9353_v30  ;;  %v9373_v41 = vand.u32 4294901760, %v277_v34  ;;  %v9383_v47 = vand.u32 4294901760, %v280_v35  ;;  %v9407_v58 = vand.u32 4294901760, %v283_v48 }
  0x19   : > { %v9063_v42 = vpack.c.bf16 %v437_v36, %v430_v33  ;;  %v357_v43 = vand.u32 4294901760, %v9364_v37  ;;  %v367_v44 = vand.u32 4294901760, %v9367_v38  ;;  %v286_v63 = vsel %vm266_vm1, %v262_v55, 0 }
  0x1a   : > { %v377_v51 = vand.u32 4294901760, %v9370_v39  ;;  %v9394_v52 = vsub.f32 %v277_v34, %v9373_v41  ;;  %v9416_v62 = vsub.f32 %v280_v35, %v9383_v47  ;;  %v9429_v2 = vsub.f32 %v283_v48, %v9407_v58 }
  0x1b   : > { %1760 = vperm.xlu1 %9236, %v7199_v31   ;;  %244 = vperm.xlu0 %9235, %v211_v32   ;;  %v358_v49 = vsub.f32 %v9364_v37, %v357_v43  ;;  %v368_v50 = vsub.f32 %v9367_v38, %v367_v44  ;;  %v9438_v7 = vand.u32 4294901760, %v286_v63  ;;  %v1027_v23 = vand.u32 4294901760, %v9459_v18 }
  0x1c   : > { %9064 = vmatpush3.bf16.msra.mxu1 %v9063_v42  ;;  %v378_v60 = vsub.f32 %v9370_v39, %v377_v51  ;;  %v387_v61 = vand.u32 4294901760, %v9394_v52  ;;  %v397_v5 = vand.u32 4294901760, %v9416_v62  ;;  %v407_v14 = vand.u32 4294901760, %v9429_v2  ;;  %v200_v42 = vld [vmem:[%s9330_s10 + $0x16] sm:$0xff] }
  0x1d   : > { %9068 = vmatprep.subr.bf16.mxu1 %v12443_v6  ;;  %v359_v54 = vand.u32 4294901760, %v358_v49  ;;  %v369_v59 = vand.u32 4294901760, %v368_v50  ;;  %v9452_v15 = vsub.f32 %v286_v63, %v9438_v7  ;;  %v1030_v24 = vand.u32 4294901760, %v9464_v19  ;;  %v203_v63 = vld [vmem:[%s9330_s10 + $0x2e] sm:$0xff] }
  0x1e   : > { %v379_v3 = vand.u32 4294901760, %v378_v60  ;;  %v388_v4 = vsub.f32 %v9394_v52, %v387_v61  ;;  %v398_v9 = vsub.f32 %v9416_v62, %v397_v5  ;;  %v408_v21 = vsub.f32 %v9429_v2, %v407_v14 }
  0x1f   : > { %1770 = vperm.xlu1 %9236, %v7201_v45   ;;  %1765 = vperm.xlu0 %9235, %v7200_v46   ;;  %v417_v22 = vand.u32 4294901760, %v9452_v15  ;;  %v9482_v27 = vsub.f32 %v9459_v18, %v1027_v23  ;;  %v9485_v31 = vsub.f32 %v9464_v19, %v1030_v24  ;;  %v9072_v34 = vpack.c.bf16 %v435_v17, %v428_v16  ;;  %v199_v45 = vld [vmem:[%s9330_s10 + $0xe] sm:$0xff] }
  0x20   : > { %7739 = vmatmul.mubr.f32.vlgmr.msra.gmra.mrb[0].mxu1 %v9349_v28  ;;  %7714 = vmatmul.mubr.f32.vlgmr.msra.gmra.mrb[0].mxu0 %v359_v54  ;;  %v389_v8 = vand.u32 4294901760, %v388_v4  ;;  %v399_v20 = vand.u32 4294901760, %v398_v9  ;;  %v409_v25 = vand.u32 4294901760, %v408_v21  ;;  %v9555_v36 = vpack.c.bf16 %v1030_v24, %v1027_v23 }
  0x21   : > { %7741 = vmatprep.mubr.msk.f32.mxu1 %vm9252_vm0, %v12448_v10  ;;  %7716 = vmatprep.mubr.msk.f32.mxu0 %vm9252_vm0, %v12448_v10  ;;  %v418_v26 = vsub.f32 %v9452_v15, %v417_v22  ;;  %v9084_v32 = vpack.c.bf16 %v9485_v31, %v9482_v27  ;;  %v1166_v11 = vand.u32 4294901760, %v9482_v27 }
  0x22   : > { %9067 = vmatpush3.bf16.msra.mxu0 %v9066_v53  ;;  %9070 = vmatpush3.bf16.msra.mxu1 %v9316_v12 }
  0x23   : > { %1780 = vperm.xlu1 %9236, %v7203_v56   ;;  %1775 = vperm.xlu0 %9235, %v7202_v57   ;;  %v419_v33 = vand.u32 4294901760, %v418_v26  ;;  %v1167_v13 = vsub.f32 %v9482_v27, %v1166_v11 }
  0x24   : > { %7742 = vmatmul.mubr.f32.gmra.mrb[2].mxu1 %v9351_v29  ;;  %9071 = vmatprep.subr.bf16.mxu0 %v12443_v6 }
  0x25   : > { %7717 = vmatmul.mubr.f32.gmra.mrb[2].mxu0 %v369_v59  ;;  %7744 = vmatprep.mubr.msk.f32.mxu1 %vm9252_vm0, %v12448_v10  ;;  %v1168_v17 = vand.u32 4294901760, %v1167_v13  ;;  %v202_v59 = vld [vmem:[%s9330_s10 + $0x26] sm:$0xff] }
  0x26   : > { %7719 = vmatprep.mubr.msk.f32.mxu0 %vm9252_vm0, %v12448_v10  ;;  %9074 = vmatprep.subr.bf16.mxu1 %v12443_v6 }
  0x27   : > { %1790 = vperm.xlu1 %9236, %v7205_v0   ;;  %1785 = vperm.xlu0 %9235, %v7204_v1  }
  0x28   : > { %7745 = vmatmul.mubr.f32.gmra.mrb[4].mxu1 %v9353_v30 }
  0x29   : > { %7720 = vmatmul.mubr.f32.gmra.mrb[4].mxu0 %v379_v3  ;;  %7747 = vmatprep.mubr.msk.f32.mxu1 %vm9252_vm0, %v12448_v10 }
  0x2a   : > { %7722 = vmatprep.mubr.msk.f32.mxu0 %vm9252_vm0, %v12448_v10 }
  0x2c   : > { %7748 = vmatmul.mubr.f32.gmra.mrb[6].mxu1 %v9373_v41 }
  0x2d   : > { %7723 = vmatmul.mubr.f32.gmra.mrb[6].mxu0 %v389_v8  ;;  %7750 = vmatprep.mubr.msk.f32.mxu1 %vm9252_vm0, %v12448_v10 }
  0x2e   : > { %7725 = vmatprep.mubr.msk.f32.mxu0 %vm9252_vm0, %v12448_v10 }
  0x30   : > { %7751 = vmatmul.mubr.f32.gmra.mrb[8].mxu1 %v9383_v47 }
  0x31   : > { %7726 = vmatmul.mubr.f32.gmra.mrb[8].mxu0 %v399_v20  ;;  %7753 = vmatprep.mubr.msk.f32.mxu1 %vm9252_vm0, %v12448_v10 }
  0x32   : > { %7728 = vmatprep.mubr.msk.f32.mxu0 %vm9252_vm0, %v12448_v10 }
  0x34   : > { %7754 = vmatmul.mubr.f32.gmra.mrb[10].mxu1 %v9407_v58 }
  0x35   : > { %7729 = vmatmul.mubr.f32.gmra.mrb[10].mxu0 %v409_v25  ;;  %7756 = vmatprep.mubr.msk.f32.mxu1 %vm9252_vm0, %v12448_v10 }
  0x36   : > { %7731 = vmatprep.mubr.msk.f32.mxu0 %vm9252_vm0, %v12448_v10 }
  0x38   : > { %7757 = vmatmul.mubr.f32.gmra.mrb[12].mxu1 %v9438_v7 }
  0x39   : > { %7732 = vmatmul.mubr.f32.gmra.mrb[12].mxu0 %v419_v33  ;;  %7788 = vmatprep.mubr.msk.f32.mxu1 %vm9252_vm0, %v12448_v10 }
  0x3a   : > { %7763 = vmatprep.mubr.msk.f32.mxu0 %vm9252_vm0, %v12448_v10 }
  0x3c   : > { %7789 = vmatmul.mubr.f32.vlgmr.msra.gmra.mrb[14].mxu1 %v357_v43 }
  0x3d   : > { %7764 = vmatmul.mubr.f32.vlgmr.msra.gmra.mrb[14].mxu0 %v9364_v37  ;;  %7791 = vmatprep.mubr.msk.f32.mxu1 %vm9252_vm0, %v12448_v10 }
  0x3e   : > { %7766 = vmatprep.mubr.msk.f32.mxu0 %vm9252_vm0, %v12448_v10  ;;  %9073 = vmatpush3.bf16.msra.mxu0 %v9072_v34 }
  0x3f   : > { %9076 = vmatpush3.bf16.msra.mxu1 %v9316_v12  ;;  %9077 = vmatprep.subr.bf16.mxu0 %v12443_v6  ;;  %v1173_v12 = vand.u32 4294901760, %v9485_v31 }
  0x40   : > { %7792 = vmatmul.mubr.f32.gmra.mrb[16].mxu1 %v367_v44  ;;  %9080 = vmatprep.subr.bf16.mxu1 %v12443_v6 }
  0x41   : > { %7767 = vmatmul.mubr.f32.gmra.mrb[16].mxu0 %v9367_v38  ;;  %7794 = vmatprep.mubr.msk.f32.mxu1 %vm9252_vm0, %v12448_v10  ;;  %v1174_v16 = vsub.f32 %v9485_v31, %v1173_v12  ;;  %v9564_v38 = vpack.c.bf16 %v1173_v12, %v1166_v11  ;;  %v9727_v11 = vld [vmem:[%s12435_s1 + $0x20] sm:$0xff]  ;;  %v9732_v12 = vld [vmem:[%s12435_s1 + $0x28] sm:$0xff] }
  0x42   : > { %7769 = vmatprep.mubr.msk.f32.mxu0 %vm9252_vm0, %v12448_v10 }
  0x43   : > { %v1175_v35 = vand.u32 4294901760, %v1174_v16  ;;  %v1825_v16 = vand.u32 4294901760, %v9727_v11 }
  0x44   : > { %7795 = vmatmul.mubr.f32.gmra.mrb[18].mxu1 %v377_v51  ;;  %v201_v51 = vld [vmem:[%s9330_s10 + $0x1e] sm:$0xff] }
  0x45   : > { %7770 = vmatmul.mubr.f32.gmra.mrb[18].mxu0 %v9370_v39  ;;  %7797 = vmatprep.mubr.msk.f32.mxu1 %vm9252_vm0, %v12448_v10  ;;  %v9081_v37 = vpack.c.bf16 %v1175_v35, %v1168_v17  ;;  %v1828_v17 = vand.u32 4294901760, %v9732_v12 }
  0x46   : > { %7772 = vmatprep.mubr.msk.f32.mxu0 %vm9252_vm0, %v12448_v10 }
  0x48   : > { %7798 = vmatmul.mubr.f32.gmra.mrb[20].mxu1 %v387_v61 }
  0x49   : > { %7773 = vmatmul.mubr.f32.gmra.mrb[20].mxu0 %v9394_v52  ;;  %7800 = vmatprep.mubr.msk.f32.mxu1 %vm9252_vm0, %v12448_v10 }
  0x4a   : > { %7775 = vmatprep.mubr.msk.f32.mxu0 %vm9252_vm0, %v12448_v10 }
  0x4c   : > { %7801 = vmatmul.mubr.f32.gmra.mrb[22].mxu1 %v397_v5 }
  0x4d   : > { %7776 = vmatmul.mubr.f32.gmra.mrb[22].mxu0 %v9416_v62  ;;  %7803 = vmatprep.mubr.msk.f32.mxu1 %vm9252_vm0, %v12448_v10 }
  0x4e   : > { %7778 = vmatprep.mubr.msk.f32.mxu0 %vm9252_vm0, %v12448_v10 }
  0x50   : > { %7804 = vmatmul.mubr.f32.gmra.mrb[24].mxu1 %v407_v14 }
  0x51   : > { %7779 = vmatmul.mubr.f32.gmra.mrb[24].mxu0 %v9429_v2  ;;  %7806 = vmatprep.mubr.msk.f32.mxu1 %vm9252_vm0, %v12448_v10 }
  0x52   : > { %7781 = vmatprep.mubr.msk.f32.mxu0 %vm9252_vm0, %v12448_v10 }
  0x54   : > { %7807 = vmatmul.mubr.f32.gmra.mrb[26].mxu1 %v417_v22 }
  0x55   : > { %7782 = vmatmul.mubr.f32.gmra.mrb[26].mxu0 %v9452_v15  ;;  %7838 = vmatprep.mubr.msk.f32.mxu1 %vm9252_vm0, %v12448_v10 }
  0x56   : > { %7813 = vmatprep.mubr.msk.f32.mxu0 %vm9252_vm0, %v12448_v10 }
  0x58   : > { %7839 = vmatmul.mubr.f32.vlgmr.msra.gmra.mrb[28].mxu1 %v9349_v28 }
  0x59   : > { %7814 = vmatmul.mubr.f32.vlgmr.msra.gmra.mrb[28].mxu0 %v9349_v28  ;;  %7841 = vmatprep.mubr.msk.f32.mxu1 %vm9252_vm0, %v12448_v10  ;;  %v198_v28 = vld [vmem:[%s9330_s10 + $0x6] sm:$0xff] }
  0x5a   : > { %7816 = vmatprep.mubr.msk.f32.mxu0 %vm9252_vm0, %v12448_v10  ;;  %9079 = vmatpush3.bf16.msra.mxu0 %v9555_v36 }
  0x5b   : > { %9082 = vmatpush3.bf16.msra.mxu1 %v9081_v37  ;;  %9083 = vmatprep.subr.bf16.mxu0 %v12443_v6 }
  0x5c   : > { %7842 = vmatmul.mubr.f32.gmra.mrb[30].mxu1 %v9351_v29  ;;  %9086 = vmatprep.subr.bf16.mxu1 %v12443_v6 }
  0x5d   : > { %7817 = vmatmul.mubr.f32.gmra.mrb[30].mxu0 %v9351_v29  ;;  %7844 = vmatprep.mubr.msk.f32.mxu1 %vm9252_vm0, %v12448_v10 }
  0x5e   : > { %7819 = vmatprep.mubr.msk.f32.mxu0 %vm9252_vm0, %v12448_v10 }
  0x60   : > { %7845 = vmatmul.mubr.f32.gmra.mrb[32].mxu1 %v9353_v30 }
  0x61   : > { %7820 = vmatmul.mubr.f32.gmra.mrb[32].mxu0 %v9353_v30  ;;  %7847 = vmatprep.mubr.msk.f32.mxu1 %vm9252_vm0, %v12448_v10 }
  0x62   : > { %7822 = vmatprep.mubr.msk.f32.mxu0 %vm9252_vm0, %v12448_v10 }
  0x64   : > { %7848 = vmatmul.mubr.f32.gmra.mrb[34].mxu1 %v9373_v41 }
  0x65   : > { %7823 = vmatmul.mubr.f32.gmra.mrb[34].mxu0 %v9373_v41  ;;  %7850 = vmatprep.mubr.msk.f32.mxu1 %vm9252_vm0, %v12448_v10 }
  0x66   : > { %7825 = vmatprep.mubr.msk.f32.mxu0 %vm9252_vm0, %v12448_v10 }
  0x68   : > { %7851 = vmatmul.mubr.f32.gmra.mrb[36].mxu1 %v9383_v47 }
  0x69   : > { %7826 = vmatmul.mubr.f32.gmra.mrb[36].mxu0 %v9383_v47  ;;  %7853 = vmatprep.mubr.msk.f32.mxu1 %vm9252_vm0, %v12448_v10 }
  0x6a   : > { %7828 = vmatprep.mubr.msk.f32.mxu0 %vm9252_vm0, %v12448_v10 }
  0x6c   : > { %7854 = vmatmul.mubr.f32.gmra.mrb[38].mxu1 %v9407_v58 }
  0x6d   : > { %7829 = vmatmul.mubr.f32.gmra.mrb[38].mxu0 %v9407_v58  ;;  %7856 = vmatprep.mubr.msk.f32.mxu1 %vm9252_vm0, %v12448_v10 }
  0x6e   : > { %7831 = vmatprep.mubr.msk.f32.mxu0 %vm9252_vm0, %v12448_v10 }
  0x70   : > { %7857 = vmatmul.mubr.f32.gmra.mrb[40].mxu1 %v9438_v7 }
  0x71   : > { %7832 = vmatmul.mubr.f32.gmra.mrb[40].mxu0 %v9438_v7  ;;  %7888 = vmatprep.mubr.msk.f32.mxu1 %vm9252_vm0, %v12448_v10  ;;  %v204_v7 = vld [vmem:[%s9330_s10 + $0x36] sm:$0x1] }
  0x72   : > { %7863 = vmatprep.mubr.msk.f32.mxu0 %vm9252_vm0, %v12448_v10 }
  0x8e   : > { %v9605_v29 = vpop.permute.xlu0 %214  ;;  %v9607_v30 = vpop.permute.xlu1 %224 }
  0x8f   : > { %12465 = vst [vmem:[#allocation2_spill] sm:$0xff] %v9607_v30  ;;  %v247_v39 = vmul.f32 %v9605_v29, %v198_v28  ;;  %v249_v48 = vmul.f32 %v9607_v30, %v200_v42  ;;  %v9750_v28 = vsub.f32 %v9727_v11, %v1825_v16 }
  0x91   : > { %v1006_v40 = vsel %vm266_vm1, %v247_v39, 0  ;;  %v1012_v55 = vsel %vm266_vm1, %v249_v48, 0  ;;  %v9755_v39 = vsub.f32 %v9732_v12, %v1828_v17  ;;  %v12442_v48 = vand.u32 4294901760, %v9750_v28 }
  0x92   : > { %v9611_v41 = vand.u32 4294901760, %v1006_v40  ;;  %v9617_v44 = vpop.permute.xlu0 %219  ;;  %v9621_v46 = vpop.permute.xlu1 %229  ;;  %v9645_v60 = vand.u32 4294901760, %v1012_v55 }
  0x93   : > { %12466 = vst [vmem:[#allocation3_spill] sm:$0xff] %v9621_v46  ;;  %v248_v49 = vmul.f32 %v9617_v44, %v199_v45  ;;  %v250_v56 = vmul.f32 %v9621_v46, %v201_v51 }
  0x94   : > { %v9615_v43 = vsub.f32 %v1006_v40, %v9611_v41  ;;  %7889 = vmatmul.mubr.f32.vlgmr.msra.gmra.mrb[42].mxu1 %v9611_v41 }
  0x95   : > { %7891 = vmatprep.mubr.msk.f32.mxu1 %vm9252_vm0, %v12448_v10  ;;  %9088 = vmatpush3.bf16.msra.mxu1 %v9555_v36  ;;  %v1009_v52 = vsel %vm266_vm1, %v248_v49, 0  ;;  %v1015_v61 = vsel %vm266_vm1, %v250_v56, 0  ;;  %v12441_v49 = vand.u32 4294901760, %v9755_v39 }
  0x96   : > { %v1095_v47 = vand.u32 4294901760, %v9615_v43  ;;  %9092 = vmatprep.subr.bf16.mxu1 %v12443_v6  ;;  %v9633_v54 = vand.u32 4294901760, %v1009_v52  ;;  %v9637_v57 = vpop.permute.xlu1 %239  ;;  %v9639_v58 = vpop.permute.xlu0 %234  ;;  %v9661_v1 = vand.u32 4294901760, %v1015_v61 }
  0x97   : > { %12467 = vst [vmem:[#allocation4_spill] sm:$0xff] %v9637_v57  ;;  %12468 = vst [vmem:[#allocation5_spill] sm:$0xff] %v9639_v58  ;;  %v251_v62 = vmul.f32 %v9639_v58, %v202_v59  ;;  %v252_v2 = vmul.f32 %v9637_v57, %v203_v63 }
  0x98   : > { %v1096_v50 = vsub.f32 %v9615_v43, %v1095_v47  ;;  %7892 = vmatmul.mubr.f32.gmra.mrb[44].mxu1 %v9633_v54  ;;  %v9694_v22 = vsub.f32 %v1009_v52, %v9633_v54  ;;  %v9740_v35 = vsub.f32 %v1015_v61, %v9661_v1 }
  0x99   : > { %7894 = vmatprep.mubr.msk.f32.mxu1 %vm9252_vm0, %v12448_v10  ;;  %v1018_v3 = vsel %vm266_vm1, %v251_v62, 0  ;;  %v1021_v9 = vsel %vm266_vm1, %v252_v2, 0  ;;  %v1972_v62 = vsub.f32 %v9755_v39, %v12441_v49 }
  0x9a   : > { %v1097_v53 = vand.u32 4294901760, %v1096_v50  ;;  %v9657_v0 = vpop.permute.xlu1 %1760  ;;  %v9668_v5 = vpop.permute.xlu0 %244  ;;  %v9674_v8 = vand.u32 4294901760, %v1018_v3  ;;  %v9681_v15 = vand.u32 4294901760, %v1021_v9  ;;  %v1105_v25 = vand.u32 4294901760, %v9694_v22 }
  0x9b   : > { %v9666_v4 = vmul.f32 %v9657_v0, %v200_v42  ;;  %12470 = vst [vmem:[#allocation7_spill] sm:$0xff] %v9668_v5  ;;  %v253_v14 = vmul.f32 %v9668_v5, %v204_v7  ;;  %v1125_v42 = vand.u32 4294901760, %v9740_v35  ;;  %v1973_v7 = vand.u32 4294901760, %v1972_v62 }
  0x9c   : > { %7864 = vmatmul.mubr.f32.vlgmr.msra.gmra.mrb[42].mxu0 %v1097_v53  ;;  %7895 = vmatmul.mubr.f32.gmra.mrb[46].mxu1 %v9645_v60  ;;  %v1106_v26 = vsub.f32 %v9694_v22, %v1105_v25  ;;  %v9758_v40 = vsub.f32 %v1021_v9, %v9681_v15 }
  0x9d   : > { %9085 = vmatpush3.bf16.msra.mxu0 %v9084_v32  ;;  %7866 = vmatprep.mubr.msk.f32.mxu0 %vm9252_vm0, %v12448_v10  ;;  %12469 = vst [vmem:[#allocation6_spill] sm:$0xff] %v9666_v4  ;;  %v1024_v18 = vsel %vm266_vm1, %v253_v14, 0  ;;  %v9714_v32 = vsub.f32 %v1012_v55, %v9645_v60  ;;  %v1965_v55 = vsub.f32 %v9750_v28, %v12442_v48 }
  0x9e   : > { %9089 = vmatprep.subr.bf16.mxu0 %v12443_v6  ;;  %7897 = vmatprep.mubr.msk.f32.mxu1 %vm9252_vm0, %v12448_v10  ;;  %v9684_v19 = vpop.permute.xlu1 %1770  ;;  %v9689_v20 = vand.u32 4294901760, %v1024_v18  ;;  %v9691_v21 = vpop.permute.xlu0 %1765  ;;  %v1107_v27 = vand.u32 4294901760, %v1106_v26  ;;  %v1145_v53 = vand.u32 4294901760, %v9758_v40 }
  0x9f   : > { %v9697_v23 = vmul.f32 %v9684_v19, %v202_v59  ;;  %v9701_v24 = vmul.f32 %v9691_v21, %v201_v51  ;;  %v1115_v34 = vand.u32 4294901760, %v9714_v32 }
  0xa0   : > { %7898 = vmatmul.mubr.f32.gmra.mrb[48].mxu1 %v9661_v1  ;;  %7867 = vmatmul.mubr.f32.gmra.mrb[44].mxu0 %v1107_v27  ;;  %v9768_v50 = vsub.f32 %v1024_v18, %v9689_v20  ;;  %v1146_v59 = vsub.f32 %v9758_v40, %v1145_v53  ;;  %v9810_v18 = vld [vmem:[%s12435_s1 + $0x30] sm:$0xff]  ;;  %v1743_v27 = vld [vmem:[%s9330_s10 + $0x8] sm:$0xff] }
  0xa1   : > { %7900 = vmatprep.mubr.msk.f32.mxu1 %vm9252_vm0, %v12448_v10  ;;  %12471 = vst [vmem:[#allocation8_spill] sm:$0xff] %v9697_v23  ;;  %12472 = vst [vmem:[#allocation9_spill] sm:$0xff] %v9701_v24  ;;  %7869 = vmatprep.mubr.msk.f32.mxu0 %vm9252_vm0, %v12448_v10  ;;  %v1116_v13 = vsub.f32 %v9714_v32, %v1115_v34 }
  0xa2   : > { %v9711_v31 = vpop.permute.xlu0 %1775  ;;  %v1155_v61 = vand.u32 4294901760, %v9768_v50 }
  0xa3   : > { %v9719_v33 = vmul.f32 %v9711_v31, %v203_v63  ;;  %v1117_v37 = vand.u32 4294901760, %v1116_v13  ;;  %v1147_v63 = vand.u32 4294901760, %v1146_v59  ;;  %v1744_v13 = vld [vmem:[%s9330_s10 + $0x10] sm:$0xff]  ;;  %v1747_v59 = vld [vmem:[%s9330_s10 + $0x28] sm:$0xff] }
  0xa4   : > { %7901 = vmatmul.mubr.f32.gmra.mrb[50].mxu1 %v9674_v8  ;;  %v1156_v2 = vsub.f32 %v9768_v50, %v1155_v61 }
  0xa5   : > { %7903 = vmatprep.mubr.msk.f32.mxu1 %vm9252_vm0, %v12448_v10  ;;  %12473 = vst [vmem:[#allocation10_spill] sm:$0xff] %v9719_v33  ;;  %7870 = vmatmul.mubr.f32.gmra.mrb[46].mxu0 %v1117_v37  ;;  %v1794_v37 = vmul.f32 %v9691_v21, %v1744_v13 }
  0xa6   : > { %7872 = vmatprep.mubr.msk.f32.mxu0 %vm9252_vm0, %v12448_v10  ;;  %v1157_v9 = vand.u32 4294901760, %v1156_v2 }
  0xa8   : > { %7904 = vmatmul.mubr.f32.gmra.mrb[52].mxu1 %v9681_v15 }
  0xa9   : > { %7906 = vmatprep.mubr.msk.f32.mxu1 %vm9252_vm0, %v12448_v10 }
  0xac   : > { %7907 = vmatmul.mubr.f32.gmra.mrb[54].mxu1 %v9689_v20 }
  0xad   : > { %7938 = vmatprep.mubr.msk.f32.mxu1 %vm9252_vm0, %v12448_v10 }
  0xb0   : > { %7939 = vmatmul.mubr.f32.vlgmr.msra.gmra.mrb[56].mxu1 %v1095_v47  ;;  %v1126_v47 = vsub.f32 %v9740_v35, %v1125_v42 }
  0xb1   : > { %7941 = vmatprep.mubr.msk.f32.mxu1 %vm9252_vm0, %v12448_v10  ;;  %9094 = vmatpush3.bf16.msra.mxu1 %v9555_v36  ;;  %v9743_v36 = vsub.f32 %v1018_v3, %v9674_v8  ;;  %v1966_v3 = vand.u32 4294901760, %v1965_v55 }
  0xb2   : > { %9098 = vmatprep.subr.bf16.mxu1 %v12443_v6  ;;  %v1127_v51 = vand.u32 4294901760, %v1126_v47  ;;  %v9874_v47 = vsel %vm266_vm1, %v1794_v37, 0 }
  0xb3   : > { %v1135_v45 = vand.u32 4294901760, %v9743_v36  ;;  %v9099_v14 = vpack.c.bf16 %v1973_v7, %v1966_v3 }
  0xb4   : > { %7942 = vmatmul.mubr.f32.gmra.mrb[58].mxu1 %v1105_v25  ;;  %7873 = vmatmul.mubr.f32.gmra.mrb[48].mxu0 %v1127_v51  ;;  %v1746_v51 = vld [vmem:[%s9330_s10 + $0x20] sm:$0xff] }
  0xb5   : > { %7944 = vmatprep.mubr.msk.f32.mxu1 %vm9252_vm0, %v12448_v10  ;;  %v1136_v52 = vsub.f32 %v9743_v36, %v1135_v45  ;;  %7875 = vmatprep.mubr.msk.f32.mxu0 %vm9252_vm0, %v12448_v10 }
  0xb7   : > { %v1137_v56 = vand.u32 4294901760, %v1136_v52 }
  0xb8   : > { %7945 = vmatmul.mubr.f32.gmra.mrb[60].mxu1 %v1115_v34  ;;  %v1793_v34 = vmul.f32 %v9657_v0, %v1743_v27  ;;  %v1748_v27 = vld [vmem:[%s9330_s10 + $0x30] sm:$0xff] }
  0xb9   : > { %7947 = vmatprep.mubr.msk.f32.mxu1 %vm9252_vm0, %v12448_v10  ;;  %7876 = vmatmul.mubr.f32.gmra.mrb[50].mxu0 %v1137_v56  ;;  %v9900_v56 = vpop.permute.xlu1 %1780 }
  0xba   : > { %7878 = vmatprep.mubr.msk.f32.mxu0 %vm9252_vm0, %v12448_v10  ;;  %12474 = vst [vmem:[#allocation11_spill] sm:$0xff] %v9900_v56 }
  0xbc   : > { %7948 = vmatmul.mubr.f32.gmra.mrb[62].mxu1 %v1125_v42  ;;  %v1745_v42 = vld [vmem:[%s9330_s10 + $0x18] sm:$0xff] }
  0xbd   : > { %7950 = vmatprep.mubr.msk.f32.mxu1 %vm9252_vm0, %v12448_v10  ;;  %7879 = vmatmul.mubr.f32.gmra.mrb[52].mxu0 %v1147_v63 }
  0xbe   : > { %7881 = vmatprep.mubr.msk.f32.mxu0 %vm9252_vm0, %v12448_v10 }
  0xc0   : > { %7951 = vmatmul.mubr.f32.gmra.mrb[64].mxu1 %v1135_v45  ;;  %v1795_v45 = vmul.f32 %v9684_v19, %v1745_v42 }
  0xc1   : > { %7953 = vmatprep.mubr.msk.f32.mxu1 %vm9252_vm0, %v12448_v10  ;;  %7882 = vmatmul.mubr.f32.gmra.mrb[54].mxu0 %v1157_v9 }
  0xc2   : > { %7913 = vmatprep.mubr.msk.f32.mxu0 %vm9252_vm0, %v12448_v10  ;;  %v9894_v12 = vsel %vm266_vm1, %v1795_v45, 0 }
  0xc3   : > { %v9909_v62 = vand.u32 4294901760, %v9894_v12 }
  0xc4   : > { %7954 = vmatmul.mubr.f32.gmra.mrb[66].mxu1 %v1145_v53  ;;  %v9890_v53 = vand.u32 4294901760, %v9874_v47 }
  0xc5   : > { %7956 = vmatprep.mubr.msk.f32.mxu1 %vm9252_vm0, %v12448_v10  ;;  %7914 = vmatmul.mubr.f32.vlgmr.msra.gmra.mrb[56].mxu0 %v9615_v43  ;;  %v9815_v43 = vld [vmem:[%s12435_s1 + $0x38] sm:$0xff] }
  0xc6   : > { %9091 = vmatpush3.bf16.msra.mxu0 %v9564_v38  ;;  %7916 = vmatprep.mubr.msk.f32.mxu0 %vm9252_vm0, %v12448_v10  ;;  %v12440_v38 = vand.u32 4294901760, %v9810_v18  ;;  %v12439_v25 = vand.u32 4294901760, %v9815_v43 }
  0xc7   : > { %9095 = vmatprep.subr.bf16.mxu0 %v12443_v6 }
  0xc8   : > { %7957 = vmatmul.mubr.f32.gmra.mrb[68].mxu1 %v1155_v61  ;;  %v9839_v26 = vsub.f32 %v9815_v43, %v12439_v25  ;;  %v9102_v25 = vpack.c.bf16 %v9755_v39, %v9750_v28 }
  0xc9   : > { %7988 = vmatprep.mubr.msk.f32.mxu1 %vm9252_vm0, %v12448_v10  ;;  %7917 = vmatmul.mubr.f32.gmra.mrb[58].mxu0 %v9694_v22  ;;  %v9834_v22 = vsub.f32 %v9810_v18, %v12440_v38 }
  0xca   : > { %7919 = vmatprep.mubr.msk.f32.mxu0 %vm9252_vm0, %v12448_v10 }
  0xcc   : > { %7989 = vmatmul.mubr.f32.vlgmr.msra.gmra.mrb[70].mxu1 %v9611_v41 }
  0xcd   : > { %7991 = vmatprep.mubr.msk.f32.mxu1 %vm9252_vm0, %v12448_v10  ;;  %9100 = vmatpush3.bf16.msra.mxu1 %v9099_v14  ;;  %v9920_v14 = vpop.permute.xlu0 %1785 }
  0xce   : > { %9104 = vmatprep.subr.bf16.mxu1 %v12443_v6  ;;  %7920 = vmatmul.mubr.f32.gmra.mrb[60].mxu0 %v9714_v32  ;;  %12475 = vst [vmem:[#allocation12_spill] sm:$0xff] %v9920_v14  ;;  %v10007_v32 = vsub.f32 %v9894_v12, %v9909_v62 }
  0xcf   : > { %7922 = vmatprep.mubr.msk.f32.mxu0 %vm9252_vm0, %v12448_v10 }
  0xd0   : > { %7992 = vmatmul.mubr.f32.gmra.mrb[72].mxu1 %v9633_v54 }
  0xd1   : > { %7994 = vmatprep.mubr.msk.f32.mxu1 %vm9252_vm0, %v12448_v10 }
  0xd2   : > { %7923 = vmatmul.mubr.f32.gmra.mrb[62].mxu0 %v9740_v35  ;;  %v9859_v35 = vsel %vm266_vm1, %v1793_v34, 0 }
  0xd3   : > { %7925 = vmatprep.mubr.msk.f32.mxu0 %vm9252_vm0, %v12448_v10 }
  0xd4   : > { %7995 = vmatmul.mubr.f32.gmra.mrb[74].mxu1 %v9645_v60 }
  0xd5   : > { %7997 = vmatprep.mubr.msk.f32.mxu1 %vm9252_vm0, %v12448_v10 }
  0xd6   : > { %7926 = vmatmul.mubr.f32.gmra.mrb[64].mxu0 %v9743_v36  ;;  %v9870_v36 = vand.u32 4294901760, %v9859_v35 }
  0xd7   : > { %7928 = vmatprep.mubr.msk.f32.mxu0 %vm9252_vm0, %v12448_v10 }
  0xd8   : > { %7998 = vmatmul.mubr.f32.gmra.mrb[76].mxu1 %v9661_v1 }
  0xd9   : > { %8000 = vmatprep.mubr.msk.f32.mxu1 %vm9252_vm0, %v12448_v10 }
  0xda   : > { %7929 = vmatmul.mubr.f32.gmra.mrb[66].mxu0 %v9758_v40  ;;  %v9882_v40 = vpack.c.bf16 %v1828_v17, %v1825_v16  ;;  %v1796_v16 = vmul.f32 %v9711_v31, %v1746_v51  ;;  %v1798_v51 = vmul.f32 %v9920_v14, %v1748_v27 }
  0xdb   : > { %7931 = vmatprep.mubr.msk.f32.mxu0 %vm9252_vm0, %v12448_v10 }
  0xdc   : > { %8001 = vmatmul.mubr.f32.gmra.mrb[78].mxu1 %v9674_v8  ;;  %v9916_v3 = vsel %vm266_vm1, %v1796_v16, 0 }
  0xdd   : > { %8003 = vmatprep.mubr.msk.f32.mxu1 %vm9252_vm0, %v12448_v10  ;;  %v9930_v13 = vand.u32 4294901760, %v9916_v3 }
  0xde   : > { %7932 = vmatmul.mubr.f32.gmra.mrb[68].mxu0 %v9768_v50 }
  0xdf   : > { %7963 = vmatprep.mubr.msk.f32.mxu0 %vm9252_vm0, %v12448_v10 }
  0xe0   : > { %8004 = vmatmul.mubr.f32.gmra.mrb[80].mxu1 %v9681_v15 }
  0xe1   : > { %8006 = vmatprep.mubr.msk.f32.mxu1 %vm9252_vm0, %v12448_v10 }
  0xe2   : > { %7964 = vmatmul.mubr.f32.vlgmr.msra.gmra.mrb[70].mxu0 %v9611_v41  ;;  %v1797_v41 = vmul.f32 %v9900_v56, %v1747_v59 }
  0xe3   : > { %9097 = vmatpush3.bf16.msra.mxu0 %v9882_v40  ;;  %7966 = vmatprep.mubr.msk.f32.mxu0 %vm9252_vm0, %v12448_v10 }
  0xe4   : > { %8007 = vmatmul.mubr.f32.gmra.mrb[82].mxu1 %v9689_v20  ;;  %9101 = vmatprep.subr.bf16.mxu0 %v12443_v6  ;;  %v9933_v45 = vsel %vm266_vm1, %v1797_v41, 0  ;;  %v9954_v41 = vsel %vm266_vm1, %v1798_v51, 0 }
  0xe5   : > { %8038 = vmatprep.mubr.msk.f32.mxu1 %vm9252_vm0, %v12448_v10 }
  0xe6   : > { %7967 = vmatmul.mubr.f32.gmra.mrb[72].mxu0 %v9633_v54 }
  0xe7   : > { %7969 = vmatprep.mubr.msk.f32.mxu0 %vm9252_vm0, %v12448_v10 }
  0xe8   : > { %8039 = vmatmul.mubr.f32.vlgmr.msra.gmra.mrb[84].mxu1 %v9870_v36 }
  0xe9   : > { %8041 = vmatprep.mubr.msk.f32.mxu1 %vm9252_vm0, %v12448_v10  ;;  %9106 = vmatpush3.bf16.msra.mxu1 %v9882_v40 }
  0xea   : > { %9110 = vmatprep.subr.bf16.mxu1 %v12443_v6  ;;  %7970 = vmatmul.mubr.f32.gmra.mrb[74].mxu0 %v9645_v60 }
  0xeb   : > { %7972 = vmatprep.mubr.msk.f32.mxu0 %vm9252_vm0, %v12448_v10 }
  0xec   : > { %8042 = vmatmul.mubr.f32.gmra.mrb[86].mxu1 %v9890_v53 }
  0xed   : > { %8044 = vmatprep.mubr.msk.f32.mxu1 %vm9252_vm0, %v12448_v10 }
  0xee   : > { %7973 = vmatmul.mubr.f32.gmra.mrb[76].mxu0 %v9661_v1  ;;  %v9975_v1 = vand.u32 4294901760, %v9954_v41 }
  0xef   : > { %7975 = vmatprep.mubr.msk.f32.mxu0 %vm9252_vm0, %v12448_v10 }
  0xf0   : > { %8045 = vmatmul.mubr.f32.gmra.mrb[88].mxu1 %v9909_v62 }
  0xf1   : > { %8047 = vmatprep.mubr.msk.f32.mxu1 %vm9252_vm0, %v12448_v10 }
  0xf2   : > { %7976 = vmatmul.mubr.f32.gmra.mrb[78].mxu0 %v9674_v8 }
  0xf3   : > { %v502_v52 = vpop.f32.mrb[0].mxu1  ;;  %v361_v11 = vpop.f32.mrb[0].mxu0  ;;  %7978 = vmatprep.mubr.msk.f32.mxu0 %vm9252_vm0, %v12448_v10 }
  0xf4   : > { %v7740_v50 = vpop.f32.mrb[1].mxu1  ;;  %v7715_v17 = vpop.f32.mrb[1].mxu0  ;;  %v9898_v55 = vadd.f32 %v502_v52, %v361_v11  ;;  %8048 = vmatmul.mubr.f32.gmra.mrb[90].mxu1 %v9930_v13 }
  0xf5   : > { %v9938_v11 = vpop.permute.xlu1 %1790  ;;  %v1749_v50 = vld [vmem:[%s9330_s10 + $0x38] sm:$0x1]  ;;  %8050 = vmatprep.mubr.msk.f32.mxu1 %vm9252_vm0, %v12448_v10  ;;  %v9948_v17 = vand.u32 4294901760, %v9933_v45 }
  0xf6   : > { %12476 = vst [vmem:[#allocation13_spill] sm:$0xff] %v9938_v11  ;;  %v1799_v60 = vmul.f32 %v9938_v11, %v1749_v50  ;;  %7979 = vmatmul.mubr.f32.gmra.mrb[80].mxu0 %v9681_v15 }
  0xf7   : > { %v508_v61 = vpop.f32.mrb[2].mxu1  ;;  %7981 = vmatprep.mubr.msk.f32.mxu0 %vm9252_vm0, %v12448_v10  ;;  %v10034_v48 = vsub.f32 %v9933_v45, %v9948_v17 }
  0xf8   : > { %v371_v63 = vpop.f32.mrb[2].mxu0  ;;  %v7743_v2 = vpop.f32.mrb[3].mxu1  ;;  %8051 = vmatmul.mubr.f32.gmra.mrb[92].mxu1 %v9948_v17  ;;  %v9978_v50 = vsel %vm266_vm1, %v1799_v60, 0  ;;  %v9991_v60 = vsub.f32 %v9874_v47, %v9890_v53 }
  0xf9   : > { %v7718_v7 = vpop.f32.mrb[3].mxu0  ;;  %v9918_v9 = vadd.f32 %v508_v61, %v371_v63  ;;  %v2726_v63 = vand.u32 4294901760, %v9834_v22  ;;  %v2733_v2 = vand.u32 4294901760, %v9839_v26  ;;  %8053 = vmatprep.mubr.msk.f32.mxu1 %vm9252_vm0, %v12448_v10 }
  0xfa   : > { %7982 = vmatmul.mubr.f32.gmra.mrb[82].mxu0 %v9689_v20  ;;  %v1913_v20 = vand.u32 4294901760, %v10007_v32 }
  0xfb   : > { %v514_v34 = vpop.f32.mrb[4].mxu1  ;;  %8013 = vmatprep.mubr.msk.f32.mxu0 %vm9252_vm0, %v12448_v10 }
  0xfc   : > { %v381_v37 = vpop.f32.mrb[4].mxu0  ;;  %v7746_v42 = vpop.f32.mrb[5].mxu1  ;;  %8054 = vmatmul.mubr.f32.gmra.mrb[94].mxu1 %v9975_v1 }
  0xfd   : > { %v7721_v54 = vpop.f32.mrb[5].mxu0  ;;  %v9936_v52 = vadd.f32 %v514_v34, %v381_v37  ;;  %v9964_v34 = vpack.c.bf16 %v2733_v2, %v2726_v63  ;;  %v9972_v42 = vsub.f32 %v9859_v35, %v9870_v36  ;;  %8056 = vmatprep.mubr.msk.f32.mxu1 %vm9252_vm0, %v12448_v10 }
  0xff   : > { %v520_v16 = vpop.f32.mrb[6].mxu1 }
 0x100   : > { %v391_v59 = vpop.f32.mrb[6].mxu0  ;;  %v7749_v61 = vpop.f32.mrb[7].mxu1 }
 0x101   : > { %v7724_v7 = vpop.f32.mrb[7].mxu0  ;;  %v9956_v27 = vadd.f32 %v520_v16, %v391_v59  ;;  %v1893_v61 = vand.u32 4294901760, %v9972_v42 }
 0x102   : > { %v9994_v7 = vand.u32 4294901760, %v9978_v50 }
 0x103   : > { %v526_v37 = vpop.f32.mrb[8].mxu1 }
 0x104   : > { %v401_v51 = vpop.f32.mrb[8].mxu0  ;;  %v7752_v54 = vpop.f32.mrb[9].mxu1  ;;  %8057 = vmatmul.mubr.f32.gmra.mrb[96].mxu1 %v9994_v7 }
 0x105   : > { %v7727_v16 = vpop.f32.mrb[9].mxu0  ;;  %v9980_v59 = vadd.f32 %v526_v37, %v401_v51  ;;  %8088 = vmatprep.mubr.msk.f32.mxu1 %vm9252_vm0, %v12448_v10 }
 0x106   : > { %v1894_v16 = vsub.f32 %v9972_v42, %v1893_v61 }
 0x107   : > { %v532_v35 = vpop.f32.mrb[10].mxu1 }
 0x108   : > { %v411_v37 = vpop.f32.mrb[10].mxu0  ;;  %v7755_v8 = vpop.f32.mrb[11].mxu1  ;;  %8089 = vmatmul.mubr.f32.vlgmr.msra.gmra.mrb[98].mxu1 %v1893_v61  ;;  %v1895_v38 = vand.u32 4294901760, %v1894_v16 }
 0x109   : > { %v7730_v51 = vpop.f32.mrb[11].mxu0  ;;  %v9996_v54 = vadd.f32 %v532_v35, %v411_v37  ;;  %v1903_v35 = vand.u32 4294901760, %v9991_v60  ;;  %8091 = vmatprep.mubr.msk.f32.mxu1 %vm9252_vm0, %v12448_v10  ;;  %9112 = vmatpush3.bf16.msra.mxu1 %v9882_v40 }
 0x10a   : > { %9116 = vmatprep.subr.bf16.mxu1 %v12443_v6  ;;  %8014 = vmatmul.mubr.f32.vlgmr.msra.gmra.mrb[84].mxu0 %v1895_v38 }
 0x10b   : > { %v538_v47 = vpop.f32.mrb[12].mxu1  ;;  %9103 = vmatpush3.bf16.msra.mxu0 %v9102_v25  ;;  %8016 = vmatprep.mubr.msk.f32.mxu0 %vm9252_vm0, %v12448_v10 }
 0x10c   : > { %v421_v37 = vpop.f32.mrb[12].mxu0  ;;  %v7758_v8 = vpop.f32.mrb[13].mxu1  ;;  %8092 = vmatmul.mubr.f32.gmra.mrb[100].mxu1 %v1903_v35  ;;  %9107 = vmatprep.subr.bf16.mxu0 %v12443_v6 }
 0x10d   : > { %v7733_v15 = vpop.f32.mrb[13].mxu0  ;;  %v10010_v51 = vadd.f32 %v538_v47, %v421_v37  ;;  %v10021_v8 = vsub.f32 %v9916_v3, %v9930_v13  ;;  %v1904_v47 = vsub.f32 %v9991_v60, %v1903_v35  ;;  %8094 = vmatprep.mubr.msk.f32.mxu1 %vm9252_vm0, %v12448_v10 }
 0x10f   : > { %v731_v12 = vpop.f32.mrb[14].mxu1  ;;  %v1905_v40 = vand.u32 4294901760, %v1904_v47  ;;  %v10050_v47 = vsub.f32 %v9954_v41, %v9975_v1 }
 0x110   : > { %v614_v61 = vpop.f32.mrb[14].mxu0  ;;  %v7790_v37 = vpop.f32.mrb[15].mxu1  ;;  %8095 = vmatmul.mubr.f32.gmra.mrb[102].mxu1 %v1913_v20 }
 0x111   : > { %v615_v15 = vadd.f32 %v614_v61, %v9898_v55  ;;  %v7765_v49 = vpop.f32.mrb[15].mxu0  ;;  %v1914_v37 = vsub.f32 %v10007_v32, %v1913_v20  ;;  %8017 = vmatmul.mubr.f32.gmra.mrb[86].mxu0 %v1905_v40  ;;  %8097 = vmatprep.mubr.msk.f32.mxu1 %vm9252_vm0, %v12448_v10 }
 0x112   : > { %v1923_v49 = vand.u32 4294901760, %v10021_v8  ;;  %8019 = vmatprep.mubr.msk.f32.mxu0 %vm9252_vm0, %v12448_v10 }
 0x113   : > { %v10030_v3 = vadd.f32 %v731_v12, %v615_v15  ;;  %v739_v16 = vpop.f32.mrb[16].mxu1  ;;  %v1915_v61 = vand.u32 4294901760, %v1914_v37 }
 0x114   : > { %v621_v38 = vpop.f32.mrb[16].mxu0  ;;  %v7793_v25 = vpop.f32.mrb[17].mxu1  ;;  %v1924_v15 = vsub.f32 %v10021_v8, %v1923_v49  ;;  %8098 = vmatmul.mubr.f32.gmra.mrb[104].mxu1 %v1923_v49 }
 0x115   : > { %v622_v55 = vadd.f32 %v621_v38, %v9918_v9  ;;  %v7768_v35 = vpop.f32.mrb[17].mxu0  ;;  %v1933_v9 = vand.u32 4294901760, %v10034_v48  ;;  %8020 = vmatmul.mubr.f32.gmra.mrb[88].mxu0 %v1915_v61  ;;  %8100 = vmatprep.mubr.msk.f32.mxu1 %vm9252_vm0, %v12448_v10 }
 0x116   : > { %8022 = vmatprep.mubr.msk.f32.mxu0 %vm9252_vm0, %v12448_v10 }
 0x117   : > { %v10046_v45 = vadd.f32 %v739_v16, %v622_v55  ;;  %v747_v12 = vpop.f32.mrb[18].mxu1  ;;  %v10057_v16 = vsub.f32 %v9978_v50, %v9994_v7  ;;  %v1925_v55 = vand.u32 4294901760, %v1924_v15  ;;  %v1934_v35 = vsub.f32 %v10034_v48, %v1933_v9 }
 0x118   : > { %v628_v40 = vpop.f32.mrb[18].mxu0  ;;  %v7796_v20 = vpop.f32.mrb[19].mxu1  ;;  %8101 = vmatmul.mubr.f32.gmra.mrb[106].mxu1 %v1933_v9  ;;  %v2734_v9 = vsub.f32 %v9839_v26, %v2733_v2 }
 0x119   : > { %v629_v38 = vadd.f32 %v628_v40, %v9936_v52  ;;  %v7771_v25 = vpop.f32.mrb[19].mxu0  ;;  %v1943_v52 = vand.u32 4294901760, %v10050_v47  ;;  %8023 = vmatmul.mubr.f32.gmra.mrb[90].mxu0 %v1925_v55  ;;  %v1953_v20 = vand.u32 4294901760, %v10057_v16  ;;  %8103 = vmatprep.mubr.msk.f32.mxu1 %vm9252_vm0, %v12448_v10 }
 0x11a   : > { %8025 = vmatprep.mubr.msk.f32.mxu0 %vm9252_vm0, %v12448_v10  ;;  %v2735_v33 = vand.u32 4294901760, %v2734_v9 }
 0x11b   : > { %v10063_v41 = vadd.f32 %v747_v12, %v629_v38  ;;  %v755_v37 = vpop.f32.mrb[20].mxu1  ;;  %v1935_v38 = vand.u32 4294901760, %v1934_v35  ;;  %v1944_v25 = vsub.f32 %v10050_v47, %v1943_v52 }
 0x11c   : > { %v635_v61 = vpop.f32.mrb[20].mxu0  ;;  %v7799_v49 = vpop.f32.mrb[21].mxu1  ;;  %8104 = vmatmul.mubr.f32.gmra.mrb[108].mxu1 %v1943_v52 }
 0x11d   : > { %v636_v40 = vadd.f32 %v635_v61, %v9956_v27  ;;  %v7774_v50 = vpop.f32.mrb[21].mxu0  ;;  %v2727_v27 = vsub.f32 %v9834_v22, %v2726_v63  ;;  %8026 = vmatmul.mubr.f32.gmra.mrb[92].mxu0 %v1935_v38  ;;  %8106 = vmatprep.mubr.msk.f32.mxu1 %vm9252_vm0, %v12448_v10  ;;  %v1945_v35 = vand.u32 4294901760, %v1944_v25  ;;  %v1954_v63 = vsub.f32 %v10057_v16, %v1953_v20 }
 0x11e   : > { %8028 = vmatprep.mubr.msk.f32.mxu0 %vm9252_vm0, %v12448_v10 }
 0x11f   : > { %v10073_v12 = vadd.f32 %v755_v37, %v636_v40  ;;  %v763_v15 = vpop.f32.mrb[22].mxu1  ;;  %v2728_v2 = vand.u32 4294901760, %v2727_v27  ;;  %v1955_v25 = vand.u32 4294901760, %v1954_v63 }
 0x120   : > { %v642_v49 = vpop.f32.mrb[22].mxu0  ;;  %v7802_v6 = vpop.f32.mrb[23].mxu1  ;;  %8107 = vmatmul.mubr.f32.gmra.mrb[110].mxu1 %v1953_v20  ;;  %v12478_v20 = vand.u32 4294901760, %v9755_v39 }
 0x121   : > { %v643_v55 = vadd.f32 %v642_v49, %v9980_v59  ;;  %v7777_v61 = vpop.f32.mrb[23].mxu0  ;;  %8029 = vmatmul.mubr.f32.gmra.mrb[94].mxu0 %v1945_v35  ;;  %8138 = vmatprep.mubr.msk.f32.mxu1 %vm9252_vm0, %v12448_v10 }
 0x122   : > { %8031 = vmatprep.mubr.msk.f32.mxu0 %vm9252_vm0, %v12448_v10 }
 0x123   : > { %v10087_v6 = vadd.f32 %v763_v15, %v643_v55  ;;  %v771_v37 = vpop.f32.mrb[24].mxu1  ;;  %v9117_v55 = vpack.c.bf16 %v2735_v33, %v2728_v2  ;;  %v12479_v2 = vmov 0.0|0.0  }
 0x124   : > { %v649_v40 = vpop.f32.mrb[24].mxu0  ;;  %v7805_v50 = vpop.f32.mrb[25].mxu1  ;;  %8139 = vmatmul.mubr.f32.vlgmr.msra.gmra.mrb[112].mxu1 %v9870_v36 }
 0x125   : > { %v650_v59 = vadd.f32 %v649_v40, %v9996_v54  ;;  %v7780_v38 = vpop.f32.mrb[25].mxu0  ;;  %8032 = vmatmul.mubr.f32.gmra.mrb[96].mxu0 %v1955_v25  ;;  %v12477_v54 = vand.u32 4294901760, %v9750_v28  ;;  %8141 = vmatprep.mubr.msk.f32.mxu1 %vm9252_vm0, %v12448_v10  ;;  %v10129_v25 = vld [vmem:[%s12435_s1 + $0x48] sm:$0xff] }
 0x126   : > { %8063 = vmatprep.mubr.msk.f32.mxu0 %vm9252_vm0, %v12448_v10  ;;  %9118 = vmatpush3.bf16.msra.mxu1 %v9117_v55 }
 0x127   : > { %v10095_v52 = vadd.f32 %v771_v37, %v650_v59  ;;  %v779_v15 = vpop.f32.mrb[26].mxu1  ;;  %v9108_v37 = vpack.c.bf16 %v12478_v20, %v12477_v54  ;;  %9122 = vmatprep.subr.bf16.mxu1 %v12479_v2 }
 0x128   : > { %v656_v49 = vpop.f32.mrb[26].mxu0  ;;  %v7808_v61 = vpop.f32.mrb[27].mxu1  ;;  %8142 = vmatmul.mubr.f32.gmra.mrb[114].mxu1 %v9890_v53 }
 0x129   : > { %v657_v27 = vadd.f32 %v656_v49, %v10010_v51  ;;  %v7783_v9 = vpop.f32.mrb[27].mxu0  ;;  %8064 = vmatmul.mubr.f32.vlgmr.msra.gmra.mrb[98].mxu0 %v9972_v42  ;;  %8144 = vmatprep.mubr.msk.f32.mxu1 %vm9252_vm0, %v12448_v10  ;;  %v10124_v42 = vld [vmem:[%s12435_s1 + $0x40] sm:$0xff] }
 0x12a   : > { %9109 = vmatpush3.bf16.msra.mxu0 %v9108_v37  ;;  %8066 = vmatprep.mubr.msk.f32.mxu0 %vm9252_vm0, %v12448_v10  ;;  %v12445_v9 = vand.u32 4294901760, %v10129_v25 }
 0x12b   : > { %v10107_v35 = vadd.f32 %v779_v15, %v657_v27  ;;  %v965_v33 = vpop.f32.mrb[28].mxu1  ;;  %9113 = vmatprep.subr.bf16.mxu0 %v12479_v2  ;;  %v3342_v27 = vand.u32 4294901760, %v10124_v42 }
 0x12c   : > { %v856_v51 = vpop.f32.mrb[28].mxu0  ;;  %v7840_v63 = vpop.f32.mrb[29].mxu1  ;;  %8145 = vmatmul.mubr.f32.gmra.mrb[116].mxu1 %v9909_v62 }
 0x12d   : > { %v857_v40 = vadd.f32 %v856_v51, %v10030_v3  ;;  %v7815_v50 = vpop.f32.mrb[29].mxu0  ;;  %8067 = vmatmul.mubr.f32.gmra.mrb[100].mxu0 %v9991_v60  ;;  %8147 = vmatprep.mubr.msk.f32.mxu1 %vm9252_vm0, %v12448_v10 }
 0x12e   : > { %8069 = vmatprep.mubr.msk.f32.mxu0 %vm9252_vm0, %v12448_v10  ;;  %v2548_v50 = vld [vmem:[%s9330_s10 + $0xd] sm:$0xff] }
 0x12f   : > { %v10115_v28 = vadd.f32 %v965_v33, %v857_v40  ;;  %v971_v39 = vpop.f32.mrb[30].mxu1 }
 0x130   : > { %v862_v3 = vpop.f32.mrb[30].mxu0  ;;  %v7843_v59 = vpop.f32.mrb[31].mxu1  ;;  %8148 = vmatmul.mubr.f32.gmra.mrb[118].mxu1 %v9930_v13 }
 0x131   : > { %v863_v38 = vadd.f32 %v862_v3, %v10046_v45  ;;  %v7818_v15 = vpop.f32.mrb[31].mxu0  ;;  %8070 = vmatmul.mubr.f32.gmra.mrb[102].mxu0 %v10007_v32  ;;  %8150 = vmatprep.mubr.msk.f32.mxu1 %vm9252_vm0, %v12448_v10  ;;  %v10158_v32 = vsub.f32 %v10129_v25, %v12445_v9 }
 0x132   : > { %8072 = vmatprep.mubr.msk.f32.mxu0 %vm9252_vm0, %v12448_v10  ;;  %v2555_v15 = vmul.f32 %v2548_v50, %v9605_v29 }
 0x133   : > { %v10137_v45 = vadd.f32 %v971_v39, %v863_v38  ;;  %v977_v49 = vpop.f32.mrb[32].mxu1 }
 0x134   : > { %v868_v55 = vpop.f32.mrb[32].mxu0  ;;  %v7846_v61 = vpop.f32.mrb[33].mxu1  ;;  %8151 = vmatmul.mubr.f32.gmra.mrb[120].mxu1 %v9948_v17 }
 0x135   : > { %v869_v60 = vadd.f32 %v868_v55, %v10063_v41  ;;  %v7821_v54 = vpop.f32.mrb[33].mxu0  ;;  %v10153_v41 = vsub.f32 %v10124_v42, %v3342_v27  ;;  %8073 = vmatmul.mubr.f32.gmra.mrb[104].mxu0 %v10021_v8  ;;  %8153 = vmatprep.mubr.msk.f32.mxu1 %vm9252_vm0, %v12448_v10  ;;  %v2549_v55 = vld [vmem:[%s9330_s10 + $0x15] sm:$0xff]  ;;  %v3313_v42 = vld [vmem:[%s9330_s10 + $0x26] sm:$0xff] }
 0x136   : > { %8075 = vmatprep.mubr.msk.f32.mxu0 %vm9252_vm0, %v12448_v10 }
 0x137   : > { %v10148_v20 = vadd.f32 %v977_v49, %v869_v60  ;;  %v983_v37 = vpop.f32.mrb[34].mxu1 }
 0x138   : > { %v874_v33 = vpop.f32.mrb[34].mxu0  ;;  %v7849_v51 = vpop.f32.mrb[35].mxu1  ;;  %8154 = vmatmul.mubr.f32.gmra.mrb[122].mxu1 %v9975_v1 }
 0x139   : > { %v875_v63 = vadd.f32 %v874_v33, %v10073_v12  ;;  %v7824_v40 = vpop.f32.mrb[35].mxu0  ;;  %8076 = vmatmul.mubr.f32.gmra.mrb[106].mxu0 %v10034_v48  ;;  %8156 = vmatprep.mubr.msk.f32.mxu1 %vm9252_vm0, %v12448_v10  ;;  %v2566_v33 = vsel %vm266_vm1, %v2555_v15, 0 }
 0x13a   : > { %8078 = vmatprep.mubr.msk.f32.mxu0 %vm9252_vm0, %v12448_v10 }
 0x13b   : > { %v10170_v3 = vadd.f32 %v983_v37, %v875_v63  ;;  %v989_v59 = vpop.f32.mrb[36].mxu1  ;;  %v2550_v63 = vld [vmem:[%s9330_s10 + $0x1d] sm:$0xff] }
 0x13c   : > { %v880_v38 = vpop.f32.mrb[36].mxu0  ;;  %v7852_v12 = vpop.f32.mrb[37].mxu1  ;;  %8157 = vmatmul.mubr.f32.gmra.mrb[124].mxu1 %v9994_v7 }
 0x13d   : > { %v881_v8 = vadd.f32 %v880_v38, %v10087_v6  ;;  %v7827_v49 = vpop.f32.mrb[37].mxu0  ;;  %v2556_v6 = vmul.f32 %v2549_v55, %v9617_v44  ;;  %8079 = vmatmul.mubr.f32.gmra.mrb[108].mxu0 %v10050_v47  ;;  %8188 = vmatprep.mubr.msk.f32.mxu1 %vm9252_vm0, %v12448_v10  ;;  %v2557_v12 = vmul.f32 %v2550_v63, %v9607_v30  ;;  %v12480_v55 = vand.u32 4294901760, %v9810_v18 }
 0x13e   : > { %8081 = vmatprep.mubr.msk.f32.mxu0 %vm9252_vm0, %v12448_v10  ;;  %v2551_v49 = vld [vmem:[%s9330_s10 + $0x25] sm:$0xff] }
 0x13f   : > { %v10181_v61 = vadd.f32 %v989_v59, %v881_v8  ;;  %v995_v60 = vpop.f32.mrb[38].mxu1  ;;  %v10195_v59 = vand.u32 4294901760, %v2566_v33  ;;  %v2569_v47 = vsel %vm266_vm1, %v2556_v6, 0  ;;  %v2572_v18 = vsel %vm266_vm1, %v2557_v12, 0 }
 0x140   : > { %v886_v54 = vpop.f32.mrb[38].mxu0  ;;  %v7855_v37 = vpop.f32.mrb[39].mxu1  ;;  %v10227_v6 = vand.u32 4294901760, %v2572_v18 }
 0x141   : > { %v887_v51 = vadd.f32 %v886_v54, %v10095_v52  ;;  %v7830_v48 = vpop.f32.mrb[39].mxu0  ;;  %8082 = vmatmul.mubr.f32.gmra.mrb[110].mxu0 %v10057_v16  ;;  %8189 = vmatmul.mubr.f32.vlgmr.msra.gmra.mrb[126].mxu1 %v10195_v59  ;;  %v2552_v16 = vld [vmem:[%s9330_s10 + $0x2d] sm:$0xff] }
 0x142   : > { %8113 = vmatprep.mubr.msk.f32.mxu0 %vm9252_vm0, %v12448_v10  ;;  %8191 = vmatprep.mubr.msk.f32.mxu1 %vm9252_vm0, %v12448_v10  ;;  %v2559_v48 = vmul.f32 %v2552_v16, %v9639_v58 }
 0x143   : > { %v10193_v40 = vadd.f32 %v995_v60, %v887_v51  ;;  %v1001_v50 = vpop.f32.mrb[40].mxu1  ;;  %v12481_v60 = vand.u32 4294901760, %v9815_v43  ;;  %v2558_v43 = vmul.f32 %v2551_v49, %v9621_v46  ;;  %v10265_v49 = vsub.f32 %v2566_v33, %v10195_v59 }
 0x144   : > { %v892_v38 = vpop.f32.mrb[40].mxu0  ;;  %v7858_v52 = vpop.f32.mrb[41].mxu1 }
 0x145   : > { %v893_v15 = vadd.f32 %v892_v38, %v10107_v35  ;;  %v7833_v8 = vpop.f32.mrb[41].mxu0  ;;  %v10206_v54 = vpack.c.bf16 %v12481_v60, %v12480_v55  ;;  %v10215_v35 = vand.u32 4294901760, %v2569_v47  ;;  %8114 = vmatmul.mubr.f32.vlgmr.msra.gmra.mrb[112].mxu0 %v9870_v36  ;;  %v2575_v51 = vsel %vm266_vm1, %v2558_v43, 0  ;;  %v2553_v36 = vld [vmem:[%s9330_s10 + $0x35] sm:$0xff]  ;;  %v2554_v52 = vld [vmem:[%s9330_s10 + $0x3d] sm:$0x1] }
 0x146   : > { %8116 = vmatprep.mubr.msk.f32.mxu0 %vm9252_vm0, %v12448_v10  ;;  %v10241_v63 = vand.u32 4294901760, %v2575_v51  ;;  %v2578_v38 = vsel %vm266_vm1, %v2559_v48, 0  ;;  %v3488_v8 = vand.u32 4294901760, %v10158_v32  ;;  %v2655_v33 = vand.u32 4294901760, %v10265_v49 }
 0x147   : > { %v10213_v37 = vadd.f32 %v1001_v50, %v893_v15  ;;  %9124 = vmatpush3.bf16.msra.mxu1 %v10206_v54  ;;  %9115 = vmatpush3.bf16.msra.mxu0 %v10206_v54  ;;  %v2560_v50 = vmul.f32 %v2553_v36, %v9637_v57  ;;  %v2561_v15 = vmul.f32 %v2554_v52, %v9668_v5 }
 0x148   : > { %9128 = vmatprep.subr.bf16.mxu1 %v12479_v2  ;;  %8192 = vmatmul.mubr.f32.gmra.mrb[128].mxu1 %v10215_v35  ;;  %v10284_v43 = vsub.f32 %v2569_v47, %v10215_v35  ;;  %v2656_v48 = vsub.f32 %v10265_v49, %v2655_v33  ;;  %v10305_v36 = vsub.f32 %v2575_v51, %v10241_v63 }
 0x149   : > { %8194 = vmatprep.mubr.msk.f32.mxu1 %vm9252_vm0, %v12448_v10  ;;  %9119 = vmatprep.subr.bf16.mxu0 %v12479_v2  ;;  %v2581_v12 = vsel %vm266_vm1, %v2560_v50, 0  ;;  %v2584_v60 = vsel %vm266_vm1, %v2561_v15, 0 }
 0x14a   : > { %8117 = vmatmul.mubr.f32.gmra.mrb[114].mxu0 %v9890_v53  ;;  %v10252_v53 = vand.u32 4294901760, %v2578_v38  ;;  %v10267_v55 = vand.u32 4294901760, %v2581_v12  ;;  %v10286_v16 = vand.u32 4294901760, %v2584_v60  ;;  %v2665_v47 = vand.u32 4294901760, %v10284_v43 }
 0x14b   : > { %8119 = vmatprep.mubr.msk.f32.mxu0 %vm9252_vm0, %v12448_v10 }
 0x14c   : > { %8195 = vmatmul.mubr.f32.gmra.mrb[130].mxu1 %v10227_v6  ;;  %v10317_v51 = vsub.f32 %v2578_v38, %v10252_v53 }
 0x14d   : > { %8197 = vmatprep.mubr.msk.f32.mxu1 %vm9252_vm0, %v12448_v10 }
 0x14e   : > { %8120 = vmatmul.mubr.f32.gmra.mrb[116].mxu0 %v9909_v62  ;;  %v3481_v62 = vand.u32 4294901760, %v10153_v41 }
 0x14f   : > { %8122 = vmatprep.mubr.msk.f32.mxu0 %vm9252_vm0, %v12448_v10 }
 0x150   : > { %8198 = vmatmul.mubr.f32.gmra.mrb[132].mxu1 %v10241_v63 }
 0x151   : > { %8200 = vmatprep.mubr.msk.f32.mxu1 %vm9252_vm0, %v12448_v10 }
 0x152   : > { %8123 = vmatmul.mubr.f32.gmra.mrb[118].mxu0 %v9930_v13  ;;  %v10273_v13 = vpack.c.bf16 %v3488_v8, %v3481_v62 }
 0x153   : > { %8125 = vmatprep.mubr.msk.f32.mxu0 %vm9252_vm0, %v12448_v10 }
 0x154   : > { %8201 = vmatmul.mubr.f32.gmra.mrb[134].mxu1 %v10252_v53 }
 0x155   : > { %8203 = vmatprep.mubr.msk.f32.mxu1 %vm9252_vm0, %v12448_v10 }
 0x156   : > { %8126 = vmatmul.mubr.f32.gmra.mrb[120].mxu0 %v9948_v17  ;;  %v10295_v17 = vsub.f32 %v2572_v18, %v10227_v6  ;;  %v2666_v18 = vsub.f32 %v10284_v43, %v2665_v47 }
 0x157   : > { %8128 = vmatprep.mubr.msk.f32.mxu0 %vm9252_vm0, %v12448_v10 }
 0x158   : > { %8204 = vmatmul.mubr.f32.gmra.mrb[136].mxu1 %v10267_v55  ;;  %v2675_v50 = vand.u32 4294901760, %v10295_v17  ;;  %v2667_v15 = vand.u32 4294901760, %v2666_v18 }
 0x159   : > { %8206 = vmatprep.mubr.msk.f32.mxu1 %vm9252_vm0, %v12448_v10 }
 0x15a   : > { %8129 = vmatmul.mubr.f32.gmra.mrb[122].mxu0 %v9975_v1  ;;  %v2657_v1 = vand.u32 4294901760, %v2656_v48 }
 0x15b   : > { %8131 = vmatprep.mubr.msk.f32.mxu0 %vm9252_vm0, %v12448_v10 }
 0x15c   : > { %8207 = vmatmul.mubr.f32.gmra.mrb[138].mxu1 %v10286_v16 }
 0x15d   : > { %8238 = vmatprep.mubr.msk.f32.mxu1 %vm9252_vm0, %v12448_v10 }
 0x15e   : > { %8132 = vmatmul.mubr.f32.gmra.mrb[124].mxu0 %v9994_v7  ;;  %v12482_v7 = vpack.c.bf16 %v9839_v26, %v9834_v22  ;;  %v10329_v22 = vsub.f32 %v2581_v12, %v10267_v55 }
 0x15f   : > { %8163 = vmatprep.mubr.msk.f32.mxu0 %vm9252_vm0, %v12448_v10 }
 0x160   : > { %8239 = vmatmul.mubr.f32.vlgmr.msra.gmra.mrb[140].mxu1 %v2655_v33  ;;  %v2676_v33 = vsub.f32 %v10295_v17, %v2675_v50 }
 0x161   : > { %8241 = vmatprep.mubr.msk.f32.mxu1 %vm9252_vm0, %v12448_v10  ;;  %9130 = vmatpush3.bf16.msra.mxu1 %v10206_v54  ;;  %v2685_v54 = vand.u32 4294901760, %v10305_v36 }
 0x162   : > { %9134 = vmatprep.subr.bf16.mxu1 %v12479_v2  ;;  %8164 = vmatmul.mubr.f32.vlgmr.msra.gmra.mrb[126].mxu0 %v2657_v1  ;;  %v2677_v26 = vand.u32 4294901760, %v2676_v33  ;;  %v10334_v1 = vsub.f32 %v2584_v60, %v10286_v16 }
 0x163   : > { %9121 = vmatpush3.bf16.msra.mxu0 %v12482_v7  ;;  %8166 = vmatprep.mubr.msk.f32.mxu0 %vm9252_vm0, %v12448_v10  ;;  %v2686_v38 = vsub.f32 %v10305_v36, %v2685_v54  ;;  %v2705_v7 = vand.u32 4294901760, %v10329_v22 }
 0x164   : > { %8242 = vmatmul.mubr.f32.gmra.mrb[142].mxu1 %v2665_v47  ;;  %9125 = vmatprep.subr.bf16.mxu0 %v12479_v2  ;;  %v2695_v47 = vand.u32 4294901760, %v10317_v51  ;;  %v2715_v60 = vand.u32 4294901760, %v10334_v1 }
 0x165   : > { %8244 = vmatprep.mubr.msk.f32.mxu1 %vm9252_vm0, %v12448_v10  ;;  %v2687_v12 = vand.u32 4294901760, %v2686_v38 }
 0x166   : > { %8167 = vmatmul.mubr.f32.gmra.mrb[128].mxu0 %v2667_v15 }
 0x167   : > { %v1240_v52 = vpop.f32.mrb[42].mxu1  ;;  %8169 = vmatprep.mubr.msk.f32.mxu0 %vm9252_vm0, %v12448_v10 }
 0x168   : > { %v7890_v48 = vpop.f32.mrb[43].mxu1  ;;  %8245 = vmatmul.mubr.f32.gmra.mrb[144].mxu1 %v2675_v50  ;;  %v2696_v50 = vsub.f32 %v10317_v51, %v2695_v47 }
 0x169   : > { %8247 = vmatprep.mubr.msk.f32.mxu1 %vm9252_vm0, %v12448_v10 }
 0x16a   : > { %8170 = vmatmul.mubr.f32.gmra.mrb[130].mxu0 %v2677_v26  ;;  %v2697_v39 = vand.u32 4294901760, %v2696_v50 }
 0x16b   : > { %8172 = vmatprep.mubr.msk.f32.mxu0 %vm9252_vm0, %v12448_v10  ;;  %v10340_v18 = vpop.f32.mrb[44].mxu1 }
 0x16c   : > { %8248 = vmatmul.mubr.f32.gmra.mrb[146].mxu1 %v2685_v54  ;;  %v7893_v15 = vpop.f32.mrb[45].mxu1 }
 0x16d   : > { %8250 = vmatprep.mubr.msk.f32.mxu1 %vm9252_vm0, %v12448_v10  ;;  %v2706_v15 = vsub.f32 %v10329_v22, %v2705_v7 }
 0x16e   : > { %8173 = vmatmul.mubr.f32.gmra.mrb[132].mxu0 %v2687_v12 }
 0x16f   : > { %v1099_v33 = vpop.f32.mrb[42].mxu0  ;;  %8175 = vmatprep.mubr.msk.f32.mxu0 %vm9252_vm0, %v12448_v10  ;;  %v10350_v26 = vpop.f32.mrb[46].mxu1  ;;  %v2707_v12 = vand.u32 4294901760, %v2706_v15 }
 0x170   : > { %v1100_v54 = vadd.f32 %v1099_v33, %v10115_v28  ;;  %v7865_v48 = vpop.f32.mrb[43].mxu0  ;;  %8251 = vmatmul.mubr.f32.gmra.mrb[148].mxu1 %v2695_v47  ;;  %v7896_v9 = vpop.f32.mrb[47].mxu1  ;;  %v3482_v28 = vsub.f32 %v10153_v41, %v3481_v62  ;;  %v3489_v47 = vsub.f32 %v10158_v32, %v3488_v8 }
 0x171   : > { %8253 = vmatprep.mubr.msk.f32.mxu1 %vm9252_vm0, %v12448_v10  ;;  %v2716_v9 = vsub.f32 %v10334_v1, %v2715_v60 }
 0x172   : > { %v10352_v38 = vadd.f32 %v1240_v52, %v1100_v54  ;;  %8176 = vmatmul.mubr.f32.gmra.mrb[134].mxu0 %v2697_v39  ;;  %v3483_v33 = vand.u32 4294901760, %v3482_v28  ;;  %v3490_v62 = vand.u32 4294901760, %v3489_v47  ;;  %v10395_v47 = vld [vmem:[%s12435_s1 + $0x50] sm:$0xff] }
 0x173   : > { %8178 = vmatprep.mubr.msk.f32.mxu0 %vm9252_vm0, %v12448_v10  ;;  %v10365_v52 = vpop.f32.mrb[48].mxu1  ;;  %v2717_v8 = vand.u32 4294901760, %v2716_v9  ;;  %v12447_v9 = vand.u32 4294901760, %v10395_v47 }
 0x174   : > { %8254 = vmatmul.mubr.f32.gmra.mrb[150].mxu1 %v2705_v7  ;;  %v7899_v50 = vpop.f32.mrb[49].mxu1  ;;  %v9135_v54 = vpack.c.bf16 %v3490_v62, %v3483_v33  ;;  %v1109_v33 = vpop.f32.mrb[44].mxu0 }
 0x175   : > { %8256 = vmatprep.mubr.msk.f32.mxu1 %vm9252_vm0, %v12448_v10 }
 0x176   : > { %8179 = vmatmul.mubr.f32.gmra.mrb[136].mxu0 %v2707_v12 }
 0x177   : > { %8181 = vmatprep.mubr.msk.f32.mxu0 %vm9252_vm0, %v12448_v10  ;;  %v10372_v39 = vpop.f32.mrb[50].mxu1 }
 0x178   : > { %8257 = vmatmul.mubr.f32.gmra.mrb[152].mxu1 %v2715_v60  ;;  %v7902_v7 = vpop.f32.mrb[51].mxu1 }
 0x179   : > { %8288 = vmatprep.mubr.msk.f32.mxu1 %vm9252_vm0, %v12448_v10  ;;  %v1110_v7 = vadd.f32 %v1109_v33, %v10137_v45 }
 0x17a   : > { %8182 = vmatmul.mubr.f32.gmra.mrb[138].mxu0 %v2717_v8  ;;  %v10423_v8 = vsub.f32 %v10395_v47, %v12447_v9 }
 0x17b   : > { %8213 = vmatprep.mubr.msk.f32.mxu0 %vm9252_vm0, %v12448_v10  ;;  %v10379_v48 = vpop.f32.mrb[52].mxu1 }
 0x17c   : > { %8289 = vmatmul.mubr.f32.vlgmr.msra.gmra.mrb[154].mxu1 %v10195_v59  ;;  %v7905_v60 = vpop.f32.mrb[53].mxu1 }
 0x17d   : > { %8291 = vmatprep.mubr.msk.f32.mxu1 %vm9252_vm0, %v12448_v10  ;;  %9136 = vmatpush3.bf16.msra.mxu1 %v9135_v54  ;;  %v7868_v54 = vpop.f32.mrb[45].mxu0 }
 0x17e   : > { %9140 = vmatprep.subr.bf16.mxu1 %v12479_v2  ;;  %8214 = vmatmul.mubr.f32.vlgmr.msra.gmra.mrb[140].mxu0 %v10265_v49 }
 0x17f   : > { %9127 = vmatpush3.bf16.msra.mxu0 %v9964_v34  ;;  %8216 = vmatprep.mubr.msk.f32.mxu0 %vm9252_vm0, %v12448_v10  ;;  %v10387_v15 = vpop.f32.mrb[54].mxu1  ;;  %v10400_v34 = vld [vmem:[%s12435_s1 + $0x58] sm:$0xff] }
 0x180   : > { %8292 = vmatmul.mubr.f32.gmra.mrb[156].mxu1 %v10215_v35  ;;  %9131 = vmatprep.subr.bf16.mxu0 %v12479_v2  ;;  %v7908_v28 = vpop.f32.mrb[55].mxu1  ;;  %v12446_v50 = vand.u32 4294901760, %v10400_v34 }
 0x181   : > { %8294 = vmatprep.mubr.msk.f32.mxu1 %vm9252_vm0, %v12448_v10  ;;  %v10440_v28 = vadd.f32 %v10340_v18, %v1110_v7  ;;  %v3311_v18 = vld [vmem:[%s9330_s10 + $0x16] sm:$0xff] }
 0x182   : > { %8217 = vmatmul.mubr.f32.gmra.mrb[142].mxu0 %v10284_v43 }
 0x183   : > { %8219 = vmatprep.mubr.msk.f32.mxu0 %vm9252_vm0, %v12448_v10  ;;  %v10408_v49 = vpop.f32.mrb[56].mxu1 }
 0x184   : > { %8295 = vmatmul.mubr.f32.gmra.mrb[158].mxu1 %v10227_v6  ;;  %v7940_v12 = vpop.f32.mrb[57].mxu1 }
 0x185   : > { %8297 = vmatprep.mubr.msk.f32.mxu1 %vm9252_vm0, %v12448_v10  ;;  %v3310_v12 = vld [vmem:[%s9330_s10 + $0xe] sm:$0xff] }
 0x186   : > { %8220 = vmatmul.mubr.f32.gmra.mrb[144].mxu0 %v10295_v17  ;;  %v10428_v17 = vsub.f32 %v10400_v34, %v12446_v50  ;;  %v10452_v33 = vsel %vm266_vm1, %v3310_v12, 0  ;;  %v10466_v12 = vsel %vm266_vm1, %v3311_v18, 0 }
 0x187   : > { %8222 = vmatprep.mubr.msk.f32.mxu0 %vm9252_vm0, %v12448_v10  ;;  %v10418_v43 = vpop.f32.mrb[58].mxu1  ;;  %v10459_v54 = vand.u32 4294901760, %v10452_v33  ;;  %v10483_v18 = vand.u32 4294901760, %v10466_v12 }
 0x188   : > { %8298 = vmatmul.mubr.f32.gmra.mrb[160].mxu1 %v10241_v63  ;;  %v7943_v62 = vpop.f32.mrb[59].mxu1 }
 0x189   : > { %8300 = vmatprep.mubr.msk.f32.mxu1 %vm9252_vm0, %v12448_v10  ;;  %v1119_v62 = vpop.f32.mrb[46].mxu0 }
 0x18a   : > { %8223 = vmatmul.mubr.f32.gmra.mrb[146].mxu0 %v10305_v36  ;;  %v1120_v7 = vadd.f32 %v1119_v62, %v10148_v20  ;;  %v3312_v20 = vld [vmem:[%s9330_s10 + $0x1e] sm:$0xff]  ;;  %v12483_v62 = vand.u32 4294901760, %v10129_v25 }
 0x18b   : > { %8225 = vmatprep.mubr.msk.f32.mxu0 %vm9252_vm0, %v12448_v10  ;;  %v10443_v45 = vpop.f32.mrb[60].mxu1 }
 0x18c   : > { %8301 = vmatmul.mubr.f32.gmra.mrb[162].mxu1 %v10252_v53  ;;  %v7946_v36 = vpop.f32.mrb[61].mxu1 }
 0x18d   : > { %8303 = vmatprep.mubr.msk.f32.mxu1 %vm9252_vm0, %v12448_v10 }
 0x18e   : > { %8226 = vmatmul.mubr.f32.gmra.mrb[148].mxu0 %v10317_v51  ;;  %v7871_v51 = vpop.f32.mrb[47].mxu0 }
 0x18f   : > { %8228 = vmatprep.mubr.msk.f32.mxu0 %vm9252_vm0, %v12448_v10  ;;  %v10472_v36 = vpop.f32.mrb[62].mxu1  ;;  %v10479_v51 = vpack.c.bf16 %v12483_v62, %v3342_v27  ;;  %v1129_v25 = vpop.f32.mrb[48].mxu0  ;;  %v10507_v62 = vsel %vm266_vm1, %v3313_v42, 0 }
 0x190   : > { %8304 = vmatmul.mubr.f32.gmra.mrb[164].mxu1 %v10267_v55  ;;  %v7949_v60 = vpop.f32.mrb[63].mxu1 }
 0x191   : > { %8306 = vmatprep.mubr.msk.f32.mxu1 %vm9252_vm0, %v12448_v10  ;;  %v7874_v60 = vpop.f32.mrb[49].mxu0 }
 0x192   : > { %8229 = vmatmul.mubr.f32.gmra.mrb[150].mxu0 %v10329_v22  ;;  %v10469_v22 = vadd.f32 %v10350_v26, %v1120_v7  ;;  %v1130_v26 = vadd.f32 %v1129_v25, %v10170_v3  ;;  %v3314_v3 = vld [vmem:[%s9330_s10 + $0x2e] sm:$0xff] }
 0x193   : > { %8231 = vmatprep.mubr.msk.f32.mxu0 %vm9252_vm0, %v12448_v10  ;;  %v10494_v27 = vpop.f32.mrb[64].mxu1 }
 0x194   : > { %8307 = vmatmul.mubr.f32.gmra.mrb[166].mxu1 %v10286_v16  ;;  %v7952_v7 = vpop.f32.mrb[65].mxu1  ;;  %v10510_v50 = vadd.f32 %v10365_v52, %v1130_v26  ;;  %v10522_v52 = vand.u32 4294901760, %v10507_v62  ;;  %v10529_v26 = vsel %vm266_vm1, %v3314_v3, 0  ;;  %v12484_v3 = vmov 0.0  }
 0x195   : > { %8338 = vmatprep.mubr.msk.f32.mxu1 %vm9252_vm0, %v12448_v10 }
 0x196   : > { %8232 = vmatmul.mubr.f32.gmra.mrb[152].mxu0 %v10334_v1  ;;  %v10490_v1 = vsel %vm266_vm1, %v3312_v20, 0 }
 0x197   : > { %8263 = vmatprep.mubr.msk.f32.mxu0 %vm9252_vm0, %v12448_v10  ;;  %v10501_v20 = vand.u32 4294901760, %v10490_v1  ;;  %v10516_v25 = vpop.f32.mrb[66].mxu1 }
 0x198   : > { %8339 = vmatmul.mubr.f32.vlgmr.msra.gmra.mrb[168].mxu1 %v10459_v54  ;;  %v7955_v42 = vpop.f32.mrb[67].mxu1 }
 0x199   : > { %8341 = vmatprep.mubr.msk.f32.mxu1 %vm9252_vm0, %v12448_v10  ;;  %9142 = vmatpush3.bf16.msra.mxu1 %v10479_v51  ;;  %v10612_v57 = vsub.f32 %v10490_v1, %v10501_v20 }
 0x19a   : > { %9146 = vmatprep.subr.bf16.mxu1 %v12479_v2  ;;  %8264 = vmatmul.mubr.f32.vlgmr.msra.gmra.mrb[154].mxu0 %v10195_v59  ;;  %v1139_v59 = vpop.f32.mrb[50].mxu0 }
 0x19b   : > { %9133 = vmatpush3.bf16.msra.mxu0 %v10479_v51  ;;  %8266 = vmatprep.mubr.msk.f32.mxu0 %vm9252_vm0, %v12448_v10  ;;  %v1140_v60 = vadd.f32 %v1139_v59, %v10181_v61  ;;  %v7877_v7 = vpop.f32.mrb[51].mxu0  ;;  %v3430_v46 = vand.u32 4294901760, %v10612_v57 }
 0x19c   : > { %8342 = vmatmul.mubr.f32.gmra.mrb[170].mxu1 %v10483_v18  ;;  %9137 = vmatprep.subr.bf16.mxu0 %v12479_v2  ;;  %v1149_v59 = vpop.f32.mrb[52].mxu0  ;;  %v10535_v7 = vpop.f32.mrb[68].mxu1 }
 0x19d   : > { %8344 = vmatprep.mubr.msk.f32.mxu1 %vm9252_vm0, %v12448_v10  ;;  %v10532_v61 = vadd.f32 %v10372_v39, %v1140_v60  ;;  %v1150_v42 = vadd.f32 %v1149_v59, %v10193_v40  ;;  %v7880_v9 = vpop.f32.mrb[53].mxu0  ;;  %v7958_v23 = vpop.f32.mrb[69].mxu1 }
 0x19e   : > { %8267 = vmatmul.mubr.f32.gmra.mrb[156].mxu0 %v10215_v35  ;;  %v3315_v35 = vld [vmem:[%s9330_s10 + $0x36] sm:$0xff]  ;;  %v3316_v9 = vld [vmem:[%s9330_s10 + $0x3e] sm:$0x1]  ;;  %v10556_v23 = vsub.f32 %v10452_v33, %v10459_v54 }
 0x19f   : > { %8269 = vmatprep.mubr.msk.f32.mxu0 %vm9252_vm0, %v12448_v10  ;;  %v10548_v39 = vsel %vm266_vm1, %v3315_v35, 0  ;;  %v10551_v40 = vadd.f32 %v10379_v48, %v1150_v42  ;;  %v10558_v60 = vpop.f32.mrb[70].mxu1  ;;  %v12452_v48 = vand.u32 4294901760, %v10423_v8  ;;  %v12451_v42 = vand.u32 4294901760, %v10428_v17 }
 0x1a0   : > { %8345 = vmatmul.mubr.f32.gmra.mrb[172].mxu1 %v10501_v20  ;;  %v7990_v4 = vpop.f32.mrb[71].mxu1  ;;  %v10564_v35 = vand.u32 4294901760, %v10548_v39 }
 0x1a1   : > { %8347 = vmatprep.mubr.msk.f32.mxu1 %vm9252_vm0, %v12448_v10  ;;  %v10541_v10 = vand.u32 4294901760, %v10529_v26 }
 0x1a2   : > { %8270 = vmatmul.mubr.f32.gmra.mrb[158].mxu0 %v10227_v6  ;;  %v1159_v6 = vpop.f32.mrb[54].mxu0 }
 0x1a3   : > { %8272 = vmatprep.mubr.msk.f32.mxu0 %vm9252_vm0, %v12484_v3  ;;  %v1160_v59 = vadd.f32 %v1159_v6, %v10213_v37  ;;  %v7883_v24 = vpop.f32.mrb[55].mxu0  ;;  %v10582_v37 = vpack.c.bf16 %v12451_v42, %v12452_v48  ;;  %v10584_v33 = vpop.f32.mrb[72].mxu1 }
 0x1a4   : > { %8348 = vmatmul.mubr.f32.gmra.mrb[174].mxu1 %v10522_v52  ;;  %v10573_v24 = vsel %vm266_vm1, %v3316_v9, 0  ;;  %v3410_v9 = vand.u32 4294901760, %v10556_v23 }
 0x1a5   : > { %8350 = vmatprep.mubr.msk.f32.mxu1 %vm9252_vm0, %v12484_v3  ;;  %v10576_v4 = vadd.f32 %v10387_v15, %v1160_v59  ;;  %v10591_v15 = vsub.f32 %v10466_v12, %v10483_v18  ;;  %v7993_v59 = vpop.f32.mrb[73].mxu1  ;;  %v10595_v42 = vand.u32 4294901760, %v10573_v24 }
 0x1a6   : > { %8273 = vmatmul.mubr.f32.gmra.mrb[160].mxu0 %v10241_v63  ;;  %v1352_v63 = vpop.f32.mrb[56].mxu0  ;;  %v3411_v59 = vsub.f32 %v10556_v23, %v3410_v9 }
 0x1a7   : > { %8275 = vmatprep.mubr.msk.f32.mxu0 %vm9252_vm0, %v12484_v3  ;;  %v1353_v6 = vadd.f32 %v1352_v63, %v10352_v38  ;;  %v7915_v5 = vpop.f32.mrb[57].mxu0  ;;  %v10604_v38 = vpop.f32.mrb[74].mxu1  ;;  %v3420_v48 = vand.u32 4294901760, %v10591_v15 }
 0x1a8   : > { %8351 = vmatmul.mubr.f32.gmra.mrb[176].mxu1 %v10541_v10  ;;  %v7996_v58 = vpop.f32.mrb[75].mxu1 }
 0x1a9   : > { %8353 = vmatprep.mubr.msk.f32.mxu1 %vm9252_vm0, %v12484_v3  ;;  %v10602_v5 = vadd.f32 %v10408_v49, %v1353_v6 }
 0x1aa   : > { %8276 = vmatmul.mubr.f32.gmra.mrb[162].mxu0 %v10252_v53  ;;  %v1359_v53 = vpop.f32.mrb[58].mxu0 }
 0x1ab   : > { %8278 = vmatprep.mubr.msk.f32.mxu0 %vm9252_vm0, %v12484_v3  ;;  %v1360_v12 = vadd.f32 %v1359_v53, %v10440_v28  ;;  %v7918_v63 = vpop.f32.mrb[59].mxu0  ;;  %v10624_v28 = vsub.f32 %v10507_v62, %v10522_v52  ;;  %v10626_v6 = vpop.f32.mrb[76].mxu1  ;;  %v3412_v53 = vand.u32 4294901760, %v3411_v59  ;;  %v3431_v59 = vsub.f32 %v10612_v57, %v3430_v46 }
 0x1ac   : > { %8354 = vmatmul.mubr.f32.gmra.mrb[178].mxu1 %v10564_v35  ;;  %v3421_v63 = vsub.f32 %v10591_v15, %v3420_v48  ;;  %v7999_v30 = vpop.f32.mrb[77].mxu1 }
 0x1ad   : > { %8356 = vmatprep.mubr.msk.f32.mxu1 %vm9252_vm0, %v12484_v3  ;;  %v10620_v49 = vadd.f32 %v10418_v43, %v1360_v12 }
 0x1ae   : > { %8279 = vmatmul.mubr.f32.gmra.mrb[164].mxu0 %v10267_v55  ;;  %v1366_v55 = vpop.f32.mrb[60].mxu0  ;;  %v3422_v12 = vand.u32 4294901760, %v3421_v63 }
 0x1af   : > { %8281 = vmatprep.mubr.msk.f32.mxu0 %vm9252_vm0, %v12484_v3  ;;  %v1367_v58 = vadd.f32 %v1366_v55, %v10469_v22  ;;  %v7921_v1 = vpop.f32.mrb[61].mxu0  ;;  %v10641_v62 = vpop.f32.mrb[78].mxu1 }
 0x1b0   : > { %8357 = vmatmul.mubr.f32.gmra.mrb[180].mxu1 %v10595_v42  ;;  %v1373_v22 = vpop.f32.mrb[62].mxu0  ;;  %v8002_v55 = vpop.f32.mrb[79].mxu1 }
 0x1b1   : > { %8388 = vmatprep.mubr.msk.f32.mxu1 %vm9252_vm0, %v12484_v3  ;;  %v10637_v43 = vadd.f32 %v10443_v45, %v1367_v58  ;;  %v1374_v30 = vadd.f32 %v1373_v22, %v10510_v50  ;;  %v10648_v45 = vsub.f32 %v10529_v26, %v10541_v10  ;;  %v10684_v55 = vsub.f32 %v10573_v24, %v10595_v42 }
 0x1b2   : > { %8282 = vmatmul.mubr.f32.gmra.mrb[166].mxu0 %v10286_v16  ;;  %v3440_v16 = vand.u32 4294901760, %v10624_v28 }
 0x1b3   : > { %8313 = vmatprep.mubr.msk.f32.mxu0 %vm9252_vm0, %v12484_v3  ;;  %v10656_v50 = vadd.f32 %v10472_v36, %v1374_v30  ;;  %v10662_v1 = vpop.f32.mrb[80].mxu1  ;;  %v10668_v36 = vsub.f32 %v10548_v39, %v10564_v35 }
 0x1b4   : > { %8389 = vmatmul.mubr.f32.vlgmr.msra.gmra.mrb[182].mxu1 %v3410_v9  ;;  %v7924_v9 = vpop.f32.mrb[63].mxu0  ;;  %v3441_v26 = vsub.f32 %v10624_v28, %v3440_v16  ;;  %v8005_v63 = vpop.f32.mrb[81].mxu1 }
 0x1b5   : > { %8391 = vmatprep.mubr.msk.f32.mxu1 %vm9252_vm0, %v12484_v3  ;;  %9148 = vmatpush3.bf16.msra.mxu1 %v10479_v51  ;;  %v12485_v51 = vpack.c.bf16 %v10158_v32, %v10153_v41  ;;  %v1380_v58 = vpop.f32.mrb[64].mxu0  ;;  %v3432_v32 = vand.u32 4294901760, %v3431_v59 }
 0x1b6   : > { %9152 = vmatprep.subr.bf16.mxu1 %v12479_v2  ;;  %8314 = vmatmul.mubr.f32.vlgmr.msra.gmra.mrb[168].mxu0 %v3412_v53  ;;  %v7927_v41 = vpop.f32.mrb[65].mxu0  ;;  %v3450_v53 = vand.u32 4294901760, %v10648_v45  ;;  %v3442_v30 = vand.u32 4294901760, %v3441_v26 }
 0x1b7   : > { %9139 = vmatpush3.bf16.msra.mxu0 %v12485_v51  ;;  %8316 = vmatprep.mubr.msk.f32.mxu0 %vm9252_vm0, %v12484_v3  ;;  %v10677_v9 = vpop.f32.mrb[82].mxu1 }
 0x1b8   : > { %8392 = vmatmul.mubr.f32.gmra.mrb[184].mxu1 %v3420_v48  ;;  %9143 = vmatprep.subr.bf16.mxu0 %v12479_v2  ;;  %v1381_v48 = vadd.f32 %v1380_v58, %v10532_v61  ;;  %v1387_v61 = vpop.f32.mrb[66].mxu0  ;;  %v3451_v39 = vsub.f32 %v10648_v45, %v3450_v53  ;;  %v8008_v51 = vpop.f32.mrb[83].mxu1 }
 0x1b9   : > { %8394 = vmatprep.mubr.msk.f32.mxu1 %vm9252_vm0, %v12484_v3  ;;  %v7930_v59 = vpop.f32.mrb[67].mxu0 }
 0x1ba   : > { %8317 = vmatmul.mubr.f32.gmra.mrb[170].mxu0 %v3422_v12  ;;  %v10675_v22 = vadd.f32 %v10494_v27, %v1381_v48  ;;  %v1388_v12 = vadd.f32 %v1387_v61, %v10551_v40  ;;  %v1394_v40 = vpop.f32.mrb[68].mxu0  ;;  %v3452_v24 = vand.u32 4294901760, %v3451_v39  ;;  %v12487_v61 = vand.u32 4294901760, %v10428_v17 }
 0x1bb   : > { %8319 = vmatprep.mubr.msk.f32.mxu0 %vm9252_vm0, %v12484_v3  ;;  %v10693_v58 = vpop.f32.mrb[84].mxu1  ;;  %v1395_v26 = vadd.f32 %v1394_v40, %v10576_v4  ;;  %v7933_v48 = vpop.f32.mrb[69].mxu0  ;;  %v12486_v4 = vand.u32 4294901760, %v10423_v8 }
 0x1bc   : > { %8395 = vmatmul.mubr.f32.gmra.mrb[186].mxu1 %v3430_v46  ;;  %v3460_v46 = vand.u32 4294901760, %v10668_v36  ;;  %v10691_v27 = vadd.f32 %v10516_v25, %v1388_v12  ;;  %v1594_v12 = vpop.f32.mrb[70].mxu0 }
 0x1bd   : > { %8397 = vmatprep.mubr.msk.f32.mxu1 %vm9252_vm0, %v12484_v3  ;;  %v10703_v25 = vadd.f32 %v10535_v7, %v1395_v26  ;;  %v4244_v63 = vsub.f32 %v10423_v8, %v12486_v4  ;;  %v7965_v39 = vpop.f32.mrb[71].mxu0 }
 0x1be   : > { %8320 = vmatmul.mubr.f32.gmra.mrb[172].mxu0 %v3432_v32  ;;  %v3461_v41 = vsub.f32 %v10668_v36, %v3460_v46  ;;  %v8040_v32 = vpop.f32.mrb[85].mxu1  ;;  %v1600_v4 = vpop.f32.mrb[72].mxu0 }
 0x1bf   : > { %8322 = vmatprep.mubr.msk.f32.mxu0 %vm9252_vm0, %v12484_v3  ;;  %v10711_v59 = vpop.f32.mrb[86].mxu1  ;;  %v4245_v48 = vand.u32 4294901760, %v4244_v63 }
 0x1c0   : > { %8398 = vmatmul.mubr.f32.gmra.mrb[188].mxu1 %v3440_v16  ;;  %v3470_v16 = vand.u32 4294901760, %v10684_v55  ;;  %v3462_v51 = vand.u32 4294901760, %v3461_v41  ;;  %v8043_v7 = vpop.f32.mrb[87].mxu1  ;;  %v7968_v41 = vpop.f32.mrb[73].mxu0 }
 0x1c1   : > { %8400 = vmatprep.mubr.msk.f32.mxu1 %vm9252_vm0, %v12484_v3 }
 0x1c2   : > { %8323 = vmatmul.mubr.f32.gmra.mrb[174].mxu0 %v3442_v30  ;;  %v4251_v30 = vsub.f32 %v10428_v17, %v12487_v61  ;;  %v3471_v40 = vsub.f32 %v10684_v55, %v3470_v16 }
 0x1c3   : > { %8325 = vmatprep.mubr.msk.f32.mxu0 %vm9252_vm0, %v12484_v3 }
 0x1c4   : > { %8401 = vmatmul.mubr.f32.gmra.mrb[190].mxu1 %v3450_v53  ;;  %v1595_v53 = vadd.f32 %v1594_v12, %v10602_v5  ;;  %v4252_v32 = vand.u32 4294901760, %v4251_v30  ;;  %v10722_v5 = vpop.f32.mrb[88].mxu1  ;;  %v3472_v61 = vand.u32 4294901760, %v3471_v40  ;;  %v1606_v30 = vpop.f32.mrb[74].mxu0 }
 0x1c5   : > { %8403 = vmatprep.mubr.msk.f32.mxu1 %vm9252_vm0, %v12484_v3 }
 0x1c6   : > { %8326 = vmatmul.mubr.f32.gmra.mrb[176].mxu0 %v3452_v24  ;;  %v10720_v26 = vadd.f32 %v10558_v60, %v1595_v53  ;;  %v1601_v24 = vadd.f32 %v1600_v4, %v10620_v49  ;;  %v9153_v63 = vpack.c.bf16 %v4252_v32, %v4245_v48  ;;  %v1607_v49 = vadd.f32 %v1606_v30, %v10637_v43  ;;  %v7971_v53 = vpop.f32.mrb[75].mxu0 }
 0x1c7   : > { %8328 = vmatprep.mubr.msk.f32.mxu0 %vm9252_vm0, %v12484_v3 }
 0x1c8   : > { %8404 = vmatmul.mubr.f32.gmra.mrb[192].mxu1 %v3460_v46  ;;  %v8046_v46 = vpop.f32.mrb[89].mxu1  ;;  %v10730_v60 = vadd.f32 %v10584_v33, %v1601_v24  ;;  %v10741_v33 = vadd.f32 %v10604_v38, %v1607_v49 }
 0x1c9   : > { %8406 = vmatprep.mubr.msk.f32.mxu1 %vm9252_vm0, %v12484_v3  ;;  %v10732_v12 = vpop.f32.mrb[90].mxu1 }
 0x1ca   : > { %8329 = vmatmul.mubr.f32.gmra.mrb[178].mxu0 %v3462_v51  ;;  %v8049_v39 = vpop.f32.mrb[91].mxu1 }
 0x1cb   : > { %8331 = vmatprep.mubr.msk.f32.mxu0 %vm9252_vm0, %v12484_v3  ;;  %v10743_v51 = vpop.f32.mrb[92].mxu1 }
 0x1cc   : > { %8407 = vmatmul.mubr.f32.gmra.mrb[194].mxu1 %v3470_v16  ;;  %v1612_v16 = vpop.f32.mrb[76].mxu0  ;;  %v8052_v7 = vpop.f32.mrb[93].mxu1 }
 0x1cd   : > { %8438 = vmatprep.mubr.msk.f32.mxu1 %vm9252_vm0, %v12484_v3  ;;  %v1613_v43 = vadd.f32 %v1612_v16, %v10656_v50  ;;  %v7974_v40 = vpop.f32.mrb[77].mxu0 }
 0x1ce   : > { %8332 = vmatmul.mubr.f32.gmra.mrb[180].mxu0 %v3472_v61  ;;  %v1618_v50 = vpop.f32.mrb[78].mxu0 }
 0x1cf   : > { %8363 = vmatprep.mubr.msk.f32.mxu0 %vm9252_vm0, %v12484_v3  ;;  %v10753_v38 = vadd.f32 %v10626_v6, %v1613_v43  ;;  %v10758_v48 = vpop.f32.mrb[94].mxu1  ;;  %v1619_v6 = vadd.f32 %v1618_v50, %v10675_v22  ;;  %v7977_v32 = vpop.f32.mrb[79].mxu0 }
 0x1d0   : > { %8439 = vmatmul.mubr.f32.vlgmr.msra.gmra.mrb[196].mxu1 %v10459_v54  ;;  %v8055_v4 = vpop.f32.mrb[95].mxu1  ;;  %v1624_v22 = vpop.f32.mrb[80].mxu0 }
 0x1d1   : > { %8441 = vmatprep.mubr.msk.f32.mxu1 %vm9252_vm0, %v12484_v3  ;;  %9154 = vmatpush3.bf16.msra.mxu1 %v9153_v63  ;;  %v10778_v24 = vadd.f32 %v10641_v62, %v1619_v6  ;;  %v7980_v63 = vpop.f32.mrb[81].mxu0 }
 0x1d2   : > { %9158 = vmatprep.subr.bf16.mxu1 %v12479_v2  ;;  %8364 = vmatmul.mubr.f32.vlgmr.msra.gmra.mrb[182].mxu0 %v10556_v23  ;;  %v10763_v23 = vld [vmem:[%s12435_s1 + $0x60] sm:$0xff]  ;;  %v1630_v49 = vpop.f32.mrb[82].mxu0 }
 0x1d3   : > { %9145 = vmatpush3.bf16.msra.mxu0 %v10273_v13  ;;  %8366 = vmatprep.mubr.msk.f32.mxu0 %vm9252_vm0, %v12484_v3  ;;  %v10768_v13 = vld [vmem:[%s12435_s1 + $0x68] sm:$0xff]  ;;  %v12458_v41 = vand.u32 4294901760, %v10763_v23  ;;  %v1631_v39 = vadd.f32 %v1630_v49, %v10703_v25  ;;  %v7983_v16 = vpop.f32.mrb[83].mxu0  ;;  %v9239_v49 = vld [vmem:[%s9330_s10 + $0x1f] sm:$0xff] }
 0x1d4   : > { %8442 = vmatmul.mubr.f32.gmra.mrb[198].mxu1 %v10483_v18  ;;  %9149 = vmatprep.subr.bf16.mxu0 %v12479_v2  ;;  %v12457_v61 = vand.u32 4294901760, %v10768_v13  ;;  %v9237_v25 = vld [vmem:[%s9330_s10 + $0xf] sm:$0xff] }
 0x1d5   : > { %8444 = vmatprep.mubr.msk.f32.mxu1 %vm9252_vm0, %v12484_v3  ;;  %v10816_v40 = vadd.f32 %v10677_v9, %v1631_v39  ;;  %v4072_v7 = vmul.f32 %v9237_v25, %v9657_v0  ;;  %v9238_v9 = vld [vmem:[%s9330_s10 + $0x17] sm:$0xff] }
 0x1d6   : > { %8367 = vmatmul.mubr.f32.gmra.mrb[184].mxu0 %v10591_v15  ;;  %v1625_v15 = vadd.f32 %v1624_v22, %v10691_v27  ;;  %v10797_v27 = vsub.f32 %v10763_v23, %v12458_v41 }
 0x1d7   : > { %8369 = vmatprep.mubr.msk.f32.mxu0 %vm9252_vm0, %v12484_v3  ;;  %v10782_v46 = vpop.f32.mrb[96].mxu1  ;;  %v10832_v0 = vsel %vm266_vm1, %v4072_v7, 0  ;;  %v12488_v7 = vand.u32 4294901760, %v10395_v47 }
 0x1d8   : > { %8445 = vmatmul.mubr.f32.gmra.mrb[200].mxu1 %v10501_v20  ;;  %v8058_v30 = vpop.f32.mrb[97].mxu1  ;;  %v10792_v62 = vadd.f32 %v10662_v1, %v1625_v15 }
 0x1d9   : > { %8447 = vmatprep.mubr.msk.f32.mxu1 %vm9252_vm0, %v12484_v3 }
 0x1da   : > { %8370 = vmatmul.mubr.f32.gmra.mrb[186].mxu0 %v10612_v57  ;;  %v10802_v57 = vsub.f32 %v10768_v13, %v12457_v61 }
 0x1db   : > { %8372 = vmatprep.mubr.msk.f32.mxu0 %vm9252_vm0, %v12484_v3  ;;  %v10804_v53 = vpop.f32.mrb[98].mxu1 }
 0x1dc   : > { %8448 = vmatmul.mubr.f32.gmra.mrb[202].mxu1 %v10522_v52  ;;  %v8090_v1 = vpop.f32.mrb[99].mxu1 }
 0x1dd   : > { %8450 = vmatprep.mubr.msk.f32.mxu1 %vm9252_vm0, %v12484_v3 }
 0x1de   : > { %8373 = vmatmul.mubr.f32.gmra.mrb[188].mxu0 %v10624_v28  ;;  %v1897_v28 = vpop.f32.mrb[84].mxu0 }
 0x1df   : > { %8375 = vmatprep.mubr.msk.f32.mxu0 %vm9252_vm0, %v12484_v3  ;;  %v10820_v50 = vpop.f32.mrb[100].mxu1  ;;  %v10823_v6 = vadd.f32 %v10693_v58, %v1897_v28  ;;  %v8015_v32 = vpop.f32.mrb[85].mxu0  ;;  %v4073_v58 = vmul.f32 %v9238_v9, %v9691_v21  ;;  %v10848_v21 = vand.u32 4294901760, %v10832_v0  ;;  %v12489_v28 = vand.u32 4294901760, %v10400_v34  ;;  %v9240_v34 = vld [vmem:[%s9330_s10 + $0x27] sm:$0xff] }
 0x1e0   : > { %8451 = vmatmul.mubr.f32.gmra.mrb[204].mxu1 %v10541_v10  ;;  %v8093_v4 = vpop.f32.mrb[101].mxu1 }
 0x1e1   : > { %8453 = vmatprep.mubr.msk.f32.mxu1 %vm9252_vm0, %v12484_v3  ;;  %v10853_v39 = vsel %vm266_vm1, %v4073_v58, 0  ;;  %v10865_v32 = vpack.c.bf16 %v12489_v28, %v12488_v7 }
 0x1e2   : > { %8376 = vmatmul.mubr.f32.gmra.mrb[190].mxu0 %v10648_v45 }
 0x1e3   : > { %8378 = vmatprep.mubr.msk.f32.mxu0 %vm9252_vm0, %v12484_v3  ;;  %v10836_v15 = vpop.f32.mrb[102].mxu1 }
 0x1e4   : > { %8454 = vmatmul.mubr.f32.gmra.mrb[206].mxu1 %v10564_v35  ;;  %v1907_v22 = vpop.f32.mrb[86].mxu0  ;;  %v8096_v30 = vpop.f32.mrb[103].mxu1 }
 0x1e5   : > { %8456 = vmatprep.mubr.msk.f32.mxu1 %vm9252_vm0, %v12484_v3  ;;  %v10839_v45 = vadd.f32 %v10711_v59, %v1907_v22  ;;  %v8018_v63 = vpop.f32.mrb[87].mxu0  ;;  %v4074_v59 = vmul.f32 %v9239_v49, %v9684_v19  ;;  %v10873_v19 = vand.u32 4294901760, %v10853_v39 }
 0x1e6   : > { %8379 = vmatmul.mubr.f32.gmra.mrb[192].mxu0 %v10668_v36 }
 0x1e7   : > { %8381 = vmatprep.mubr.msk.f32.mxu0 %vm9252_vm0, %v12484_v3  ;;  %v10855_v16 = vpop.f32.mrb[104].mxu1  ;;  %v10877_v47 = vsel %vm266_vm1, %v4074_v59, 0 }
 0x1e8   : > { %8457 = vmatmul.mubr.f32.gmra.mrb[208].mxu1 %v10595_v42  ;;  %v1917_v36 = vpop.f32.mrb[88].mxu0  ;;  %v8099_v4 = vpop.f32.mrb[105].mxu1 }
 0x1e9   : > { %8488 = vmatprep.mubr.msk.f32.mxu1 %vm9252_vm0, %v12484_v3  ;;  %v10858_v1 = vadd.f32 %v10722_v5, %v1917_v36  ;;  %v8021_v25 = vpop.f32.mrb[89].mxu0  ;;  %v4070_v36 = vld [vmem:[%s9330_s10 + $0x37] sm:$0xff] }
 0x1ea   : > { %8382 = vmatmul.mubr.f32.gmra.mrb[194].mxu0 %v10684_v55  ;;  %v4075_v55 = vmul.f32 %v9240_v34, %v9711_v31  ;;  %v10893_v31 = vand.u32 4294901760, %v10877_v47 }
 0x1eb   : > { %8413 = vmatprep.mubr.msk.f32.mxu0 %vm9252_vm0, %v12484_v3  ;;  %v10881_v9 = vpop.f32.mrb[106].mxu1 }
 0x1ec   : > { %8489 = vmatmul.mubr.f32.vlgmr.msra.gmra.mrb[210].mxu1 %v10848_v21  ;;  %v1927_v5 = vpop.f32.mrb[90].mxu0  ;;  %v8102_v63 = vpop.f32.mrb[107].mxu1 }
 0x1ed   : > { %8491 = vmatprep.mubr.msk.f32.mxu1 %vm9252_vm0, %v12484_v3  ;;  %9160 = vmatpush3.bf16.msra.mxu1 %v10865_v32  ;;  %v10885_v58 = vadd.f32 %v10732_v12, %v1927_v5  ;;  %v8024_v22 = vpop.f32.mrb[91].mxu0  ;;  %v9241_v12 = vld [vmem:[%s9330_s10 + $0x2f] sm:$0xff] }
 0x1ee   : > { %9164 = vmatprep.subr.bf16.mxu1 %v12479_v2  ;;  %8414 = vmatmul.mubr.f32.vlgmr.msra.gmra.mrb[196].mxu0 %v10459_v54  ;;  %v4076_v30 = vmul.f32 %v9241_v12, %v9900_v56  ;;  %v10901_v54 = vsel %vm266_vm1, %v4075_v55, 0 }
 0x1ef   : > { %9151 = vmatpush3.bf16.msra.mxu0 %v10865_v32  ;;  %8416 = vmatprep.mubr.msk.f32.mxu0 %vm9252_vm0, %v12484_v3  ;;  %v10903_v59 = vpop.f32.mrb[108].mxu1  ;;  %v10916_v4 = vand.u32 4294901760, %v10901_v54 }
 0x1f0   : > { %8492 = vmatmul.mubr.f32.gmra.mrb[212].mxu1 %v10873_v19  ;;  %9155 = vmatprep.subr.bf16.mxu0 %v12479_v2  ;;  %v1937_v49 = vpop.f32.mrb[92].mxu0  ;;  %v8105_v28 = vpop.f32.mrb[109].mxu1  ;;  %v10919_v34 = vsel %vm266_vm1, %v4076_v30, 0 }
 0x1f1   : > { %8494 = vmatprep.mubr.msk.f32.mxu1 %vm9252_vm0, %v12484_v3  ;;  %v10907_v25 = vadd.f32 %v10743_v51, %v1937_v49  ;;  %v8027_v7 = vpop.f32.mrb[93].mxu0  ;;  %v4077_v51 = vmul.f32 %v4070_v36, %v9920_v14  ;;  %v10935_v30 = vand.u32 4294901760, %v10919_v34 }
 0x1f2   : > { %8417 = vmatmul.mubr.f32.gmra.mrb[198].mxu0 %v10483_v18  ;;  %v4071_v18 = vld [vmem:[%s9330_s10 + $0x3f] sm:$0x1] }
 0x1f3   : > { %8419 = vmatprep.mubr.msk.f32.mxu0 %vm9252_vm0, %v12484_v3  ;;  %v10922_v5 = vpop.f32.mrb[110].mxu1  ;;  %v4078_v49 = vmul.f32 %v4071_v18, %v9938_v11 }
 0x1f4   : > { %8495 = vmatmul.mubr.f32.gmra.mrb[214].mxu1 %v10893_v31  ;;  %v1947_v55 = vpop.f32.mrb[94].mxu0  ;;  %v8108_v12 = vpop.f32.mrb[111].mxu1 }
 0x1f5   : > { %8497 = vmatprep.mubr.msk.f32.mxu1 %vm9252_vm0, %v12484_v3  ;;  %v10926_v22 = vadd.f32 %v10758_v48, %v1947_v55  ;;  %v8030_v63 = vpop.f32.mrb[95].mxu0  ;;  %v10939_v48 = vsel %vm266_vm1, %v4077_v51, 0  ;;  %v12459_v12 = vand.u32 4294901760, %v10802_v57  ;;  %v10952_v51 = vsub.f32 %v10832_v0, %v10848_v21 }
 0x1f6   : > { %8420 = vmatmul.mubr.f32.gmra.mrb[200].mxu0 %v10501_v20  ;;  %v12460_v63 = vand.u32 4294901760, %v10797_v27  ;;  %v10968_v18 = vsel %vm266_vm1, %v4078_v49, 0  ;;  %v10982_v49 = vsub.f32 %v10853_v39, %v10873_v19 }
 0x1f7   : > { %8422 = vmatprep.mubr.msk.f32.mxu0 %vm9252_vm0, %v12484_v3  ;;  %v10941_v7 = vpop.f32.mrb[112].mxu1  ;;  %v4172_v61 = vand.u32 4294901760, %v10952_v51 }
 0x1f8   : > { %8498 = vmatmul.mubr.f32.gmra.mrb[216].mxu1 %v10916_v4  ;;  %v1957_v36 = vpop.f32.mrb[96].mxu0  ;;  %v8140_v55 = vpop.f32.mrb[113].mxu1 }
 0x1f9   : > { %8500 = vmatprep.mubr.msk.f32.mxu1 %vm9252_vm0, %v12484_v3  ;;  %v10944_v20 = vadd.f32 %v10782_v46, %v1957_v36  ;;  %v8033_v28 = vpop.f32.mrb[97].mxu0  ;;  %v10959_v46 = vand.u32 4294901760, %v10939_v48  ;;  %v4173_v39 = vsub.f32 %v10952_v51, %v4172_v61 }
 0x1fa   : > { %8423 = vmatmul.mubr.f32.gmra.mrb[202].mxu0 %v10522_v52  ;;  %v10965_v52 = vpack.c.bf16 %v12459_v12, %v12460_v63 }
 0x1fb   : > { %8425 = vmatprep.mubr.msk.f32.mxu0 %vm9252_vm0, %v12484_v3  ;;  %v10970_v36 = vpop.f32.mrb[114].mxu1  ;;  %v4174_v11 = vand.u32 4294901760, %v4173_v39 }
 0x1fc   : > { %8501 = vmatmul.mubr.f32.gmra.mrb[218].mxu1 %v10935_v30  ;;  %v2150_v0 = vpop.f32.mrb[98].mxu0  ;;  %v8143_v43 = vpop.f32.mrb[115].mxu1 }
 0x1fd   : > { %8503 = vmatprep.mubr.msk.f32.mxu1 %vm9252_vm0, %v12484_v3  ;;  %v2151_v28 = vadd.f32 %v2150_v0, %v10823_v6  ;;  %v8065_v55 = vpop.f32.mrb[99].mxu0  ;;  %v10985_v6 = vand.u32 4294901760, %v10968_v18 }
 0x1fe   : > { %8426 = vmatmul.mubr.f32.gmra.mrb[204].mxu0 %v10541_v10 }
 0x1ff   : > { %8428 = vmatprep.mubr.msk.f32.mxu0 %vm9252_vm0, %v12484_v3  ;;  %v10988_v10 = vadd.f32 %v10804_v53, %v2151_v28  ;;  %v10990_v0 = vpop.f32.mrb[116].mxu1  ;;  %v11002_v53 = vsub.f32 %v10877_v47, %v10893_v31 }
 0x200   : > { %8504 = vmatmul.mubr.f32.gmra.mrb[220].mxu1 %v10959_v46  ;;  %v2157_v43 = vpop.f32.mrb[100].mxu0  ;;  %v8146_v12 = vpop.f32.mrb[117].mxu1 }
 0x201   : > { %8506 = vmatprep.mubr.msk.f32.mxu1 %vm9252_vm0, %v12484_v3  ;;  %v2158_v55 = vadd.f32 %v2157_v43, %v10839_v45  ;;  %v8068_v41 = vpop.f32.mrb[101].mxu0  ;;  %v4182_v45 = vand.u32 4294901760, %v10982_v49 }
 0x202   : > { %8429 = vmatmul.mubr.f32.gmra.mrb[206].mxu0 %v10564_v35 }
 0x203   : > { %8431 = vmatprep.mubr.msk.f32.mxu0 %vm9252_vm0, %v12484_v3  ;;  %v11006_v41 = vadd.f32 %v10820_v50, %v2158_v55  ;;  %v11008_v12 = vpop.f32.mrb[118].mxu1  ;;  %v11018_v50 = vsub.f32 %v10901_v54, %v10916_v4  ;;  %v4183_v47 = vsub.f32 %v10982_v49, %v4182_v45 }
 0x204   : > { %8507 = vmatmul.mubr.f32.gmra.mrb[222].mxu1 %v10985_v6  ;;  %v2164_v35 = vpop.f32.mrb[102].mxu0  ;;  %v8149_v63 = vpop.f32.mrb[119].mxu1 }
 0x205   : > { %8538 = vmatprep.mubr.msk.f32.mxu1 %vm9252_vm0, %v12484_v3  ;;  %v2165_v28 = vadd.f32 %v2164_v35, %v10858_v1  ;;  %v8071_v43 = vpop.f32.mrb[103].mxu0  ;;  %v4192_v1 = vand.u32 4294901760, %v11002_v53  ;;  %v11032_v35 = vsub.f32 %v10919_v34, %v10935_v30 }
 0x206   : > { %8432 = vmatmul.mubr.f32.gmra.mrb[208].mxu0 %v10595_v42 }
 0x207   : > { %8463 = vmatprep.mubr.msk.f32.mxu0 %vm9252_vm0, %v12484_v3  ;;  %v11023_v55 = vadd.f32 %v10836_v15, %v2165_v28  ;;  %v12490_v15 = vpack.c.bf16 %v10428_v17, %v10423_v8  ;;  %v4193_v28 = vsub.f32 %v11002_v53, %v4192_v1 }
 0x208   : > { %8539 = vmatmul.mubr.f32.vlgmr.msra.gmra.mrb[224].mxu1 %v4172_v61  ;;  %v2171_v42 = vpop.f32.mrb[104].mxu0  ;;  %v11026_v61 = vpop.f32.mrb[120].mxu1 }
 0x209   : > { %8541 = vmatprep.mubr.msk.f32.mxu1 %vm9252_vm0, %v12484_v3  ;;  %9166 = vmatpush3.bf16.msra.mxu1 %v10865_v32  ;;  %v2172_v63 = vadd.f32 %v2171_v42, %v10885_v58  ;;  %v8074_v39 = vpop.f32.mrb[105].mxu0  ;;  %v8152_v54 = vpop.f32.mrb[121].mxu1  ;;  %v4184_v32 = vand.u32 4294901760, %v4183_v47  ;;  %v4202_v58 = vand.u32 4294901760, %v11018_v50  ;;  %v11052_v47 = vsub.f32 %v10939_v48, %v10959_v46 }
 0x20a   : > { %9170 = vmatprep.subr.bf16.mxu1 %v12479_v2  ;;  %8464 = vmatmul.mubr.f32.vlgmr.msra.gmra.mrb[210].mxu0 %v4174_v11 }
 0x20b   : > { %9157 = vmatpush3.bf16.msra.mxu0 %v12490_v15  ;;  %8466 = vmatprep.mubr.msk.f32.mxu0 %vm9252_vm0, %v12484_v3  ;;  %v11042_v11 = vadd.f32 %v10855_v16, %v2172_v63  ;;  %v4194_v16 = vand.u32 4294901760, %v4193_v28  ;;  %v4203_v42 = vsub.f32 %v11018_v50, %v4202_v58  ;;  %v4212_v63 = vand.u32 4294901760, %v11032_v35 }
 0x20c   : > { %8542 = vmatmul.mubr.f32.gmra.mrb[226].mxu1 %v4182_v45  ;;  %9161 = vmatprep.subr.bf16.mxu0 %v12479_v2  ;;  %v2178_v34 = vpop.f32.mrb[106].mxu0  ;;  %v11047_v45 = vpop.f32.mrb[122].mxu1  ;;  %v4222_v28 = vand.u32 4294901760, %v11052_v47 }
 0x20d   : > { %8544 = vmatprep.mubr.msk.f32.mxu1 %vm9252_vm0, %v12484_v3  ;;  %v2179_v8 = vadd.f32 %v2178_v34, %v10907_v25  ;;  %v8077_v17 = vpop.f32.mrb[107].mxu0  ;;  %v8155_v43 = vpop.f32.mrb[123].mxu1  ;;  %v4213_v34 = vsub.f32 %v11032_v35, %v4212_v63 }
 0x20e   : > { %8467 = vmatmul.mubr.f32.gmra.mrb[212].mxu0 %v4184_v32  ;;  %v11068_v32 = vsub.f32 %v10968_v18, %v10985_v6 }
 0x20f   : > { %8469 = vmatprep.mubr.msk.f32.mxu0 %vm9252_vm0, %v12484_v3  ;;  %v11061_v25 = vadd.f32 %v10881_v9, %v2179_v8  ;;  %v4204_v9 = vand.u32 4294901760, %v4203_v42 }
 0x210   : > { %8545 = vmatmul.mubr.f32.gmra.mrb[228].mxu1 %v4192_v1  ;;  %v2185_v39 = vpop.f32.mrb[108].mxu0  ;;  %v11063_v1 = vpop.f32.mrb[124].mxu1  ;;  %v4232_v42 = vand.u32 4294901760, %v11068_v32 }
 0x211   : > { %8547 = vmatprep.mubr.msk.f32.mxu1 %vm9252_vm0, %v12484_v3  ;;  %v2186_v48 = vadd.f32 %v2185_v39, %v10926_v22  ;;  %v8080_v54 = vpop.f32.mrb[109].mxu0  ;;  %v8158_v15 = vpop.f32.mrb[125].mxu1 }
 0x212   : > { %8470 = vmatmul.mubr.f32.gmra.mrb[214].mxu0 %v4194_v16  ;;  %v4223_v16 = vsub.f32 %v11052_v47, %v4222_v28 }
 0x213   : > { %8472 = vmatprep.mubr.msk.f32.mxu0 %vm9252_vm0, %v12484_v3  ;;  %v11077_v22 = vadd.f32 %v10903_v59, %v2186_v48  ;;  %v4214_v59 = vand.u32 4294901760, %v4213_v34 }
 0x214   : > { %8548 = vmatmul.mubr.f32.gmra.mrb[230].mxu1 %v4202_v58  ;;  %v2192_v8 = vpop.f32.mrb[110].mxu0  ;;  %v11079_v58 = vpop.f32.mrb[126].mxu1 }
 0x215   : > { %8550 = vmatprep.mubr.msk.f32.mxu1 %vm9252_vm0, %v12484_v3  ;;  %v2193_v18 = vadd.f32 %v2192_v8, %v10944_v20  ;;  %v8083_v17 = vpop.f32.mrb[111].mxu0  ;;  %v8190_v43 = vpop.f32.mrb[127].mxu1  ;;  %v12491_v20 = vand.u32 4294901760, %v10797_v27 }
 0x216   : > { %8473 = vmatmul.mubr.f32.gmra.mrb[216].mxu0 %v4204_v9 }
 0x217   : > { %8475 = vmatprep.mubr.msk.f32.mxu0 %vm9252_vm0, %v12484_v3  ;;  %v11089_v39 = vadd.f32 %v10922_v5, %v2193_v18  ;;  %v5006_v48 = vsub.f32 %v10797_v27, %v12491_v20  ;;  %v4233_v5 = vsub.f32 %v11068_v32, %v4232_v42  ;;  %v4224_v18 = vand.u32 4294901760, %v4223_v16 }
 0x218   : > { %8551 = vmatmul.mubr.f32.gmra.mrb[232].mxu1 %v4212_v63  ;;  %v12492_v63 = vand.u32 4294901760, %v10802_v57  ;;  %v2392_v15 = vpop.f32.mrb[112].mxu0 }
 0x219   : > { %8553 = vmatprep.mubr.msk.f32.mxu1 %vm9252_vm0, %v12484_v3  ;;  %v2393_v8 = vadd.f32 %v2392_v15, %v10988_v10  ;;  %v8115_v17 = vpop.f32.mrb[113].mxu0  ;;  %v5007_v20 = vand.u32 4294901760, %v5006_v48  ;;  %v4234_v16 = vand.u32 4294901760, %v4233_v5 }
 0x21a   : > { %v5013_v54 = vsub.f32 %v10802_v57, %v12492_v63  ;;  %8476 = vmatmul.mubr.f32.gmra.mrb[218].mxu0 %v4214_v59 }
 0x21b   : > { %v11097_v9 = vpop.f32.mrb[128].mxu1  ;;  %8478 = vmatprep.mubr.msk.f32.mxu0 %vm9252_vm0, %v12484_v3  ;;  %v2502_v34 = vadd.f32 %v10941_v7, %v2393_v8 }
 0x21c   : > { %v8193_v43 = vpop.f32.mrb[129].mxu1  ;;  %8554 = vmatmul.mubr.f32.gmra.mrb[234].mxu1 %v4222_v28  ;;  %v5014_v63 = vand.u32 4294901760, %v5013_v54 }
 0x21d   : > { %8556 = vmatprep.mubr.msk.f32.mxu1 %vm9252_vm0, %v12484_v3  ;;  %v2398_v14 = vpop.f32.mrb[114].mxu0  ;;  %v11110_v15 = vadd.f32 %v2502_v34, %v10720_v26 }
 0x21e   : > { %v2399_v10 = vadd.f32 %v2398_v14, %v11006_v41  ;;  %v8118_v59 = vpop.f32.mrb[115].mxu0  ;;  %8479 = vmatmul.mubr.f32.gmra.mrb[220].mxu0 %v4224_v18  ;;  %v9171_v48 = vpack.c.bf16 %v5014_v63, %v5007_v20 }
 0x21f   : > { %v11106_v56 = vpop.f32.mrb[130].mxu1  ;;  %8481 = vmatprep.mubr.msk.f32.mxu0 %vm9252_vm0, %v12484_v3 }
 0x220   : > { %v8196_v28 = vpop.f32.mrb[131].mxu1  ;;  %8557 = vmatmul.mubr.f32.gmra.mrb[236].mxu1 %v4232_v42  ;;  %v2508_v7 = vadd.f32 %v10970_v36, %v2399_v10 }
 0x221   : > { %8588 = vmatprep.mubr.msk.f32.mxu1 %vm9252_vm0, %v12484_v3  ;;  %v2404_v54 = vpop.f32.mrb[116].mxu0 }
 0x222   : > { %v2405_v14 = vadd.f32 %v2404_v54, %v11023_v55  ;;  %v8121_v41 = vpop.f32.mrb[117].mxu0  ;;  %8482 = vmatmul.mubr.f32.gmra.mrb[222].mxu0 %v4234_v16  ;;  %v11122_v26 = vadd.f32 %v2508_v7, %v10730_v60 }
 0x223   : > { %v11117_v8 = vpop.f32.mrb[132].mxu1  ;;  %8513 = vmatprep.mubr.msk.f32.mxu0 %vm9252_vm0, %v12484_v3 }
 0x224   : > { %v8199_v42 = vpop.f32.mrb[133].mxu1  ;;  %8589 = vmatmul.mubr.f32.vlgmr.msra.gmra.mrb[238].mxu1 %v10848_v21  ;;  %v2514_v36 = vadd.f32 %v10990_v0, %v2405_v14 }
 0x225   : > { %8591 = vmatprep.mubr.msk.f32.mxu1 %vm9252_vm0, %v12484_v3  ;;  %9172 = vmatpush3.bf16.msra.mxu1 %v9171_v48  ;;  %v2410_v17 = vpop.f32.mrb[118].mxu0 }
 0x226   : > { %9176 = vmatprep.subr.bf16.mxu1 %v12479_v2  ;;  %v2411_v55 = vadd.f32 %v2410_v17, %v11042_v11  ;;  %v8124_v5 = vpop.f32.mrb[119].mxu0  ;;  %8514 = vmatmul.mubr.f32.vlgmr.msra.gmra.mrb[224].mxu0 %v10952_v51  ;;  %v11136_v34 = vadd.f32 %v2514_v36, %v10741_v33 }
 0x227   : > { %v11129_v43 = vpop.f32.mrb[134].mxu1  ;;  %9163 = vmatpush3.bf16.msra.mxu0 %v10582_v37  ;;  %8516 = vmatprep.mubr.msk.f32.mxu0 %vm9252_vm0, %v12484_v3  ;;  %v11153_v37 = vld [vmem:[%s12435_s1 + $0x70] sm:$0xff]  ;;  %v4828_v5 = vld [vmem:[%s9330_s10 + $0x1c] sm:$0xff] }
 0x228   : > { %v8202_v60 = vpop.f32.mrb[135].mxu1  ;;  %8592 = vmatmul.mubr.f32.gmra.mrb[240].mxu1 %v10873_v19  ;;  %v2520_v0 = vadd.f32 %v11008_v12, %v2411_v55  ;;  %9167 = vmatprep.subr.bf16.mxu0 %v12479_v2 }
 0x229   : > { %8594 = vmatprep.mubr.msk.f32.mxu1 %vm9252_vm0, %v12484_v3  ;;  %v2416_v11 = vpop.f32.mrb[120].mxu0 }
 0x22a   : > { %v2417_v18 = vadd.f32 %v2416_v11, %v11061_v25  ;;  %v8127_v20 = vpop.f32.mrb[121].mxu0  ;;  %8517 = vmatmul.mubr.f32.gmra.mrb[226].mxu0 %v10982_v49  ;;  %v11156_v12 = vadd.f32 %v2520_v0, %v10753_v38  ;;  %v11165_v49 = vld [vmem:[%s12435_s1 + $0x78] sm:$0xff]  ;;  %v5621_v38 = vand.u32 4294901760, %v11153_v37 }
 0x22b   : > { %v11145_v51 = vpop.f32.mrb[136].mxu1  ;;  %8519 = vmatprep.mubr.msk.f32.mxu0 %vm9252_vm0, %v12484_v3  ;;  %v5624_v48 = vand.u32 4294901760, %v11165_v49  ;;  %v4829_v20 = vld [vmem:[%s9330_s10 + $0x24] sm:$0xff] }
 0x22c   : > { %v8205_v33 = vpop.f32.mrb[137].mxu1  ;;  %8595 = vmatmul.mubr.f32.gmra.mrb[242].mxu1 %v10893_v31  ;;  %v2526_v25 = vadd.f32 %v11026_v61, %v2417_v18 }
 0x22d   : > { %8597 = vmatprep.mubr.msk.f32.mxu1 %vm9252_vm0, %v12484_v3  ;;  %v2422_v63 = vpop.f32.mrb[122].mxu0 }
 0x22e   : > { %v2423_v59 = vadd.f32 %v2422_v63, %v11077_v22  ;;  %v8130_v28 = vpop.f32.mrb[123].mxu0  ;;  %8520 = vmatmul.mubr.f32.gmra.mrb[228].mxu0 %v11002_v53  ;;  %v11175_v16 = vadd.f32 %v2526_v25, %v10778_v24  ;;  %v11188_v53 = vsub.f32 %v11153_v37, %v5621_v38  ;;  %v4827_v24 = vld [vmem:[%s9330_s10 + $0x14] sm:$0xff]  ;;  %v12493_v63 = vld [vmem:[#allocation2_spill] sm:$0xff] }
 0x22f   : > { %v11168_v10 = vpop.f32.mrb[138].mxu1  ;;  %8522 = vmatprep.mubr.msk.f32.mxu0 %vm9252_vm0, %v12484_v3  ;;  %v5592_v37 = vld [vmem:[%s9330_s10 + $0x2d] sm:$0xff] }
 0x230   : > { %v8208_v7 = vpop.f32.mrb[139].mxu1  ;;  %8598 = vmatmul.mubr.f32.gmra.mrb[244].mxu1 %v10916_v4  ;;  %v2532_v61 = vadd.f32 %v11047_v45, %v2423_v59  ;;  %v11200_v45 = vsub.f32 %v11165_v49, %v5624_v48  ;;  %v4836_v59 = vmul.f32 %v4829_v20, %v12493_v63 }
 0x231   : > { %8600 = vmatprep.mubr.msk.f32.mxu1 %vm9252_vm0, %v12484_v3  ;;  %v2428_v22 = vpop.f32.mrb[124].mxu0 }
 0x232   : > { %v11192_v14 = vadd.f32 %v2532_v61, %v10792_v62  ;;  %v2429_v41 = vadd.f32 %v2428_v22, %v11089_v39  ;;  %v8133_v42 = vpop.f32.mrb[125].mxu0  ;;  %8523 = vmatmul.mubr.f32.gmra.mrb[230].mxu0 %v11018_v50  ;;  %v4834_v50 = vmul.f32 %v4827_v24, %v9605_v29  ;;  %v12494_v24 = vand.u32 4294901760, %v10763_v23 }
 0x233   : > { %v11183_v54 = vpop.f32.mrb[140].mxu1  ;;  %8525 = vmatprep.mubr.msk.f32.mxu0 %vm9252_vm0, %v12484_v3  ;;  %v11271_v23 = vsel %vm266_vm1, %v4836_v59, 0 }
 0x234   : > { %v8240_v36 = vpop.f32.mrb[141].mxu1  ;;  %8601 = vmatmul.mubr.f32.gmra.mrb[246].mxu1 %v10935_v30  ;;  %v2538_v62 = vadd.f32 %v11063_v1, %v2429_v41  ;;  %v11226_v29 = vsel %vm266_vm1, %v4834_v50, 0  ;;  %v12495_v41 = vand.u32 4294901760, %v10768_v13  ;;  %v12496_v13 = vld [vmem:[#allocation3_spill] sm:$0xff] }
 0x235   : > { %8603 = vmatprep.mubr.msk.f32.mxu1 %vm9252_vm0, %v12484_v3  ;;  %v2659_v17 = vpop.f32.mrb[126].mxu0 }
 0x236   : > { %v11214_v60 = vadd.f32 %v2538_v62, %v10816_v40  ;;  %v11217_v0 = vadd.f32 %v11079_v58, %v2659_v17  ;;  %v8165_v11 = vpop.f32.mrb[127].mxu0  ;;  %8526 = vmatmul.mubr.f32.gmra.mrb[232].mxu0 %v11032_v35  ;;  %v4835_v40 = vmul.f32 %v4828_v5, %v9617_v44  ;;  %v11242_v44 = vand.u32 4294901760, %v11226_v29  ;;  %v4831_v17 = vld [vmem:[%s9330_s10 + $0x34] sm:$0xff] }
 0x237   : > { %v11210_v55 = vpop.f32.mrb[142].mxu1  ;;  %8528 = vmatprep.mubr.msk.f32.mxu0 %vm9252_vm0, %v12484_v3  ;;  %v11259_v42 = vpack.c.bf16 %v12495_v41, %v12494_v24 }
 0x238   : > { %v8243_v1 = vpop.f32.mrb[143].mxu1  ;;  %8604 = vmatmul.mubr.f32.gmra.mrb[248].mxu1 %v10959_v46 }
 0x239   : > { %8606 = vmatprep.mubr.msk.f32.mxu1 %vm9252_vm0, %v12484_v3  ;;  %v2669_v58 = vpop.f32.mrb[128].mxu0 }
 0x23a   : > { %v11233_v35 = vadd.f32 %v11097_v9, %v2669_v58  ;;  %v8168_v33 = vpop.f32.mrb[129].mxu0  ;;  %8529 = vmatmul.mubr.f32.gmra.mrb[234].mxu0 %v11052_v47  ;;  %v11246_v9 = vsel %vm266_vm1, %v4835_v40, 0  ;;  %v4830_v47 = vld [vmem:[%s9330_s10 + $0x2c] sm:$0xff]  ;;  %v11287_v40 = vand.u32 4294901760, %v11271_v23 }
 0x23b   : > { %v11229_v18 = vpop.f32.mrb[144].mxu1  ;;  %8531 = vmatprep.mubr.msk.f32.mxu0 %vm9252_vm0, %v12484_v3 }
 0x23c   : > { %v8246_v25 = vpop.f32.mrb[145].mxu1  ;;  %8607 = vmatmul.mubr.f32.gmra.mrb[250].mxu1 %v10985_v6 }
 0x23d   : > { %8638 = vmatprep.mubr.msk.f32.mxu1 %vm9252_vm0, %v12484_v3  ;;  %v2679_v28 = vpop.f32.mrb[130].mxu0  ;;  %v4832_v25 = vld [vmem:[%s9330_s10 + $0x3c] sm:$0xff] }
 0x23e   : > { %v11252_v61 = vadd.f32 %v11106_v56, %v2679_v28  ;;  %v8171_v22 = vpop.f32.mrb[131].mxu0  ;;  %8532 = vmatmul.mubr.f32.gmra.mrb[236].mxu0 %v11068_v32  ;;  %v11267_v56 = vand.u32 4294901760, %v11246_v9  ;;  %v4837_v32 = vmul.f32 %v4830_v47, %v12496_v13 }
 0x23f   : > { %v11248_v7 = vpop.f32.mrb[146].mxu1  ;;  %8563 = vmatprep.mubr.msk.f32.mxu0 %vm9252_vm0, %v12484_v3  ;;  %v12498_v22 = vld [vmem:[#allocation4_spill] sm:$0xff] }
 0x240   : > { %v8249_v36 = vpop.f32.mrb[147].mxu1  ;;  %8639 = vmatmul.mubr.f32.vlgmr.msra.gmra.mrb[252].mxu1 %v11242_v44  ;;  %v4839_v24 = vmul.f32 %v4832_v25, %v12498_v22 }
 0x241   : > { %8641 = vmatprep.mubr.msk.f32.mxu1 %vm9252_vm0, %v12484_v3  ;;  %9178 = vmatpush3.bf16.msra.mxu1 %v11259_v42  ;;  %v2689_v62 = vpop.f32.mrb[132].mxu0 }
 0x242   : > { %9182 = vmatprep.subr.bf16.mxu1 %v12479_v2  ;;  %v11279_v5 = vadd.f32 %v11117_v8, %v2689_v62  ;;  %v8174_v11 = vpop.f32.mrb[133].mxu0  ;;  %8564 = vmatmul.mubr.f32.vlgmr.msra.gmra.mrb[238].mxu0 %v10848_v21  ;;  %v11293_v8 = vsel %vm266_vm1, %v4837_v32, 0  ;;  %v12497_v21 = vld [vmem:[#allocation5_spill] sm:$0xff] }
 0x243   : > { %v11274_v50 = vpop.f32.mrb[148].mxu1  ;;  %9169 = vmatpush3.bf16.msra.mxu0 %v11259_v42  ;;  %8566 = vmatprep.mubr.msk.f32.mxu0 %vm9252_vm0, %v12484_v3  ;;  %v4838_v58 = vmul.f32 %v4831_v17, %v12497_v21  ;;  %v11309_v47 = vand.u32 4294901760, %v11293_v8  ;;  %v11331_v11 = vsel %vm266_vm1, %v4839_v24, 0 }
 0x244   : > { %v8252_v1 = vpop.f32.mrb[149].mxu1  ;;  %8642 = vmatmul.mubr.f32.gmra.mrb[254].mxu1 %v11267_v56  ;;  %9173 = vmatprep.subr.bf16.mxu0 %v12479_v2 }
 0x245   : > { %8644 = vmatprep.mubr.msk.f32.mxu1 %vm9252_vm0, %v12484_v3  ;;  %v2699_v20 = vpop.f32.mrb[134].mxu0 }
 0x246   : > { %v11300_v63 = vadd.f32 %v11129_v43, %v2699_v20  ;;  %v8177_v59 = vpop.f32.mrb[135].mxu0  ;;  %8567 = vmatmul.mubr.f32.gmra.mrb[240].mxu0 %v10873_v19  ;;  %v11313_v43 = vsel %vm266_vm1, %v4838_v58, 0  ;;  %v4833_v19 = vld [vmem:[%s9330_s10 + $0x44] sm:$0x1] }
 0x247   : > { %v11296_v33 = vpop.f32.mrb[150].mxu1  ;;  %8569 = vmatprep.mubr.msk.f32.mxu0 %vm9252_vm0, %v12484_v3  ;;  %v11328_v17 = vand.u32 4294901760, %v11313_v43  ;;  %v11347_v59 = vsub.f32 %v11226_v29, %v11242_v44 }
 0x248   : > { %v8255_v28 = vpop.f32.mrb[151].mxu1  ;;  %8645 = vmatmul.mubr.f32.gmra.mrb[0].mxu1 %v11287_v40 }
 0x249   : > { %8647 = vmatprep.mubr.msk.f32.mxu1 %vm9252_vm0, %v12484_v3  ;;  %v2709_v41 = vpop.f32.mrb[136].mxu0  ;;  %v11350_v28 = vand.u32 4294901760, %v11331_v11 }
 0x24a   : > { %v11319_v13 = vadd.f32 %v11145_v51, %v2709_v41  ;;  %v8180_v32 = vpop.f32.mrb[137].mxu0  ;;  %8570 = vmatmul.mubr.f32.gmra.mrb[242].mxu0 %v10893_v31  ;;  %v12499_v51 = vld [vmem:[#allocation7_spill] sm:$0xff] }
 0x24b   : > { %v11315_v36 = vpop.f32.mrb[152].mxu1  ;;  %8572 = vmatprep.mubr.msk.f32.mxu0 %vm9252_vm0, %v12484_v3  ;;  %v4840_v1 = vmul.f32 %v4833_v19, %v12499_v51 }
 0x24c   : > { %v8258_v62 = vpop.f32.mrb[153].mxu1  ;;  %8648 = vmatmul.mubr.f32.gmra.mrb[2].mxu1 %v11309_v47 }
 0x24d   : > { %8650 = vmatprep.mubr.msk.f32.mxu1 %vm9252_vm0, %v12484_v3  ;;  %v2719_v21 = vpop.f32.mrb[138].mxu0  ;;  %v11355_v22 = vsel %vm266_vm1, %v4840_v1, 0 }
 0x24e   : > { %v11337_v31 = vadd.f32 %v11168_v10, %v2719_v21  ;;  %v8183_v20 = vpop.f32.mrb[139].mxu0  ;;  %8573 = vmatmul.mubr.f32.gmra.mrb[244].mxu0 %v10916_v4  ;;  %v5760_v10 = vand.u32 4294901760, %v11188_v53  ;;  %v5767_v4 = vand.u32 4294901760, %v11200_v45  ;;  %v11378_v51 = vand.u32 4294901760, %v11355_v22 }
 0x24f   : > { %v11334_v58 = vpop.f32.mrb[154].mxu1  ;;  %8575 = vmatprep.mubr.msk.f32.mxu0 %vm9252_vm0, %v12484_v3 }
 0x250   : > { %v8290_v25 = vpop.f32.mrb[155].mxu1  ;;  %8651 = vmatmul.mubr.f32.gmra.mrb[4].mxu1 %v11328_v17  ;;  %v11366_v62 = vpack.c.bf16 %v5767_v4, %v5760_v10 }
 0x251   : > { %8653 = vmatprep.mubr.msk.f32.mxu1 %vm9252_vm0, %v12484_v3  ;;  %v2912_v24 = vpop.f32.mrb[140].mxu0 }
 0x252   : > { %v2913_v19 = vadd.f32 %v2912_v24, %v11217_v0  ;;  %v8215_v32 = vpop.f32.mrb[141].mxu0  ;;  %8576 = vmatmul.mubr.f32.gmra.mrb[246].mxu0 %v10935_v30  ;;  %v4934_v0 = vand.u32 4294901760, %v11347_v59  ;;  %v11375_v30 = vsub.f32 %v11246_v9, %v11267_v56  ;;  %v11390_v9 = vsub.f32 %v11271_v23, %v11287_v40 }
 0x253   : > { %v11357_v41 = vpop.f32.mrb[156].mxu1  ;;  %8578 = vmatprep.mubr.msk.f32.mxu0 %vm9252_vm0, %v12484_v3 }
 0x254   : > { %v8293_v29 = vpop.f32.mrb[157].mxu1  ;;  %8654 = vmatmul.mubr.f32.gmra.mrb[6].mxu1 %v11350_v28  ;;  %v11381_v1 = vadd.f32 %v11183_v54, %v2913_v19  ;;  %v4935_v54 = vsub.f32 %v11347_v59, %v4934_v0 }
 0x255   : > { %8656 = vmatprep.mubr.msk.f32.mxu1 %vm9252_vm0, %v12484_v3  ;;  %v2919_v21 = vpop.f32.mrb[142].mxu0 }
 0x256   : > { %v2920_v25 = vadd.f32 %v2919_v21, %v11233_v35  ;;  %v8218_v24 = vpop.f32.mrb[143].mxu0  ;;  %8579 = vmatmul.mubr.f32.gmra.mrb[248].mxu0 %v10959_v46  ;;  %v4944_v35 = vand.u32 4294901760, %v11375_v30 }
 0x257   : > { %v11383_v20 = vpop.f32.mrb[158].mxu1  ;;  %8581 = vmatprep.mubr.msk.f32.mxu0 %vm9252_vm0, %v12484_v3 }
 0x258   : > { %v8296_v32 = vpop.f32.mrb[159].mxu1  ;;  %8657 = vmatmul.mubr.f32.gmra.mrb[8].mxu1 %v11378_v51  ;;  %v11399_v19 = vadd.f32 %v11210_v55, %v2920_v25  ;;  %v4936_v55 = vand.u32 4294901760, %v4935_v54  ;;  %v11412_v25 = vsub.f32 %v11293_v8, %v11309_v47  ;;  %v11425_v8 = vsub.f32 %v11313_v43, %v11328_v17 }
 0x259   : > { %8688 = vmatprep.mubr.msk.f32.mxu1 %vm9252_vm0, %v12484_v3  ;;  %v2926_v46 = vpop.f32.mrb[144].mxu0  ;;  %v4954_v32 = vand.u32 4294901760, %v11390_v9 }
 0x25a   : > { %v2927_v21 = vadd.f32 %v2926_v46, %v11252_v61  ;;  %v8221_v23 = vpop.f32.mrb[145].mxu0  ;;  %8582 = vmatmul.mubr.f32.gmra.mrb[250].mxu0 %v10985_v6  ;;  %v4945_v61 = vsub.f32 %v11375_v30, %v4944_v35 }
 0x25b   : > { %v11401_v29 = vpop.f32.mrb[160].mxu1  ;;  %8613 = vmatprep.mubr.msk.f32.mxu0 %vm9252_vm0, %v12484_v3 }
 0x25c   : > { %v8299_v24 = vpop.f32.mrb[161].mxu1  ;;  %8689 = vmatmul.mubr.f32.vlgmr.msra.gmra.mrb[10].mxu1 %v4934_v0  ;;  %v11416_v46 = vadd.f32 %v11229_v18, %v2927_v21  ;;  %v12500_v18 = vpack.c.bf16 %v10802_v57, %v10797_v27  ;;  %v4964_v21 = vand.u32 4294901760, %v11412_v25 }
 0x25d   : > { %8691 = vmatprep.mubr.msk.f32.mxu1 %vm9252_vm0, %v12484_v3  ;;  %9184 = vmatpush3.bf16.msra.mxu1 %v11259_v42  ;;  %v2933_v6 = vpop.f32.mrb[146].mxu0  ;;  %v4955_v42 = vsub.f32 %v11390_v9, %v4954_v32 }
 0x25e   : > { %9188 = vmatprep.subr.bf16.mxu1 %v12479_v2  ;;  %v2934_v23 = vadd.f32 %v2933_v6, %v11279_v5  ;;  %v8224_v24 = vpop.f32.mrb[147].mxu0  ;;  %8614 = vmatmul.mubr.f32.vlgmr.msra.gmra.mrb[252].mxu0 %v4936_v55  ;;  %v4946_v5 = vand.u32 4294901760, %v4945_v61  ;;  %v11445_v61 = vsub.f32 %v11331_v11, %v11350_v28 }
 0x25f   : > { %v11419_v0 = vpop.f32.mrb[162].mxu1  ;;  %9175 = vmatpush3.bf16.msra.mxu0 %v12500_v18  ;;  %8616 = vmatprep.mubr.msk.f32.mxu0 %vm9252_vm0, %v12484_v3  ;;  %v4965_v24 = vsub.f32 %v11412_v25, %v4964_v21 }
 0x260   : > { %v8302_v54 = vpop.f32.mrb[163].mxu1  ;;  %8692 = vmatmul.mubr.f32.gmra.mrb[12].mxu1 %v4944_v35  ;;  %v11435_v55 = vadd.f32 %v11248_v7, %v2934_v23  ;;  %9179 = vmatprep.subr.bf16.mxu0 %v12479_v2  ;;  %v4974_v7 = vand.u32 4294901760, %v11425_v8  ;;  %v4956_v23 = vand.u32 4294901760, %v4955_v42  ;;  %v11467_v42 = vsub.f32 %v11355_v22, %v11378_v51 }
 0x261   : > { %8694 = vmatprep.mubr.msk.f32.mxu1 %vm9252_vm0, %v12484_v3  ;;  %v2940_v43 = vpop.f32.mrb[148].mxu0 }
 0x262   : > { %v2941_v27 = vadd.f32 %v2940_v43, %v11300_v63  ;;  %v8227_v57 = vpop.f32.mrb[149].mxu0  ;;  %8617 = vmatmul.mubr.f32.gmra.mrb[254].mxu0 %v4946_v5  ;;  %v4984_v43 = vand.u32 4294901760, %v11445_v61 }
 0x263   : > { %v11440_v35 = vpop.f32.mrb[164].mxu1  ;;  %8619 = vmatprep.mubr.msk.f32.mxu0 %vm9252_vm0, %v12484_v3  ;;  %v4975_v57 = vsub.f32 %v11425_v8, %v4974_v7 }
 0x264   : > { %v8305_v6 = vpop.f32.mrb[165].mxu1  ;;  %8695 = vmatmul.mubr.f32.gmra.mrb[14].mxu1 %v4954_v32  ;;  %v11454_v63 = vadd.f32 %v11274_v50, %v2941_v27  ;;  %v4966_v50 = vand.u32 4294901760, %v4965_v24 }
 0x265   : > { %8697 = vmatprep.mubr.msk.f32.mxu1 %vm9252_vm0, %v12484_v3  ;;  %v2947_v54 = vpop.f32.mrb[150].mxu0 }
 0x266   : > { %v2948_v11 = vadd.f32 %v2947_v54, %v11319_v13  ;;  %v8230_v18 = vpop.f32.mrb[151].mxu0  ;;  %8620 = vmatmul.mubr.f32.gmra.mrb[0].mxu0 %v4956_v23 }
 0x267   : > { %v11456_v32 = vpop.f32.mrb[166].mxu1  ;;  %8622 = vmatprep.mubr.msk.f32.mxu0 %vm9252_vm0, %v12484_v3  ;;  %v4985_v18 = vsub.f32 %v11445_v61, %v4984_v43 }
 0x268   : > { %v8308_v5 = vpop.f32.mrb[167].mxu1  ;;  %8698 = vmatmul.mubr.f32.gmra.mrb[16].mxu1 %v4964_v21  ;;  %v11470_v13 = vadd.f32 %v11296_v33, %v2948_v11  ;;  %v4994_v33 = vand.u32 4294901760, %v11467_v42 }
 0x269   : > { %8700 = vmatprep.mubr.msk.f32.mxu1 %vm9252_vm0, %v12484_v3  ;;  %v2954_v27 = vpop.f32.mrb[152].mxu0  ;;  %v4976_v5 = vand.u32 4294901760, %v4975_v57 }
 0x26a   : > { %v2955_v6 = vadd.f32 %v2954_v27, %v11337_v31  ;;  %v8233_v23 = vpop.f32.mrb[153].mxu0  ;;  %8623 = vmatmul.mubr.f32.gmra.mrb[2].mxu0 %v4966_v50  ;;  %v5761_v31 = vsub.f32 %v11188_v53, %v5760_v10 }
 0x26b   : > { %v11472_v21 = vpop.f32.mrb[168].mxu1  ;;  %8625 = vmatprep.mubr.msk.f32.mxu0 %vm9252_vm0, %v12484_v3  ;;  %v4986_v23 = vand.u32 4294901760, %v4985_v18 }
 0x26c   : > { %8701 = vmatmul.mubr.f32.gmra.mrb[18].mxu1 %v4974_v7  ;;  %v8340_v54 = vpop.f32.mrb[169].mxu1  ;;  %v11482_v22 = vadd.f32 %v11315_v36, %v2955_v6  ;;  %v5768_v7 = vsub.f32 %v11200_v45, %v5767_v4  ;;  %v4995_v36 = vsub.f32 %v11467_v42, %v4994_v33  ;;  %v5762_v4 = vand.u32 4294901760, %v5761_v31 }
 0x26d   : > { %8703 = vmatprep.mubr.msk.f32.mxu1 %vm9252_vm0, %v12484_v3  ;;  %v3154_v24 = vpop.f32.mrb[154].mxu0 }
 0x26e   : > { %v3155_v57 = vadd.f32 %v3154_v24, %v11381_v1  ;;  %v8265_v50 = vpop.f32.mrb[155].mxu0  ;;  %8626 = vmatmul.mubr.f32.gmra.mrb[4].mxu0 %v4976_v5  ;;  %v5769_v6 = vand.u32 4294901760, %v5768_v7 }
 0x26f   : > { %v11490_v11 = vpop.f32.mrb[170].mxu1  ;;  %8628 = vmatprep.mubr.msk.f32.mxu0 %vm9252_vm0, %v12484_v3 }
 0x270   : > { %8704 = vmatmul.mubr.f32.gmra.mrb[20].mxu1 %v4984_v43  ;;  %v8343_v27 = vpop.f32.mrb[171].mxu1  ;;  %v3264_v10 = vadd.f32 %v11334_v58, %v3155_v57  ;;  %v4996_v58 = vand.u32 4294901760, %v4995_v36  ;;  %v9189_v7 = vpack.c.bf16 %v5769_v6, %v5762_v4 }
 0x271   : > { %8706 = vmatprep.mubr.msk.f32.mxu1 %vm9252_vm0, %v12484_v3  ;;  %v3160_v54 = vpop.f32.mrb[156].mxu0 }
 0x272   : > { %v3161_v1 = vadd.f32 %v3160_v54, %v11399_v19  ;;  %v8268_v43 = vpop.f32.mrb[157].mxu0  ;;  %8629 = vmatmul.mubr.f32.gmra.mrb[6].mxu0 %v4986_v23  ;;  %v11503_v5 = vadd.f32 %v3264_v10, %v11110_v15 }
 0x273   : > { %v11499_v39 = vpop.f32.mrb[172].mxu1  ;;  %8631 = vmatprep.mubr.msk.f32.mxu0 %vm9252_vm0, %v12484_v3 }
 0x274   : > { %8707 = vmatmul.mubr.f32.gmra.mrb[22].mxu1 %v4994_v33  ;;  %v8346_v18 = vpop.f32.mrb[173].mxu1  ;;  %v3270_v31 = vadd.f32 %v11357_v41, %v3161_v1 }
 0x275   : > { %8738 = vmatprep.mubr.msk.f32.mxu1 %vm9252_vm0, %v12484_v3  ;;  %v3166_v24 = vpop.f32.mrb[158].mxu0 }
 0x276   : > { %v3167_v19 = vadd.f32 %v3166_v24, %v11416_v46  ;;  %v8271_v33 = vpop.f32.mrb[159].mxu0  ;;  %8632 = vmatmul.mubr.f32.gmra.mrb[8].mxu0 %v4996_v58  ;;  %v11515_v50 = vadd.f32 %v3270_v31, %v11122_v26 }
 0x277   : > { %v11510_v57 = vpop.f32.mrb[174].mxu1  ;;  %8663 = vmatprep.mubr.msk.f32.mxu0 %vm9252_vm0, %v12484_v3 }
 0x278   : > { %8739 = vmatmul.mubr.f32.vlgmr.msra.gmra.mrb[24].mxu1 %v11242_v44  ;;  %v8349_v15 = vpop.f32.mrb[175].mxu1  ;;  %v3276_v41 = vadd.f32 %v11383_v20, %v3167_v19 }
 0x279   : > { %8741 = vmatprep.mubr.msk.f32.mxu1 %vm9252_vm0, %v12484_v3  ;;  %9190 = vmatpush3.bf16.msra.mxu1 %v9189_v7  ;;  %v3172_v27 = vpop.f32.mrb[160].mxu0 }
 0x27a   : > { %9194 = vmatprep.subr.bf16.mxu1 %v12479_v2  ;;  %v3173_v46 = vadd.f32 %v3172_v27, %v11435_v55  ;;  %v8274_v36 = vpop.f32.mrb[161].mxu0  ;;  %8664 = vmatmul.mubr.f32.vlgmr.msra.gmra.mrb[10].mxu0 %v11347_v59  ;;  %v11529_v10 = vadd.f32 %v3276_v41, %v11136_v34  ;;  %v11543_v34 = vld [vmem:[%s12435_s1 + $0x80] sm:$0xff]  ;;  %v5589_v27 = vld [vmem:[%s9330_s10 + $0x15] sm:$0xff] }
 0x27b   : > { %v11522_v23 = vpop.f32.mrb[176].mxu1  ;;  %9181 = vmatpush3.bf16.msra.mxu0 %v10965_v52  ;;  %8666 = vmatprep.mubr.msk.f32.mxu0 %vm9252_vm0, %v12484_v3  ;;  %v11548_v52 = vld [vmem:[%s12435_s1 + $0x88] sm:$0xff]  ;;  %v6383_v43 = vand.u32 4294901760, %v11543_v34 }
 0x27c   : > { %8742 = vmatmul.mubr.f32.gmra.mrb[26].mxu1 %v11267_v56  ;;  %v8352_v26 = vpop.f32.mrb[177].mxu1  ;;  %v3282_v20 = vadd.f32 %v11401_v29, %v3173_v46  ;;  %9185 = vmatprep.subr.bf16.mxu0 %v12479_v2 }
 0x27d   : > { %8744 = vmatprep.mubr.msk.f32.mxu1 %vm9252_vm0, %v12484_v3  ;;  %v3178_v55 = vpop.f32.mrb[162].mxu0 }
 0x27e   : > { %v3179_v29 = vadd.f32 %v3178_v55, %v11454_v63  ;;  %v8277_v4 = vpop.f32.mrb[163].mxu0  ;;  %8667 = vmatmul.mubr.f32.gmra.mrb[12].mxu0 %v11375_v30  ;;  %v11554_v54 = vadd.f32 %v3282_v20, %v11156_v12  ;;  %v12464_v63 = vand.u32 4294901760, %v11548_v52 }
 0x27f   : > { %v11538_v59 = vpop.f32.mrb[178].mxu1  ;;  %8669 = vmatprep.mubr.msk.f32.mxu0 %vm9252_vm0, %v12484_v3 }
 0x280   : > { %8745 = vmatmul.mubr.f32.gmra.mrb[28].mxu1 %v11287_v40  ;;  %v8355_v6 = vpop.f32.mrb[179].mxu1  ;;  %v3288_v1 = vadd.f32 %v11419_v0, %v3179_v29 }
 0x281   : > { %8747 = vmatprep.mubr.msk.f32.mxu1 %vm9252_vm0, %v12484_v3  ;;  %v3184_v18 = vpop.f32.mrb[164].mxu0 }
 0x282   : > { %v11566_v58 = vadd.f32 %v3288_v1, %v11175_v16  ;;  %v3185_v12 = vadd.f32 %v3184_v18, %v11470_v13  ;;  %v8280_v31 = vpop.f32.mrb[165].mxu0  ;;  %8670 = vmatmul.mubr.f32.gmra.mrb[14].mxu0 %v11390_v9  ;;  %v11579_v16 = vsub.f32 %v11543_v34, %v6383_v43  ;;  %v11584_v9 = vsub.f32 %v11548_v52, %v12464_v63 }
 0x283   : > { %v11563_v30 = vpop.f32.mrb[180].mxu1  ;;  %8672 = vmatprep.mubr.msk.f32.mxu0 %vm9252_vm0, %v12484_v3 }
 0x284   : > { %8748 = vmatmul.mubr.f32.gmra.mrb[30].mxu1 %v11309_v47  ;;  %v8358_v7 = vpop.f32.mrb[181].mxu1  ;;  %v3294_v0 = vadd.f32 %v11440_v35, %v3185_v12 }
 0x285   : > { %8750 = vmatprep.mubr.msk.f32.mxu1 %vm9252_vm0, %v12484_v3  ;;  %v3190_v13 = vpop.f32.mrb[166].mxu0  ;;  %v11648_v7 = vpack.c.bf16 %v5624_v48, %v5621_v38 }
 0x286   : > { %v11589_v19 = vadd.f32 %v3294_v0, %v11192_v14  ;;  %v3191_v33 = vadd.f32 %v3190_v13, %v11482_v22  ;;  %v8283_v15 = vpop.f32.mrb[167].mxu0  ;;  %8673 = vmatmul.mubr.f32.gmra.mrb[16].mxu0 %v11412_v25 }
 0x287   : > { %v11586_v24 = vpop.f32.mrb[182].mxu1  ;;  %8675 = vmatprep.mubr.msk.f32.mxu0 %vm9252_vm0, %v12484_v3 }
 0x288   : > { %8751 = vmatmul.mubr.f32.gmra.mrb[32].mxu1 %v11328_v17  ;;  %v8390_v35 = vpop.f32.mrb[183].mxu1  ;;  %v3300_v14 = vadd.f32 %v11456_v32, %v3191_v33  ;;  %v11617_v32 = vsel %vm266_vm1, %v5589_v27, 0 }
 0x289   : > { %8753 = vmatprep.mubr.msk.f32.mxu1 %vm9252_vm0, %v12484_v3  ;;  %v3414_v22 = vpop.f32.mrb[168].mxu0  ;;  %v11628_v4 = vand.u32 4294901760, %v11617_v32  ;;  %v11678_v35 = vsel %vm266_vm1, %v5592_v37, 0 }
 0x28a   : > { %v11605_v25 = vadd.f32 %v3300_v14, %v11214_v60  ;;  %v11608_v36 = vadd.f32 %v11472_v21, %v3414_v22  ;;  %v8315_v26 = vpop.f32.mrb[169].mxu0  ;;  %8676 = vmatmul.mubr.f32.gmra.mrb[18].mxu0 %v11425_v8  ;;  %v5590_v60 = vld [vmem:[%s9330_s10 + $0x1d] sm:$0xff] }
 0x28b   : > { %v11602_v46 = vpop.f32.mrb[184].mxu1  ;;  %8678 = vmatprep.mubr.msk.f32.mxu0 %vm9252_vm0, %v12484_v3  ;;  %v11635_v1 = vsel %vm266_vm1, %v5590_v60, 0  ;;  %v11692_v26 = vand.u32 4294901760, %v11678_v35 }
 0x28c   : > { %8754 = vmatmul.mubr.f32.gmra.mrb[34].mxu1 %v11350_v28  ;;  %v8393_v20 = vpop.f32.mrb[185].mxu1  ;;  %v11652_v0 = vand.u32 4294901760, %v11635_v1 }
 0x28d   : > { %8756 = vmatprep.mubr.msk.f32.mxu1 %vm9252_vm0, %v12484_v3  ;;  %v3424_v55 = vpop.f32.mrb[170].mxu0 }
 0x28e   : > { %v11623_v29 = vadd.f32 %v11490_v11, %v3424_v55  ;;  %v8318_v8 = vpop.f32.mrb[171].mxu0  ;;  %8679 = vmatmul.mubr.f32.gmra.mrb[20].mxu0 %v11445_v61  ;;  %v5591_v11 = vld [vmem:[%s9330_s10 + $0x25] sm:$0xff] }
 0x28f   : > { %v11620_v21 = vpop.f32.mrb[186].mxu1  ;;  %8681 = vmatprep.mubr.msk.f32.mxu0 %vm9252_vm0, %v12484_v3 }
 0x290   : > { %8757 = vmatmul.mubr.f32.gmra.mrb[36].mxu1 %v11378_v51  ;;  %v8396_v6 = vpop.f32.mrb[187].mxu1 }
 0x291   : > { %8788 = vmatprep.mubr.msk.f32.mxu1 %vm9252_vm0, %v12484_v3  ;;  %v3434_v18 = vpop.f32.mrb[172].mxu0 }
 0x292   : > { %v11641_v61 = vadd.f32 %v11499_v39, %v3434_v18  ;;  %v8321_v31 = vpop.f32.mrb[173].mxu0  ;;  %8682 = vmatmul.mubr.f32.gmra.mrb[22].mxu0 %v11467_v42  ;;  %v11659_v39 = vsel %vm266_vm1, %v5591_v11, 0 }
 0x293   : > { %v11638_v12 = vpop.f32.mrb[188].mxu1  ;;  %8713 = vmatprep.mubr.msk.f32.mxu0 %vm9252_vm0, %v12484_v3  ;;  %v11672_v33 = vand.u32 4294901760, %v11659_v39 }
 0x294   : > { %8789 = vmatmul.mubr.f32.vlgmr.msra.gmra.mrb[38].mxu1 %v11628_v4  ;;  %v8399_v13 = vpop.f32.mrb[189].mxu1 }
 0x295   : > { %8791 = vmatprep.mubr.msk.f32.mxu1 %vm9252_vm0, %v12484_v3  ;;  %9196 = vmatpush3.bf16.msra.mxu1 %v11648_v7  ;;  %v3444_v49 = vpop.f32.mrb[174].mxu0 }
 0x296   : > { %9200 = vmatprep.subr.bf16.mxu1 %v12479_v2  ;;  %v11667_v48 = vadd.f32 %v11510_v57, %v3444_v49  ;;  %v8324_v42 = vpop.f32.mrb[175].mxu0  ;;  %8714 = vmatmul.mubr.f32.vlgmr.msra.gmra.mrb[24].mxu0 %v11242_v44  ;;  %v5593_v44 = vld [vmem:[%s9330_s10 + $0x35] sm:$0xff] }
 0x297   : > { %v11663_v38 = vpop.f32.mrb[190].mxu1  ;;  %9187 = vmatpush3.bf16.msra.mxu0 %v11648_v7  ;;  %8716 = vmatprep.mubr.msk.f32.mxu0 %vm9252_vm0, %v12484_v3  ;;  %v11699_v60 = vsel %vm266_vm1, %v5593_v44, 0  ;;  %v11728_v42 = vsub.f32 %v11617_v32, %v11628_v4  ;;  %v6529_v32 = vand.u32 4294901760, %v11584_v9 }
 0x298   : > { %8792 = vmatmul.mubr.f32.gmra.mrb[40].mxu1 %v11652_v0  ;;  %v8402_v15 = vpop.f32.mrb[191].mxu1  ;;  %9191 = vmatprep.subr.bf16.mxu0 %v12479_v2  ;;  %v11710_v11 = vand.u32 4294901760, %v11699_v60 }
 0x299   : > { %8794 = vmatprep.mubr.msk.f32.mxu1 %vm9252_vm0, %v12484_v3  ;;  %v3454_v57 = vpop.f32.mrb[176].mxu0 }
 0x29a   : > { %v11687_v27 = vadd.f32 %v11522_v23, %v3454_v57  ;;  %v8327_v22 = vpop.f32.mrb[177].mxu0  ;;  %8717 = vmatmul.mubr.f32.gmra.mrb[26].mxu0 %v11267_v56  ;;  %v5594_v23 = vld [vmem:[%s9330_s10 + $0x3d] sm:$0xff] }
 0x29b   : > { %v11684_v14 = vpop.f32.mrb[192].mxu1  ;;  %8719 = vmatprep.mubr.msk.f32.mxu0 %vm9252_vm0, %v12484_v3  ;;  %v11717_v31 = vsel %vm266_vm1, %v5594_v23, 0  ;;  %v11745_v22 = vsub.f32 %v11635_v1, %v11652_v0 }
 0x29c   : > { %8795 = vmatmul.mubr.f32.gmra.mrb[42].mxu1 %v11672_v33  ;;  %v8405_v20 = vpop.f32.mrb[193].mxu1  ;;  %v11732_v15 = vand.u32 4294901760, %v11717_v31 }
 0x29d   : > { %8797 = vmatprep.mubr.msk.f32.mxu1 %vm9252_vm0, %v12484_v3  ;;  %v3464_v55 = vpop.f32.mrb[178].mxu0 }
 0x29e   : > { %v11705_v56 = vadd.f32 %v11538_v59, %v3464_v55  ;;  %v8330_v6 = vpop.f32.mrb[179].mxu0  ;;  %8720 = vmatmul.mubr.f32.gmra.mrb[28].mxu0 %v11287_v40  ;;  %v5595_v59 = vld [vmem:[%s9330_s10 + $0x45] sm:$0x1] }
 0x29f   : > { %v11702_v8 = vpop.f32.mrb[194].mxu1  ;;  %8722 = vmatprep.mubr.msk.f32.mxu0 %vm9252_vm0, %v12484_v3  ;;  %v5689_v6 = vand.u32 4294901760, %v11728_v42 }
 0x2a0   : > { %8798 = vmatmul.mubr.f32.gmra.mrb[44].mxu1 %v11692_v26  ;;  %v8408_v18 = vpop.f32.mrb[195].mxu1 }
 0x2a1   : > { %8800 = vmatprep.mubr.msk.f32.mxu1 %vm9252_vm0, %v12484_v3  ;;  %v3474_v13 = vpop.f32.mrb[180].mxu0 }
 0x2a2   : > { %v11723_v40 = vadd.f32 %v11563_v30, %v3474_v13  ;;  %v8333_v49 = vpop.f32.mrb[181].mxu0  ;;  %8723 = vmatmul.mubr.f32.gmra.mrb[30].mxu0 %v11309_v47  ;;  %v11739_v30 = vsel %vm266_vm1, %v5595_v59, 0  ;;  %v6522_v47 = vand.u32 4294901760, %v11579_v16 }
 0x2a3   : > { %v11720_v37 = vpop.f32.mrb[196].mxu1  ;;  %8725 = vmatprep.mubr.msk.f32.mxu0 %vm9252_vm0, %v12484_v3  ;;  %v11754_v18 = vand.u32 4294901760, %v11739_v30 }
 0x2a4   : > { %8801 = vmatmul.mubr.f32.gmra.mrb[46].mxu1 %v11710_v11  ;;  %v8440_v44 = vpop.f32.mrb[197].mxu1  ;;  %v11760_v1 = vpack.c.bf16 %v6529_v32, %v6522_v47 }
 0x2a5   : > { %8803 = vmatprep.mubr.msk.f32.mxu1 %vm9252_vm0, %v12484_v3  ;;  %v3667_v57 = vpop.f32.mrb[182].mxu0 }
 0x2a6   : > { %v3668_v23 = vadd.f32 %v3667_v57, %v11608_v36  ;;  %v8365_v55 = vpop.f32.mrb[183].mxu0  ;;  %8726 = vmatmul.mubr.f32.gmra.mrb[32].mxu0 %v11328_v17  ;;  %v5690_v57 = vsub.f32 %v11728_v42, %v5689_v6 }
 0x2a7   : > { %v11747_v20 = vpop.f32.mrb[198].mxu1  ;;  %8728 = vmatprep.mubr.msk.f32.mxu0 %vm9252_vm0, %v12484_v3  ;;  %v11776_v55 = vsub.f32 %v11659_v39, %v11672_v33 }
 0x2a8   : > { %8804 = vmatmul.mubr.f32.gmra.mrb[48].mxu1 %v11732_v15  ;;  %v8443_v59 = vpop.f32.mrb[199].mxu1  ;;  %v11767_v17 = vadd.f32 %v11586_v24, %v3668_v23  ;;  %v11789_v23 = vsub.f32 %v11678_v35, %v11692_v26 }
 0x2a9   : > { %8806 = vmatprep.mubr.msk.f32.mxu1 %vm9252_vm0, %v12484_v3  ;;  %v3674_v36 = vpop.f32.mrb[184].mxu0  ;;  %v5699_v59 = vand.u32 4294901760, %v11745_v22  ;;  %v5709_v63 = vand.u32 4294901760, %v11776_v55 }
 0x2aa   : > { %v3675_v49 = vadd.f32 %v3674_v36, %v11623_v29  ;;  %v8368_v44 = vpop.f32.mrb[185].mxu0  ;;  %8729 = vmatmul.mubr.f32.gmra.mrb[34].mxu0 %v11350_v28 }
 0x2ab   : > { %v11769_v13 = vpop.f32.mrb[200].mxu1  ;;  %8731 = vmatprep.mubr.msk.f32.mxu0 %vm9252_vm0, %v12484_v3  ;;  %v5700_v41 = vsub.f32 %v11745_v22, %v5699_v59 }
 0x2ac   : > { %8807 = vmatmul.mubr.f32.gmra.mrb[50].mxu1 %v11754_v18  ;;  %v8446_v24 = vpop.f32.mrb[201].mxu1  ;;  %v11785_v29 = vadd.f32 %v11602_v46, %v3675_v49 }
 0x2ad   : > { %8838 = vmatprep.mubr.msk.f32.mxu1 %vm9252_vm0, %v12484_v3  ;;  %v3681_v28 = vpop.f32.mrb[186].mxu0  ;;  %v5691_v24 = vand.u32 4294901760, %v5690_v57 }
 0x2ae   : > { %v3682_v36 = vadd.f32 %v3681_v28, %v11641_v61  ;;  %v8371_v44 = vpop.f32.mrb[187].mxu0  ;;  %8732 = vmatmul.mubr.f32.gmra.mrb[36].mxu0 %v11378_v51  ;;  %v5719_v51 = vand.u32 4294901760, %v11789_v23  ;;  %v5701_v28 = vand.u32 4294901760, %v5700_v41 }
 0x2af   : > { %v11791_v39 = vpop.f32.mrb[202].mxu1  ;;  %8763 = vmatprep.mubr.msk.f32.mxu0 %vm9252_vm0, %v12484_v3  ;;  %v5710_v44 = vsub.f32 %v11776_v55, %v5709_v63 }
 0x2b0   : > { %8839 = vmatmul.mubr.f32.vlgmr.msra.gmra.mrb[52].mxu1 %v5689_v6  ;;  %v8449_v46 = vpop.f32.mrb[203].mxu1  ;;  %v11802_v35 = vadd.f32 %v11620_v21, %v3682_v36  ;;  %v11813_v21 = vsub.f32 %v11699_v60, %v11710_v11  ;;  %v12501_v36 = vpack.c.bf16 %v11200_v45, %v11188_v53  ;;  %v5720_v60 = vsub.f32 %v11789_v23, %v5719_v51 }
 0x2b1   : > { %8841 = vmatprep.mubr.msk.f32.mxu1 %vm9252_vm0, %v12484_v3  ;;  %9202 = vmatpush3.bf16.msra.mxu1 %v11648_v7  ;;  %v3688_v61 = vpop.f32.mrb[188].mxu0  ;;  %v5711_v45 = vand.u32 4294901760, %v5710_v44  ;;  %v11832_v46 = vsub.f32 %v11717_v31, %v11732_v15 }
 0x2b2   : > { %9206 = vmatprep.subr.bf16.mxu1 %v12479_v2  ;;  %v3689_v6 = vadd.f32 %v3688_v61, %v11667_v48  ;;  %v8374_v57 = vpop.f32.mrb[189].mxu0  ;;  %8764 = vmatmul.mubr.f32.vlgmr.msra.gmra.mrb[38].mxu0 %v5691_v24 }
 0x2b3   : > { %v11806_v49 = vpop.f32.mrb[204].mxu1  ;;  %9193 = vmatpush3.bf16.msra.mxu0 %v12501_v36  ;;  %8766 = vmatprep.mubr.msk.f32.mxu0 %vm9252_vm0, %v12484_v3  ;;  %v5721_v57 = vand.u32 4294901760, %v5720_v60  ;;  %v5739_v36 = vand.u32 4294901760, %v11832_v46 }
 0x2b4   : > { %8842 = vmatmul.mubr.f32.gmra.mrb[54].mxu1 %v5699_v59  ;;  %v8452_v7 = vpop.f32.mrb[205].mxu1  ;;  %v11821_v48 = vadd.f32 %v11638_v12, %v3689_v6  ;;  %9197 = vmatprep.subr.bf16.mxu0 %v12479_v2  ;;  %v5729_v12 = vand.u32 4294901760, %v11813_v21 }
 0x2b5   : > { %8844 = vmatprep.mubr.msk.f32.mxu1 %vm9252_vm0, %v12484_v3  ;;  %v3695_v41 = vpop.f32.mrb[190].mxu0  ;;  %v11848_v7 = vsub.f32 %v11739_v30, %v11754_v18 }
 0x2b6   : > { %v3696_v24 = vadd.f32 %v3695_v41, %v11687_v27  ;;  %v8377_v53 = vpop.f32.mrb[191].mxu0  ;;  %8767 = vmatmul.mubr.f32.gmra.mrb[40].mxu0 %v5701_v28 }
 0x2b7   : > { %v11827_v59 = vpop.f32.mrb[206].mxu1  ;;  %8769 = vmatprep.mubr.msk.f32.mxu0 %vm9252_vm0, %v12484_v3 }
 0x2b8   : > { %8845 = vmatmul.mubr.f32.gmra.mrb[56].mxu1 %v5709_v63  ;;  %v8455_v61 = vpop.f32.mrb[207].mxu1  ;;  %v11840_v6 = vadd.f32 %v11663_v38, %v3696_v24  ;;  %v5730_v63 = vsub.f32 %v11813_v21, %v5729_v12 }
 0x2b9   : > { %8847 = vmatprep.mubr.msk.f32.mxu1 %vm9252_vm0, %v12484_v3  ;;  %v3702_v27 = vpop.f32.mrb[192].mxu0 }
 0x2ba   : > { %v3703_v31 = vadd.f32 %v3702_v27, %v11705_v56  ;;  %v8380_v44 = vpop.f32.mrb[193].mxu0  ;;  %8770 = vmatmul.mubr.f32.gmra.mrb[42].mxu0 %v5711_v45  ;;  %v5731_v53 = vand.u32 4294901760, %v5730_v63  ;;  %v5749_v45 = vand.u32 4294901760, %v11848_v7  ;;  %v6530_v27 = vsub.f32 %v11584_v9, %v6529_v32 }
 0x2bb   : > { %v11842_v28 = vpop.f32.mrb[208].mxu1  ;;  %8772 = vmatprep.mubr.msk.f32.mxu0 %vm9252_vm0, %v12484_v3 }
 0x2bc   : > { %8848 = vmatmul.mubr.f32.gmra.mrb[58].mxu1 %v5719_v51  ;;  %v8458_v41 = vpop.f32.mrb[209].mxu1  ;;  %v11856_v38 = vadd.f32 %v11684_v14, %v3703_v31  ;;  %v5740_v51 = vsub.f32 %v11832_v46, %v5739_v36 }
 0x2bd   : > { %8850 = vmatprep.mubr.msk.f32.mxu1 %vm9252_vm0, %v12484_v3  ;;  %v3709_v56 = vpop.f32.mrb[194].mxu0  ;;  %v5750_v41 = vsub.f32 %v11848_v7, %v5749_v45 }
 0x2be   : > { %v3710_v24 = vadd.f32 %v3709_v56, %v11723_v40  ;;  %v8383_v30 = vpop.f32.mrb[195].mxu0  ;;  %8773 = vmatmul.mubr.f32.gmra.mrb[44].mxu0 %v5721_v57  ;;  %v6523_v40 = vsub.f32 %v11579_v16, %v6522_v47  ;;  %v5741_v63 = vand.u32 4294901760, %v5740_v51  ;;  %v6531_v56 = vand.u32 4294901760, %v6530_v27 }
 0x2bf   : > { %v11858_v60 = vpop.f32.mrb[210].mxu1  ;;  %8775 = vmatprep.mubr.msk.f32.mxu0 %vm9252_vm0, %v12484_v3 }
 0x2c0   : > { %v8490_v61 = vpop.f32.mrb[211].mxu1  ;;  %8851 = vmatmul.mubr.f32.gmra.mrb[60].mxu1 %v5729_v12  ;;  %v11868_v14 = vadd.f32 %v11702_v8, %v3710_v24  ;;  %v6524_v32 = vand.u32 4294901760, %v6523_v40 }
 0x2c1   : > { %8853 = vmatprep.mubr.msk.f32.mxu1 %vm9252_vm0, %v12484_v3  ;;  %v3909_v57 = vpop.f32.mrb[196].mxu0 }
 0x2c2   : > { %v3910_v12 = vadd.f32 %v3909_v57, %v11767_v17  ;;  %v8415_v44 = vpop.f32.mrb[197].mxu0  ;;  %8776 = vmatmul.mubr.f32.gmra.mrb[46].mxu0 %v5731_v53  ;;  %v9207_v40 = vpack.c.bf16 %v6531_v56, %v6524_v32 }
 0x2c3   : > { %v11876_v31 = vpop.f32.mrb[212].mxu1  ;;  %8778 = vmatprep.mubr.msk.f32.mxu0 %vm9252_vm0, %v12484_v3 }
 0x2c4   : > { %v8493_v8 = vpop.f32.mrb[213].mxu1  ;;  %8854 = vmatmul.mubr.f32.gmra.mrb[62].mxu1 %v5739_v36  ;;  %v4019_v47 = vadd.f32 %v11720_v37, %v3910_v12  ;;  %v5751_v36 = vand.u32 4294901760, %v5750_v41 }
 0x2c5   : > { %8856 = vmatprep.mubr.msk.f32.mxu1 %vm9252_vm0, %v12484_v3  ;;  %v3915_v24 = vpop.f32.mrb[198].mxu0 }
 0x2c6   : > { %v11888_v17 = vadd.f32 %v4019_v47, %v11503_v5  ;;  %v3916_v53 = vadd.f32 %v3915_v24, %v11785_v29  ;;  %v8418_v51 = vpop.f32.mrb[199].mxu0  ;;  %8779 = vmatmul.mubr.f32.gmra.mrb[48].mxu0 %v5741_v63 }
 0x2c7   : > { %v11885_v30 = vpop.f32.mrb[214].mxu1  ;;  %8781 = vmatprep.mubr.msk.f32.mxu0 %vm9252_vm0, %v12484_v3 }
 0x2c8   : > { %v8496_v61 = vpop.f32.mrb[215].mxu1  ;;  %8857 = vmatmul.mubr.f32.gmra.mrb[64].mxu1 %v5749_v45  ;;  %v4025_v37 = vadd.f32 %v11747_v20, %v3916_v53 }
 0x2c9   : > { %8888 = vmatprep.mubr.msk.f32.mxu1 %vm9252_vm0, %v12484_v3  ;;  %v3921_v27 = vpop.f32.mrb[200].mxu0 }
 0x2ca   : > { %v11899_v5 = vadd.f32 %v4025_v37, %v11515_v50  ;;  %v3922_v29 = vadd.f32 %v3921_v27, %v11802_v35  ;;  %v8421_v12 = vpop.f32.mrb[201].mxu0  ;;  %8782 = vmatmul.mubr.f32.gmra.mrb[50].mxu0 %v5751_v36 }
 0x2cb   : > { %v11896_v57 = vpop.f32.mrb[216].mxu1  ;;  %8813 = vmatprep.mubr.msk.f32.mxu0 %vm9252_vm0, %v12484_v3 }
 0x2cc   : > { %v8499_v45 = vpop.f32.mrb[217].mxu1  ;;  %8889 = vmatmul.mubr.f32.vlgmr.msra.gmra.mrb[66].mxu1 %v11628_v4  ;;  %v4031_v20 = vadd.f32 %v11769_v13, %v3922_v29 }
 0x2cd   : > { %8891 = vmatprep.mubr.msk.f32.mxu1 %vm9252_vm0, %v12484_v3  ;;  %9208 = vmatpush3.bf16.msra.mxu1 %v9207_v40  ;;  %v3927_v44 = vpop.f32.mrb[202].mxu0 }
 0x2ce   : > { %9212 = vmatprep.subr.bf16.mxu1 %v12479_v2  ;;  %v11912_v50 = vadd.f32 %v4031_v20, %v11529_v10  ;;  %v3928_v35 = vadd.f32 %v3927_v44, %v11821_v48  ;;  %v8424_v41 = vpop.f32.mrb[203].mxu0  ;;  %8814 = vmatmul.mubr.f32.vlgmr.msra.gmra.mrb[52].mxu0 %v11728_v42  ;;  %v12503_v44 = vld [vmem:[#allocation9_spill] sm:$0xff] }
 0x2cf   : > { %v11908_v63 = vpop.f32.mrb[218].mxu1  ;;  %9199 = vmatpush3.bf16.msra.mxu0 %v11366_v62  ;;  %8816 = vmatprep.mubr.msk.f32.mxu0 %vm9252_vm0, %v12484_v3 }
 0x2d0   : > { %v8502_v8 = vpop.f32.mrb[219].mxu1  ;;  %8892 = vmatmul.mubr.f32.gmra.mrb[68].mxu1 %v11652_v0  ;;  %v4037_v13 = vadd.f32 %v11791_v39, %v3928_v35  ;;  %9203 = vmatprep.subr.bf16.mxu0 %v12479_v2  ;;  %v11997_v35 = vsel %vm266_vm1, %v12503_v44, 0 }
 0x2d1   : > { %8894 = vmatprep.mubr.msk.f32.mxu1 %vm9252_vm0, %v12484_v3  ;;  %v3933_v10 = vpop.f32.mrb[204].mxu0 }
 0x2d2   : > { %v11927_v42 = vadd.f32 %v4037_v13, %v11554_v54  ;;  %v3934_v47 = vadd.f32 %v3933_v10, %v11840_v6  ;;  %v8427_v32 = vpop.f32.mrb[205].mxu0  ;;  %8817 = vmatmul.mubr.f32.gmra.mrb[54].mxu0 %v11745_v22  ;;  %v12504_v13 = vand.u32 4294901760, %v11548_v52 }
 0x2d3   : > { %v11924_v48 = vpop.f32.mrb[220].mxu1  ;;  %8819 = vmatprep.mubr.msk.f32.mxu0 %vm9252_vm0, %v12484_v3  ;;  %v6348_v32 = vld [vmem:[%s9330_s10 + $0x36] sm:$0xff] }
 0x2d4   : > { %v8505_v62 = vpop.f32.mrb[221].mxu1  ;;  %8895 = vmatmul.mubr.f32.gmra.mrb[70].mxu1 %v11672_v33  ;;  %v4043_v39 = vadd.f32 %v11806_v49, %v3934_v47  ;;  %v12009_v10 = vpack.c.bf16 %v12504_v13, %v6383_v43 }
 0x2d5   : > { %8897 = vmatprep.mubr.msk.f32.mxu1 %vm9252_vm0, %v12484_v3  ;;  %v3939_v56 = vpop.f32.mrb[206].mxu0 }
 0x2d6   : > { %v11940_v54 = vadd.f32 %v4043_v39, %v11566_v58  ;;  %v3940_v6 = vadd.f32 %v3939_v56, %v11856_v38  ;;  %v8430_v22 = vpop.f32.mrb[207].mxu0  ;;  %8820 = vmatmul.mubr.f32.gmra.mrb[56].mxu0 %v11776_v55 }
 0x2d7   : > { %v11937_v24 = vpop.f32.mrb[222].mxu1  ;;  %8822 = vmatprep.mubr.msk.f32.mxu0 %vm9252_vm0, %v12484_v3 }
 0x2d8   : > { %v8508_v53 = vpop.f32.mrb[223].mxu1  ;;  %8898 = vmatmul.mubr.f32.gmra.mrb[72].mxu1 %v11692_v26  ;;  %v4049_v49 = vadd.f32 %v11827_v59, %v3940_v6 }
 0x2d9   : > { %8900 = vmatprep.mubr.msk.f32.mxu1 %vm9252_vm0, %v12484_v3  ;;  %v3945_v51 = vpop.f32.mrb[208].mxu0  ;;  %v12507_v53 = vld [vmem:[#allocation10_spill] sm:$0xff] }
 0x2da   : > { %v11953_v58 = vadd.f32 %v4049_v49, %v11589_v19  ;;  %v3946_v38 = vadd.f32 %v3945_v51, %v11868_v14  ;;  %v8433_v55 = vpop.f32.mrb[209].mxu0  ;;  %8823 = vmatmul.mubr.f32.gmra.mrb[58].mxu0 %v11789_v23 }
 0x2db   : > { %v11950_v36 = vpop.f32.mrb[224].mxu1  ;;  %8825 = vmatprep.mubr.msk.f32.mxu0 %vm9252_vm0, %v12484_v3 }
 0x2dc   : > { %v8540_v61 = vpop.f32.mrb[225].mxu1  ;;  %8901 = vmatmul.mubr.f32.gmra.mrb[74].mxu1 %v11710_v11  ;;  %v4055_v59 = vadd.f32 %v11842_v28, %v3946_v38  ;;  %v12502_v28 = vld [vmem:[#allocation6_spill] sm:$0xff] }
 0x2dd   : > { %8903 = vmatprep.mubr.msk.f32.mxu1 %vm9252_vm0, %v12484_v3  ;;  %v4176_v37 = vpop.f32.mrb[210].mxu0  ;;  %v11979_v29 = vsel %vm266_vm1, %v12502_v28, 0  ;;  %v6349_v38 = vld [vmem:[%s9330_s10 + $0x3e] sm:$0xff] }
 0x2de   : > { %v11966_v19 = vadd.f32 %v4055_v59, %v11605_v25  ;;  %v11969_v14 = vadd.f32 %v11858_v60, %v4176_v37  ;;  %v8465_v23 = vpop.f32.mrb[211].mxu0  ;;  %8826 = vmatmul.mubr.f32.gmra.mrb[60].mxu0 %v11813_v21  ;;  %v11993_v20 = vand.u32 4294901760, %v11979_v29 }
 0x2df   : > { %v11963_v40 = vpop.f32.mrb[226].mxu1  ;;  %8828 = vmatprep.mubr.msk.f32.mxu0 %vm9252_vm0, %v12484_v3 }
 0x2e0   : > { %v8543_v27 = vpop.f32.mrb[227].mxu1  ;;  %8904 = vmatmul.mubr.f32.gmra.mrb[76].mxu1 %v11732_v15 }
 0x2e1   : > { %8906 = vmatprep.mubr.msk.f32.mxu1 %vm9252_vm0, %v12484_v3  ;;  %v4186_v25 = vpop.f32.mrb[212].mxu0 }
 0x2e2   : > { %v11984_v60 = vadd.f32 %v11876_v31, %v4186_v25  ;;  %v8468_v21 = vpop.f32.mrb[213].mxu0  ;;  %8829 = vmatmul.mubr.f32.gmra.mrb[62].mxu0 %v11832_v46 }
 0x2e3   : > { %v11981_v12 = vpop.f32.mrb[228].mxu1  ;;  %8831 = vmatprep.mubr.msk.f32.mxu0 %vm9252_vm0, %v12484_v3 }
 0x2e4   : > { %v8546_v45 = vpop.f32.mrb[229].mxu1  ;;  %8907 = vmatmul.mubr.f32.gmra.mrb[78].mxu1 %v11754_v18 }
 0x2e5   : > { %8938 = vmatprep.mubr.msk.f32.mxu1 %vm9252_vm0, %v12484_v3  ;;  %v4196_v31 = vpop.f32.mrb[214].mxu0 }
 0x2e6   : > { %v12002_v46 = vadd.f32 %v11885_v30, %v4196_v31  ;;  %v8471_v8 = vpop.f32.mrb[215].mxu0  ;;  %8832 = vmatmul.mubr.f32.gmra.mrb[64].mxu0 %v11848_v7  ;;  %v12017_v30 = vand.u32 4294901760, %v11997_v35  ;;  %v12505_v7 = vld [vmem:[#allocation8_spill] sm:$0xff] }
 0x2e7   : > { %v11999_v41 = vpop.f32.mrb[230].mxu1  ;;  %8863 = vmatprep.mubr.msk.f32.mxu0 %vm9252_vm0, %v12484_v3  ;;  %v12022_v34 = vsel %vm266_vm1, %v12505_v7, 0  ;;  %v12509_v8 = vld [vmem:[#allocation13_spill] sm:$0xff] }
 0x2e8   : > { %v8549_v47 = vpop.f32.mrb[231].mxu1  ;;  %8939 = vmatmul.mubr.f32.vlgmr.msra.gmra.mrb[80].mxu1 %v11993_v20  ;;  %v12037_v6 = vand.u32 4294901760, %v12022_v34 }
 0x2e9   : > { %8941 = vmatprep.mubr.msk.f32.mxu1 %vm9252_vm0, %v12484_v3  ;;  %9214 = vmatpush3.bf16.msra.mxu1 %v12009_v10  ;;  %v4206_v52 = vpop.f32.mrb[216].mxu0 }
 0x2ea   : > { %9218 = vmatprep.subr.bf16.mxu1 %v12479_v2  ;;  %v12029_v62 = vadd.f32 %v11896_v57, %v4206_v52  ;;  %v8474_v39 = vpop.f32.mrb[217].mxu0  ;;  %8864 = vmatmul.mubr.f32.vlgmr.msra.gmra.mrb[66].mxu0 %v11628_v4  ;;  %v12506_v57 = vld [vmem:[#allocation11_spill] sm:$0xff]  ;;  %v12045_v4 = vsel %vm266_vm1, %v12507_v53, 0 }
 0x2eb   : > { %v12024_v43 = vpop.f32.mrb[232].mxu1  ;;  %9205 = vmatpush3.bf16.msra.mxu0 %v12009_v10  ;;  %8866 = vmatprep.mubr.msk.f32.mxu0 %vm9252_vm0, %v12484_v3  ;;  %v6355_v22 = vmul.f32 %v6348_v32, %v12506_v57  ;;  %v12060_v37 = vand.u32 4294901760, %v12045_v4  ;;  %v12094_v39 = vsub.f32 %v11979_v29, %v11993_v20 }
 0x2ec   : > { %v8552_v56 = vpop.f32.mrb[233].mxu1  ;;  %8942 = vmatmul.mubr.f32.gmra.mrb[82].mxu1 %v12017_v30  ;;  %9209 = vmatprep.subr.bf16.mxu0 %v12479_v2 }
 0x2ed   : > { %8944 = vmatprep.mubr.msk.f32.mxu1 %vm9252_vm0, %v12484_v3  ;;  %v4216_v49 = vpop.f32.mrb[218].mxu0  ;;  %v12063_v23 = vsel %vm266_vm1, %v6355_v22, 0 }
 0x2ee   : > { %v12051_v55 = vadd.f32 %v11908_v63, %v4216_v49  ;;  %v8477_v61 = vpop.f32.mrb[219].mxu0  ;;  %8867 = vmatmul.mubr.f32.gmra.mrb[68].mxu0 %v11652_v0  ;;  %v12508_v63 = vld [vmem:[#allocation12_spill] sm:$0xff]  ;;  %v6350_v0 = vld [vmem:[%s9330_s10 + $0x46] sm:$0x1]  ;;  %v12079_v31 = vand.u32 4294901760, %v12063_v23  ;;  %v6451_v49 = vand.u32 4294901760, %v12094_v39 }
 0x2ef   : > { %v12047_v51 = vpop.f32.mrb[234].mxu1  ;;  %8869 = vmatprep.mubr.msk.f32.mxu0 %vm9252_vm0, %v12484_v3  ;;  %v6356_v27 = vmul.f32 %v6349_v38, %v12508_v63  ;;  %v6357_v13 = vmul.f32 %v6350_v0, %v12509_v8  ;;  %v12118_v38 = vsub.f32 %v11997_v35, %v12017_v30  ;;  %s9222_s10 = smul.u32 56, %s12512_s16 }
 0x2f0   : > { %v8555_v59 = vpop.f32.mrb[235].mxu1  ;;  %8945 = vmatmul.mubr.f32.gmra.mrb[84].mxu1 %v12037_v6  ;;  %v6452_v35 = vsub.f32 %v12094_v39, %v6451_v49 }
 0x2f1   : > { %8947 = vmatprep.mubr.msk.f32.mxu1 %vm9252_vm0, %v12484_v3  ;;  %v4226_v28 = vpop.f32.mrb[220].mxu0  ;;  %s12410_s19 = scalar_lea.vmem %s12438_s4, %s9222_s10 }
 0x2f2   : > { %v12070_v21 = vadd.f32 %v11924_v48, %v4226_v28  ;;  %v8480_v45 = vpop.f32.mrb[221].mxu0  ;;  %8870 = vmatmul.mubr.f32.gmra.mrb[70].mxu0 %v11672_v33  ;;  %v12083_v48 = vsel %vm266_vm1, %v6356_v27, 0 }
 0x2f3   : > { %v12066_v25 = vpop.f32.mrb[236].mxu1  ;;  %8872 = vmatprep.mubr.msk.f32.mxu0 %vm9252_vm0, %v12484_v3  ;;  %v12101_v56 = vand.u32 4294901760, %v12083_v48 }
 0x2f4   : > { %v8558_v44 = vpop.f32.mrb[237].mxu1  ;;  %8948 = vmatmul.mubr.f32.gmra.mrb[86].mxu1 %v12060_v37 }
 0x2f5   : > { %8950 = vmatprep.mubr.msk.f32.mxu1 %vm9252_vm0, %v12484_v3  ;;  %v4236_v47 = vpop.f32.mrb[222].mxu0 }
 0x2f6   : > { %v12088_v33 = vadd.f32 %v11937_v24, %v4236_v47  ;;  %v8483_v52 = vpop.f32.mrb[223].mxu0  ;;  %8873 = vmatmul.mubr.f32.gmra.mrb[72].mxu0 %v11692_v26  ;;  %v12104_v24 = vsel %vm266_vm1, %v6357_v13, 0  ;;  %v6453_v47 = vand.u32 4294901760, %v6452_v35 }
 0x2f7   : > { %v12085_v7 = vpop.f32.mrb[238].mxu1  ;;  %8875 = vmatprep.mubr.msk.f32.mxu0 %vm9252_vm0, %v12484_v3  ;;  %v12156_v52 = vsub.f32 %v12045_v4, %v12060_v37  ;;  %v12510_v4 = vpack.c.bf16 %v11584_v9, %v11579_v16 }
 0x2f8   : > { %v8590_v32 = vpop.f32.mrb[239].mxu1  ;;  %8951 = vmatmul.mubr.f32.gmra.mrb[88].mxu1 %v12079_v31 }
 0x2f9   : > { %8953 = vmatprep.mubr.msk.f32.mxu1 %vm9252_vm0, %v12484_v3  ;;  %v4429_v26 = vpop.f32.mrb[224].mxu0 }
 0x2fa   : > { %v4430_v22 = vadd.f32 %v4429_v26, %v11969_v14  ;;  %v8515_v53 = vpop.f32.mrb[225].mxu0  ;;  %8876 = vmatmul.mubr.f32.gmra.mrb[74].mxu0 %v11710_v11  ;;  %v12121_v14 = vand.u32 4294901760, %v12104_v24 }
 0x2fb   : > { %v12106_v57 = vpop.f32.mrb[240].mxu1  ;;  %8878 = vmatprep.mubr.msk.f32.mxu0 %vm9252_vm0, %v12484_v3 }
 0x2fc   : > { %v8593_v29 = vpop.f32.mrb[241].mxu1  ;;  %8954 = vmatmul.mubr.f32.gmra.mrb[90].mxu1 %v12101_v56  ;;  %v12124_v11 = vadd.f32 %v11950_v36, %v4430_v22  ;;  %v12138_v36 = vsub.f32 %v12022_v34, %v12037_v6 }
 0x2fd   : > { %8956 = vmatprep.mubr.msk.f32.mxu1 %vm9252_vm0, %v12484_v3  ;;  %v4436_v61 = vpop.f32.mrb[226].mxu0  ;;  %v12167_v29 = vsub.f32 %v12063_v23, %v12079_v31 }
 0x2fe   : > { %v4437_v63 = vadd.f32 %v4436_v61, %v11984_v60  ;;  %v8518_v27 = vpop.f32.mrb[227].mxu0  ;;  %8879 = vmatmul.mubr.f32.gmra.mrb[76].mxu0 %v11732_v15  ;;  %v6461_v60 = vand.u32 4294901760, %v12118_v38 }
 0x2ff   : > { %v12126_v59 = vpop.f32.mrb[242].mxu1  ;;  %8881 = vmatprep.mubr.msk.f32.mxu0 %vm9252_vm0, %v12484_v3  ;;  %v6491_v27 = vand.u32 4294901760, %v12167_v29 }
 0x300   : > { %v8596_v28 = vpop.f32.mrb[243].mxu1  ;;  %8957 = vmatmul.mubr.f32.gmra.mrb[92].mxu1 %v12121_v14  ;;  %v12142_v0 = vadd.f32 %v11963_v40, %v4437_v63  ;;  %v6471_v40 = vand.u32 4294901760, %v12138_v36  ;;  %v6462_v34 = vsub.f32 %v12118_v38, %v6461_v60 }
 0x301   : > { %8988 = vmatprep.mubr.msk.f32.mxu1 %vm9252_vm0, %v12484_v3  ;;  %v4443_v15 = vpop.f32.mrb[228].mxu0  ;;  %v12193_v28 = vsub.f32 %v12083_v48, %v12101_v56 }
 0x302   : > { %v4444_v44 = vadd.f32 %v4443_v15, %v12002_v46  ;;  %v8521_v8 = vpop.f32.mrb[229].mxu0  ;;  %8882 = vmatmul.mubr.f32.gmra.mrb[78].mxu0 %v11754_v18 }
 0x303   : > { %v12144_v45 = vpop.f32.mrb[244].mxu1  ;;  %8913 = vmatprep.mubr.msk.f32.mxu0 %vm9252_vm0, %v12484_v3 }
 0x304   : > { %v8599_v13 = vpop.f32.mrb[245].mxu1  ;;  %8989 = vmatmul.mubr.f32.vlgmr.msra.gmra.mrb[94].mxu1 %v6451_v49  ;;  %v12159_v46 = vadd.f32 %v11981_v12, %v4444_v44  ;;  %v6472_v12 = vsub.f32 %v12138_v36, %v6471_v40 }
 0x305   : > { %8991 = vmatprep.mubr.msk.f32.mxu1 %vm9252_vm0, %v12484_v3  ;;  %9220 = vmatpush3.bf16.msra.mxu1 %v12009_v10  ;;  %v4450_v18 = vpop.f32.mrb[230].mxu0  ;;  %v6463_v10 = vand.u32 4294901760, %v6462_v34  ;;  %v6492_v13 = vsub.f32 %v12167_v29, %v6491_v27 }
 0x306   : > { %v4451_v26 = vadd.f32 %v4450_v18, %v12029_v62  ;;  %v8524_v22 = vpop.f32.mrb[231].mxu0  ;;  %8914 = vmatmul.mubr.f32.vlgmr.msra.gmra.mrb[80].mxu0 %v6453_v47  ;;  %v6481_v62 = vand.u32 4294901760, %v12156_v52  ;;  %v6501_v47 = vand.u32 4294901760, %v12193_v28 }
 0x307   : > { %v12162_v32 = vpop.f32.mrb[246].mxu1  ;;  %9211 = vmatpush3.bf16.msra.mxu0 %v12510_v4  ;;  %8916 = vmatprep.mubr.msk.f32.mxu0 %vm9252_vm0, %v12484_v3 }
 0x308   : > { %v8602_v53 = vpop.f32.mrb[247].mxu1  ;;  %8992 = vmatmul.mubr.f32.gmra.mrb[96].mxu1 %v6461_v60  ;;  %v12177_v49 = vadd.f32 %v11999_v41, %v4451_v26  ;;  %9215 = vmatprep.subr.bf16.mxu0 %v12479_v2  ;;  %v6473_v41 = vand.u32 4294901760, %v6472_v12  ;;  %v6482_v2 = vsub.f32 %v12156_v52, %v6481_v62 }
 0x309   : > { %8994 = vmatprep.mubr.msk.f32.mxu1 %vm9252_vm0, %v12484_v3  ;;  %v4457_v23 = vpop.f32.mrb[232].mxu0 }
 0x30a   : > { %v4458_v16 = vadd.f32 %v4457_v23, %v12051_v55  ;;  %v8527_v9 = vpop.f32.mrb[233].mxu0  ;;  %8917 = vmatmul.mubr.f32.gmra.mrb[82].mxu0 %v6463_v10  ;;  %v6483_v48 = vand.u32 4294901760, %v6482_v2 }
 0x30b   : > { %v12182_v61 = vpop.f32.mrb[248].mxu1  ;;  %8919 = vmatprep.mubr.msk.f32.mxu0 %vm9252_vm0, %v12484_v3 }
 0x30c   : > { %v8605_v63 = vpop.f32.mrb[249].mxu1  ;;  %8995 = vmatmul.mubr.f32.gmra.mrb[98].mxu1 %v6471_v40  ;;  %v12196_v55 = vadd.f32 %v12024_v43, %v4458_v16  ;;  %v12208_v43 = vsub.f32 %v12104_v24, %v12121_v14  ;;  %v6493_v24 = vand.u32 4294901760, %v6492_v13 }
 0x30d   : > { %8997 = vmatprep.mubr.msk.f32.mxu1 %vm9252_vm0, %v12484_v3  ;;  %v4464_v35 = vpop.f32.mrb[234].mxu0 }
 0x30e   : > { %v4465_v15 = vadd.f32 %v4464_v35, %v12070_v21  ;;  %v8530_v44 = vpop.f32.mrb[235].mxu0  ;;  %8920 = vmatmul.mubr.f32.gmra.mrb[84].mxu0 %v6473_v41  ;;  %v6511_v53 = vand.u32 4294901760, %v12208_v43 }
 0x30f   : > { %v12198_v60 = vpop.f32.mrb[250].mxu1  ;;  %8922 = vmatprep.mubr.msk.f32.mxu0 %vm9252_vm0, %v12484_v3 }
 0x310   : > { %v8608_v8 = vpop.f32.mrb[251].mxu1  ;;  %8998 = vmatmul.mubr.f32.gmra.mrb[100].mxu1 %v6481_v62  ;;  %v12212_v21 = vadd.f32 %v12047_v51, %v4465_v15  ;;  %v6502_v51 = vsub.f32 %v12193_v28, %v6501_v47  ;;  %v6512_v16 = vsub.f32 %v12208_v43, %v6511_v53 }
 0x311   : > { %9000 = vmatprep.mubr.msk.f32.mxu1 %vm9252_vm0, %v12484_v3  ;;  %v4471_v40 = vpop.f32.mrb[236].mxu0 }
 0x312   : > { %v4472_v18 = vadd.f32 %v4471_v40, %v12088_v33  ;;  %v8533_v26 = vpop.f32.mrb[237].mxu0  ;;  %8923 = vmatmul.mubr.f32.gmra.mrb[86].mxu0 %v6483_v48  ;;  %v6503_v9 = vand.u32 4294901760, %v6502_v51  ;;  %v6513_v15 = vand.u32 4294901760, %v6512_v16 }
 0x313   : > { %v12214_v34 = vpop.f32.mrb[252].mxu1  ;;  %8925 = vmatprep.mubr.msk.f32.mxu0 %vm9252_vm0, %v12484_v3 }
 0x314   : > { %v8640_v22 = vpop.f32.mrb[253].mxu1  ;;  %9001 = vmatmul.mubr.f32.gmra.mrb[102].mxu1 %v6491_v27  ;;  %v12224_v4 = vadd.f32 %v12066_v25, %v4472_v18 }
 0x315   : > { %9003 = vmatprep.mubr.msk.f32.mxu1 %vm9252_vm0, %v12484_v3  ;;  %v4671_v12 = vpop.f32.mrb[238].mxu0 }
 0x316   : > { %v4672_v10 = vadd.f32 %v4671_v12, %v12124_v11  ;;  %v8565_v62 = vpop.f32.mrb[239].mxu0  ;;  %8926 = vmatmul.mubr.f32.gmra.mrb[88].mxu0 %v6493_v24 }
 0x317   : > { %v12226_v33 = vpop.f32.mrb[254].mxu1  ;;  %8928 = vmatprep.mubr.msk.f32.mxu0 %vm9252_vm0, %v12484_v3 }
 0x318   : > { %v8643_v23 = vpop.f32.mrb[255].mxu1  ;;  %9004 = vmatmul.mubr.f32.gmra.mrb[104].mxu1 %v6501_v47  ;;  %v4781_v25 = vadd.f32 %v12085_v7, %v4672_v10 }
 0x319   : > { %9006 = vmatprep.mubr.msk.f32.mxu1 %vm9252_vm0, %v12484_v3  ;;  %v4677_v63 = vpop.f32.mrb[240].mxu0 }
 0x31a   : > { %v12238_v11 = vadd.f32 %v4781_v25, %v11888_v17  ;;  %v4678_v41 = vadd.f32 %v4677_v63, %v12142_v0  ;;  %v8568_v2 = vpop.f32.mrb[241].mxu0  ;;  %8929 = vmatmul.mubr.f32.gmra.mrb[90].mxu0 %v6503_v9 }
 0x31b   : > { %v12235_v27 = vpop.f32.mrb[0].mxu1  ;;  %8931 = vmatprep.mubr.msk.f32.mxu0 %vm9252_vm0, %v12484_v3 }
 0x31c   : > { %v8646_v35 = vpop.f32.mrb[1].mxu1  ;;  %9007 = vmatmul.mubr.f32.gmra.mrb[106].mxu1 %v6511_v53  ;;  %v4787_v7 = vadd.f32 %v12106_v57, %v4678_v41 }
 0x31d   : > { %9038 = vmatprep.mubr.msk.f32.mxu1 %vm9252_vm0, %v12484_v3  ;;  %v4683_v44 = vpop.f32.mrb[242].mxu0 }
 0x31e   : > { %v12249_v17 = vadd.f32 %v4787_v7, %v11899_v5  ;;  %v4684_v0 = vadd.f32 %v4683_v44, %v12159_v46  ;;  %v8571_v13 = vpop.f32.mrb[243].mxu0  ;;  %8932 = vmatmul.mubr.f32.gmra.mrb[92].mxu0 %v6513_v15 }
 0x31f   : > { %v12246_v8 = vpop.f32.mrb[2].mxu1  ;;  %8963 = vmatprep.mubr.msk.f32.mxu0 %vm9252_vm0, %v12484_v3 }
 0x320   : > { %v8649_v48 = vpop.f32.mrb[3].mxu1  ;;  %9039 = vmatmul.mubr.f32.vlgmr.msra.gmra.mrb[108].mxu1 %v11993_v20  ;;  %v4793_v57 = vadd.f32 %v12126_v59, %v4684_v0 }
 0x321   : > { %9041 = vmatprep.mubr.msk.f32.mxu1 %vm9252_vm0, %v12484_v3  ;;  %v4689_v47 = vpop.f32.mrb[244].mxu0 }
 0x322   : > { %v12261_v5 = vadd.f32 %v4793_v57, %v11912_v50  ;;  %v4690_v46 = vadd.f32 %v4689_v47, %v12177_v49  ;;  %v8574_v18 = vpop.f32.mrb[245].mxu0  ;;  %8964 = vmatmul.mubr.f32.vlgmr.msra.gmra.mrb[94].mxu0 %v12094_v39 }
 0x323   : > { %v12258_v40 = vpop.f32.mrb[4].mxu1  ;;  %9217 = vmatpush3.bf16.msra.mxu0 %v11760_v1  ;;  %8966 = vmatprep.mubr.msk.f32.mxu0 %vm9252_vm0, %v12484_v3 }
 0x324   : > { %v8652_v26 = vpop.f32.mrb[5].mxu1  ;;  %9042 = vmatmul.mubr.f32.gmra.mrb[110].mxu1 %v12017_v30  ;;  %v4799_v59 = vadd.f32 %v12144_v45, %v4690_v46 }
 0x325   : > { %9044 = vmatprep.mubr.msk.f32.mxu1 %vm9252_vm0, %v12484_v3  ;;  %v4695_v50 = vpop.f32.mrb[246].mxu0 }
 0x326   : > { %v12275_v49 = vadd.f32 %v4799_v59, %v11927_v42  ;;  %v4696_v39 = vadd.f32 %v4695_v50, %v12196_v55  ;;  %v8577_v24 = vpop.f32.mrb[247].mxu0  ;;  %8967 = vmatmul.mubr.f32.gmra.mrb[96].mxu0 %v12118_v38 }
 0x327   : > { %v12272_v22 = vpop.f32.mrb[6].mxu1  ;;  %8969 = vmatprep.mubr.msk.f32.mxu0 %vm9252_vm0, %v12484_v3 }
 0x328   : > { %v8655_v1 = vpop.f32.mrb[7].mxu1  ;;  %9045 = vmatmul.mubr.f32.gmra.mrb[112].mxu1 %v12037_v6  ;;  %v4805_v45 = vadd.f32 %v12162_v32, %v4696_v39 }
 0x329   : > { %9047 = vmatprep.mubr.msk.f32.mxu1 %vm9252_vm0, %v12484_v3  ;;  %v4701_v53 = vpop.f32.mrb[248].mxu0 }
 0x32a   : > { %v12288_v42 = vadd.f32 %v4805_v45, %v11940_v54  ;;  %v4702_v55 = vadd.f32 %v4701_v53, %v12212_v21  ;;  %v8580_v38 = vpop.f32.mrb[249].mxu0  ;;  %8970 = vmatmul.mubr.f32.gmra.mrb[98].mxu0 %v12138_v36 }
 0x32b   : > { %v12285_v51 = vpop.f32.mrb[8].mxu1  ;;  %8972 = vmatprep.mubr.msk.f32.mxu0 %vm9252_vm0, %v12484_v3 }
 0x32c   : > { %v8658_v12 = vpop.f32.mrb[9].mxu1  ;;  %9048 = vmatmul.mubr.f32.gmra.mrb[114].mxu1 %v12060_v37  ;;  %v4811_v32 = vadd.f32 %v12182_v61, %v4702_v55 }
 0x32d   : > { %9050 = vmatprep.mubr.msk.f32.mxu1 %vm9252_vm0, %v12484_v3  ;;  %v4707_v10 = vpop.f32.mrb[250].mxu0 }
 0x32e   : > { %v12301_v54 = vadd.f32 %v4811_v32, %v11953_v58  ;;  %v4708_v21 = vadd.f32 %v4707_v10, %v12224_v4  ;;  %v8583_v36 = vpop.f32.mrb[251].mxu0  ;;  %8973 = vmatmul.mubr.f32.gmra.mrb[100].mxu0 %v12156_v52 }
 0x32f   : > { %v12298_v62 = vpop.f32.mrb[10].mxu1  ;;  %8975 = vmatprep.mubr.msk.f32.mxu0 %vm9252_vm0, %v12484_v3 }
 0x330   : > { %v8690_v23 = vpop.f32.mrb[11].mxu1  ;;  %9051 = vmatmul.mubr.f32.gmra.mrb[116].mxu1 %v12079_v31  ;;  %v4817_v61 = vadd.f32 %v12198_v60, %v4708_v21 }
 0x331   : > { %9053 = vmatprep.mubr.msk.f32.mxu1 %vm9252_vm0, %v12484_v3  ;;  %v4938_v16 = vpop.f32.mrb[252].mxu0 }
 0x332   : > { %v12314_v58 = vadd.f32 %v4817_v61, %v11966_v19  ;;  %v5080_v4 = vadd.f32 %v12214_v34, %v4938_v16  ;;  %v8615_v52 = vpop.f32.mrb[253].mxu0  ;;  %8976 = vmatmul.mubr.f32.gmra.mrb[102].mxu0 %v12167_v29 }
 0x333   : > { %v12311_v9 = vpop.f32.mrb[12].mxu1  ;;  %8978 = vmatprep.mubr.msk.f32.mxu0 %vm9252_vm0, %v12484_v3 }
 0x334   : > { %v8693_v25 = vpop.f32.mrb[13].mxu1  ;;  %9054 = vmatmul.mubr.f32.gmra.mrb[118].mxu1 %v12101_v56 }
 0x335   : > { %9056 = vmatprep.mubr.msk.f32.mxu1 %vm9252_vm0, %v12484_v3  ;;  %v4948_v60 = vpop.f32.mrb[254].mxu0 }
 0x336   : > { %v5086_v19 = vadd.f32 %v12226_v33, %v4948_v60  ;;  %v8618_v41 = vpop.f32.mrb[255].mxu0  ;;  %8979 = vmatmul.mubr.f32.gmra.mrb[104].mxu0 %v12193_v28 }
 0x337   : > { %v12323_v63 = vpop.f32.mrb[14].mxu1  ;;  %8981 = vmatprep.mubr.msk.f32.mxu0 %vm9252_vm0, %v12484_v3 }
 0x338   : > { %v8696_v34 = vpop.f32.mrb[15].mxu1  ;;  %9057 = vmatmul.mubr.f32.gmra.mrb[120].mxu1 %v12121_v14 }
 0x339   : > { %v4958_v29 = vpop.f32.mrb[0].mxu0 }
 0x33a   : > { %v5092_v35 = vadd.f32 %v12235_v27, %v4958_v29  ;;  %v8621_v15 = vpop.f32.mrb[1].mxu0  ;;  %8982 = vmatmul.mubr.f32.gmra.mrb[106].mxu0 %v12208_v43 }
 0x33b   : > { %v5332_v2 = vpop.f32.mrb[16].mxu1  ;;  %9013 = vmatprep.mubr.msk.f32.mxu0 %vm9252_vm0, %v12484_v3 }
 0x33c   : > { %v8699_v7 = vpop.f32.mrb[17].mxu1 }
 0x33d   : > { %v4968_v33 = vpop.f32.mrb[2].mxu0 }
 0x33e   : > { %v5098_v28 = vadd.f32 %v12246_v8, %v4968_v33  ;;  %v8624_v0 = vpop.f32.mrb[3].mxu0  ;;  %9014 = vmatmul.mubr.f32.vlgmr.msra.gmra.mrb[108].mxu0 %v11993_v20 }
 0x33f   : > { %v5340_v44 = vpop.f32.mrb[18].mxu1  ;;  %9016 = vmatprep.mubr.msk.f32.mxu0 %vm9252_vm0, %v12484_v3 }
 0x340   : > { %v8702_v13 = vpop.f32.mrb[19].mxu1 }
 0x341   : > { %v4978_v48 = vpop.f32.mrb[4].mxu0 }
 0x342   : > { %v5104_v57 = vadd.f32 %v12258_v40, %v4978_v48  ;;  %v8627_v43 = vpop.f32.mrb[5].mxu0  ;;  %9017 = vmatmul.mubr.f32.gmra.mrb[110].mxu0 %v12017_v30 }
 0x343   : > { %v5348_v27 = vpop.f32.mrb[20].mxu1  ;;  %9019 = vmatprep.mubr.msk.f32.mxu0 %vm9252_vm0, %v12484_v3 }
 0x344   : > { %v8705_v47 = vpop.f32.mrb[21].mxu1 }
 0x345   : > { %v4988_v46 = vpop.f32.mrb[6].mxu0 }
 0x346   : > { %v5110_v18 = vadd.f32 %v12272_v22, %v4988_v46  ;;  %v8630_v20 = vpop.f32.mrb[7].mxu0  ;;  %9020 = vmatmul.mubr.f32.gmra.mrb[112].mxu0 %v12037_v6 }
 0x347   : > { %v5356_v8 = vpop.f32.mrb[22].mxu1  ;;  %9022 = vmatprep.mubr.msk.f32.mxu0 %vm9252_vm0, %v12484_v3 }
 0x348   : > { %v8708_v26 = vpop.f32.mrb[23].mxu1 }
 0x349   : > { %v4998_v59 = vpop.f32.mrb[8].mxu0 }
 0x34a   : > { %v5116_v50 = vadd.f32 %v12285_v51, %v4998_v59  ;;  %v8633_v30 = vpop.f32.mrb[9].mxu0  ;;  %9023 = vmatmul.mubr.f32.gmra.mrb[114].mxu0 %v12060_v37 }
 0x34b   : > { %v5542_v40 = vpop.f32.mrb[24].mxu1  ;;  %9025 = vmatprep.mubr.msk.f32.mxu0 %vm9252_vm0, %v12484_v3 }
 0x34c   : > { %v8740_v39 = vpop.f32.mrb[25].mxu1 }
 0x34d   : > { %v5191_v24 = vpop.f32.mrb[10].mxu0 }
 0x34e   : > { %v5192_v1 = vadd.f32 %v5191_v24, %v5080_v4  ;;  %v8665_v45 = vpop.f32.mrb[11].mxu0  ;;  %9026 = vmatmul.mubr.f32.gmra.mrb[116].mxu0 %v12079_v31 }
 0x34f   : > { %v5548_v22 = vpop.f32.mrb[26].mxu1  ;;  %9028 = vmatprep.mubr.msk.f32.mxu0 %vm9252_vm0, %v12484_v3 }
 0x350   : > { %v8743_v6 = vpop.f32.mrb[27].mxu1  ;;  %v5309_v53 = vadd.f32 %v12298_v62, %v5192_v1 }
 0x351   : > { %v5198_v51 = vpop.f32.mrb[12].mxu0 }
 0x352   : > { %v5199_v38 = vadd.f32 %v5198_v51, %v5086_v19  ;;  %v8668_v37 = vpop.f32.mrb[13].mxu0  ;;  %9029 = vmatmul.mubr.f32.gmra.mrb[118].mxu0 %v12101_v56 }
 0x353   : > { %v5554_v55 = vpop.f32.mrb[28].mxu1  ;;  %9031 = vmatprep.mubr.msk.f32.mxu0 %vm9252_vm0, %v12484_v3 }
 0x354   : > { %v8746_v12 = vpop.f32.mrb[29].mxu1  ;;  %v5317_v32 = vadd.f32 %v12311_v9, %v5199_v38 }
 0x355   : > { %v5205_v10 = vpop.f32.mrb[14].mxu0 }
 0x356   : > { %v5206_v21 = vadd.f32 %v5205_v10, %v5092_v35  ;;  %v8671_v36 = vpop.f32.mrb[15].mxu0  ;;  %9032 = vmatmul.mubr.f32.gmra.mrb[120].mxu0 %v12121_v14 }
 0x357   : > { %v5560_v31 = vpop.f32.mrb[30].mxu1 }
 0x358   : > { %v8749_v23 = vpop.f32.mrb[31].mxu1  ;;  %v5325_v62 = vadd.f32 %v12323_v63, %v5206_v21 }
 0x359   : > { %v5212_v61 = vpop.f32.mrb[16].mxu0 }
 0x35a   : > { %v5213_v4 = vadd.f32 %v5212_v61, %v5098_v28  ;;  %v8674_v52 = vpop.f32.mrb[17].mxu0 }
 0x35b   : > { %v5566_v16 = vpop.f32.mrb[32].mxu1 }
 0x35c   : > { %v8752_v56 = vpop.f32.mrb[33].mxu1  ;;  %v5333_v25 = vadd.f32 %v5332_v2, %v5213_v4 }
 0x35d   : > { %v5219_v60 = vpop.f32.mrb[18].mxu0 }
 0x35e   : > { %v5220_v3 = vadd.f32 %v5219_v60, %v5104_v57  ;;  %v8677_v41 = vpop.f32.mrb[19].mxu0 }
 0x35f   : > { %v5572_v19 = vpop.f32.mrb[34].mxu1 }
 0x360   : > { %v8755_v9 = vpop.f32.mrb[35].mxu1  ;;  %v5341_v34 = vadd.f32 %v5340_v44, %v5220_v3 }
 0x361   : > { %v5226_v29 = vpop.f32.mrb[20].mxu0 }
 0x362   : > { %v5227_v15 = vadd.f32 %v5226_v29, %v5110_v18  ;;  %v8680_v7 = vpop.f32.mrb[21].mxu0 }
 0x363   : > { %v5578_v35 = vpop.f32.mrb[36].mxu1 }
 0x364   : > { %v8758_v14 = vpop.f32.mrb[37].mxu1  ;;  %v5349_v33 = vadd.f32 %v5348_v27, %v5227_v15 }
 0x365   : > { %v5233_v0 = vpop.f32.mrb[22].mxu0 }
 0x366   : > { %v5234_v13 = vadd.f32 %v5233_v0, %v5116_v50  ;;  %v8683_v48 = vpop.f32.mrb[23].mxu0 }
 0x367   : > { %v5834_v63 = vpop.f32.mrb[38].mxu1 }
 0x368   : > { %v8790_v28 = vpop.f32.mrb[39].mxu1  ;;  %v5357_v43 = vadd.f32 %v5356_v8, %v5234_v13 }
 0x369   : > { %v5433_v47 = vpop.f32.mrb[24].mxu0 }
 0x36a   : > { %v5434_v46 = vadd.f32 %v5433_v47, %v5309_v53  ;;  %v8715_v20 = vpop.f32.mrb[25].mxu0 }
 0x36b   : > { %v5840_v2 = vpop.f32.mrb[40].mxu1 }
 0x36c   : > { %v8793_v57 = vpop.f32.mrb[41].mxu1  ;;  %v5543_v26 = vadd.f32 %v5542_v40, %v5434_v46 }
 0x36d   : > { %v5439_v59 = vpop.f32.mrb[26].mxu0 }
 0x36e   : > { %v5440_v30 = vadd.f32 %v5439_v59, %v5317_v32  ;;  %v8718_v39 = vpop.f32.mrb[27].mxu0  ;;  %v12361_v24 = vadd.f32 %v5543_v26, %v12238_v11 }
 0x36f   : > { %v5846_v44 = vpop.f32.mrb[42].mxu1 }
 0x370   : > { %v8796_v18 = vpop.f32.mrb[43].mxu1  ;;  %v5549_v27 = vadd.f32 %v5548_v22, %v5440_v30 }
 0x371   : > { %v5445_v1 = vpop.f32.mrb[28].mxu0 }
 0x372   : > { %v5446_v45 = vadd.f32 %v5445_v1, %v5325_v62  ;;  %v8721_v6 = vpop.f32.mrb[29].mxu0  ;;  %v12364_v51 = vadd.f32 %v5549_v27, %v12249_v17 }
 0x373   : > { %v5852_v50 = vpop.f32.mrb[44].mxu1 }
 0x374   : > { %v8799_v8 = vpop.f32.mrb[45].mxu1  ;;  %v5555_v53 = vadd.f32 %v5554_v55, %v5446_v45 }
 0x375   : > { %v5451_v38 = vpop.f32.mrb[30].mxu0 }
 0x376   : > { %v5452_v37 = vadd.f32 %v5451_v38, %v5333_v25  ;;  %v8724_v12 = vpop.f32.mrb[31].mxu0  ;;  %v12367_v10 = vadd.f32 %v5555_v53, %v12261_v5 }
 0x377   : > { %v5858_v40 = vpop.f32.mrb[46].mxu1 }
 0x378   : > { %v8802_v32 = vpop.f32.mrb[47].mxu1  ;;  %v5561_v11 = vadd.f32 %v5560_v31, %v5452_v37 }
 0x379   : > { %v5457_v21 = vpop.f32.mrb[32].mxu0 }
 0x37a   : > { %v5458_v36 = vadd.f32 %v5457_v21, %v5341_v34  ;;  %v8727_v23 = vpop.f32.mrb[33].mxu0  ;;  %v12370_v61 = vadd.f32 %v5561_v11, %v12275_v49 }
 0x37b   : > { %v5864_v22 = vpop.f32.mrb[48].mxu1 }
 0x37c   : > { %v8805_v62 = vpop.f32.mrb[49].mxu1  ;;  %v5567_v17 = vadd.f32 %v5566_v16, %v5458_v36 }
 0x37d   : > { %v5463_v4 = vpop.f32.mrb[34].mxu0 }
 0x37e   : > { %v12373_v52 = vadd.f32 %v5567_v17, %v12288_v42  ;;  %v5464_v56 = vadd.f32 %v5463_v4, %v5349_v33  ;;  %v8730_v25 = vpop.f32.mrb[35].mxu0 }
 0x37f   : > { %v5870_v55 = vpop.f32.mrb[50].mxu1 }
 0x380   : > { %v8808_v60 = vpop.f32.mrb[51].mxu1  ;;  %v5573_v5 = vadd.f32 %v5572_v19, %v5464_v56 }
 0x381   : > { %v5469_v3 = vpop.f32.mrb[36].mxu0 }
 0x382   : > { %v12376_v41 = vadd.f32 %v5573_v5, %v12301_v54  ;;  %v5470_v9 = vadd.f32 %v5469_v3, %v5357_v43  ;;  %v8733_v34 = vpop.f32.mrb[37].mxu0 }
 0x383   : > { %v6063_v31 = vpop.f32.mrb[52].mxu1 }
 0x384   : > { %v8840_v29 = vpop.f32.mrb[53].mxu1  ;;  %v5579_v49 = vadd.f32 %v5578_v35, %v5470_v9 }
 0x385   : > { %v5693_v15 = vpop.f32.mrb[38].mxu0 }
 0x386   : > { %v12379_v7 = vadd.f32 %v5579_v49, %v12314_v58  ;;  %v5835_v42 = vadd.f32 %v5834_v63, %v5693_v15  ;;  %v8765_v14 = vpop.f32.mrb[39].mxu0 }
 0x387   : > { %v6071_v16 = vpop.f32.mrb[54].mxu1 }
 0x388   : > { %v8843_v33 = vpop.f32.mrb[55].mxu1 }
 0x389   : > { %v5703_v0 = vpop.f32.mrb[40].mxu0 }
 0x38a   : > { %v5841_v19 = vadd.f32 %v5840_v2, %v5703_v0  ;;  %v8768_v48 = vpop.f32.mrb[41].mxu0 }
 0x38b   : > { %v6079_v13 = vpop.f32.mrb[56].mxu1 }
 0x38c   : > { %v8846_v28 = vpop.f32.mrb[57].mxu1 }
 0x38d   : > { %v5713_v47 = vpop.f32.mrb[42].mxu0 }
 0x38e   : > { %v5847_v46 = vadd.f32 %v5846_v44, %v5713_v47  ;;  %v8771_v43 = vpop.f32.mrb[43].mxu0 }
 0x38f   : > { %v6087_v54 = vpop.f32.mrb[58].mxu1 }
 0x390   : > { %v8849_v20 = vpop.f32.mrb[59].mxu1 }
 0x391   : > { %v5723_v57 = vpop.f32.mrb[44].mxu0 }
 0x392   : > { %v5853_v26 = vadd.f32 %v5852_v50, %v5723_v57  ;;  %v8774_v59 = vpop.f32.mrb[45].mxu0 }
 0x393   : > { %v6095_v35 = vpop.f32.mrb[60].mxu1 }
 0x394   : > { %v8852_v30 = vpop.f32.mrb[61].mxu1 }
 0x395   : > { %v5733_v58 = vpop.f32.mrb[46].mxu0 }
 0x396   : > { %v5859_v63 = vadd.f32 %v5858_v40, %v5733_v58  ;;  %v8777_v18 = vpop.f32.mrb[47].mxu0 }
 0x397   : > { %v6103_v39 = vpop.f32.mrb[62].mxu1 }
 0x398   : > { %v8855_v27 = vpop.f32.mrb[63].mxu1 }
 0x399   : > { %v5743_v1 = vpop.f32.mrb[48].mxu0 }
 0x39a   : > { %v5865_v2 = vadd.f32 %v5864_v22, %v5743_v1  ;;  %v8780_v6 = vpop.f32.mrb[49].mxu0 }
 0x39b   : > { %v6111_v45 = vpop.f32.mrb[64].mxu1 }
 0x39c   : > { %v8858_v8 = vpop.f32.mrb[65].mxu1 }
 0x39d   : > { %v5753_v53 = vpop.f32.mrb[50].mxu0 }
 0x39e   : > { %v5871_v44 = vadd.f32 %v5870_v55, %v5753_v53  ;;  %v8783_v37 = vpop.f32.mrb[51].mxu0 }
 0x39f   : > { %v6297_v38 = vpop.f32.mrb[66].mxu1 }
 0x3a0   : > { %v8890_v12 = vpop.f32.mrb[67].mxu1 }
 0x3a1   : > { %v5946_v32 = vpop.f32.mrb[52].mxu0 }
 0x3a2   : > { %v5947_v50 = vadd.f32 %v5946_v32, %v5835_v42  ;;  %v8815_v21 = vpop.f32.mrb[53].mxu0 }
 0x3a3   : > { %v6303_v11 = vpop.f32.mrb[68].mxu1 }
 0x3a4   : > { %v8893_v36 = vpop.f32.mrb[69].mxu1  ;;  %v6064_v23 = vadd.f32 %v6063_v31, %v5947_v50 }
 0x3a5   : > { %v5953_v62 = vpop.f32.mrb[54].mxu0 }
 0x3a6   : > { %v5954_v17 = vadd.f32 %v5953_v62, %v5841_v19  ;;  %v8818_v4 = vpop.f32.mrb[55].mxu0 }
 0x3a7   : > { %v6309_v40 = vpop.f32.mrb[70].mxu1 }
 0x3a8   : > { %v8896_v56 = vpop.f32.mrb[71].mxu1  ;;  %v6072_v25 = vadd.f32 %v6071_v16, %v5954_v17 }
 0x3a9   : > { %v5960_v22 = vpop.f32.mrb[56].mxu0 }
 0x3aa   : > { %v5961_v5 = vadd.f32 %v5960_v22, %v5847_v46  ;;  %v8821_v3 = vpop.f32.mrb[57].mxu0 }
 0x3ab   : > { %v6315_v60 = vpop.f32.mrb[72].mxu1 }
 0x3ac   : > { %v8899_v9 = vpop.f32.mrb[73].mxu1  ;;  %v6080_v55 = vadd.f32 %v6079_v13, %v5961_v5 }
 0x3ad   : > { %v5967_v34 = vpop.f32.mrb[58].mxu0 }
 0x3ae   : > { %v5968_v49 = vadd.f32 %v5967_v34, %v5853_v26  ;;  %v8824_v15 = vpop.f32.mrb[59].mxu0 }
 0x3af   : > { %v6321_v29 = vpop.f32.mrb[74].mxu1 }
 0x3b0   : > { %v8902_v42 = vpop.f32.mrb[75].mxu1  ;;  %v6088_v14 = vadd.f32 %v6087_v54, %v5968_v49 }
 0x3b1   : > { %v5974_v33 = vpop.f32.mrb[60].mxu0 }
 0x3b2   : > { %v5975_v0 = vadd.f32 %v5974_v33, %v5859_v63  ;;  %v8827_v48 = vpop.f32.mrb[61].mxu0 }
 0x3b3   : > { %v6327_v31 = vpop.f32.mrb[76].mxu1 }
 0x3b4   : > { %v8905_v19 = vpop.f32.mrb[77].mxu1  ;;  %v6096_v28 = vadd.f32 %v6095_v35, %v5975_v0 }
 0x3b5   : > { %v5981_v47 = vpop.f32.mrb[62].mxu0 }
 0x3b6   : > { %v5982_v43 = vadd.f32 %v5981_v47, %v5865_v2  ;;  %v8830_v20 = vpop.f32.mrb[63].mxu0 }
 0x3b7   : > { %v6333_v16 = vpop.f32.mrb[78].mxu1 }
 0x3b8   : > { %v8908_v46 = vpop.f32.mrb[79].mxu1  ;;  %v6104_v57 = vadd.f32 %v6103_v39, %v5982_v43 }
 0x3b9   : > { %v5988_v59 = vpop.f32.mrb[64].mxu0 }
 0x3ba   : > { %v5989_v30 = vadd.f32 %v5988_v59, %v5871_v44  ;;  %v8833_v58 = vpop.f32.mrb[65].mxu0 }
 0x3bb   : > { %v6596_v13 = vpop.f32.mrb[80].mxu1 }
 0x3bc   : > { %v8940_v26 = vpop.f32.mrb[81].mxu1  ;;  %v6112_v18 = vadd.f32 %v6111_v45, %v5989_v30 }
 0x3bd   : > { %v6188_v27 = vpop.f32.mrb[66].mxu0 }
 0x3be   : > { %v6189_v1 = vadd.f32 %v6188_v27, %v6064_v23  ;;  %v8865_v6 = vpop.f32.mrb[67].mxu0 }
 0x3bf   : > { %v6602_v54 = vpop.f32.mrb[82].mxu1 }
 0x3c0   : > { %v8943_v63 = vpop.f32.mrb[83].mxu1  ;;  %v6298_v8 = vadd.f32 %v6297_v38, %v6189_v1 }
 0x3c1   : > { %v6194_v53 = vpop.f32.mrb[68].mxu0 }
 0x3c2   : > { %v12382_v37 = vadd.f32 %v6298_v8, %v12361_v24  ;;  %v6195_v2 = vadd.f32 %v6194_v53, %v6072_v25  ;;  %v8868_v12 = vpop.f32.mrb[69].mxu0 }
 0x3c3   : > { %v6608_v35 = vpop.f32.mrb[84].mxu1 }
 0x3c4   : > { %v8946_v39 = vpop.f32.mrb[85].mxu1  ;;  %v6304_v32 = vadd.f32 %v6303_v11, %v6195_v2 }
 0x3c5   : > { %v6200_v50 = vpop.f32.mrb[70].mxu0 }
 0x3c6   : > { %v12385_v21 = vadd.f32 %v6304_v32, %v12364_v51  ;;  %v6201_v45 = vadd.f32 %v6200_v50, %v6080_v55  ;;  %v8871_v36 = vpop.f32.mrb[71].mxu0 }
 0x3c7   : > { %v6614_v44 = vpop.f32.mrb[86].mxu1 }
 0x3c8   : > { %v8949_v23 = vpop.f32.mrb[87].mxu1  ;;  %v6310_v62 = vadd.f32 %v6309_v40, %v6201_v45 }
 0x3c9   : > { %v6206_v17 = vpop.f32.mrb[72].mxu0 }
 0x3ca   : > { %v12388_v4 = vadd.f32 %v6310_v62, %v12367_v10  ;;  %v6207_v24 = vadd.f32 %v6206_v17, %v6088_v14  ;;  %v8874_v56 = vpop.f32.mrb[73].mxu0 }
 0x3cb   : > { %v6620_v38 = vpop.f32.mrb[88].mxu1 }
 0x3cc   : > { %v8952_v25 = vpop.f32.mrb[89].mxu1  ;;  %v6316_v22 = vadd.f32 %v6315_v60, %v6207_v24 }
 0x3cd   : > { %v6212_v5 = vpop.f32.mrb[74].mxu0 }
 0x3ce   : > { %v12391_v3 = vadd.f32 %v6316_v22, %v12370_v61  ;;  %v6213_v51 = vadd.f32 %v6212_v5, %v6096_v28  ;;  %v8877_v9 = vpop.f32.mrb[75].mxu0 }
 0x3cf   : > { %v6626_v11 = vpop.f32.mrb[90].mxu1 }
 0x3d0   : > { %v8955_v55 = vpop.f32.mrb[91].mxu1  ;;  %v6322_v34 = vadd.f32 %v6321_v29, %v6213_v51 }
 0x3d1   : > { %v6218_v49 = vpop.f32.mrb[76].mxu0 }
 0x3d2   : > { %v12394_v15 = vadd.f32 %v6322_v34, %v12373_v52  ;;  %v6219_v10 = vadd.f32 %v6218_v49, %v6104_v57  ;;  %v8880_v42 = vpop.f32.mrb[77].mxu0 }
 0x3d3   : > { %v6632_v40 = vpop.f32.mrb[92].mxu1 }
 0x3d4   : > { %v8958_v14 = vpop.f32.mrb[93].mxu1  ;;  %v6328_v33 = vadd.f32 %v6327_v31, %v6219_v10 }
 0x3d5   : > { %v6224_v0 = vpop.f32.mrb[78].mxu0 }
 0x3d6   : > { %v12397_v48 = vadd.f32 %v6328_v33, %v12376_v41  ;;  %v6225_v61 = vadd.f32 %v6224_v0, %v6112_v18  ;;  %v8883_v19 = vpop.f32.mrb[79].mxu0 }
 0x3d7   : > { %v6825_v60 = vpop.f32.mrb[94].mxu1 }
 0x3d8   : > { %v8990_v28 = vpop.f32.mrb[95].mxu1  ;;  %v6334_v47 = vadd.f32 %v6333_v16, %v6225_v61 }
 0x3d9   : > { %v6455_v43 = vpop.f32.mrb[80].mxu0 }
 0x3da   : > { %v12400_v20 = vadd.f32 %v6334_v47, %v12379_v7  ;;  %v6597_v52 = vadd.f32 %v6596_v13, %v6455_v43  ;;  %v8915_v46 = vpop.f32.mrb[81].mxu0 }
 0x3db   : > { %v6833_v29 = vpop.f32.mrb[96].mxu1 }
 0x3dc   : > { %v8993_v57 = vpop.f32.mrb[97].mxu1 }
 0x3dd   : > { %v6465_v59 = vpop.f32.mrb[82].mxu0 }
 0x3de   : > { %v6603_v31 = vadd.f32 %v6602_v54, %v6465_v59  ;;  %v8918_v58 = vpop.f32.mrb[83].mxu0 }
 0x3df   : > { %v6841_v30 = vpop.f32.mrb[98].mxu1 }
 0x3e0   : > { %v8996_v26 = vpop.f32.mrb[99].mxu1 }
 0x3e1   : > { %v6475_v27 = vpop.f32.mrb[84].mxu0 }
 0x3e2   : > { %v6609_v1 = vadd.f32 %v6608_v35, %v6475_v27  ;;  %v8921_v18 = vpop.f32.mrb[85].mxu0 }
 0x3e3   : > { %v6849_v41 = vpop.f32.mrb[100].mxu1 }
 0x3e4   : > { %v8999_v6 = vpop.f32.mrb[101].mxu1 }
 0x3e5   : > { %v6485_v63 = vpop.f32.mrb[86].mxu0 }
 0x3e6   : > { %v6615_v8 = vadd.f32 %v6614_v44, %v6485_v63  ;;  %v8924_v53 = vpop.f32.mrb[87].mxu0 }
 0x3e7   : > { %v6857_v16 = vpop.f32.mrb[102].mxu1 }
 0x3e8   : > { %v9002_v2 = vpop.f32.mrb[103].mxu1 }
 0x3e9   : > { %v6495_v7 = vpop.f32.mrb[88].mxu0 }
 0x3ea   : > { %v6621_v13 = vadd.f32 %v6620_v38, %v6495_v7  ;;  %v8927_v39 = vpop.f32.mrb[89].mxu0 }
 0x3eb   : > { %v6865_v12 = vpop.f32.mrb[104].mxu1 }
 0x3ec   : > { %v9005_v32 = vpop.f32.mrb[105].mxu1 }
 0x3ed   : > { %v6505_v50 = vpop.f32.mrb[90].mxu0 }
 0x3ee   : > { %v6627_v54 = vadd.f32 %v6626_v11, %v6505_v50  ;;  %v8930_v36 = vpop.f32.mrb[91].mxu0 }
 0x3ef   : > { %v6873_v45 = vpop.f32.mrb[106].mxu1 }
 0x3f0   : > { %v9008_v23 = vpop.f32.mrb[107].mxu1 }
 0x3f1   : > { %v6515_v62 = vpop.f32.mrb[92].mxu0 }
 0x3f2   : > { %v6633_v35 = vadd.f32 %v6632_v40, %v6515_v62  ;;  %v8933_v24 = vpop.f32.mrb[93].mxu0 }
 0x3f3   : > { %v7059_v17 = vpop.f32.mrb[108].mxu1 }
 0x3f4   : > { %v9040_v56 = vpop.f32.mrb[109].mxu1 }
 0x3f5   : > { %v6708_v25 = vpop.f32.mrb[94].mxu0 }
 0x3f6   : > { %v6709_v44 = vadd.f32 %v6708_v25, %v6597_v52  ;;  %v8965_v5 = vpop.f32.mrb[95].mxu0 }
 0x3f7   : > { %v7065_v22 = vpop.f32.mrb[110].mxu1 }
 0x3f8   : > { %v9043_v51 = vpop.f32.mrb[111].mxu1  ;;  %v6826_v9 = vadd.f32 %v6825_v60, %v6709_v44 }
 0x3f9   : > { %v6715_v55 = vpop.f32.mrb[96].mxu0 }
 0x3fa   : > { %v6716_v34 = vadd.f32 %v6715_v55, %v6603_v31  ;;  %v8968_v49 = vpop.f32.mrb[97].mxu0 }
 0x3fb   : > { %v7071_v38 = vpop.f32.mrb[112].mxu1 }
 0x3fc   : > { %v9046_v10 = vpop.f32.mrb[113].mxu1  ;;  %v6834_v42 = vadd.f32 %v6833_v29, %v6716_v34 }
 0x3fd   : > { %v6722_v11 = vpop.f32.mrb[98].mxu0 }
 0x3fe   : > { %v6723_v33 = vadd.f32 %v6722_v11, %v6609_v1  ;;  %v8971_v0 = vpop.f32.mrb[99].mxu0 }
 0x3ff   : > { %v7077_v14 = vpop.f32.mrb[114].mxu1 }
 0x400   : > { %v9049_v61 = vpop.f32.mrb[115].mxu1  ;;  %v6842_v40 = vadd.f32 %v6841_v30, %v6723_v33 }
 0x401   : > { %v6729_v19 = vpop.f32.mrb[100].mxu0 }
 0x402   : > { %v6730_v47 = vadd.f32 %v6729_v19, %v6615_v8  ;;  %v8974_v43 = vpop.f32.mrb[101].mxu0 }
 0x403   : > { %v7083_v28 = vpop.f32.mrb[116].mxu1 }
 0x404   : > { %v9052_v52 = vpop.f32.mrb[117].mxu1  ;;  %v6850_v46 = vadd.f32 %v6849_v41, %v6730_v47 }
 0x405   : > { %v6736_v57 = vpop.f32.mrb[102].mxu0 }
 0x406   : > { %v6737_v59 = vadd.f32 %v6736_v57, %v6621_v13  ;;  %v8977_v58 = vpop.f32.mrb[103].mxu0  ;;  %v7220_v13 = vld [vmem:[%s12436_s2] ss:$0 sm:$0xff] }
 0x407   : > { %v7089_v60 = vpop.f32.mrb[118].mxu1 }
 0x408   : > { %v9055_v31 = vpop.f32.mrb[119].mxu1  ;;  %v6858_v26 = vadd.f32 %v6857_v16, %v6737_v59 }
 0x409   : > { %v6743_v29 = vpop.f32.mrb[104].mxu0 }
 0x40a   : > { %v6744_v18 = vadd.f32 %v6743_v29, %v6627_v54  ;;  %v8980_v1 = vpop.f32.mrb[105].mxu0 }
 0x40b   : > { %v7095_v27 = vpop.f32.mrb[120].mxu1 }
 0x40c   : > { %v9058_v6 = vpop.f32.mrb[121].mxu1  ;;  %v6866_v63 = vadd.f32 %v6865_v12, %v6744_v18 }
 0x40d   : > { %v6750_v30 = vpop.f32.mrb[106].mxu0 }
 0x40e   : > { %v6751_v53 = vadd.f32 %v6750_v30, %v6633_v35  ;;  %v8983_v2 = vpop.f32.mrb[107].mxu0 }
 0x410   : > { %v6874_v8 = vadd.f32 %v6873_v45, %v6751_v53 }
 0x411   : > { %v6950_v7 = vpop.f32.mrb[108].mxu0 }
 0x412   : > { %v6951_v39 = vadd.f32 %v6950_v7, %v6826_v9  ;;  %v9015_v41 = vpop.f32.mrb[109].mxu0 }
 0x414   : > { %v7060_v32 = vadd.f32 %v7059_v17, %v6951_v39 }
 0x415   : > { %v6956_v16 = vpop.f32.mrb[110].mxu0 }
 0x416   : > { %v7099_v50 = vadd.f32 %v7060_v32, %v12382_v37  ;;  %v6957_v54 = vadd.f32 %v6956_v16, %v6834_v42  ;;  %v9018_v36 = vpop.f32.mrb[111].mxu0 }
 0x418   : > { %v7113_v23 = vadd.f32 %v7220_v13, %v7099_v50  ;;  %v7066_v12 = vadd.f32 %v7065_v22, %v6957_v54 }
 0x419   : > { %v6962_v45 = vpop.f32.mrb[112].mxu0 }
 0x41a   : > { %v7120_v62 = vmax.f32 %v7113_v23, 0.0  ;;  %v7100_v17 = vadd.f32 %v7066_v12, %v12385_v21  ;;  %v6963_v35 = vadd.f32 %v6962_v45, %v6842_v40  ;;  %v9021_v24 = vpop.f32.mrb[113].mxu0 }
 0x41c   : > { %7127 = vst.msk [vmem:[%s12410_s19] sm:$0xff] %vm266_vm1, %v7120_v62  ;;  %v7114_v37 = vadd.f32 %v7220_v13, %v7100_v17  ;;  %v7072_v56 = vadd.f32 %v7071_v38, %v6963_v35 }
 0x41d   : > { %v6968_v25 = vpop.f32.mrb[114].mxu0 }
 0x41e   : > { %v7121_v22 = vmax.f32 %v7114_v37, 0.0  ;;  %v7101_v44 = vadd.f32 %v7072_v56, %v12388_v4  ;;  %v6969_v5 = vadd.f32 %v6968_v25, %v6850_v46  ;;  %v9024_v51 = vpop.f32.mrb[115].mxu0 }
 0x420   : > { %7128 = vst.msk [vmem:[%s12410_s19 + $0x8] sm:$0xff] %vm266_vm1, %v7121_v22  ;;  %v7115_v9 = vadd.f32 %v7220_v13, %v7101_v44  ;;  %v7078_v55 = vadd.f32 %v7077_v14, %v6969_v5 }
 0x421   : > { %v6974_v34 = vpop.f32.mrb[116].mxu0 }
 0x422   : > { %v7122_v21 = vmax.f32 %v7115_v9, 0.0  ;;  %v7102_v49 = vadd.f32 %v7078_v55, %v12391_v3  ;;  %v6975_v10 = vadd.f32 %v6974_v34, %v6858_v26  ;;  %v9027_v42 = vpop.f32.mrb[117].mxu0 }
 0x424   : > { %7129 = vst.msk [vmem:[%s12410_s19 + $0x10] sm:$0xff] %vm266_vm1, %v7122_v21  ;;  %v7116_v38 = vadd.f32 %v7220_v13, %v7102_v49  ;;  %v7084_v11 = vadd.f32 %v7083_v28, %v6975_v10 }
 0x425   : > { %v6980_v33 = vpop.f32.mrb[118].mxu0 }
 0x426   : > { %v7123_v4 = vmax.f32 %v7116_v38, 0.0  ;;  %v7103_v0 = vadd.f32 %v7084_v11, %v12394_v15  ;;  %v6981_v61 = vadd.f32 %v6980_v33, %v6866_v63  ;;  %v9030_v40 = vpop.f32.mrb[119].mxu0 }
 0x428   : > { %7130 = vst.msk [vmem:[%s12410_s19 + $0x18] sm:$0xff] %vm266_vm1, %v7123_v4  ;;  %v7117_v14 = vadd.f32 %v7220_v13, %v7103_v0  ;;  %v7090_v19 = vadd.f32 %v7089_v60, %v6981_v61 }
 0x429   : > { %v6986_v3 = vpop.f32.mrb[120].mxu0 }
 0x42a   : > { %v7124_v47 = vmax.f32 %v7117_v14, 0.0  ;;  %v7104_v43 = vadd.f32 %v7090_v19, %v12397_v48  ;;  %v6987_v52 = vadd.f32 %v6986_v3, %v6874_v8  ;;  %v9033_v46 = vpop.f32.mrb[121].mxu0 }
 0x42c   : > { %7131 = vst.msk [vmem:[%s12410_s19 + $0x20] sm:$0xff] %vm266_vm1, %v7124_v47  ;;  %v7118_v28 = vadd.f32 %v7220_v13, %v7104_v43  ;;  %v7096_v57 = vadd.f32 %v7095_v27, %v6987_v52 }
 0x42e   : > { %v7125_v59 = vmax.f32 %v7118_v28, 0.0  ;;  %v7105_v15 = vadd.f32 %v7096_v57, %v12400_v20 }
 0x430   : > { %7132 = vst.msk [vmem:[%s12410_s19 + $0x28] sm:$0xff] %vm266_vm1, %v7125_v59  ;;  %v7119_v58 = vadd.f32 %v7220_v13, %v7105_v15 }
 0x432   : > { %v7126_v31 = vmax.f32 %v7119_v58, 0.0 }
 0x434   : > { %7134 = vst.msk [vmem:[%s12410_s19 + $0x30] sm:$0x1] %vm7133_vm2, %v7126_v31 }
 0x435 PF: > { %s14_s15 = sadd.s32 1, %s9248_s15  }
 0x436   : > { %p11_p4 = scmp.ge.s32.totalorder %s14_s15, 6  }
 0x438   :  { %13 = sbr.rel (!%p11_p4) target bundleno = 1 (0x1), region = 75 }

</bundles_post_ra>
